<compile_context>
chip_gen: v7x
topology: tpu7x:2x2x1
jax: 0.10.0
libtpu: 0.0.40
codegen_flags: <defaults>
</compile_context>

<pallas_src>
import functools
import math

import numpy as np
import jax
import jax.numpy as jnp
from jax import lax
from jax.experimental import pallas as pl
from jax.experimental.pallas import tpu as pltpu


# --------------------------------------------------------------------------------------------
# Kernel A: conv1 + pool + relu + conv2 + pool + relu + NCHW view + particle mixing (fused)
# --------------------------------------------------------------------------------------------

def _conv_mix_kernel(x_ref, p_ref, w1_ref, b1_ref, w2_ref, b2_ref, xint_ref, mix_ref):
    tb = x_ref.shape[0]
    f32 = jnp.float32

    imgs = x_ref[...]                                                    # (TB, 28, 28) bf16

    # ---- conv1 (1 -> 20): 5 row-banded GEMMs, x-pool phases folded into the columns ----
    # columns of w1_ref[ky]: [dx*256 + xo*20 + co]  (xo in [0,12), co in [0,20), 16 pad cols)
    acc1 = None
    for ky in range(5):
        lhs = imgs[:, ky:ky + 24, :].reshape(tb * 24, 28)                # free reshape (24%8==0)
        d = jnp.dot(lhs, w1_ref[ky], preferred_element_type=f32)
        acc1 = d if acc1 is None else acc1 + d
    acc1 = acc1.reshape(tb, 24, 512)                                     # rows = (t, conv1 y)

    b1 = b1_ref[...]                                                     # (1, 240) f32
    rows1 = []
    for yo in range(12):
        r = jnp.maximum(acc1[:, 2 * yo, :], acc1[:, 2 * yo + 1, :])      # max-pool over dy
        r = jnp.maximum(r[:, 0:240], r[:, 256:496])                      # max-pool over dx
        rows1.append(jnp.maximum(r + b1, 0.0))                           # bias + ReLU
    h1 = jnp.stack(rows1, axis=1).astype(jnp.bfloat16)                   # (TB, 12, 240) = (y, [x*20+c])

    # ---- conv2 (20 -> 50): 5 row-banded GEMMs contracting the (x_in, c) lane dim ----
    # columns of w2_ref[ky]: [dx*256 + x2o*50 + c2]  (x2o in [0,4), c2 in [0,50))
    acc2 = None
    for ky in range(5):
        lhs = h1[:, ky:ky + 8, :].reshape(tb * 8, 240)                   # free reshape (8%8==0)
        d = jnp.dot(lhs, w2_ref[ky], preferred_element_type=f32)
        acc2 = d if acc2 is None else acc2 + d
    acc2 = acc2.reshape(tb, 8, 512)

    b2 = b2_ref[...]                                                     # (1, 200) f32
    for yo in range(4):
        r = jnp.maximum(acc2[:, 2 * yo, :], acc2[:, 2 * yo + 1, :])      # pool over dy
        r = jnp.maximum(r[:, 0:200], r[:, 256:456])                      # pool over dx
        r = jnp.maximum(r + b2, 0.0)                                     # (TB, 200) = (x2o, c2)
        for xo in range(4):                                              # scatter into NCHW^T view
            xint_ref[:, 4 * yo + xo, :] = r[:, xo * 50:(xo + 1) * 50]    # xint[t, j=4y+x, c]

    # ---- particle mixing: relu(einsum('bfnij,bfcj->bfnci')) computed transposed ----
    # mixT[t, nn*16+i, c] = sum_j particles[t, nn, i, j] * x_feat[t, c, j]
    xfT = xint_ref[...].astype(jnp.bfloat16)                             # (TB, 16, 50)
    mixT = lax.dot_general(p_ref[...], xfT, (((2,), (1,)), ((0,), (0,))),
                           preferred_element_type=f32)                   # (TB, n*16, 50)
    mix_ref[...] = jnp.maximum(mixT, 0.0).astype(mix_ref.dtype)


def conv_mix_pallas(x_img, pstk, w1b, b1, w2b, b2, *, n_particle, block_b=8):
    """x_img: (BF, 28, 28) bf16, pstk: (BF, n*16, 16) bf16 -> (x_featT f32, mixT bf16)."""
    bf = x_img.shape[0]
    tb = bf if bf <= block_b else block_b
    return pl.pallas_call(
        _conv_mix_kernel,
        out_shape=(jax.ShapeDtypeStruct((bf, 16, 50), jnp.float32),
                   jax.ShapeDtypeStruct((bf, n_particle * 16, 50), jnp.bfloat16)),
        grid=(pl.cdiv(bf, tb),),
        in_specs=[pl.BlockSpec((tb, 28, 28), lambda i: (i, 0, 0)),
                  pl.BlockSpec((tb, n_particle * 16, 16), lambda i: (i, 0, 0)),
                  pl.BlockSpec((5, 28, 512), lambda i: (0, 0, 0)),
                  pl.BlockSpec((1, 240), lambda i: (0, 0)),
                  pl.BlockSpec((5, 240, 512), lambda i: (0, 0, 0)),
                  pl.BlockSpec((1, 200), lambda i: (0, 0))],
        out_specs=(pl.BlockSpec((tb, 16, 50), lambda i: (i, 0, 0)),
                   pl.BlockSpec((tb, n_particle * 16, 50), lambda i: (i, 0, 0))),
        compiler_params=pltpu.CompilerParams(dimension_semantics=("parallel",)),
    )(x_img, pstk, w1b, b1, w2b, b2)


# --------------------------------------------------------------------------------------------
# Kernel B: fc_down + 2-layer GRU + fc_rnn (fused)
# --------------------------------------------------------------------------------------------

def _gru_stack_kernel(g_ref, h0_ref, wd_ref, bd_ref, wi_ref, wh_ref, bi_ref, bh_ref,
                      wr_ref, br_ref, z2_ref, hn_ref):
    frame, tbp, kd = g_ref.shape
    f32 = jnp.float32

    # fc_down for all (t, row) pairs in one GEMM (off the recurrent critical path)
    wd = wd_ref[...]
    x_all = jnp.dot(g_ref[...].reshape(frame * tbp, kd), wd,
                    preferred_element_type=f32) + bd_ref[...]
    x_all = jnp.maximum(x_all, 0.0).astype(jnp.bfloat16)                 # (frame*tbp, nz)

    wi = [[wi_ref[l, g] for g in range(3)] for l in range(2)]            # per-gate (nz, nz) bf16
    wh = [[wh_ref[l, g] for g in range(3)] for l in range(2)]
    bi = [[bi_ref[l, g] for g in range(3)] for l in range(2)]            # (1, nz) f32
    bh = [[bh_ref[l, g] for g in range(3)] for l in range(2)]
    wr = wr_ref[...]
    br = br_ref[...]

    # layer-0 input projections hoisted (x is known for every timestep)
    gi0 = [jnp.dot(x_all, wi[0][g], preferred_element_type=f32) + bi[0][g] for g in range(3)]

    def hproj(l, g, hb):
        return jnp.dot(hb, wh[l][g], preferred_element_type=f32) + bh[l][g]

    h1 = h0_ref[0]
    h2 = h0_ref[1]
    # frame is tiny & static -> fully unrolled Python loop (max scheduler visibility)
    for t in range(frame):
        rows = slice(t * tbp, (t + 1) * tbp)
        h1b = h1.astype(jnp.bfloat16)
        r1 = jax.nn.sigmoid(gi0[0][rows] + hproj(0, 0, h1b))
        u1 = jax.nn.sigmoid(gi0[1][rows] + hproj(0, 1, h1b))
        n1 = jnp.tanh(gi0[2][rows] + r1 * hproj(0, 2, h1b))
        h1 = (1.0 - u1) * n1 + u1 * h1

        x2 = h1.astype(jnp.bfloat16)
        h2b = h2.astype(jnp.bfloat16)
        r2 = jax.nn.sigmoid(jnp.dot(x2, wi[1][0], preferred_element_type=f32) + bi[1][0]
                            + hproj(1, 0, h2b))
        u2 = jax.nn.sigmoid(jnp.dot(x2, wi[1][1], preferred_element_type=f32) + bi[1][1]
                            + hproj(1, 1, h2b))
        n2 = jnp.tanh(jnp.dot(x2, wi[1][2], preferred_element_type=f32) + bi[1][2]
                      + r2 * hproj(1, 2, h2b))
        h2 = (1.0 - u2) * n2 + u2 * h2

        # fc_rnn (Linear(nz, nz) + ReLU); Dropout(p=0.5) is identity at inference
        y = jnp.dot(h2.astype(jnp.bfloat16), wr, preferred_element_type=f32) + br
        z2_ref[t] = jnp.maximum(y, 0.0)

    hn_ref[0] = h1
    hn_ref[1] = h2


def gru_stack_pallas(g_in, h0, wd, bd, wi, wh, bi, bh, wr, br, *, block_bp=256):
    """g_in: (frame, Bp, 800) bf16, h0: (2, Bp, nz) f32 -> (z2_seq f32, h_n f32)."""
    frame, bp, kd = g_in.shape
    nz = wd.shape[1]
    tbp = bp if bp <= block_bp else block_bp
    return pl.pallas_call(
        _gru_stack_kernel,
        out_shape=(jax.ShapeDtypeStruct((frame, bp, nz), jnp.float32),
                   jax.ShapeDtypeStruct((2, bp, nz), jnp.float32)),
        grid=(pl.cdiv(bp, tbp),),
        in_specs=[pl.BlockSpec((frame, tbp, kd), lambda i: (0, i, 0)),
                  pl.BlockSpec((2, tbp, nz), lambda i: (0, i, 0)),
                  pl.BlockSpec((kd, nz), lambda i: (0, 0)),
                  pl.BlockSpec((1, nz), lambda i: (0, 0)),
                  pl.BlockSpec((2, 3, nz, nz), lambda i: (0, 0, 0, 0)),
                  pl.BlockSpec((2, 3, nz, nz), lambda i: (0, 0, 0, 0)),
                  pl.BlockSpec((2, 3, 1, nz), lambda i: (0, 0, 0, 0)),
                  pl.BlockSpec((2, 3, 1, nz), lambda i: (0, 0, 0, 0)),
                  pl.BlockSpec((nz, nz), lambda i: (0, 0)),
                  pl.BlockSpec((1, nz), lambda i: (0, 0))],
        out_specs=(pl.BlockSpec((frame, tbp, nz), lambda i: (0, i, 0)),
                   pl.BlockSpec((2, tbp, nz), lambda i: (0, i, 0))),
        compiler_params=pltpu.CompilerParams(dimension_semantics=("parallel",)),
    )(g_in, h0, wd, bd, wi, wh, bi, bh, wr, br)


# --------------------------------------------------------------------------------------------
# Parameter init / packing (matches torch layouts, packed for the kernels above)
# --------------------------------------------------------------------------------------------

def init_params(key, nz):
    def u(k, shape, fan_in):
        bound = 1.0 / math.sqrt(fan_in)
        return jax.random.uniform(k, shape, jnp.float32, -bound, bound)

    ks = jax.random.split(key, 16)
    conv1_w = np.asarray(u(ks[0], (20, 1, 5, 5), 25))
    conv1_b = np.asarray(u(ks[1], (20,), 25))
    conv2_w = np.asarray(u(ks[2], (50, 20, 5, 5), 500))
    conv2_b = np.asarray(u(ks[3], (50,), 500))
    fcd_w = np.asarray(u(ks[4], (nz, 800), 800))
    fcd_b = np.asarray(u(ks[5], (nz,), 800))
    fcr_w = np.asarray(u(ks[6], (nz, nz), nz))
    fcr_b = np.asarray(u(ks[7], (nz,), nz))
    gru = {}
    for l in range(2):
        gru[f"w_ih_l{l}"] = np.asarray(u(ks[8 + 4 * l + 0], (3 * nz, nz), nz))
        gru[f"w_hh_l{l}"] = np.asarray(u(ks[8 + 4 * l + 1], (3 * nz, nz), nz))
        gru[f"b_ih_l{l}"] = np.asarray(u(ks[8 + 4 * l + 2], (3 * nz,), nz))
        gru[f"b_hh_l{l}"] = np.asarray(u(ks[8 + 4 * l + 3], (3 * nz,), nz))

    # conv1 banded weights: w1b[ky, x_in, dx*256 + xo*20 + co] = w1[co, 0, ky, x_in - (2*xo+dx)]
    w1b = np.zeros((5, 28, 512), np.float32)
    for ky in range(5):
        for dx in range(2):
            for xo in range(12):
                for kx in range(5):
                    xin = 2 * xo + dx + kx
                    w1b[ky, xin, dx * 256 + xo * 20: dx * 256 + xo * 20 + 20] = conv1_w[:, 0, ky, kx]
    b1 = np.tile(conv1_b, 12).reshape(1, 240)

    # conv2 banded weights: w2b[ky, x_in*20+c, dx*256 + x2o*50 + c2] = w2[c2, c, ky, x_in-(2*x2o+dx)]
    w2b = np.zeros((5, 240, 512), np.float32)
    for ky in range(5):
        for dx in range(2):
            for xo in range(4):
                for kx in range(5):
                    xin = 2 * xo + dx + kx
                    for c in range(20):
                        w2b[ky, xin * 20 + c, dx * 256 + xo * 50: dx * 256 + xo * 50 + 50] = \
                            conv2_w[:, c, ky, kx]
    b2 = np.tile(conv2_b, 4).reshape(1, 200)

    # GRU: per-gate (nz, nz) weights transposed for right multiplication, gate order (r, z, n)
    gwi = np.stack([np.stack([gru[f"w_ih_l{l}"][g * nz:(g + 1) * nz, :].T for g in range(3)])
                    for l in range(2)])
    gwh = np.stack([np.stack([gru[f"w_hh_l{l}"][g * nz:(g + 1) * nz, :].T for g in range(3)])
                    for l in range(2)])
    gbi = np.stack([np.stack([gru[f"b_ih_l{l}"][g * nz:(g + 1) * nz].reshape(1, nz) for g in range(3)])
                    for l in range(2)])
    gbh = np.stack([np.stack([gru[f"b_hh_l{l}"][g * nz:(g + 1) * nz].reshape(1, nz) for g in range(3)])
                    for l in range(2)])

    return dict(
        conv1_w=jnp.asarray(w1b, jnp.bfloat16), conv1_b=jnp.asarray(b1, jnp.float32),
        conv2_w=jnp.asarray(w2b, jnp.bfloat16), conv2_b=jnp.asarray(b2, jnp.float32),
        fcd_w=jnp.asarray(fcd_w.T, jnp.bfloat16), fcd_b=jnp.asarray(fcd_b.reshape(1, nz), jnp.float32),
        fcr_w=jnp.asarray(fcr_w.T, jnp.bfloat16), fcr_b=jnp.asarray(fcr_b.reshape(1, nz), jnp.float32),
        gru_wi=jnp.asarray(gwi, jnp.bfloat16), gru_wh=jnp.asarray(gwh, jnp.bfloat16),
        gru_bi=jnp.asarray(gbi, jnp.float32), gru_bh=jnp.asarray(gbh, jnp.float32),
    )


# --------------------------------------------------------------------------------------------
# Forward pass (matches ProbEncoder.forward, eval mode)
# --------------------------------------------------------------------------------------------

def prob_encoder_forward(params, x, particles, *, nz, n_particle, hidden=None):
    """x: (batch, frame, 1, 28, 28); particles: (batch, frame, n_particle, 256)."""
    batch, frame = x.shape[:2]
    bf = batch * frame

    x_img = x.reshape(bf, 28, 28).astype(jnp.bfloat16)
    pstk = particles.reshape(bf, n_particle * 16, 16).astype(jnp.bfloat16)   # free view

    xf_t, mix_t = conv_mix_pallas(x_img, pstk, params["conv1_w"], params["conv1_b"],
                                  params["conv2_w"], params["conv2_b"],
                                  n_particle=n_particle)

    # x_inter = conv features as (batch, frame, 50, 16); kernel emits the j-major transpose.
    x_inter = jnp.swapaxes(xf_t.reshape(batch, frame, 16, 50), 2, 3)

    # mixed features -> fc_down/GRU input: (frame, batch*n_particle, 800) with 800 = [c*16 + i]
    g_in = (mix_t.reshape(batch, frame, n_particle, 16, 50)
            .transpose(1, 0, 2, 4, 3)
            .reshape(frame, batch * n_particle, 800))

    bp = batch * n_particle
    h0 = jnp.zeros((2, bp, nz), jnp.float32) if hidden is None else hidden.astype(jnp.float32)

    z2_seq, hidden_state = gru_stack_pallas(
        g_in, h0, params["fcd_w"], params["fcd_b"],
        params["gru_wi"], params["gru_wh"], params["gru_bi"], params["gru_bh"],
        params["fcr_w"], params["fcr_b"])

    z2 = z2_seq.reshape(frame, batch, n_particle, nz).transpose(1, 0, 2, 3)
    return z2, hidden_state, x_inter


if __name__ == "__main__":
    batch, frame = 2, 3
    n_particle, nz = 4, 32
    theta_dim = 16 * 16

    key = jax.random.PRNGKey(0)
    kx, kp, kw = jax.random.split(key, 3)
    x = jax.random.normal(kx, (batch, frame, 1, 28, 28), jnp.float32)
    particles = jax.random.normal(kp, (batch, frame, n_particle, theta_dim), jnp.float32)
    params = init_params(kw, nz)

    fwd = jax.jit(functools.partial(prob_encoder_forward, nz=nz, n_particle=n_particle))
    z2, hidden_state, x_inter = fwd(params, x, particles)
    jax.block_until_ready((z2, hidden_state, x_inter))

    assert z2.shape == (batch, frame, n_particle, nz)
    assert hidden_state.shape == (2, batch * n_particle, nz)
    assert x_inter.shape == (batch, frame, 50, 16)
    assert bool(jnp.isfinite(z2).all())
    assert bool(jnp.isfinite(hidden_state).all())
    assert bool(jnp.isfinite(x_inter).all())
    print("KERNEL_OK")
</pallas_src>

<mosaic_0001>
module attributes {stable_mosaic.version = 11 : i64} {
  func.func @_conv_mix_kernel(%arg0: i32, %arg1: memref<6x28x28xbf16, #tpu.memory_space<vmem>>, %arg2: memref<6x64x16xbf16, #tpu.memory_space<vmem>>, %arg3: memref<5x28x512xbf16, #tpu.memory_space<vmem>>, %arg4: memref<1x240xf32, #tpu.memory_space<vmem>>, %arg5: memref<5x240x512xbf16, #tpu.memory_space<vmem>>, %arg6: memref<1x200xf32, #tpu.memory_space<vmem>>, %arg7: memref<6x16x50xf32, #tpu.memory_space<vmem>>, %arg8: memref<6x64x50xbf16, #tpu.memory_space<vmem>>) attributes {dimension_semantics = [#tpu.dimension_semantics<parallel>], iteration_bounds = array<i64: 1>, scalar_prefetch = 0 : i64, scratch_operands = 0 : i64, tpu.core_type = #tpu.core_type<tc>, window_params = [{transform_indices = @transform_0, window_bounds = array<i64: 6, 28, 28>}, {transform_indices = @transform_1, window_bounds = array<i64: 6, 64, 16>}, {pipeline_mode = #tpu.pipeline_mode<synchronous>, transform_indices = @transform_2, window_bounds = array<i64: 5, 28, 512>}, {pipeline_mode = #tpu.pipeline_mode<synchronous>, transform_indices = @transform_3, window_bounds = array<i64: 1, 240>}, {pipeline_mode = #tpu.pipeline_mode<synchronous>, transform_indices = @transform_4, window_bounds = array<i64: 5, 240, 512>}, {pipeline_mode = #tpu.pipeline_mode<synchronous>, transform_indices = @transform_5, window_bounds = array<i64: 1, 200>}, {transform_indices = @transform_6, window_bounds = array<i64: 6, 16, 50>}, {transform_indices = @transform_7, window_bounds = array<i64: 6, 64, 50>}]} {
    %c0 = arith.constant 0 : index
    %c0_0 = arith.constant 0 : index
    %c0_1 = arith.constant 0 : index
    %0 = vector.load %arg1[%c0, %c0_0, %c0_1] : memref<6x28x28xbf16, #tpu.memory_space<vmem>>, vector<6x28x28xbf16>
    %1 = vector.extract_strided_slice %0 {offsets = [0, 0, 0], sizes = [6, 24, 28], strides = [1, 1, 1]} : vector<6x28x28xbf16> to vector<6x24x28xbf16>
    %2 = vector.shape_cast %1 : vector<6x24x28xbf16> to vector<144x28xbf16>
    %c0_2 = arith.constant 0 : index
    %c0_3 = arith.constant 0 : index
    %c0_4 = arith.constant 0 : index
    %3 = vector.load %arg3[%c0_2, %c0_3, %c0_4] : memref<5x28x512xbf16, #tpu.memory_space<vmem>>, vector<1x28x512xbf16>
    %4 = vector.shape_cast %3 : vector<1x28x512xbf16> to vector<28x512xbf16>
    %cst = arith.constant dense<0.000000e+00> : vector<144x512xf32>
    %5 = tpu.matmul %2, %4, %cst {dimension_numbers = #tpu.dot_dimension_numbers<[1], [0], [0], [1], [0, 0, 1, 1], [], []>} : vector<144x28xbf16>, vector<28x512xbf16>, vector<144x512xf32> -> vector<144x512xf32>
    %6 = vector.extract_strided_slice %0 {offsets = [0, 1, 0], sizes = [6, 24, 28], strides = [1, 1, 1]} : vector<6x28x28xbf16> to vector<6x24x28xbf16>
    %7 = vector.shape_cast %6 : vector<6x24x28xbf16> to vector<144x28xbf16>
    %c1 = arith.constant 1 : index
    %c0_5 = arith.constant 0 : index
    %c0_6 = arith.constant 0 : index
    %8 = vector.load %arg3[%c1, %c0_5, %c0_6] : memref<5x28x512xbf16, #tpu.memory_space<vmem>>, vector<1x28x512xbf16>
    %9 = vector.shape_cast %8 : vector<1x28x512xbf16> to vector<28x512xbf16>
    %cst_7 = arith.constant dense<0.000000e+00> : vector<144x512xf32>
    %10 = tpu.matmul %7, %9, %cst_7 {dimension_numbers = #tpu.dot_dimension_numbers<[1], [0], [0], [1], [0, 0, 1, 1], [], []>} : vector<144x28xbf16>, vector<28x512xbf16>, vector<144x512xf32> -> vector<144x512xf32>
    %11 = arith.addf %5, %10 : vector<144x512xf32>
    %12 = vector.extract_strided_slice %0 {offsets = [0, 2, 0], sizes = [6, 24, 28], strides = [1, 1, 1]} : vector<6x28x28xbf16> to vector<6x24x28xbf16>
    %13 = vector.shape_cast %12 : vector<6x24x28xbf16> to vector<144x28xbf16>
    %c2 = arith.constant 2 : index
    %c0_8 = arith.constant 0 : index
    %c0_9 = arith.constant 0 : index
    %14 = vector.load %arg3[%c2, %c0_8, %c0_9] : memref<5x28x512xbf16, #tpu.memory_space<vmem>>, vector<1x28x512xbf16>
    %15 = vector.shape_cast %14 : vector<1x28x512xbf16> to vector<28x512xbf16>
    %cst_10 = arith.constant dense<0.000000e+00> : vector<144x512xf32>
    %16 = tpu.matmul %13, %15, %cst_10 {dimension_numbers = #tpu.dot_dimension_numbers<[1], [0], [0], [1], [0, 0, 1, 1], [], []>} : vector<144x28xbf16>, vector<28x512xbf16>, vector<144x512xf32> -> vector<144x512xf32>
    %17 = arith.addf %11, %16 : vector<144x512xf32>
    %18 = vector.extract_strided_slice %0 {offsets = [0, 3, 0], sizes = [6, 24, 28], strides = [1, 1, 1]} : vector<6x28x28xbf16> to vector<6x24x28xbf16>
    %19 = vector.shape_cast %18 : vector<6x24x28xbf16> to vector<144x28xbf16>
    %c3 = arith.constant 3 : index
    %c0_11 = arith.constant 0 : index
    %c0_12 = arith.constant 0 : index
    %20 = vector.load %arg3[%c3, %c0_11, %c0_12] : memref<5x28x512xbf16, #tpu.memory_space<vmem>>, vector<1x28x512xbf16>
    %21 = vector.shape_cast %20 : vector<1x28x512xbf16> to vector<28x512xbf16>
    %cst_13 = arith.constant dense<0.000000e+00> : vector<144x512xf32>
    %22 = tpu.matmul %19, %21, %cst_13 {dimension_numbers = #tpu.dot_dimension_numbers<[1], [0], [0], [1], [0, 0, 1, 1], [], []>} : vector<144x28xbf16>, vector<28x512xbf16>, vector<144x512xf32> -> vector<144x512xf32>
    %23 = arith.addf %17, %22 : vector<144x512xf32>
    %24 = vector.extract_strided_slice %0 {offsets = [0, 4, 0], sizes = [6, 24, 28], strides = [1, 1, 1]} : vector<6x28x28xbf16> to vector<6x24x28xbf16>
    %25 = vector.shape_cast %24 : vector<6x24x28xbf16> to vector<144x28xbf16>
    %c4 = arith.constant 4 : index
    %c0_14 = arith.constant 0 : index
    %c0_15 = arith.constant 0 : index
    %26 = vector.load %arg3[%c4, %c0_14, %c0_15] : memref<5x28x512xbf16, #tpu.memory_space<vmem>>, vector<1x28x512xbf16>
    %27 = vector.shape_cast %26 : vector<1x28x512xbf16> to vector<28x512xbf16>
    %cst_16 = arith.constant dense<0.000000e+00> : vector<144x512xf32>
    %28 = tpu.matmul %25, %27, %cst_16 {dimension_numbers = #tpu.dot_dimension_numbers<[1], [0], [0], [1], [0, 0, 1, 1], [], []>} : vector<144x28xbf16>, vector<28x512xbf16>, vector<144x512xf32> -> vector<144x512xf32>
    %29 = arith.addf %23, %28 : vector<144x512xf32>
    %30 = vector.shape_cast %29 : vector<144x512xf32> to vector<6x24x512xf32>
    %c0_17 = arith.constant 0 : index
    %c0_18 = arith.constant 0 : index
    %31 = vector.load %arg4[%c0_17, %c0_18] : memref<1x240xf32, #tpu.memory_space<vmem>>, vector<1x240xf32>
    %32 = vector.extract_strided_slice %30 {offsets = [0, 0, 0], sizes = [6, 1, 512], strides = [1, 1, 1]} : vector<6x24x512xf32> to vector<6x1x512xf32>
    %33 = vector.shape_cast %32 : vector<6x1x512xf32> to vector<6x512xf32>
    %34 = vector.extract_strided_slice %30 {offsets = [0, 1, 0], sizes = [6, 1, 512], strides = [1, 1, 1]} : vector<6x24x512xf32> to vector<6x1x512xf32>
    %35 = vector.shape_cast %34 : vector<6x1x512xf32> to vector<6x512xf32>
    %36 = arith.maximumf %33, %35 : vector<6x512xf32>
    %37 = vector.extract_strided_slice %36 {offsets = [0, 0], sizes = [6, 240], strides = [1, 1]} : vector<6x512xf32> to vector<6x240xf32>
    %38 = vector.extract_strided_slice %36 {offsets = [0, 256], sizes = [6, 240], strides = [1, 1]} : vector<6x512xf32> to vector<6x240xf32>
    %39 = arith.maximumf %37, %38 : vector<6x240xf32>
    %40 = vector.broadcast %31 : vector<1x240xf32> to vector<6x240xf32>
    %41 = arith.addf %39, %40 : vector<6x240xf32>
    %cst_19 = arith.constant 0.000000e+00 : f32
    %42 = vector.broadcast %cst_19 : f32 to vector<6x240xf32>
    %43 = arith.maximumf %41, %42 : vector<6x240xf32>
    %44 = vector.extract_strided_slice %30 {offsets = [0, 2, 0], sizes = [6, 1, 512], strides = [1, 1, 1]} : vector<6x24x512xf32> to vector<6x1x512xf32>
    %45 = vector.shape_cast %44 : vector<6x1x512xf32> to vector<6x512xf32>
    %46 = vector.extract_strided_slice %30 {offsets = [0, 3, 0], sizes = [6, 1, 512], strides = [1, 1, 1]} : vector<6x24x512xf32> to vector<6x1x512xf32>
    %47 = vector.shape_cast %46 : vector<6x1x512xf32> to vector<6x512xf32>
    %48 = arith.maximumf %45, %47 : vector<6x512xf32>
    %49 = vector.extract_strided_slice %48 {offsets = [0, 0], sizes = [6, 240], strides = [1, 1]} : vector<6x512xf32> to vector<6x240xf32>
    %50 = vector.extract_strided_slice %48 {offsets = [0, 256], sizes = [6, 240], strides = [1, 1]} : vector<6x512xf32> to vector<6x240xf32>
    %51 = arith.maximumf %49, %50 : vector<6x240xf32>
    %52 = vector.broadcast %31 : vector<1x240xf32> to vector<6x240xf32>
    %53 = arith.addf %51, %52 : vector<6x240xf32>
    %cst_20 = arith.constant 0.000000e+00 : f32
    %54 = vector.broadcast %cst_20 : f32 to vector<6x240xf32>
    %55 = arith.maximumf %53, %54 : vector<6x240xf32>
    %56 = vector.extract_strided_slice %30 {offsets = [0, 4, 0], sizes = [6, 1, 512], strides = [1, 1, 1]} : vector<6x24x512xf32> to vector<6x1x512xf32>
    %57 = vector.shape_cast %56 : vector<6x1x512xf32> to vector<6x512xf32>
    %58 = vector.extract_strided_slice %30 {offsets = [0, 5, 0], sizes = [6, 1, 512], strides = [1, 1, 1]} : vector<6x24x512xf32> to vector<6x1x512xf32>
    %59 = vector.shape_cast %58 : vector<6x1x512xf32> to vector<6x512xf32>
    %60 = arith.maximumf %57, %59 : vector<6x512xf32>
    %61 = vector.extract_strided_slice %60 {offsets = [0, 0], sizes = [6, 240], strides = [1, 1]} : vector<6x512xf32> to vector<6x240xf32>
    %62 = vector.extract_strided_slice %60 {offsets = [0, 256], sizes = [6, 240], strides = [1, 1]} : vector<6x512xf32> to vector<6x240xf32>
    %63 = arith.maximumf %61, %62 : vector<6x240xf32>
    %64 = vector.broadcast %31 : vector<1x240xf32> to vector<6x240xf32>
    %65 = arith.addf %63, %64 : vector<6x240xf32>
    %cst_21 = arith.constant 0.000000e+00 : f32
    %66 = vector.broadcast %cst_21 : f32 to vector<6x240xf32>
    %67 = arith.maximumf %65, %66 : vector<6x240xf32>
    %68 = vector.extract_strided_slice %30 {offsets = [0, 6, 0], sizes = [6, 1, 512], strides = [1, 1, 1]} : vector<6x24x512xf32> to vector<6x1x512xf32>
    %69 = vector.shape_cast %68 : vector<6x1x512xf32> to vector<6x512xf32>
    %70 = vector.extract_strided_slice %30 {offsets = [0, 7, 0], sizes = [6, 1, 512], strides = [1, 1, 1]} : vector<6x24x512xf32> to vector<6x1x512xf32>
    %71 = vector.shape_cast %70 : vector<6x1x512xf32> to vector<6x512xf32>
    %72 = arith.maximumf %69, %71 : vector<6x512xf32>
    %73 = vector.extract_strided_slice %72 {offsets = [0, 0], sizes = [6, 240], strides = [1, 1]} : vector<6x512xf32> to vector<6x240xf32>
    %74 = vector.extract_strided_slice %72 {offsets = [0, 256], sizes = [6, 240], strides = [1, 1]} : vector<6x512xf32> to vector<6x240xf32>
    %75 = arith.maximumf %73, %74 : vector<6x240xf32>
    %76 = vector.broadcast %31 : vector<1x240xf32> to vector<6x240xf32>
    %77 = arith.addf %75, %76 : vector<6x240xf32>
    %cst_22 = arith.constant 0.000000e+00 : f32
    %78 = vector.broadcast %cst_22 : f32 to vector<6x240xf32>
    %79 = arith.maximumf %77, %78 : vector<6x240xf32>
    %80 = vector.extract_strided_slice %30 {offsets = [0, 8, 0], sizes = [6, 1, 512], strides = [1, 1, 1]} : vector<6x24x512xf32> to vector<6x1x512xf32>
    %81 = vector.shape_cast %80 : vector<6x1x512xf32> to vector<6x512xf32>
    %82 = vector.extract_strided_slice %30 {offsets = [0, 9, 0], sizes = [6, 1, 512], strides = [1, 1, 1]} : vector<6x24x512xf32> to vector<6x1x512xf32>
    %83 = vector.shape_cast %82 : vector<6x1x512xf32> to vector<6x512xf32>
    %84 = arith.maximumf %81, %83 : vector<6x512xf32>
    %85 = vector.extract_strided_slice %84 {offsets = [0, 0], sizes = [6, 240], strides = [1, 1]} : vector<6x512xf32> to vector<6x240xf32>
    %86 = vector.extract_strided_slice %84 {offsets = [0, 256], sizes = [6, 240], strides = [1, 1]} : vector<6x512xf32> to vector<6x240xf32>
    %87 = arith.maximumf %85, %86 : vector<6x240xf32>
    %88 = vector.broadcast %31 : vector<1x240xf32> to vector<6x240xf32>
    %89 = arith.addf %87, %88 : vector<6x240xf32>
    %cst_23 = arith.constant 0.000000e+00 : f32
    %90 = vector.broadcast %cst_23 : f32 to vector<6x240xf32>
    %91 = arith.maximumf %89, %90 : vector<6x240xf32>
    %92 = vector.extract_strided_slice %30 {offsets = [0, 10, 0], sizes = [6, 1, 512], strides = [1, 1, 1]} : vector<6x24x512xf32> to vector<6x1x512xf32>
    %93 = vector.shape_cast %92 : vector<6x1x512xf32> to vector<6x512xf32>
    %94 = vector.extract_strided_slice %30 {offsets = [0, 11, 0], sizes = [6, 1, 512], strides = [1, 1, 1]} : vector<6x24x512xf32> to vector<6x1x512xf32>
    %95 = vector.shape_cast %94 : vector<6x1x512xf32> to vector<6x512xf32>
    %96 = arith.maximumf %93, %95 : vector<6x512xf32>
    %97 = vector.extract_strided_slice %96 {offsets = [0, 0], sizes = [6, 240], strides = [1, 1]} : vector<6x512xf32> to vector<6x240xf32>
    %98 = vector.extract_strided_slice %96 {offsets = [0, 256], sizes = [6, 240], strides = [1, 1]} : vector<6x512xf32> to vector<6x240xf32>
    %99 = arith.maximumf %97, %98 : vector<6x240xf32>
    %100 = vector.broadcast %31 : vector<1x240xf32> to vector<6x240xf32>
    %101 = arith.addf %99, %100 : vector<6x240xf32>
    %cst_24 = arith.constant 0.000000e+00 : f32
    %102 = vector.broadcast %cst_24 : f32 to vector<6x240xf32>
    %103 = arith.maximumf %101, %102 : vector<6x240xf32>
    %104 = vector.extract_strided_slice %30 {offsets = [0, 12, 0], sizes = [6, 1, 512], strides = [1, 1, 1]} : vector<6x24x512xf32> to vector<6x1x512xf32>
    %105 = vector.shape_cast %104 : vector<6x1x512xf32> to vector<6x512xf32>
    %106 = vector.extract_strided_slice %30 {offsets = [0, 13, 0], sizes = [6, 1, 512], strides = [1, 1, 1]} : vector<6x24x512xf32> to vector<6x1x512xf32>
    %107 = vector.shape_cast %106 : vector<6x1x512xf32> to vector<6x512xf32>
    %108 = arith.maximumf %105, %107 : vector<6x512xf32>
    %109 = vector.extract_strided_slice %108 {offsets = [0, 0], sizes = [6, 240], strides = [1, 1]} : vector<6x512xf32> to vector<6x240xf32>
    %110 = vector.extract_strided_slice %108 {offsets = [0, 256], sizes = [6, 240], strides = [1, 1]} : vector<6x512xf32> to vector<6x240xf32>
    %111 = arith.maximumf %109, %110 : vector<6x240xf32>
    %112 = vector.broadcast %31 : vector<1x240xf32> to vector<6x240xf32>
    %113 = arith.addf %111, %112 : vector<6x240xf32>
    %cst_25 = arith.constant 0.000000e+00 : f32
    %114 = vector.broadcast %cst_25 : f32 to vector<6x240xf32>
    %115 = arith.maximumf %113, %114 : vector<6x240xf32>
    %116 = vector.extract_strided_slice %30 {offsets = [0, 14, 0], sizes = [6, 1, 512], strides = [1, 1, 1]} : vector<6x24x512xf32> to vector<6x1x512xf32>
    %117 = vector.shape_cast %116 : vector<6x1x512xf32> to vector<6x512xf32>
    %118 = vector.extract_strided_slice %30 {offsets = [0, 15, 0], sizes = [6, 1, 512], strides = [1, 1, 1]} : vector<6x24x512xf32> to vector<6x1x512xf32>
    %119 = vector.shape_cast %118 : vector<6x1x512xf32> to vector<6x512xf32>
    %120 = arith.maximumf %117, %119 : vector<6x512xf32>
    %121 = vector.extract_strided_slice %120 {offsets = [0, 0], sizes = [6, 240], strides = [1, 1]} : vector<6x512xf32> to vector<6x240xf32>
    %122 = vector.extract_strided_slice %120 {offsets = [0, 256], sizes = [6, 240], strides = [1, 1]} : vector<6x512xf32> to vector<6x240xf32>
    %123 = arith.maximumf %121, %122 : vector<6x240xf32>
    %124 = vector.broadcast %31 : vector<1x240xf32> to vector<6x240xf32>
    %125 = arith.addf %123, %124 : vector<6x240xf32>
    %cst_26 = arith.constant 0.000000e+00 : f32
    %126 = vector.broadcast %cst_26 : f32 to vector<6x240xf32>
    %127 = arith.maximumf %125, %126 : vector<6x240xf32>
    %128 = vector.extract_strided_slice %30 {offsets = [0, 16, 0], sizes = [6, 1, 512], strides = [1, 1, 1]} : vector<6x24x512xf32> to vector<6x1x512xf32>
    %129 = vector.shape_cast %128 : vector<6x1x512xf32> to vector<6x512xf32>
    %130 = vector.extract_strided_slice %30 {offsets = [0, 17, 0], sizes = [6, 1, 512], strides = [1, 1, 1]} : vector<6x24x512xf32> to vector<6x1x512xf32>
    %131 = vector.shape_cast %130 : vector<6x1x512xf32> to vector<6x512xf32>
    %132 = arith.maximumf %129, %131 : vector<6x512xf32>
    %133 = vector.extract_strided_slice %132 {offsets = [0, 0], sizes = [6, 240], strides = [1, 1]} : vector<6x512xf32> to vector<6x240xf32>
    %134 = vector.extract_strided_slice %132 {offsets = [0, 256], sizes = [6, 240], strides = [1, 1]} : vector<6x512xf32> to vector<6x240xf32>
    %135 = arith.maximumf %133, %134 : vector<6x240xf32>
    %136 = vector.broadcast %31 : vector<1x240xf32> to vector<6x240xf32>
    %137 = arith.addf %135, %136 : vector<6x240xf32>
    %cst_27 = arith.constant 0.000000e+00 : f32
    %138 = vector.broadcast %cst_27 : f32 to vector<6x240xf32>
    %139 = arith.maximumf %137, %138 : vector<6x240xf32>
    %140 = vector.extract_strided_slice %30 {offsets = [0, 18, 0], sizes = [6, 1, 512], strides = [1, 1, 1]} : vector<6x24x512xf32> to vector<6x1x512xf32>
    %141 = vector.shape_cast %140 : vector<6x1x512xf32> to vector<6x512xf32>
    %142 = vector.extract_strided_slice %30 {offsets = [0, 19, 0], sizes = [6, 1, 512], strides = [1, 1, 1]} : vector<6x24x512xf32> to vector<6x1x512xf32>
    %143 = vector.shape_cast %142 : vector<6x1x512xf32> to vector<6x512xf32>
    %144 = arith.maximumf %141, %143 : vector<6x512xf32>
    %145 = vector.extract_strided_slice %144 {offsets = [0, 0], sizes = [6, 240], strides = [1, 1]} : vector<6x512xf32> to vector<6x240xf32>
    %146 = vector.extract_strided_slice %144 {offsets = [0, 256], sizes = [6, 240], strides = [1, 1]} : vector<6x512xf32> to vector<6x240xf32>
    %147 = arith.maximumf %145, %146 : vector<6x240xf32>
    %148 = vector.broadcast %31 : vector<1x240xf32> to vector<6x240xf32>
    %149 = arith.addf %147, %148 : vector<6x240xf32>
    %cst_28 = arith.constant 0.000000e+00 : f32
    %150 = vector.broadcast %cst_28 : f32 to vector<6x240xf32>
    %151 = arith.maximumf %149, %150 : vector<6x240xf32>
    %152 = vector.extract_strided_slice %30 {offsets = [0, 20, 0], sizes = [6, 1, 512], strides = [1, 1, 1]} : vector<6x24x512xf32> to vector<6x1x512xf32>
    %153 = vector.shape_cast %152 : vector<6x1x512xf32> to vector<6x512xf32>
    %154 = vector.extract_strided_slice %30 {offsets = [0, 21, 0], sizes = [6, 1, 512], strides = [1, 1, 1]} : vector<6x24x512xf32> to vector<6x1x512xf32>
    %155 = vector.shape_cast %154 : vector<6x1x512xf32> to vector<6x512xf32>
    %156 = arith.maximumf %153, %155 : vector<6x512xf32>
    %157 = vector.extract_strided_slice %156 {offsets = [0, 0], sizes = [6, 240], strides = [1, 1]} : vector<6x512xf32> to vector<6x240xf32>
    %158 = vector.extract_strided_slice %156 {offsets = [0, 256], sizes = [6, 240], strides = [1, 1]} : vector<6x512xf32> to vector<6x240xf32>
    %159 = arith.maximumf %157, %158 : vector<6x240xf32>
    %160 = vector.broadcast %31 : vector<1x240xf32> to vector<6x240xf32>
    %161 = arith.addf %159, %160 : vector<6x240xf32>
    %cst_29 = arith.constant 0.000000e+00 : f32
    %162 = vector.broadcast %cst_29 : f32 to vector<6x240xf32>
    %163 = arith.maximumf %161, %162 : vector<6x240xf32>
    %164 = vector.extract_strided_slice %30 {offsets = [0, 22, 0], sizes = [6, 1, 512], strides = [1, 1, 1]} : vector<6x24x512xf32> to vector<6x1x512xf32>
    %165 = vector.shape_cast %164 : vector<6x1x512xf32> to vector<6x512xf32>
    %166 = vector.extract_strided_slice %30 {offsets = [0, 23, 0], sizes = [6, 1, 512], strides = [1, 1, 1]} : vector<6x24x512xf32> to vector<6x1x512xf32>
    %167 = vector.shape_cast %166 : vector<6x1x512xf32> to vector<6x512xf32>
    %168 = arith.maximumf %165, %167 : vector<6x512xf32>
    %169 = vector.extract_strided_slice %168 {offsets = [0, 0], sizes = [6, 240], strides = [1, 1]} : vector<6x512xf32> to vector<6x240xf32>
    %170 = vector.extract_strided_slice %168 {offsets = [0, 256], sizes = [6, 240], strides = [1, 1]} : vector<6x512xf32> to vector<6x240xf32>
    %171 = arith.maximumf %169, %170 : vector<6x240xf32>
    %172 = vector.broadcast %31 : vector<1x240xf32> to vector<6x240xf32>
    %173 = arith.addf %171, %172 : vector<6x240xf32>
    %cst_30 = arith.constant 0.000000e+00 : f32
    %174 = vector.broadcast %cst_30 : f32 to vector<6x240xf32>
    %175 = arith.maximumf %173, %174 : vector<6x240xf32>
    %176 = vector.shape_cast %43 : vector<6x240xf32> to vector<6x1x240xf32>
    %177 = vector.shape_cast %55 : vector<6x240xf32> to vector<6x1x240xf32>
    %178 = vector.shape_cast %67 : vector<6x240xf32> to vector<6x1x240xf32>
    %179 = vector.shape_cast %79 : vector<6x240xf32> to vector<6x1x240xf32>
    %180 = vector.shape_cast %91 : vector<6x240xf32> to vector<6x1x240xf32>
    %181 = vector.shape_cast %103 : vector<6x240xf32> to vector<6x1x240xf32>
    %182 = vector.shape_cast %115 : vector<6x240xf32> to vector<6x1x240xf32>
    %183 = vector.shape_cast %127 : vector<6x240xf32> to vector<6x1x240xf32>
    %184 = vector.shape_cast %139 : vector<6x240xf32> to vector<6x1x240xf32>
    %185 = vector.shape_cast %151 : vector<6x240xf32> to vector<6x1x240xf32>
    %186 = vector.shape_cast %163 : vector<6x240xf32> to vector<6x1x240xf32>
    %187 = vector.shape_cast %175 : vector<6x240xf32> to vector<6x1x240xf32>
    %188 = tpu.concatenate %176, %177, %178, %179, %180, %181, %182, %183, %184, %185, %186, %187 in 1 : vector<6x1x240xf32>, vector<6x1x240xf32>, vector<6x1x240xf32>, vector<6x1x240xf32>, vector<6x1x240xf32>, vector<6x1x240xf32>, vector<6x1x240xf32>, vector<6x1x240xf32>, vector<6x1x240xf32>, vector<6x1x240xf32>, vector<6x1x240xf32>, vector<6x1x240xf32> -> vector<6x12x240xf32>
    %189 = arith.truncf %188 : vector<6x12x240xf32> to vector<6x12x240xbf16>
    %190 = vector.extract_strided_slice %189 {offsets = [0, 0, 0], sizes = [6, 8, 240], strides = [1, 1, 1]} : vector<6x12x240xbf16> to vector<6x8x240xbf16>
    %191 = vector.shape_cast %190 : vector<6x8x240xbf16> to vector<48x240xbf16>
    %c0_31 = arith.constant 0 : index
    %c0_32 = arith.constant 0 : index
    %c0_33 = arith.constant 0 : index
    %192 = vector.load %arg5[%c0_31, %c0_32, %c0_33] : memref<5x240x512xbf16, #tpu.memory_space<vmem>>, vector<1x240x512xbf16>
    %193 = vector.shape_cast %192 : vector<1x240x512xbf16> to vector<240x512xbf16>
    %cst_34 = arith.constant dense<0.000000e+00> : vector<48x512xf32>
    %194 = tpu.matmul %191, %193, %cst_34 {dimension_numbers = #tpu.dot_dimension_numbers<[1], [0], [0], [1], [0, 0, 1, 1], [], []>} : vector<48x240xbf16>, vector<240x512xbf16>, vector<48x512xf32> -> vector<48x512xf32>
    %195 = vector.extract_strided_slice %189 {offsets = [0, 1, 0], sizes = [6, 8, 240], strides = [1, 1, 1]} : vector<6x12x240xbf16> to vector<6x8x240xbf16>
    %196 = vector.shape_cast %195 : vector<6x8x240xbf16> to vector<48x240xbf16>
    %c1_35 = arith.constant 1 : index
    %c0_36 = arith.constant 0 : index
    %c0_37 = arith.constant 0 : index
    %197 = vector.load %arg5[%c1_35, %c0_36, %c0_37] : memref<5x240x512xbf16, #tpu.memory_space<vmem>>, vector<1x240x512xbf16>
    %198 = vector.shape_cast %197 : vector<1x240x512xbf16> to vector<240x512xbf16>
    %cst_38 = arith.constant dense<0.000000e+00> : vector<48x512xf32>
    %199 = tpu.matmul %196, %198, %cst_38 {dimension_numbers = #tpu.dot_dimension_numbers<[1], [0], [0], [1], [0, 0, 1, 1], [], []>} : vector<48x240xbf16>, vector<240x512xbf16>, vector<48x512xf32> -> vector<48x512xf32>
    %200 = arith.addf %194, %199 : vector<48x512xf32>
    %201 = vector.extract_strided_slice %189 {offsets = [0, 2, 0], sizes = [6, 8, 240], strides = [1, 1, 1]} : vector<6x12x240xbf16> to vector<6x8x240xbf16>
    %202 = vector.shape_cast %201 : vector<6x8x240xbf16> to vector<48x240xbf16>
    %c2_39 = arith.constant 2 : index
    %c0_40 = arith.constant 0 : index
    %c0_41 = arith.constant 0 : index
    %203 = vector.load %arg5[%c2_39, %c0_40, %c0_41] : memref<5x240x512xbf16, #tpu.memory_space<vmem>>, vector<1x240x512xbf16>
    %204 = vector.shape_cast %203 : vector<1x240x512xbf16> to vector<240x512xbf16>
    %cst_42 = arith.constant dense<0.000000e+00> : vector<48x512xf32>
    %205 = tpu.matmul %202, %204, %cst_42 {dimension_numbers = #tpu.dot_dimension_numbers<[1], [0], [0], [1], [0, 0, 1, 1], [], []>} : vector<48x240xbf16>, vector<240x512xbf16>, vector<48x512xf32> -> vector<48x512xf32>
    %206 = arith.addf %200, %205 : vector<48x512xf32>
    %207 = vector.extract_strided_slice %189 {offsets = [0, 3, 0], sizes = [6, 8, 240], strides = [1, 1, 1]} : vector<6x12x240xbf16> to vector<6x8x240xbf16>
    %208 = vector.shape_cast %207 : vector<6x8x240xbf16> to vector<48x240xbf16>
    %c3_43 = arith.constant 3 : index
    %c0_44 = arith.constant 0 : index
    %c0_45 = arith.constant 0 : index
    %209 = vector.load %arg5[%c3_43, %c0_44, %c0_45] : memref<5x240x512xbf16, #tpu.memory_space<vmem>>, vector<1x240x512xbf16>
    %210 = vector.shape_cast %209 : vector<1x240x512xbf16> to vector<240x512xbf16>
    %cst_46 = arith.constant dense<0.000000e+00> : vector<48x512xf32>
    %211 = tpu.matmul %208, %210, %cst_46 {dimension_numbers = #tpu.dot_dimension_numbers<[1], [0], [0], [1], [0, 0, 1, 1], [], []>} : vector<48x240xbf16>, vector<240x512xbf16>, vector<48x512xf32> -> vector<48x512xf32>
    %212 = arith.addf %206, %211 : vector<48x512xf32>
    %213 = vector.extract_strided_slice %189 {offsets = [0, 4, 0], sizes = [6, 8, 240], strides = [1, 1, 1]} : vector<6x12x240xbf16> to vector<6x8x240xbf16>
    %214 = vector.shape_cast %213 : vector<6x8x240xbf16> to vector<48x240xbf16>
    %c4_47 = arith.constant 4 : index
    %c0_48 = arith.constant 0 : index
    %c0_49 = arith.constant 0 : index
    %215 = vector.load %arg5[%c4_47, %c0_48, %c0_49] : memref<5x240x512xbf16, #tpu.memory_space<vmem>>, vector<1x240x512xbf16>
    %216 = vector.shape_cast %215 : vector<1x240x512xbf16> to vector<240x512xbf16>
    %cst_50 = arith.constant dense<0.000000e+00> : vector<48x512xf32>
    %217 = tpu.matmul %214, %216, %cst_50 {dimension_numbers = #tpu.dot_dimension_numbers<[1], [0], [0], [1], [0, 0, 1, 1], [], []>} : vector<48x240xbf16>, vector<240x512xbf16>, vector<48x512xf32> -> vector<48x512xf32>
    %218 = arith.addf %212, %217 : vector<48x512xf32>
    %219 = vector.shape_cast %218 : vector<48x512xf32> to vector<6x8x512xf32>
    %c0_51 = arith.constant 0 : index
    %c0_52 = arith.constant 0 : index
    %220 = vector.load %arg6[%c0_51, %c0_52] : memref<1x200xf32, #tpu.memory_space<vmem>>, vector<1x200xf32>
    %221 = vector.extract_strided_slice %219 {offsets = [0, 0, 0], sizes = [6, 1, 512], strides = [1, 1, 1]} : vector<6x8x512xf32> to vector<6x1x512xf32>
    %222 = vector.shape_cast %221 : vector<6x1x512xf32> to vector<6x512xf32>
    %223 = vector.extract_strided_slice %219 {offsets = [0, 1, 0], sizes = [6, 1, 512], strides = [1, 1, 1]} : vector<6x8x512xf32> to vector<6x1x512xf32>
    %224 = vector.shape_cast %223 : vector<6x1x512xf32> to vector<6x512xf32>
    %225 = arith.maximumf %222, %224 : vector<6x512xf32>
    %226 = vector.extract_strided_slice %225 {offsets = [0, 0], sizes = [6, 200], strides = [1, 1]} : vector<6x512xf32> to vector<6x200xf32>
    %227 = vector.extract_strided_slice %225 {offsets = [0, 256], sizes = [6, 200], strides = [1, 1]} : vector<6x512xf32> to vector<6x200xf32>
    %228 = arith.maximumf %226, %227 : vector<6x200xf32>
    %229 = vector.broadcast %220 : vector<1x200xf32> to vector<6x200xf32>
    %230 = arith.addf %228, %229 : vector<6x200xf32>
    %cst_53 = arith.constant 0.000000e+00 : f32
    %231 = vector.broadcast %cst_53 : f32 to vector<6x200xf32>
    %232 = arith.maximumf %230, %231 : vector<6x200xf32>
    %233 = vector.extract_strided_slice %232 {offsets = [0, 0], sizes = [6, 50], strides = [1, 1]} : vector<6x200xf32> to vector<6x50xf32>
    %c0_54 = arith.constant 0 : index
    %c0_55 = arith.constant 0 : index
    %c0_56 = arith.constant 0 : index
    %234 = vector.load %arg7[%c0_54, %c0_55, %c0_56] : memref<6x16x50xf32, #tpu.memory_space<vmem>>, vector<6x1x50xf32>
    %235 = vector.shape_cast %234 : vector<6x1x50xf32> to vector<6x50xf32>
    %236 = vector.shape_cast %233 : vector<6x50xf32> to vector<6x1x50xf32>
    tpu.vector_store %arg7[%c0_54, %c0_55, %c0_56], %236 {strides = array<i32>} : memref<6x16x50xf32, #tpu.memory_space<vmem>>, vector<6x1x50xf32>,
    %237 = vector.extract_strided_slice %232 {offsets = [0, 50], sizes = [6, 50], strides = [1, 1]} : vector<6x200xf32> to vector<6x50xf32>
    %c0_57 = arith.constant 0 : index
    %c1_58 = arith.constant 1 : index
    %c0_59 = arith.constant 0 : index
    %238 = vector.load %arg7[%c0_57, %c1_58, %c0_59] : memref<6x16x50xf32, #tpu.memory_space<vmem>>, vector<6x1x50xf32>
    %239 = vector.shape_cast %238 : vector<6x1x50xf32> to vector<6x50xf32>
    %240 = vector.shape_cast %237 : vector<6x50xf32> to vector<6x1x50xf32>
    tpu.vector_store %arg7[%c0_57, %c1_58, %c0_59], %240 {strides = array<i32>} : memref<6x16x50xf32, #tpu.memory_space<vmem>>, vector<6x1x50xf32>,
    %241 = vector.extract_strided_slice %232 {offsets = [0, 100], sizes = [6, 50], strides = [1, 1]} : vector<6x200xf32> to vector<6x50xf32>
    %c0_60 = arith.constant 0 : index
    %c2_61 = arith.constant 2 : index
    %c0_62 = arith.constant 0 : index
    %242 = vector.load %arg7[%c0_60, %c2_61, %c0_62] : memref<6x16x50xf32, #tpu.memory_space<vmem>>, vector<6x1x50xf32>
    %243 = vector.shape_cast %242 : vector<6x1x50xf32> to vector<6x50xf32>
    %244 = vector.shape_cast %241 : vector<6x50xf32> to vector<6x1x50xf32>
    tpu.vector_store %arg7[%c0_60, %c2_61, %c0_62], %244 {strides = array<i32>} : memref<6x16x50xf32, #tpu.memory_space<vmem>>, vector<6x1x50xf32>,
    %245 = vector.extract_strided_slice %232 {offsets = [0, 150], sizes = [6, 50], strides = [1, 1]} : vector<6x200xf32> to vector<6x50xf32>
    %c0_63 = arith.constant 0 : index
    %c3_64 = arith.constant 3 : index
    %c0_65 = arith.constant 0 : index
    %246 = vector.load %arg7[%c0_63, %c3_64, %c0_65] : memref<6x16x50xf32, #tpu.memory_space<vmem>>, vector<6x1x50xf32>
    %247 = vector.shape_cast %246 : vector<6x1x50xf32> to vector<6x50xf32>
    %248 = vector.shape_cast %245 : vector<6x50xf32> to vector<6x1x50xf32>
    tpu.vector_store %arg7[%c0_63, %c3_64, %c0_65], %248 {strides = array<i32>} : memref<6x16x50xf32, #tpu.memory_space<vmem>>, vector<6x1x50xf32>,
    %249 = vector.extract_strided_slice %219 {offsets = [0, 2, 0], sizes = [6, 1, 512], strides = [1, 1, 1]} : vector<6x8x512xf32> to vector<6x1x512xf32>
    %250 = vector.shape_cast %249 : vector<6x1x512xf32> to vector<6x512xf32>
    %251 = vector.extract_strided_slice %219 {offsets = [0, 3, 0], sizes = [6, 1, 512], strides = [1, 1, 1]} : vector<6x8x512xf32> to vector<6x1x512xf32>
    %252 = vector.shape_cast %251 : vector<6x1x512xf32> to vector<6x512xf32>
    %253 = arith.maximumf %250, %252 : vector<6x512xf32>
    %254 = vector.extract_strided_slice %253 {offsets = [0, 0], sizes = [6, 200], strides = [1, 1]} : vector<6x512xf32> to vector<6x200xf32>
    %255 = vector.extract_strided_slice %253 {offsets = [0, 256], sizes = [6, 200], strides = [1, 1]} : vector<6x512xf32> to vector<6x200xf32>
    %256 = arith.maximumf %254, %255 : vector<6x200xf32>
    %257 = vector.broadcast %220 : vector<1x200xf32> to vector<6x200xf32>
    %258 = arith.addf %256, %257 : vector<6x200xf32>
    %cst_66 = arith.constant 0.000000e+00 : f32
    %259 = vector.broadcast %cst_66 : f32 to vector<6x200xf32>
    %260 = arith.maximumf %258, %259 : vector<6x200xf32>
    %261 = vector.extract_strided_slice %260 {offsets = [0, 0], sizes = [6, 50], strides = [1, 1]} : vector<6x200xf32> to vector<6x50xf32>
    %c0_67 = arith.constant 0 : index
    %c4_68 = arith.constant 4 : index
    %c0_69 = arith.constant 0 : index
    %262 = vector.load %arg7[%c0_67, %c4_68, %c0_69] : memref<6x16x50xf32, #tpu.memory_space<vmem>>, vector<6x1x50xf32>
    %263 = vector.shape_cast %262 : vector<6x1x50xf32> to vector<6x50xf32>
    %264 = vector.shape_cast %261 : vector<6x50xf32> to vector<6x1x50xf32>
    tpu.vector_store %arg7[%c0_67, %c4_68, %c0_69], %264 {strides = array<i32>} : memref<6x16x50xf32, #tpu.memory_space<vmem>>, vector<6x1x50xf32>,
    %265 = vector.extract_strided_slice %260 {offsets = [0, 50], sizes = [6, 50], strides = [1, 1]} : vector<6x200xf32> to vector<6x50xf32>
    %c0_70 = arith.constant 0 : index
    %c5 = arith.constant 5 : index
    %c0_71 = arith.constant 0 : index
    %266 = vector.load %arg7[%c0_70, %c5, %c0_71] : memref<6x16x50xf32, #tpu.memory_space<vmem>>, vector<6x1x50xf32>
    %267 = vector.shape_cast %266 : vector<6x1x50xf32> to vector<6x50xf32>
    %268 = vector.shape_cast %265 : vector<6x50xf32> to vector<6x1x50xf32>
    tpu.vector_store %arg7[%c0_70, %c5, %c0_71], %268 {strides = array<i32>} : memref<6x16x50xf32, #tpu.memory_space<vmem>>, vector<6x1x50xf32>,
    %269 = vector.extract_strided_slice %260 {offsets = [0, 100], sizes = [6, 50], strides = [1, 1]} : vector<6x200xf32> to vector<6x50xf32>
    %c0_72 = arith.constant 0 : index
    %c6 = arith.constant 6 : index
    %c0_73 = arith.constant 0 : index
    %270 = vector.load %arg7[%c0_72, %c6, %c0_73] : memref<6x16x50xf32, #tpu.memory_space<vmem>>, vector<6x1x50xf32>
    %271 = vector.shape_cast %270 : vector<6x1x50xf32> to vector<6x50xf32>
    %272 = vector.shape_cast %269 : vector<6x50xf32> to vector<6x1x50xf32>
    tpu.vector_store %arg7[%c0_72, %c6, %c0_73], %272 {strides = array<i32>} : memref<6x16x50xf32, #tpu.memory_space<vmem>>, vector<6x1x50xf32>,
    %273 = vector.extract_strided_slice %260 {offsets = [0, 150], sizes = [6, 50], strides = [1, 1]} : vector<6x200xf32> to vector<6x50xf32>
    %c0_74 = arith.constant 0 : index
    %c7 = arith.constant 7 : index
    %c0_75 = arith.constant 0 : index
    %274 = vector.load %arg7[%c0_74, %c7, %c0_75] : memref<6x16x50xf32, #tpu.memory_space<vmem>>, vector<6x1x50xf32>
    %275 = vector.shape_cast %274 : vector<6x1x50xf32> to vector<6x50xf32>
    %276 = vector.shape_cast %273 : vector<6x50xf32> to vector<6x1x50xf32>
    tpu.vector_store %arg7[%c0_74, %c7, %c0_75], %276 {strides = array<i32>} : memref<6x16x50xf32, #tpu.memory_space<vmem>>, vector<6x1x50xf32>,
    %277 = vector.extract_strided_slice %219 {offsets = [0, 4, 0], sizes = [6, 1, 512], strides = [1, 1, 1]} : vector<6x8x512xf32> to vector<6x1x512xf32>
    %278 = vector.shape_cast %277 : vector<6x1x512xf32> to vector<6x512xf32>
    %279 = vector.extract_strided_slice %219 {offsets = [0, 5, 0], sizes = [6, 1, 512], strides = [1, 1, 1]} : vector<6x8x512xf32> to vector<6x1x512xf32>
    %280 = vector.shape_cast %279 : vector<6x1x512xf32> to vector<6x512xf32>
    %281 = arith.maximumf %278, %280 : vector<6x512xf32>
    %282 = vector.extract_strided_slice %281 {offsets = [0, 0], sizes = [6, 200], strides = [1, 1]} : vector<6x512xf32> to vector<6x200xf32>
    %283 = vector.extract_strided_slice %281 {offsets = [0, 256], sizes = [6, 200], strides = [1, 1]} : vector<6x512xf32> to vector<6x200xf32>
    %284 = arith.maximumf %282, %283 : vector<6x200xf32>
    %285 = vector.broadcast %220 : vector<1x200xf32> to vector<6x200xf32>
    %286 = arith.addf %284, %285 : vector<6x200xf32>
    %cst_76 = arith.constant 0.000000e+00 : f32
    %287 = vector.broadcast %cst_76 : f32 to vector<6x200xf32>
    %288 = arith.maximumf %286, %287 : vector<6x200xf32>
    %289 = vector.extract_strided_slice %288 {offsets = [0, 0], sizes = [6, 50], strides = [1, 1]} : vector<6x200xf32> to vector<6x50xf32>
    %c0_77 = arith.constant 0 : index
    %c8 = arith.constant 8 : index
    %c0_78 = arith.constant 0 : index
    %290 = vector.load %arg7[%c0_77, %c8, %c0_78] : memref<6x16x50xf32, #tpu.memory_space<vmem>>, vector<6x1x50xf32>
    %291 = vector.shape_cast %290 : vector<6x1x50xf32> to vector<6x50xf32>
    %292 = vector.shape_cast %289 : vector<6x50xf32> to vector<6x1x50xf32>
    tpu.vector_store %arg7[%c0_77, %c8, %c0_78], %292 {strides = array<i32>} : memref<6x16x50xf32, #tpu.memory_space<vmem>>, vector<6x1x50xf32>,
    %293 = vector.extract_strided_slice %288 {offsets = [0, 50], sizes = [6, 50], strides = [1, 1]} : vector<6x200xf32> to vector<6x50xf32>
    %c0_79 = arith.constant 0 : index
    %c9 = arith.constant 9 : index
    %c0_80 = arith.constant 0 : index
    %294 = vector.load %arg7[%c0_79, %c9, %c0_80] : memref<6x16x50xf32, #tpu.memory_space<vmem>>, vector<6x1x50xf32>
    %295 = vector.shape_cast %294 : vector<6x1x50xf32> to vector<6x50xf32>
    %296 = vector.shape_cast %293 : vector<6x50xf32> to vector<6x1x50xf32>
    tpu.vector_store %arg7[%c0_79, %c9, %c0_80], %296 {strides = array<i32>} : memref<6x16x50xf32, #tpu.memory_space<vmem>>, vector<6x1x50xf32>,
    %297 = vector.extract_strided_slice %288 {offsets = [0, 100], sizes = [6, 50], strides = [1, 1]} : vector<6x200xf32> to vector<6x50xf32>
    %c0_81 = arith.constant 0 : index
    %c10 = arith.constant 10 : index
    %c0_82 = arith.constant 0 : index
    %298 = vector.load %arg7[%c0_81, %c10, %c0_82] : memref<6x16x50xf32, #tpu.memory_space<vmem>>, vector<6x1x50xf32>
    %299 = vector.shape_cast %298 : vector<6x1x50xf32> to vector<6x50xf32>
    %300 = vector.shape_cast %297 : vector<6x50xf32> to vector<6x1x50xf32>
    tpu.vector_store %arg7[%c0_81, %c10, %c0_82], %300 {strides = array<i32>} : memref<6x16x50xf32, #tpu.memory_space<vmem>>, vector<6x1x50xf32>,
    %301 = vector.extract_strided_slice %288 {offsets = [0, 150], sizes = [6, 50], strides = [1, 1]} : vector<6x200xf32> to vector<6x50xf32>
    %c0_83 = arith.constant 0 : index
    %c11 = arith.constant 11 : index
    %c0_84 = arith.constant 0 : index
    %302 = vector.load %arg7[%c0_83, %c11, %c0_84] : memref<6x16x50xf32, #tpu.memory_space<vmem>>, vector<6x1x50xf32>
    %303 = vector.shape_cast %302 : vector<6x1x50xf32> to vector<6x50xf32>
    %304 = vector.shape_cast %301 : vector<6x50xf32> to vector<6x1x50xf32>
    tpu.vector_store %arg7[%c0_83, %c11, %c0_84], %304 {strides = array<i32>} : memref<6x16x50xf32, #tpu.memory_space<vmem>>, vector<6x1x50xf32>,
    %305 = vector.extract_strided_slice %219 {offsets = [0, 6, 0], sizes = [6, 1, 512], strides = [1, 1, 1]} : vector<6x8x512xf32> to vector<6x1x512xf32>
    %306 = vector.shape_cast %305 : vector<6x1x512xf32> to vector<6x512xf32>
    %307 = vector.extract_strided_slice %219 {offsets = [0, 7, 0], sizes = [6, 1, 512], strides = [1, 1, 1]} : vector<6x8x512xf32> to vector<6x1x512xf32>
    %308 = vector.shape_cast %307 : vector<6x1x512xf32> to vector<6x512xf32>
    %309 = arith.maximumf %306, %308 : vector<6x512xf32>
    %310 = vector.extract_strided_slice %309 {offsets = [0, 0], sizes = [6, 200], strides = [1, 1]} : vector<6x512xf32> to vector<6x200xf32>
    %311 = vector.extract_strided_slice %309 {offsets = [0, 256], sizes = [6, 200], strides = [1, 1]} : vector<6x512xf32> to vector<6x200xf32>
    %312 = arith.maximumf %310, %311 : vector<6x200xf32>
    %313 = vector.broadcast %220 : vector<1x200xf32> to vector<6x200xf32>
    %314 = arith.addf %312, %313 : vector<6x200xf32>
    %cst_85 = arith.constant 0.000000e+00 : f32
    %315 = vector.broadcast %cst_85 : f32 to vector<6x200xf32>
    %316 = arith.maximumf %314, %315 : vector<6x200xf32>
    %317 = vector.extract_strided_slice %316 {offsets = [0, 0], sizes = [6, 50], strides = [1, 1]} : vector<6x200xf32> to vector<6x50xf32>
    %c0_86 = arith.constant 0 : index
    %c12 = arith.constant 12 : index
    %c0_87 = arith.constant 0 : index
    %318 = vector.load %arg7[%c0_86, %c12, %c0_87] : memref<6x16x50xf32, #tpu.memory_space<vmem>>, vector<6x1x50xf32>
    %319 = vector.shape_cast %318 : vector<6x1x50xf32> to vector<6x50xf32>
    %320 = vector.shape_cast %317 : vector<6x50xf32> to vector<6x1x50xf32>
    tpu.vector_store %arg7[%c0_86, %c12, %c0_87], %320 {strides = array<i32>} : memref<6x16x50xf32, #tpu.memory_space<vmem>>, vector<6x1x50xf32>,
    %321 = vector.extract_strided_slice %316 {offsets = [0, 50], sizes = [6, 50], strides = [1, 1]} : vector<6x200xf32> to vector<6x50xf32>
    %c0_88 = arith.constant 0 : index
    %c13 = arith.constant 13 : index
    %c0_89 = arith.constant 0 : index
    %322 = vector.load %arg7[%c0_88, %c13, %c0_89] : memref<6x16x50xf32, #tpu.memory_space<vmem>>, vector<6x1x50xf32>
    %323 = vector.shape_cast %322 : vector<6x1x50xf32> to vector<6x50xf32>
    %324 = vector.shape_cast %321 : vector<6x50xf32> to vector<6x1x50xf32>
    tpu.vector_store %arg7[%c0_88, %c13, %c0_89], %324 {strides = array<i32>} : memref<6x16x50xf32, #tpu.memory_space<vmem>>, vector<6x1x50xf32>,
    %325 = vector.extract_strided_slice %316 {offsets = [0, 100], sizes = [6, 50], strides = [1, 1]} : vector<6x200xf32> to vector<6x50xf32>
    %c0_90 = arith.constant 0 : index
    %c14 = arith.constant 14 : index
    %c0_91 = arith.constant 0 : index
    %326 = vector.load %arg7[%c0_90, %c14, %c0_91] : memref<6x16x50xf32, #tpu.memory_space<vmem>>, vector<6x1x50xf32>
    %327 = vector.shape_cast %326 : vector<6x1x50xf32> to vector<6x50xf32>
    %328 = vector.shape_cast %325 : vector<6x50xf32> to vector<6x1x50xf32>
    tpu.vector_store %arg7[%c0_90, %c14, %c0_91], %328 {strides = array<i32>} : memref<6x16x50xf32, #tpu.memory_space<vmem>>, vector<6x1x50xf32>,
    %329 = vector.extract_strided_slice %316 {offsets = [0, 150], sizes = [6, 50], strides = [1, 1]} : vector<6x200xf32> to vector<6x50xf32>
    %c0_92 = arith.constant 0 : index
    %c15 = arith.constant 15 : index
    %c0_93 = arith.constant 0 : index
    %330 = vector.load %arg7[%c0_92, %c15, %c0_93] : memref<6x16x50xf32, #tpu.memory_space<vmem>>, vector<6x1x50xf32>
    %331 = vector.shape_cast %330 : vector<6x1x50xf32> to vector<6x50xf32>
    %332 = vector.shape_cast %329 : vector<6x50xf32> to vector<6x1x50xf32>
    tpu.vector_store %arg7[%c0_92, %c15, %c0_93], %332 {strides = array<i32>} : memref<6x16x50xf32, #tpu.memory_space<vmem>>, vector<6x1x50xf32>,
    %c0_94 = arith.constant 0 : index
    %c0_95 = arith.constant 0 : index
    %c0_96 = arith.constant 0 : index
    %333 = vector.load %arg7[%c0_94, %c0_95, %c0_96] : memref<6x16x50xf32, #tpu.memory_space<vmem>>, vector<6x16x50xf32>
    %334 = arith.truncf %333 : vector<6x16x50xf32> to vector<6x16x50xbf16>
    %c0_97 = arith.constant 0 : index
    %c0_98 = arith.constant 0 : index
    %c0_99 = arith.constant 0 : index
    %335 = vector.load %arg2[%c0_97, %c0_98, %c0_99] : memref<6x64x16xbf16, #tpu.memory_space<vmem>>, vector<6x64x16xbf16>
    %cst_100 = arith.constant dense<0.000000e+00> : vector<6x64x50xf32>
    %336 = tpu.matmul %335, %334, %cst_100 {dimension_numbers = #tpu.dot_dimension_numbers<[2], [1], [1], [2], [0, 0, 0, 1, 1, 2], [0], [0]>} : vector<6x64x16xbf16>, vector<6x16x50xbf16>, vector<6x64x50xf32> -> vector<6x64x50xf32>
    %cst_101 = arith.constant 0.000000e+00 : f32
    %337 = vector.broadcast %cst_101 : f32 to vector<6x64x50xf32>
    %338 = arith.maximumf %336, %337 : vector<6x64x50xf32>
    %339 = arith.truncf %338 : vector<6x64x50xf32> to vector<6x64x50xbf16>
    %c0_102 = arith.constant 0 : index
    %c0_103 = arith.constant 0 : index
    %c0_104 = arith.constant 0 : index
    %340 = vector.load %arg8[%c0_102, %c0_103, %c0_104] : memref<6x64x50xbf16, #tpu.memory_space<vmem>>, vector<6x64x50xbf16>
    tpu.vector_store %arg8[%c0_102, %c0_103, %c0_104], %339 {strides = array<i32>} : memref<6x64x50xbf16, #tpu.memory_space<vmem>>, vector<6x64x50xbf16>,
    return
  }
  func.func @transform_0(%arg0: i32) -> (i32, i32, i32) {
    %c0_i32 = arith.constant 0 : i32
    %c0_i32_0 = arith.constant 0 : i32
    %c0_i32_1 = arith.constant 0 : i32
    return %arg0, %c0_i32, %c0_i32_0 : i32, i32, i32
  }
  func.func @transform_1(%arg0: i32) -> (i32, i32, i32) {
    %c0_i32 = arith.constant 0 : i32
    %c0_i32_0 = arith.constant 0 : i32
    %c0_i32_1 = arith.constant 0 : i32
    return %arg0, %c0_i32, %c0_i32_0 : i32, i32, i32
  }
  func.func @transform_2(%arg0: i32) -> (i32, i32, i32) {
    %c0_i32 = arith.constant 0 : i32
    %c0_i32_0 = arith.constant 0 : i32
    %c0_i32_1 = arith.constant 0 : i32
    %c0_i32_2 = arith.constant 0 : i32
    return %c0_i32, %c0_i32_0, %c0_i32_1 : i32, i32, i32
  }
  func.func @transform_3(%arg0: i32) -> (i32, i32) {
    %c0_i32 = arith.constant 0 : i32
    %c0_i32_0 = arith.constant 0 : i32
    %c0_i32_1 = arith.constant 0 : i32
    return %c0_i32, %c0_i32_0 : i32, i32
  }
  func.func @transform_4(%arg0: i32) -> (i32, i32, i32) {
    %c0_i32 = arith.constant 0 : i32
    %c0_i32_0 = arith.constant 0 : i32
    %c0_i32_1 = arith.constant 0 : i32
    %c0_i32_2 = arith.constant 0 : i32
    return %c0_i32, %c0_i32_0, %c0_i32_1 : i32, i32, i32
  }
  func.func @transform_5(%arg0: i32) -> (i32, i32) {
    %c0_i32 = arith.constant 0 : i32
    %c0_i32_0 = arith.constant 0 : i32
    %c0_i32_1 = arith.constant 0 : i32
    return %c0_i32, %c0_i32_0 : i32, i32
  }
  func.func @transform_6(%arg0: i32) -> (i32, i32, i32) {
    %c0_i32 = arith.constant 0 : i32
    %c0_i32_0 = arith.constant 0 : i32
    %c0_i32_1 = arith.constant 0 : i32
    return %arg0, %c0_i32, %c0_i32_0 : i32, i32, i32
  }
  func.func @transform_7(%arg0: i32) -> (i32, i32, i32) {
    %c0_i32 = arith.constant 0 : i32
    %c0_i32_0 = arith.constant 0 : i32
    %c0_i32_1 = arith.constant 0 : i32
    return %arg0, %c0_i32, %c0_i32_0 : i32, i32, i32
  }
}

module attributes {stable_mosaic.version = 11 : i64} {
  func.func @_gru_stack_kernel(%arg0: i32, %arg1: memref<3x8x800xbf16, #tpu.memory_space<vmem>>, %arg2: memref<2x8x32xf32, #tpu.memory_space<vmem>>, %arg3: memref<800x32xbf16, #tpu.memory_space<vmem>>, %arg4: memref<1x32xf32, #tpu.memory_space<vmem>>, %arg5: memref<2x3x32x32xbf16, #tpu.memory_space<vmem>>, %arg6: memref<2x3x32x32xbf16, #tpu.memory_space<vmem>>, %arg7: memref<2x3x1x32xf32, #tpu.memory_space<vmem>>, %arg8: memref<2x3x1x32xf32, #tpu.memory_space<vmem>>, %arg9: memref<32x32xbf16, #tpu.memory_space<vmem>>, %arg10: memref<1x32xf32, #tpu.memory_space<vmem>>, %arg11: memref<3x8x32xf32, #tpu.memory_space<vmem>>, %arg12: memref<2x8x32xf32, #tpu.memory_space<vmem>>) attributes {dimension_semantics = [#tpu.dimension_semantics<parallel>], iteration_bounds = array<i64: 1>, scalar_prefetch = 0 : i64, scratch_operands = 0 : i64, tpu.core_type = #tpu.core_type<tc>, window_params = [{transform_indices = @transform_0, window_bounds = array<i64: 3, 8, 800>}, {transform_indices = @transform_1, window_bounds = array<i64: 2, 8, 32>}, {pipeline_mode = #tpu.pipeline_mode<synchronous>, transform_indices = @transform_2, window_bounds = array<i64: 800, 32>}, {pipeline_mode = #tpu.pipeline_mode<synchronous>, transform_indices = @transform_3, window_bounds = array<i64: 1, 32>}, {pipeline_mode = #tpu.pipeline_mode<synchronous>, transform_indices = @transform_4, window_bounds = array<i64: 2, 3, 32, 32>}, {pipeline_mode = #tpu.pipeline_mode<synchronous>, transform_indices = @transform_5, window_bounds = array<i64: 2, 3, 32, 32>}, {pipeline_mode = #tpu.pipeline_mode<synchronous>, transform_indices = @transform_6, window_bounds = array<i64: 2, 3, 1, 32>}, {pipeline_mode = #tpu.pipeline_mode<synchronous>, transform_indices = @transform_7, window_bounds = array<i64: 2, 3, 1, 32>}, {pipeline_mode = #tpu.pipeline_mode<synchronous>, transform_indices = @transform_8, window_bounds = array<i64: 32, 32>}, {pipeline_mode = #tpu.pipeline_mode<synchronous>, transform_indices = @transform_9, window_bounds = array<i64: 1, 32>}, {transform_indices = @transform_10, window_bounds = array<i64: 3, 8, 32>}, {transform_indices = @transform_11, window_bounds = array<i64: 2, 8, 32>}]} {
    %c0 = arith.constant 0 : index
    %c0_0 = arith.constant 0 : index
    %0 = vector.load %arg3[%c0, %c0_0] : memref<800x32xbf16, #tpu.memory_space<vmem>>, vector<800x32xbf16>
    %c0_1 = arith.constant 0 : index
    %c0_2 = arith.constant 0 : index
    %c0_3 = arith.constant 0 : index
    %1 = vector.load %arg1[%c0_1, %c0_2, %c0_3] : memref<3x8x800xbf16, #tpu.memory_space<vmem>>, vector<3x8x800xbf16>
    %2 = vector.shape_cast %1 : vector<3x8x800xbf16> to vector<24x800xbf16>
    %cst = arith.constant dense<0.000000e+00> : vector<24x32xf32>
    %3 = tpu.matmul %2, %0, %cst {dimension_numbers = #tpu.dot_dimension_numbers<[1], [0], [0], [1], [0, 0, 1, 1], [], []>} : vector<24x800xbf16>, vector<800x32xbf16>, vector<24x32xf32> -> vector<24x32xf32>
    %c0_4 = arith.constant 0 : index
    %c0_5 = arith.constant 0 : index
    %4 = vector.load %arg4[%c0_4, %c0_5] : memref<1x32xf32, #tpu.memory_space<vmem>>, vector<1x32xf32>
    %5 = vector.broadcast %4 : vector<1x32xf32> to vector<24x32xf32>
    %6 = arith.addf %3, %5 : vector<24x32xf32>
    %cst_6 = arith.constant 0.000000e+00 : f32
    %7 = vector.broadcast %cst_6 : f32 to vector<24x32xf32>
    %8 = arith.maximumf %6, %7 : vector<24x32xf32>
    %9 = arith.truncf %8 : vector<24x32xf32> to vector<24x32xbf16>
    %c0_7 = arith.constant 0 : index
    %c0_8 = arith.constant 0 : index
    %c0_9 = arith.constant 0 : index
    %c0_10 = arith.constant 0 : index
    %10 = vector.load %arg5[%c0_7, %c0_8, %c0_9, %c0_10] : memref<2x3x32x32xbf16, #tpu.memory_space<vmem>>, vector<1x1x32x32xbf16>
    %11 = vector.shape_cast %10 : vector<1x1x32x32xbf16> to vector<32x32xbf16>
    %c0_11 = arith.constant 0 : index
    %c1 = arith.constant 1 : index
    %c0_12 = arith.constant 0 : index
    %c0_13 = arith.constant 0 : index
    %12 = vector.load %arg5[%c0_11, %c1, %c0_12, %c0_13] : memref<2x3x32x32xbf16, #tpu.memory_space<vmem>>, vector<1x1x32x32xbf16>
    %13 = vector.shape_cast %12 : vector<1x1x32x32xbf16> to vector<32x32xbf16>
    %c0_14 = arith.constant 0 : index
    %c2 = arith.constant 2 : index
    %c0_15 = arith.constant 0 : index
    %c0_16 = arith.constant 0 : index
    %14 = vector.load %arg5[%c0_14, %c2, %c0_15, %c0_16] : memref<2x3x32x32xbf16, #tpu.memory_space<vmem>>, vector<1x1x32x32xbf16>
    %15 = vector.shape_cast %14 : vector<1x1x32x32xbf16> to vector<32x32xbf16>
    %c1_17 = arith.constant 1 : index
    %c0_18 = arith.constant 0 : index
    %c0_19 = arith.constant 0 : index
    %c0_20 = arith.constant 0 : index
    %16 = vector.load %arg5[%c1_17, %c0_18, %c0_19, %c0_20] : memref<2x3x32x32xbf16, #tpu.memory_space<vmem>>, vector<1x1x32x32xbf16>
    %17 = vector.shape_cast %16 : vector<1x1x32x32xbf16> to vector<32x32xbf16>
    %c1_21 = arith.constant 1 : index
    %c1_22 = arith.constant 1 : index
    %c0_23 = arith.constant 0 : index
    %c0_24 = arith.constant 0 : index
    %18 = vector.load %arg5[%c1_21, %c1_22, %c0_23, %c0_24] : memref<2x3x32x32xbf16, #tpu.memory_space<vmem>>, vector<1x1x32x32xbf16>
    %19 = vector.shape_cast %18 : vector<1x1x32x32xbf16> to vector<32x32xbf16>
    %c1_25 = arith.constant 1 : index
    %c2_26 = arith.constant 2 : index
    %c0_27 = arith.constant 0 : index
    %c0_28 = arith.constant 0 : index
    %20 = vector.load %arg5[%c1_25, %c2_26, %c0_27, %c0_28] : memref<2x3x32x32xbf16, #tpu.memory_space<vmem>>, vector<1x1x32x32xbf16>
    %21 = vector.shape_cast %20 : vector<1x1x32x32xbf16> to vector<32x32xbf16>
    %c0_29 = arith.constant 0 : index
    %c0_30 = arith.constant 0 : index
    %c0_31 = arith.constant 0 : index
    %c0_32 = arith.constant 0 : index
    %22 = vector.load %arg6[%c0_29, %c0_30, %c0_31, %c0_32] : memref<2x3x32x32xbf16, #tpu.memory_space<vmem>>, vector<1x1x32x32xbf16>
    %23 = vector.shape_cast %22 : vector<1x1x32x32xbf16> to vector<32x32xbf16>
    %c0_33 = arith.constant 0 : index
    %c1_34 = arith.constant 1 : index
    %c0_35 = arith.constant 0 : index
    %c0_36 = arith.constant 0 : index
    %24 = vector.load %arg6[%c0_33, %c1_34, %c0_35, %c0_36] : memref<2x3x32x32xbf16, #tpu.memory_space<vmem>>, vector<1x1x32x32xbf16>
    %25 = vector.shape_cast %24 : vector<1x1x32x32xbf16> to vector<32x32xbf16>
    %c0_37 = arith.constant 0 : index
    %c2_38 = arith.constant 2 : index
    %c0_39 = arith.constant 0 : index
    %c0_40 = arith.constant 0 : index
    %26 = vector.load %arg6[%c0_37, %c2_38, %c0_39, %c0_40] : memref<2x3x32x32xbf16, #tpu.memory_space<vmem>>, vector<1x1x32x32xbf16>
    %27 = vector.shape_cast %26 : vector<1x1x32x32xbf16> to vector<32x32xbf16>
    %c1_41 = arith.constant 1 : index
    %c0_42 = arith.constant 0 : index
    %c0_43 = arith.constant 0 : index
    %c0_44 = arith.constant 0 : index
    %28 = vector.load %arg6[%c1_41, %c0_42, %c0_43, %c0_44] : memref<2x3x32x32xbf16, #tpu.memory_space<vmem>>, vector<1x1x32x32xbf16>
    %29 = vector.shape_cast %28 : vector<1x1x32x32xbf16> to vector<32x32xbf16>
    %c1_45 = arith.constant 1 : index
    %c1_46 = arith.constant 1 : index
    %c0_47 = arith.constant 0 : index
    %c0_48 = arith.constant 0 : index
    %30 = vector.load %arg6[%c1_45, %c1_46, %c0_47, %c0_48] : memref<2x3x32x32xbf16, #tpu.memory_space<vmem>>, vector<1x1x32x32xbf16>
    %31 = vector.shape_cast %30 : vector<1x1x32x32xbf16> to vector<32x32xbf16>
    %c1_49 = arith.constant 1 : index
    %c2_50 = arith.constant 2 : index
    %c0_51 = arith.constant 0 : index
    %c0_52 = arith.constant 0 : index
    %32 = vector.load %arg6[%c1_49, %c2_50, %c0_51, %c0_52] : memref<2x3x32x32xbf16, #tpu.memory_space<vmem>>, vector<1x1x32x32xbf16>
    %33 = vector.shape_cast %32 : vector<1x1x32x32xbf16> to vector<32x32xbf16>
    %c0_53 = arith.constant 0 : index
    %c0_54 = arith.constant 0 : index
    %c0_55 = arith.constant 0 : index
    %c0_56 = arith.constant 0 : index
    %34 = vector.load %arg7[%c0_53, %c0_54, %c0_55, %c0_56] : memref<2x3x1x32xf32, #tpu.memory_space<vmem>>, vector<1x1x1x32xf32>
    %35 = vector.shape_cast %34 : vector<1x1x1x32xf32> to vector<1x32xf32>
    %c0_57 = arith.constant 0 : index
    %c1_58 = arith.constant 1 : index
    %c0_59 = arith.constant 0 : index
    %c0_60 = arith.constant 0 : index
    %36 = vector.load %arg7[%c0_57, %c1_58, %c0_59, %c0_60] : memref<2x3x1x32xf32, #tpu.memory_space<vmem>>, vector<1x1x1x32xf32>
    %37 = vector.shape_cast %36 : vector<1x1x1x32xf32> to vector<1x32xf32>
    %c0_61 = arith.constant 0 : index
    %c2_62 = arith.constant 2 : index
    %c0_63 = arith.constant 0 : index
    %c0_64 = arith.constant 0 : index
    %38 = vector.load %arg7[%c0_61, %c2_62, %c0_63, %c0_64] : memref<2x3x1x32xf32, #tpu.memory_space<vmem>>, vector<1x1x1x32xf32>
    %39 = vector.shape_cast %38 : vector<1x1x1x32xf32> to vector<1x32xf32>
    %c1_65 = arith.constant 1 : index
    %c0_66 = arith.constant 0 : index
    %c0_67 = arith.constant 0 : index
    %c0_68 = arith.constant 0 : index
    %40 = vector.load %arg7[%c1_65, %c0_66, %c0_67, %c0_68] : memref<2x3x1x32xf32, #tpu.memory_space<vmem>>, vector<1x1x1x32xf32>
    %41 = vector.shape_cast %40 : vector<1x1x1x32xf32> to vector<1x32xf32>
    %c1_69 = arith.constant 1 : index
    %c1_70 = arith.constant 1 : index
    %c0_71 = arith.constant 0 : index
    %c0_72 = arith.constant 0 : index
    %42 = vector.load %arg7[%c1_69, %c1_70, %c0_71, %c0_72] : memref<2x3x1x32xf32, #tpu.memory_space<vmem>>, vector<1x1x1x32xf32>
    %43 = vector.shape_cast %42 : vector<1x1x1x32xf32> to vector<1x32xf32>
    %c1_73 = arith.constant 1 : index
    %c2_74 = arith.constant 2 : index
    %c0_75 = arith.constant 0 : index
    %c0_76 = arith.constant 0 : index
    %44 = vector.load %arg7[%c1_73, %c2_74, %c0_75, %c0_76] : memref<2x3x1x32xf32, #tpu.memory_space<vmem>>, vector<1x1x1x32xf32>
    %45 = vector.shape_cast %44 : vector<1x1x1x32xf32> to vector<1x32xf32>
    %c0_77 = arith.constant 0 : index
    %c0_78 = arith.constant 0 : index
    %c0_79 = arith.constant 0 : index
    %c0_80 = arith.constant 0 : index
    %46 = vector.load %arg8[%c0_77, %c0_78, %c0_79, %c0_80] : memref<2x3x1x32xf32, #tpu.memory_space<vmem>>, vector<1x1x1x32xf32>
    %47 = vector.shape_cast %46 : vector<1x1x1x32xf32> to vector<1x32xf32>
    %c0_81 = arith.constant 0 : index
    %c1_82 = arith.constant 1 : index
    %c0_83 = arith.constant 0 : index
    %c0_84 = arith.constant 0 : index
    %48 = vector.load %arg8[%c0_81, %c1_82, %c0_83, %c0_84] : memref<2x3x1x32xf32, #tpu.memory_space<vmem>>, vector<1x1x1x32xf32>
    %49 = vector.shape_cast %48 : vector<1x1x1x32xf32> to vector<1x32xf32>
    %c0_85 = arith.constant 0 : index
    %c2_86 = arith.constant 2 : index
    %c0_87 = arith.constant 0 : index
    %c0_88 = arith.constant 0 : index
    %50 = vector.load %arg8[%c0_85, %c2_86, %c0_87, %c0_88] : memref<2x3x1x32xf32, #tpu.memory_space<vmem>>, vector<1x1x1x32xf32>
    %51 = vector.shape_cast %50 : vector<1x1x1x32xf32> to vector<1x32xf32>
    %c1_89 = arith.constant 1 : index
    %c0_90 = arith.constant 0 : index
    %c0_91 = arith.constant 0 : index
    %c0_92 = arith.constant 0 : index
    %52 = vector.load %arg8[%c1_89, %c0_90, %c0_91, %c0_92] : memref<2x3x1x32xf32, #tpu.memory_space<vmem>>, vector<1x1x1x32xf32>
    %53 = vector.shape_cast %52 : vector<1x1x1x32xf32> to vector<1x32xf32>
    %c1_93 = arith.constant 1 : index
    %c1_94 = arith.constant 1 : index
    %c0_95 = arith.constant 0 : index
    %c0_96 = arith.constant 0 : index
    %54 = vector.load %arg8[%c1_93, %c1_94, %c0_95, %c0_96] : memref<2x3x1x32xf32, #tpu.memory_space<vmem>>, vector<1x1x1x32xf32>
    %55 = vector.shape_cast %54 : vector<1x1x1x32xf32> to vector<1x32xf32>
    %c1_97 = arith.constant 1 : index
    %c2_98 = arith.constant 2 : index
    %c0_99 = arith.constant 0 : index
    %c0_100 = arith.constant 0 : index
    %56 = vector.load %arg8[%c1_97, %c2_98, %c0_99, %c0_100] : memref<2x3x1x32xf32, #tpu.memory_space<vmem>>, vector<1x1x1x32xf32>
    %57 = vector.shape_cast %56 : vector<1x1x1x32xf32> to vector<1x32xf32>
    %c0_101 = arith.constant 0 : index
    %c0_102 = arith.constant 0 : index
    %58 = vector.load %arg9[%c0_101, %c0_102] : memref<32x32xbf16, #tpu.memory_space<vmem>>, vector<32x32xbf16>
    %c0_103 = arith.constant 0 : index
    %c0_104 = arith.constant 0 : index
    %59 = vector.load %arg10[%c0_103, %c0_104] : memref<1x32xf32, #tpu.memory_space<vmem>>, vector<1x32xf32>
    %cst_105 = arith.constant dense<0.000000e+00> : vector<24x32xf32>
    %60 = tpu.matmul %9, %11, %cst_105 {dimension_numbers = #tpu.dot_dimension_numbers<[1], [0], [0], [1], [0, 0, 1, 1], [], []>} : vector<24x32xbf16>, vector<32x32xbf16>, vector<24x32xf32> -> vector<24x32xf32>
    %61 = vector.broadcast %35 : vector<1x32xf32> to vector<24x32xf32>
    %62 = arith.addf %60, %61 : vector<24x32xf32>
    %cst_106 = arith.constant dense<0.000000e+00> : vector<24x32xf32>
    %63 = tpu.matmul %9, %13, %cst_106 {dimension_numbers = #tpu.dot_dimension_numbers<[1], [0], [0], [1], [0, 0, 1, 1], [], []>} : vector<24x32xbf16>, vector<32x32xbf16>, vector<24x32xf32> -> vector<24x32xf32>
    %64 = vector.broadcast %37 : vector<1x32xf32> to vector<24x32xf32>
    %65 = arith.addf %63, %64 : vector<24x32xf32>
    %cst_107 = arith.constant dense<0.000000e+00> : vector<24x32xf32>
    %66 = tpu.matmul %9, %15, %cst_107 {dimension_numbers = #tpu.dot_dimension_numbers<[1], [0], [0], [1], [0, 0, 1, 1], [], []>} : vector<24x32xbf16>, vector<32x32xbf16>, vector<24x32xf32> -> vector<24x32xf32>
    %67 = vector.broadcast %39 : vector<1x32xf32> to vector<24x32xf32>
    %68 = arith.addf %66, %67 : vector<24x32xf32>
    %c0_108 = arith.constant 0 : index
    %c0_109 = arith.constant 0 : index
    %c0_110 = arith.constant 0 : index
    %69 = vector.load %arg2[%c0_108, %c0_109, %c0_110] : memref<2x8x32xf32, #tpu.memory_space<vmem>>, vector<1x8x32xf32>
    %70 = vector.shape_cast %69 : vector<1x8x32xf32> to vector<8x32xf32>
    %c1_111 = arith.constant 1 : index
    %c0_112 = arith.constant 0 : index
    %c0_113 = arith.constant 0 : index
    %71 = vector.load %arg2[%c1_111, %c0_112, %c0_113] : memref<2x8x32xf32, #tpu.memory_space<vmem>>, vector<1x8x32xf32>
    %72 = vector.shape_cast %71 : vector<1x8x32xf32> to vector<8x32xf32>
    %73 = arith.truncf %70 : vector<8x32xf32> to vector<8x32xbf16>
    %74 = vector.extract_strided_slice %62 {offsets = [0, 0], sizes = [8, 32], strides = [1, 1]} : vector<24x32xf32> to vector<8x32xf32>
    %cst_114 = arith.constant dense<0.000000e+00> : vector<8x32xf32>
    %75 = tpu.matmul %73, %23, %cst_114 {dimension_numbers = #tpu.dot_dimension_numbers<[1], [0], [0], [1], [0, 0, 1, 1], [], []>} : vector<8x32xbf16>, vector<32x32xbf16>, vector<8x32xf32> -> vector<8x32xf32>
    %76 = vector.broadcast %47 : vector<1x32xf32> to vector<8x32xf32>
    %77 = arith.addf %75, %76 : vector<8x32xf32>
    %78 = arith.addf %74, %77 : vector<8x32xf32>
    %79 = arith.negf %78 : vector<8x32xf32>
    %80 = math.exp %79 : vector<8x32xf32>
    %cst_115 = arith.constant 1.000000e+00 : f32
    %81 = vector.broadcast %cst_115 : f32 to vector<8x32xf32>
    %82 = arith.addf %81, %80 : vector<8x32xf32>
    %83 = arith.divf %81, %82 : vector<8x32xf32>
    %84 = vector.extract_strided_slice %65 {offsets = [0, 0], sizes = [8, 32], strides = [1, 1]} : vector<24x32xf32> to vector<8x32xf32>
    %cst_116 = arith.constant dense<0.000000e+00> : vector<8x32xf32>
    %85 = tpu.matmul %73, %25, %cst_116 {dimension_numbers = #tpu.dot_dimension_numbers<[1], [0], [0], [1], [0, 0, 1, 1], [], []>} : vector<8x32xbf16>, vector<32x32xbf16>, vector<8x32xf32> -> vector<8x32xf32>
    %86 = vector.broadcast %49 : vector<1x32xf32> to vector<8x32xf32>
    %87 = arith.addf %85, %86 : vector<8x32xf32>
    %88 = arith.addf %84, %87 : vector<8x32xf32>
    %89 = arith.negf %88 : vector<8x32xf32>
    %90 = math.exp %89 : vector<8x32xf32>
    %cst_117 = arith.constant 1.000000e+00 : f32
    %91 = vector.broadcast %cst_117 : f32 to vector<8x32xf32>
    %92 = arith.addf %91, %90 : vector<8x32xf32>
    %93 = arith.divf %91, %92 : vector<8x32xf32>
    %94 = vector.extract_strided_slice %68 {offsets = [0, 0], sizes = [8, 32], strides = [1, 1]} : vector<24x32xf32> to vector<8x32xf32>
    %cst_118 = arith.constant dense<0.000000e+00> : vector<8x32xf32>
    %95 = tpu.matmul %73, %27, %cst_118 {dimension_numbers = #tpu.dot_dimension_numbers<[1], [0], [0], [1], [0, 0, 1, 1], [], []>} : vector<8x32xbf16>, vector<32x32xbf16>, vector<8x32xf32> -> vector<8x32xf32>
    %96 = vector.broadcast %51 : vector<1x32xf32> to vector<8x32xf32>
    %97 = arith.addf %95, %96 : vector<8x32xf32>
    %98 = arith.mulf %83, %97 : vector<8x32xf32>
    %99 = arith.addf %94, %98 : vector<8x32xf32>
    %100 = math.tanh %99 : vector<8x32xf32>
    %cst_119 = arith.constant 1.000000e+00 : f32
    %101 = vector.broadcast %cst_119 : f32 to vector<8x32xf32>
    %102 = arith.subf %101, %93 : vector<8x32xf32>
    %103 = arith.mulf %102, %100 : vector<8x32xf32>
    %104 = arith.mulf %93, %70 : vector<8x32xf32>
    %105 = arith.addf %103, %104 : vector<8x32xf32>
    %106 = arith.truncf %105 : vector<8x32xf32> to vector<8x32xbf16>
    %107 = arith.truncf %72 : vector<8x32xf32> to vector<8x32xbf16>
    %cst_120 = arith.constant dense<0.000000e+00> : vector<8x32xf32>
    %108 = tpu.matmul %106, %17, %cst_120 {dimension_numbers = #tpu.dot_dimension_numbers<[1], [0], [0], [1], [0, 0, 1, 1], [], []>} : vector<8x32xbf16>, vector<32x32xbf16>, vector<8x32xf32> -> vector<8x32xf32>
    %109 = vector.broadcast %41 : vector<1x32xf32> to vector<8x32xf32>
    %110 = arith.addf %108, %109 : vector<8x32xf32>
    %cst_121 = arith.constant dense<0.000000e+00> : vector<8x32xf32>
    %111 = tpu.matmul %107, %29, %cst_121 {dimension_numbers = #tpu.dot_dimension_numbers<[1], [0], [0], [1], [0, 0, 1, 1], [], []>} : vector<8x32xbf16>, vector<32x32xbf16>, vector<8x32xf32> -> vector<8x32xf32>
    %112 = vector.broadcast %53 : vector<1x32xf32> to vector<8x32xf32>
    %113 = arith.addf %111, %112 : vector<8x32xf32>
    %114 = arith.addf %110, %113 : vector<8x32xf32>
    %115 = arith.negf %114 : vector<8x32xf32>
    %116 = math.exp %115 : vector<8x32xf32>
    %cst_122 = arith.constant 1.000000e+00 : f32
    %117 = vector.broadcast %cst_122 : f32 to vector<8x32xf32>
    %118 = arith.addf %117, %116 : vector<8x32xf32>
    %119 = arith.divf %117, %118 : vector<8x32xf32>
    %cst_123 = arith.constant dense<0.000000e+00> : vector<8x32xf32>
    %120 = tpu.matmul %106, %19, %cst_123 {dimension_numbers = #tpu.dot_dimension_numbers<[1], [0], [0], [1], [0, 0, 1, 1], [], []>} : vector<8x32xbf16>, vector<32x32xbf16>, vector<8x32xf32> -> vector<8x32xf32>
    %121 = vector.broadcast %43 : vector<1x32xf32> to vector<8x32xf32>
    %122 = arith.addf %120, %121 : vector<8x32xf32>
    %cst_124 = arith.constant dense<0.000000e+00> : vector<8x32xf32>
    %123 = tpu.matmul %107, %31, %cst_124 {dimension_numbers = #tpu.dot_dimension_numbers<[1], [0], [0], [1], [0, 0, 1, 1], [], []>} : vector<8x32xbf16>, vector<32x32xbf16>, vector<8x32xf32> -> vector<8x32xf32>
    %124 = vector.broadcast %55 : vector<1x32xf32> to vector<8x32xf32>
    %125 = arith.addf %123, %124 : vector<8x32xf32>
    %126 = arith.addf %122, %125 : vector<8x32xf32>
    %127 = arith.negf %126 : vector<8x32xf32>
    %128 = math.exp %127 : vector<8x32xf32>
    %cst_125 = arith.constant 1.000000e+00 : f32
    %129 = vector.broadcast %cst_125 : f32 to vector<8x32xf32>
    %130 = arith.addf %129, %128 : vector<8x32xf32>
    %131 = arith.divf %129, %130 : vector<8x32xf32>
    %cst_126 = arith.constant dense<0.000000e+00> : vector<8x32xf32>
    %132 = tpu.matmul %106, %21, %cst_126 {dimension_numbers = #tpu.dot_dimension_numbers<[1], [0], [0], [1], [0, 0, 1, 1], [], []>} : vector<8x32xbf16>, vector<32x32xbf16>, vector<8x32xf32> -> vector<8x32xf32>
    %133 = vector.broadcast %45 : vector<1x32xf32> to vector<8x32xf32>
    %134 = arith.addf %132, %133 : vector<8x32xf32>
    %cst_127 = arith.constant dense<0.000000e+00> : vector<8x32xf32>
    %135 = tpu.matmul %107, %33, %cst_127 {dimension_numbers = #tpu.dot_dimension_numbers<[1], [0], [0], [1], [0, 0, 1, 1], [], []>} : vector<8x32xbf16>, vector<32x32xbf16>, vector<8x32xf32> -> vector<8x32xf32>
    %136 = vector.broadcast %57 : vector<1x32xf32> to vector<8x32xf32>
    %137 = arith.addf %135, %136 : vector<8x32xf32>
    %138 = arith.mulf %119, %137 : vector<8x32xf32>
    %139 = arith.addf %134, %138 : vector<8x32xf32>
    %140 = math.tanh %139 : vector<8x32xf32>
    %cst_128 = arith.constant 1.000000e+00 : f32
    %141 = vector.broadcast %cst_128 : f32 to vector<8x32xf32>
    %142 = arith.subf %141, %131 : vector<8x32xf32>
    %143 = arith.mulf %142, %140 : vector<8x32xf32>
    %144 = arith.mulf %131, %72 : vector<8x32xf32>
    %145 = arith.addf %143, %144 : vector<8x32xf32>
    %146 = arith.truncf %145 : vector<8x32xf32> to vector<8x32xbf16>
    %cst_129 = arith.constant dense<0.000000e+00> : vector<8x32xf32>
    %147 = tpu.matmul %146, %58, %cst_129 {dimension_numbers = #tpu.dot_dimension_numbers<[1], [0], [0], [1], [0, 0, 1, 1], [], []>} : vector<8x32xbf16>, vector<32x32xbf16>, vector<8x32xf32> -> vector<8x32xf32>
    %148 = vector.broadcast %59 : vector<1x32xf32> to vector<8x32xf32>
    %149 = arith.addf %147, %148 : vector<8x32xf32>
    %cst_130 = arith.constant 0.000000e+00 : f32
    %150 = vector.broadcast %cst_130 : f32 to vector<8x32xf32>
    %151 = arith.maximumf %149, %150 : vector<8x32xf32>
    %c0_131 = arith.constant 0 : index
    %c0_132 = arith.constant 0 : index
    %c0_133 = arith.constant 0 : index
    %152 = vector.load %arg11[%c0_131, %c0_132, %c0_133] : memref<3x8x32xf32, #tpu.memory_space<vmem>>, vector<1x8x32xf32>
    %153 = vector.shape_cast %152 : vector<1x8x32xf32> to vector<8x32xf32>
    %154 = vector.shape_cast %151 : vector<8x32xf32> to vector<1x8x32xf32>
    tpu.vector_store %arg11[%c0_131, %c0_132, %c0_133], %154 {strides = array<i32>} : memref<3x8x32xf32, #tpu.memory_space<vmem>>, vector<1x8x32xf32>,
    %155 = arith.truncf %105 : vector<8x32xf32> to vector<8x32xbf16>
    %156 = vector.extract_strided_slice %62 {offsets = [8, 0], sizes = [8, 32], strides = [1, 1]} : vector<24x32xf32> to vector<8x32xf32>
    %cst_134 = arith.constant dense<0.000000e+00> : vector<8x32xf32>
    %157 = tpu.matmul %155, %23, %cst_134 {dimension_numbers = #tpu.dot_dimension_numbers<[1], [0], [0], [1], [0, 0, 1, 1], [], []>} : vector<8x32xbf16>, vector<32x32xbf16>, vector<8x32xf32> -> vector<8x32xf32>
    %158 = vector.broadcast %47 : vector<1x32xf32> to vector<8x32xf32>
    %159 = arith.addf %157, %158 : vector<8x32xf32>
    %160 = arith.addf %156, %159 : vector<8x32xf32>
    %161 = arith.negf %160 : vector<8x32xf32>
    %162 = math.exp %161 : vector<8x32xf32>
    %cst_135 = arith.constant 1.000000e+00 : f32
    %163 = vector.broadcast %cst_135 : f32 to vector<8x32xf32>
    %164 = arith.addf %163, %162 : vector<8x32xf32>
    %165 = arith.divf %163, %164 : vector<8x32xf32>
    %166 = vector.extract_strided_slice %65 {offsets = [8, 0], sizes = [8, 32], strides = [1, 1]} : vector<24x32xf32> to vector<8x32xf32>
    %cst_136 = arith.constant dense<0.000000e+00> : vector<8x32xf32>
    %167 = tpu.matmul %155, %25, %cst_136 {dimension_numbers = #tpu.dot_dimension_numbers<[1], [0], [0], [1], [0, 0, 1, 1], [], []>} : vector<8x32xbf16>, vector<32x32xbf16>, vector<8x32xf32> -> vector<8x32xf32>
    %168 = vector.broadcast %49 : vector<1x32xf32> to vector<8x32xf32>
    %169 = arith.addf %167, %168 : vector<8x32xf32>
    %170 = arith.addf %166, %169 : vector<8x32xf32>
    %171 = arith.negf %170 : vector<8x32xf32>
    %172 = math.exp %171 : vector<8x32xf32>
    %cst_137 = arith.constant 1.000000e+00 : f32
    %173 = vector.broadcast %cst_137 : f32 to vector<8x32xf32>
    %174 = arith.addf %173, %172 : vector<8x32xf32>
    %175 = arith.divf %173, %174 : vector<8x32xf32>
    %176 = vector.extract_strided_slice %68 {offsets = [8, 0], sizes = [8, 32], strides = [1, 1]} : vector<24x32xf32> to vector<8x32xf32>
    %cst_138 = arith.constant dense<0.000000e+00> : vector<8x32xf32>
    %177 = tpu.matmul %155, %27, %cst_138 {dimension_numbers = #tpu.dot_dimension_numbers<[1], [0], [0], [1], [0, 0, 1, 1], [], []>} : vector<8x32xbf16>, vector<32x32xbf16>, vector<8x32xf32> -> vector<8x32xf32>
    %178 = vector.broadcast %51 : vector<1x32xf32> to vector<8x32xf32>
    %179 = arith.addf %177, %178 : vector<8x32xf32>
    %180 = arith.mulf %165, %179 : vector<8x32xf32>
    %181 = arith.addf %176, %180 : vector<8x32xf32>
    %182 = math.tanh %181 : vector<8x32xf32>
    %cst_139 = arith.constant 1.000000e+00 : f32
    %183 = vector.broadcast %cst_139 : f32 to vector<8x32xf32>
    %184 = arith.subf %183, %175 : vector<8x32xf32>
    %185 = arith.mulf %184, %182 : vector<8x32xf32>
    %186 = arith.mulf %175, %105 : vector<8x32xf32>
    %187 = arith.addf %185, %186 : vector<8x32xf32>
    %188 = arith.truncf %187 : vector<8x32xf32> to vector<8x32xbf16>
    %189 = arith.truncf %145 : vector<8x32xf32> to vector<8x32xbf16>
    %cst_140 = arith.constant dense<0.000000e+00> : vector<8x32xf32>
    %190 = tpu.matmul %188, %17, %cst_140 {dimension_numbers = #tpu.dot_dimension_numbers<[1], [0], [0], [1], [0, 0, 1, 1], [], []>} : vector<8x32xbf16>, vector<32x32xbf16>, vector<8x32xf32> -> vector<8x32xf32>
    %191 = vector.broadcast %41 : vector<1x32xf32> to vector<8x32xf32>
    %192 = arith.addf %190, %191 : vector<8x32xf32>
    %cst_141 = arith.constant dense<0.000000e+00> : vector<8x32xf32>
    %193 = tpu.matmul %189, %29, %cst_141 {dimension_numbers = #tpu.dot_dimension_numbers<[1], [0], [0], [1], [0, 0, 1, 1], [], []>} : vector<8x32xbf16>, vector<32x32xbf16>, vector<8x32xf32> -> vector<8x32xf32>
    %194 = vector.broadcast %53 : vector<1x32xf32> to vector<8x32xf32>
    %195 = arith.addf %193, %194 : vector<8x32xf32>
    %196 = arith.addf %192, %195 : vector<8x32xf32>
    %197 = arith.negf %196 : vector<8x32xf32>
    %198 = math.exp %197 : vector<8x32xf32>
    %cst_142 = arith.constant 1.000000e+00 : f32
    %199 = vector.broadcast %cst_142 : f32 to vector<8x32xf32>
    %200 = arith.addf %199, %198 : vector<8x32xf32>
    %201 = arith.divf %199, %200 : vector<8x32xf32>
    %cst_143 = arith.constant dense<0.000000e+00> : vector<8x32xf32>
    %202 = tpu.matmul %188, %19, %cst_143 {dimension_numbers = #tpu.dot_dimension_numbers<[1], [0], [0], [1], [0, 0, 1, 1], [], []>} : vector<8x32xbf16>, vector<32x32xbf16>, vector<8x32xf32> -> vector<8x32xf32>
    %203 = vector.broadcast %43 : vector<1x32xf32> to vector<8x32xf32>
    %204 = arith.addf %202, %203 : vector<8x32xf32>
    %cst_144 = arith.constant dense<0.000000e+00> : vector<8x32xf32>
    %205 = tpu.matmul %189, %31, %cst_144 {dimension_numbers = #tpu.dot_dimension_numbers<[1], [0], [0], [1], [0, 0, 1, 1], [], []>} : vector<8x32xbf16>, vector<32x32xbf16>, vector<8x32xf32> -> vector<8x32xf32>
    %206 = vector.broadcast %55 : vector<1x32xf32> to vector<8x32xf32>
    %207 = arith.addf %205, %206 : vector<8x32xf32>
    %208 = arith.addf %204, %207 : vector<8x32xf32>
    %209 = arith.negf %208 : vector<8x32xf32>
    %210 = math.exp %209 : vector<8x32xf32>
    %cst_145 = arith.constant 1.000000e+00 : f32
    %211 = vector.broadcast %cst_145 : f32 to vector<8x32xf32>
    %212 = arith.addf %211, %210 : vector<8x32xf32>
    %213 = arith.divf %211, %212 : vector<8x32xf32>
    %cst_146 = arith.constant dense<0.000000e+00> : vector<8x32xf32>
    %214 = tpu.matmul %188, %21, %cst_146 {dimension_numbers = #tpu.dot_dimension_numbers<[1], [0], [0], [1], [0, 0, 1, 1], [], []>} : vector<8x32xbf16>, vector<32x32xbf16>, vector<8x32xf32> -> vector<8x32xf32>
    %215 = vector.broadcast %45 : vector<1x32xf32> to vector<8x32xf32>
    %216 = arith.addf %214, %215 : vector<8x32xf32>
    %cst_147 = arith.constant dense<0.000000e+00> : vector<8x32xf32>
    %217 = tpu.matmul %189, %33, %cst_147 {dimension_numbers = #tpu.dot_dimension_numbers<[1], [0], [0], [1], [0, 0, 1, 1], [], []>} : vector<8x32xbf16>, vector<32x32xbf16>, vector<8x32xf32> -> vector<8x32xf32>
    %218 = vector.broadcast %57 : vector<1x32xf32> to vector<8x32xf32>
    %219 = arith.addf %217, %218 : vector<8x32xf32>
    %220 = arith.mulf %201, %219 : vector<8x32xf32>
    %221 = arith.addf %216, %220 : vector<8x32xf32>
    %222 = math.tanh %221 : vector<8x32xf32>
    %cst_148 = arith.constant 1.000000e+00 : f32
    %223 = vector.broadcast %cst_148 : f32 to vector<8x32xf32>
    %224 = arith.subf %223, %213 : vector<8x32xf32>
    %225 = arith.mulf %224, %222 : vector<8x32xf32>
    %226 = arith.mulf %213, %145 : vector<8x32xf32>
    %227 = arith.addf %225, %226 : vector<8x32xf32>
    %228 = arith.truncf %227 : vector<8x32xf32> to vector<8x32xbf16>
    %cst_149 = arith.constant dense<0.000000e+00> : vector<8x32xf32>
    %229 = tpu.matmul %228, %58, %cst_149 {dimension_numbers = #tpu.dot_dimension_numbers<[1], [0], [0], [1], [0, 0, 1, 1], [], []>} : vector<8x32xbf16>, vector<32x32xbf16>, vector<8x32xf32> -> vector<8x32xf32>
    %230 = vector.broadcast %59 : vector<1x32xf32> to vector<8x32xf32>
    %231 = arith.addf %229, %230 : vector<8x32xf32>
    %cst_150 = arith.constant 0.000000e+00 : f32
    %232 = vector.broadcast %cst_150 : f32 to vector<8x32xf32>
    %233 = arith.maximumf %231, %232 : vector<8x32xf32>
    %c1_151 = arith.constant 1 : index
    %c0_152 = arith.constant 0 : index
    %c0_153 = arith.constant 0 : index
    %234 = vector.load %arg11[%c1_151, %c0_152, %c0_153] : memref<3x8x32xf32, #tpu.memory_space<vmem>>, vector<1x8x32xf32>
    %235 = vector.shape_cast %234 : vector<1x8x32xf32> to vector<8x32xf32>
    %236 = vector.shape_cast %233 : vector<8x32xf32> to vector<1x8x32xf32>
    tpu.vector_store %arg11[%c1_151, %c0_152, %c0_153], %236 {strides = array<i32>} : memref<3x8x32xf32, #tpu.memory_space<vmem>>, vector<1x8x32xf32>,
    %237 = arith.truncf %187 : vector<8x32xf32> to vector<8x32xbf16>
    %238 = vector.extract_strided_slice %62 {offsets = [16, 0], sizes = [8, 32], strides = [1, 1]} : vector<24x32xf32> to vector<8x32xf32>
    %cst_154 = arith.constant dense<0.000000e+00> : vector<8x32xf32>
    %239 = tpu.matmul %237, %23, %cst_154 {dimension_numbers = #tpu.dot_dimension_numbers<[1], [0], [0], [1], [0, 0, 1, 1], [], []>} : vector<8x32xbf16>, vector<32x32xbf16>, vector<8x32xf32> -> vector<8x32xf32>
    %240 = vector.broadcast %47 : vector<1x32xf32> to vector<8x32xf32>
    %241 = arith.addf %239, %240 : vector<8x32xf32>
    %242 = arith.addf %238, %241 : vector<8x32xf32>
    %243 = arith.negf %242 : vector<8x32xf32>
    %244 = math.exp %243 : vector<8x32xf32>
    %cst_155 = arith.constant 1.000000e+00 : f32
    %245 = vector.broadcast %cst_155 : f32 to vector<8x32xf32>
    %246 = arith.addf %245, %244 : vector<8x32xf32>
    %247 = arith.divf %245, %246 : vector<8x32xf32>
    %248 = vector.extract_strided_slice %65 {offsets = [16, 0], sizes = [8, 32], strides = [1, 1]} : vector<24x32xf32> to vector<8x32xf32>
    %cst_156 = arith.constant dense<0.000000e+00> : vector<8x32xf32>
    %249 = tpu.matmul %237, %25, %cst_156 {dimension_numbers = #tpu.dot_dimension_numbers<[1], [0], [0], [1], [0, 0, 1, 1], [], []>} : vector<8x32xbf16>, vector<32x32xbf16>, vector<8x32xf32> -> vector<8x32xf32>
    %250 = vector.broadcast %49 : vector<1x32xf32> to vector<8x32xf32>
    %251 = arith.addf %249, %250 : vector<8x32xf32>
    %252 = arith.addf %248, %251 : vector<8x32xf32>
    %253 = arith.negf %252 : vector<8x32xf32>
    %254 = math.exp %253 : vector<8x32xf32>
    %cst_157 = arith.constant 1.000000e+00 : f32
    %255 = vector.broadcast %cst_157 : f32 to vector<8x32xf32>
    %256 = arith.addf %255, %254 : vector<8x32xf32>
    %257 = arith.divf %255, %256 : vector<8x32xf32>
    %258 = vector.extract_strided_slice %68 {offsets = [16, 0], sizes = [8, 32], strides = [1, 1]} : vector<24x32xf32> to vector<8x32xf32>
    %cst_158 = arith.constant dense<0.000000e+00> : vector<8x32xf32>
    %259 = tpu.matmul %237, %27, %cst_158 {dimension_numbers = #tpu.dot_dimension_numbers<[1], [0], [0], [1], [0, 0, 1, 1], [], []>} : vector<8x32xbf16>, vector<32x32xbf16>, vector<8x32xf32> -> vector<8x32xf32>
    %260 = vector.broadcast %51 : vector<1x32xf32> to vector<8x32xf32>
    %261 = arith.addf %259, %260 : vector<8x32xf32>
    %262 = arith.mulf %247, %261 : vector<8x32xf32>
    %263 = arith.addf %258, %262 : vector<8x32xf32>
    %264 = math.tanh %263 : vector<8x32xf32>
    %cst_159 = arith.constant 1.000000e+00 : f32
    %265 = vector.broadcast %cst_159 : f32 to vector<8x32xf32>
    %266 = arith.subf %265, %257 : vector<8x32xf32>
    %267 = arith.mulf %266, %264 : vector<8x32xf32>
    %268 = arith.mulf %257, %187 : vector<8x32xf32>
    %269 = arith.addf %267, %268 : vector<8x32xf32>
    %270 = arith.truncf %269 : vector<8x32xf32> to vector<8x32xbf16>
    %271 = arith.truncf %227 : vector<8x32xf32> to vector<8x32xbf16>
    %cst_160 = arith.constant dense<0.000000e+00> : vector<8x32xf32>
    %272 = tpu.matmul %270, %17, %cst_160 {dimension_numbers = #tpu.dot_dimension_numbers<[1], [0], [0], [1], [0, 0, 1, 1], [], []>} : vector<8x32xbf16>, vector<32x32xbf16>, vector<8x32xf32> -> vector<8x32xf32>
    %273 = vector.broadcast %41 : vector<1x32xf32> to vector<8x32xf32>
    %274 = arith.addf %272, %273 : vector<8x32xf32>
    %cst_161 = arith.constant dense<0.000000e+00> : vector<8x32xf32>
    %275 = tpu.matmul %271, %29, %cst_161 {dimension_numbers = #tpu.dot_dimension_numbers<[1], [0], [0], [1], [0, 0, 1, 1], [], []>} : vector<8x32xbf16>, vector<32x32xbf16>, vector<8x32xf32> -> vector<8x32xf32>
    %276 = vector.broadcast %53 : vector<1x32xf32> to vector<8x32xf32>
    %277 = arith.addf %275, %276 : vector<8x32xf32>
    %278 = arith.addf %274, %277 : vector<8x32xf32>
    %279 = arith.negf %278 : vector<8x32xf32>
    %280 = math.exp %279 : vector<8x32xf32>
    %cst_162 = arith.constant 1.000000e+00 : f32
    %281 = vector.broadcast %cst_162 : f32 to vector<8x32xf32>
    %282 = arith.addf %281, %280 : vector<8x32xf32>
    %283 = arith.divf %281, %282 : vector<8x32xf32>
    %cst_163 = arith.constant dense<0.000000e+00> : vector<8x32xf32>
    %284 = tpu.matmul %270, %19, %cst_163 {dimension_numbers = #tpu.dot_dimension_numbers<[1], [0], [0], [1], [0, 0, 1, 1], [], []>} : vector<8x32xbf16>, vector<32x32xbf16>, vector<8x32xf32> -> vector<8x32xf32>
    %285 = vector.broadcast %43 : vector<1x32xf32> to vector<8x32xf32>
    %286 = arith.addf %284, %285 : vector<8x32xf32>
    %cst_164 = arith.constant dense<0.000000e+00> : vector<8x32xf32>
    %287 = tpu.matmul %271, %31, %cst_164 {dimension_numbers = #tpu.dot_dimension_numbers<[1], [0], [0], [1], [0, 0, 1, 1], [], []>} : vector<8x32xbf16>, vector<32x32xbf16>, vector<8x32xf32> -> vector<8x32xf32>
    %288 = vector.broadcast %55 : vector<1x32xf32> to vector<8x32xf32>
    %289 = arith.addf %287, %288 : vector<8x32xf32>
    %290 = arith.addf %286, %289 : vector<8x32xf32>
    %291 = arith.negf %290 : vector<8x32xf32>
    %292 = math.exp %291 : vector<8x32xf32>
    %cst_165 = arith.constant 1.000000e+00 : f32
    %293 = vector.broadcast %cst_165 : f32 to vector<8x32xf32>
    %294 = arith.addf %293, %292 : vector<8x32xf32>
    %295 = arith.divf %293, %294 : vector<8x32xf32>
    %cst_166 = arith.constant dense<0.000000e+00> : vector<8x32xf32>
    %296 = tpu.matmul %270, %21, %cst_166 {dimension_numbers = #tpu.dot_dimension_numbers<[1], [0], [0], [1], [0, 0, 1, 1], [], []>} : vector<8x32xbf16>, vector<32x32xbf16>, vector<8x32xf32> -> vector<8x32xf32>
    %297 = vector.broadcast %45 : vector<1x32xf32> to vector<8x32xf32>
    %298 = arith.addf %296, %297 : vector<8x32xf32>
    %cst_167 = arith.constant dense<0.000000e+00> : vector<8x32xf32>
    %299 = tpu.matmul %271, %33, %cst_167 {dimension_numbers = #tpu.dot_dimension_numbers<[1], [0], [0], [1], [0, 0, 1, 1], [], []>} : vector<8x32xbf16>, vector<32x32xbf16>, vector<8x32xf32> -> vector<8x32xf32>
    %300 = vector.broadcast %57 : vector<1x32xf32> to vector<8x32xf32>
    %301 = arith.addf %299, %300 : vector<8x32xf32>
    %302 = arith.mulf %283, %301 : vector<8x32xf32>
    %303 = arith.addf %298, %302 : vector<8x32xf32>
    %304 = math.tanh %303 : vector<8x32xf32>
    %cst_168 = arith.constant 1.000000e+00 : f32
    %305 = vector.broadcast %cst_168 : f32 to vector<8x32xf32>
    %306 = arith.subf %305, %295 : vector<8x32xf32>
    %307 = arith.mulf %306, %304 : vector<8x32xf32>
    %308 = arith.mulf %295, %227 : vector<8x32xf32>
    %309 = arith.addf %307, %308 : vector<8x32xf32>
    %310 = arith.truncf %309 : vector<8x32xf32> to vector<8x32xbf16>
    %cst_169 = arith.constant dense<0.000000e+00> : vector<8x32xf32>
    %311 = tpu.matmul %310, %58, %cst_169 {dimension_numbers = #tpu.dot_dimension_numbers<[1], [0], [0], [1], [0, 0, 1, 1], [], []>} : vector<8x32xbf16>, vector<32x32xbf16>, vector<8x32xf32> -> vector<8x32xf32>
    %312 = vector.broadcast %59 : vector<1x32xf32> to vector<8x32xf32>
    %313 = arith.addf %311, %312 : vector<8x32xf32>
    %cst_170 = arith.constant 0.000000e+00 : f32
    %314 = vector.broadcast %cst_170 : f32 to vector<8x32xf32>
    %315 = arith.maximumf %313, %314 : vector<8x32xf32>
    %c2_171 = arith.constant 2 : index
    %c0_172 = arith.constant 0 : index
    %c0_173 = arith.constant 0 : index
    %316 = vector.load %arg11[%c2_171, %c0_172, %c0_173] : memref<3x8x32xf32, #tpu.memory_space<vmem>>, vector<1x8x32xf32>
    %317 = vector.shape_cast %316 : vector<1x8x32xf32> to vector<8x32xf32>
    %318 = vector.shape_cast %315 : vector<8x32xf32> to vector<1x8x32xf32>
    tpu.vector_store %arg11[%c2_171, %c0_172, %c0_173], %318 {strides = array<i32>} : memref<3x8x32xf32, #tpu.memory_space<vmem>>, vector<1x8x32xf32>,
    %c0_174 = arith.constant 0 : index
    %c0_175 = arith.constant 0 : index
    %c0_176 = arith.constant 0 : index
    %319 = vector.load %arg12[%c0_174, %c0_175, %c0_176] : memref<2x8x32xf32, #tpu.memory_space<vmem>>, vector<1x8x32xf32>
    %320 = vector.shape_cast %319 : vector<1x8x32xf32> to vector<8x32xf32>
    %321 = vector.shape_cast %269 : vector<8x32xf32> to vector<1x8x32xf32>
    tpu.vector_store %arg12[%c0_174, %c0_175, %c0_176], %321 {strides = array<i32>} : memref<2x8x32xf32, #tpu.memory_space<vmem>>, vector<1x8x32xf32>,
    %c1_177 = arith.constant 1 : index
    %c0_178 = arith.constant 0 : index
    %c0_179 = arith.constant 0 : index
    %322 = vector.load %arg12[%c1_177, %c0_178, %c0_179] : memref<2x8x32xf32, #tpu.memory_space<vmem>>, vector<1x8x32xf32>
    %323 = vector.shape_cast %322 : vector<1x8x32xf32> to vector<8x32xf32>
    %324 = vector.shape_cast %309 : vector<8x32xf32> to vector<1x8x32xf32>
    tpu.vector_store %arg12[%c1_177, %c0_178, %c0_179], %324 {strides = array<i32>} : memref<2x8x32xf32, #tpu.memory_space<vmem>>, vector<1x8x32xf32>,
    return
  }
  func.func @transform_0(%arg0: i32) -> (i32, i32, i32) {
    %c0_i32 = arith.constant 0 : i32
    %c0_i32_0 = arith.constant 0 : i32
    %c0_i32_1 = arith.constant 0 : i32
    return %c0_i32, %arg0, %c0_i32_0 : i32, i32, i32
  }
  func.func @transform_1(%arg0: i32) -> (i32, i32, i32) {
    %c0_i32 = arith.constant 0 : i32
    %c0_i32_0 = arith.constant 0 : i32
    %c0_i32_1 = arith.constant 0 : i32
    return %c0_i32, %arg0, %c0_i32_0 : i32, i32, i32
  }
  func.func @transform_2(%arg0: i32) -> (i32, i32) {
    %c0_i32 = arith.constant 0 : i32
    %c0_i32_0 = arith.constant 0 : i32
    %c0_i32_1 = arith.constant 0 : i32
    return %c0_i32, %c0_i32_0 : i32, i32
  }
  func.func @transform_3(%arg0: i32) -> (i32, i32) {
    %c0_i32 = arith.constant 0 : i32
    %c0_i32_0 = arith.constant 0 : i32
    %c0_i32_1 = arith.constant 0 : i32
    return %c0_i32, %c0_i32_0 : i32, i32
  }
  func.func @transform_4(%arg0: i32) -> (i32, i32, i32, i32) {
    %c0_i32 = arith.constant 0 : i32
    %c0_i32_0 = arith.constant 0 : i32
    %c0_i32_1 = arith.constant 0 : i32
    %c0_i32_2 = arith.constant 0 : i32
    %c0_i32_3 = arith.constant 0 : i32
    return %c0_i32, %c0_i32_0, %c0_i32_1, %c0_i32_2 : i32, i32, i32, i32
  }
  func.func @transform_5(%arg0: i32) -> (i32, i32, i32, i32) {
    %c0_i32 = arith.constant 0 : i32
    %c0_i32_0 = arith.constant 0 : i32
    %c0_i32_1 = arith.constant 0 : i32
    %c0_i32_2 = arith.constant 0 : i32
    %c0_i32_3 = arith.constant 0 : i32
    return %c0_i32, %c0_i32_0, %c0_i32_1, %c0_i32_2 : i32, i32, i32, i32
  }
  func.func @transform_6(%arg0: i32) -> (i32, i32, i32, i32) {
    %c0_i32 = arith.constant 0 : i32
    %c0_i32_0 = arith.constant 0 : i32
    %c0_i32_1 = arith.constant 0 : i32
    %c0_i32_2 = arith.constant 0 : i32
    %c0_i32_3 = arith.constant 0 : i32
    return %c0_i32, %c0_i32_0, %c0_i32_1, %c0_i32_2 : i32, i32, i32, i32
  }
  func.func @transform_7(%arg0: i32) -> (i32, i32, i32, i32) {
    %c0_i32 = arith.constant 0 : i32
    %c0_i32_0 = arith.constant 0 : i32
    %c0_i32_1 = arith.constant 0 : i32
    %c0_i32_2 = arith.constant 0 : i32
    %c0_i32_3 = arith.constant 0 : i32
    return %c0_i32, %c0_i32_0, %c0_i32_1, %c0_i32_2 : i32, i32, i32, i32
  }
  func.func @transform_8(%arg0: i32) -> (i32, i32) {
    %c0_i32 = arith.constant 0 : i32
    %c0_i32_0 = arith.constant 0 : i32
    %c0_i32_1 = arith.constant 0 : i32
    return %c0_i32, %c0_i32_0 : i32, i32
  }
  func.func @transform_9(%arg0: i32) -> (i32, i32) {
    %c0_i32 = arith.constant 0 : i32
    %c0_i32_0 = arith.constant 0 : i32
    %c0_i32_1 = arith.constant 0 : i32
    return %c0_i32, %c0_i32_0 : i32, i32
  }
  func.func @transform_10(%arg0: i32) -> (i32, i32, i32) {
    %c0_i32 = arith.constant 0 : i32
    %c0_i32_0 = arith.constant 0 : i32
    %c0_i32_1 = arith.constant 0 : i32
    return %c0_i32, %arg0, %c0_i32_0 : i32, i32, i32
  }
  func.func @transform_11(%arg0: i32) -> (i32, i32, i32) {
    %c0_i32 = arith.constant 0 : i32
    %c0_i32_0 = arith.constant 0 : i32
    %c0_i32_1 = arith.constant 0 : i32
    return %c0_i32, %arg0, %c0_i32_0 : i32, i32, i32
  }
}

</mosaic_0001>

<bundles_post_ra>
// kernel: prob_encoder_forward.3
= control target key start
LH: loop header
LB: loop body
LE: loop exit
PB: predicated region body
PF: predicated region fallthrough
CT: control target
= control target key end

     0   :  { %vm517_vm0 = vcmask 261120   ;;  %s4252_s0 = inlined_call_operand.vmem [shape: bf16[3,8,800], index: 0, kind: input, shape index: {}]   ;;  %s4253_s1 = inlined_call_operand.vmem [shape: f32[2,8,32], index: 1, kind: input, shape index: {}]   ;;  %s4254_s2 = inlined_call_operand.vmem [shape: bf16[800,32], index: 2, kind: input, shape index: {}]   ;;  %s4255_s3 = inlined_call_operand.vmem [shape: f32[1,32], index: 3, kind: input, shape index: {}]   ;;  %s4256_s4 = inlined_call_operand.vmem [shape: bf16[2,3,32,32], index: 4, kind: input, shape index: {}]   ;;  %s4257_s5 = inlined_call_operand.vmem [shape: bf16[2,3,32,32], index: 5, kind: input, shape index: {}]   ;;  %s4258_s6 = inlined_call_operand.vmem [shape: f32[2,3,1,32], index: 6, kind: input, shape index: {}]   ;;  %s4259_s7 = inlined_call_operand.vmem [shape: f32[2,3,1,32], index: 7, kind: input, shape index: {}]   ;;  %s4260_s8 = inlined_call_operand.vmem [shape: bf16[32,32], index: 8, kind: input, shape index: {}]   ;;  %s4261_s9 = inlined_call_operand.vmem [shape: f32[1,32], index: 9, kind: input, shape index: {}]   ;;  %s4262_s10 = inlined_call_operand.vmem [shape: f32[3,8,32], index: 10, kind: output, shape index: {0}]   ;;  %s4263_s11 = inlined_call_operand.hbm [shape: f32[2,8,32], index: 11, kind: output, shape index: {1}]  }
   0x1   :  { %v3292_v0 = vld [vmem:[%s4254_s2 + $0x40] sm:$0xff]   ;;  %v3296_v4 = vld [vmem:[%s4254_s2 + $0x48] sm:$0xff]   ;;  %v3300_v8 = vld [vmem:[%s4254_s2 + $0x50] sm:$0xff]  }
   0x2   :  { %v3293_v1 = vld [vmem:[%s4254_s2] sm:$0xff]   ;;  %2789 = vmatprep.subr.bf16.mxu0 %v3292_v0  ;;  %v3297_v5 = vld [vmem:[%s4254_s2 + $0x8] sm:$0xff]   ;;  %v3301_v9 = vld [vmem:[%s4254_s2 + $0x10] sm:$0xff]  }
   0x3   :  { %v3294_v2 = vld [vmem:[%s4254_s2 + $0xc0] sm:$0xff]   ;;  %2790 = vmatpush3.bf16.msra.mxu0 %v3293_v1  ;;  %v3298_v6 = vld [vmem:[%s4254_s2 + $0xc8] sm:$0xff]   ;;  %v3302_v10 = vld [vmem:[%s4254_s2 + $0xd0] sm:$0xff]  }
   0x4   :  { %v3295_v3 = vld [vmem:[%s4254_s2 + $0x80] sm:$0xff]   ;;  %2817 = vmatprep.subr.bf16.mxu1 %v3294_v2  ;;  %2791 = vmatprep.subr.bf16.mxu0 %v3296_v4  ;;  %v3299_v7 = vld [vmem:[%s4254_s2 + $0x88] sm:$0xff]   ;;  %v3303_v11 = vld [vmem:[%s4254_s2 + $0x90] sm:$0xff]  }
   0x5   :  { %2818 = vmatpush3.bf16.msra.mxu1 %v3295_v3  ;;  %v3304_v12 = vld [vmem:[%s4254_s2 + $0x58] sm:$0xff]   ;;  %v3308_v16 = vld [vmem:[%s4254_s2 + $0x60] sm:$0xff]   ;;  %v3312_v20 = vld [vmem:[%s4254_s2 + $0x68] sm:$0xff]  }
   0x6   :  { %2819 = vmatprep.subr.bf16.mxu1 %v3298_v6  ;;  %v3305_v13 = vld [vmem:[%s4254_s2 + $0x18] sm:$0xff]   ;;  %v3309_v17 = vld [vmem:[%s4254_s2 + $0x20] sm:$0xff]   ;;  %v3313_v21 = vld [vmem:[%s4254_s2 + $0x28] sm:$0xff]  }
   0x7   :  { %2792 = vmatpush3.bf16.msra.mxu0 %v3297_v5  ;;  %v3306_v14 = vld [vmem:[%s4254_s2 + $0xd8] sm:$0xff]   ;;  %v3310_v18 = vld [vmem:[%s4254_s2 + $0xe0] sm:$0xff]   ;;  %v3314_v22 = vld [vmem:[%s4254_s2 + $0xe8] sm:$0xff]  }
   0x8   :  { %2793 = vmatprep.subr.bf16.mxu0 %v3300_v8  ;;  %v3307_v15 = vld [vmem:[%s4254_s2 + $0x98] sm:$0xff]   ;;  %v3311_v19 = vld [vmem:[%s4254_s2 + $0xa0] sm:$0xff]   ;;  %v3315_v23 = vld [vmem:[%s4254_s2 + $0xa8] sm:$0xff]  }
   0x9   :  { %2820 = vmatpush3.bf16.msra.mxu1 %v3299_v7  ;;  %v3316_v24 = vld [vmem:[%s4254_s2 + $0x70] sm:$0xff]   ;;  %v3320_v28 = vld [vmem:[%s4254_s2 + $0x78] sm:$0xff]   ;;  %v3325_v32 = vld [vmem:[%s4252_s0 + $0x4] ss:$28 sps:$4 sm:$0xff]  }
   0xa   :  { %2821 = vmatprep.subr.bf16.mxu1 %v3302_v10  ;;  %v3317_v25 = vld [vmem:[%s4254_s2 + $0x30] sm:$0xff]   ;;  %v3321_v29 = vld [vmem:[%s4254_s2 + $0x38] sm:$0xff]   ;;  %556 = vmatprep.mubr.bf16.mxu0 %v3325_v32  ;;  %v3327_v34 = vld [vmem:[%s4254_s2 + $0x140] sm:$0xff]  }
   0xb   :  { %2794 = vmatpush3.bf16.msra.mxu0 %v3301_v9  ;;  %v3318_v26 = vld [vmem:[%s4254_s2 + $0xf0] sm:$0xff]   ;;  %v3322_v30 = vld [vmem:[%s4254_s2 + $0xf8] sm:$0xff]   ;;  %v3328_v35 = vld [vmem:[%s4252_s0 + $0x8] ss:$28 sps:$4 sm:$0xff]  }
   0xc   :  { %2795 = vmatprep.subr.bf16.mxu0 %v3304_v12  ;;  %v3319_v27 = vld [vmem:[%s4254_s2 + $0xb0] sm:$0xff]   ;;  %v3323_v31 = vld [vmem:[%s4252_s0] ss:$28 sps:$4 sm:$0xff]   ;;  %v3330_v36 = vld [vmem:[%s4252_s0 + $0xc] ss:$28 sps:$4 sm:$0xff]  }
   0xd   :  { %2822 = vmatpush3.bf16.msra.mxu1 %v3303_v11  ;;  %v3326_v33 = vld [vmem:[%s4254_s2 + $0xb8] sm:$0xff]   ;;  %v3331_v37 = vld [vmem:[%s4254_s2 + $0x100] sm:$0xff]   ;;  %604 = vmatprep.mubr.bf16.mxu1 %v3330_v36  ;;  %v3332_v38 = vld [vmem:[%s4254_s2 + $0x148] sm:$0xff]  }
   0xe   :  { %2823 = vmatprep.subr.bf16.mxu1 %v3306_v14  ;;  %v3333_v39 = vld [vmem:[%s4254_s2 + $0x108] sm:$0xff]   ;;  %v3334_v40 = vld [vmem:[%s4254_s2 + $0x150] sm:$0xff]   ;;  %v3336_v42 = vld [vmem:[%s4254_s2 + $0x158] sm:$0xff]  }
   0xf   :  { %2796 = vmatpush3.bf16.msra.mxu0 %v3305_v13  ;;  %v3335_v41 = vld [vmem:[%s4254_s2 + $0x110] sm:$0xff]   ;;  %v147_v43 = vld [vmem:[%s4252_s0 + $0x38] sm:$0xff]  ;;  %v3338_v47 = vld [vmem:[%s4254_s2 + $0x160] sm:$0xff]  }
  0x10   :  { %2797 = vmatprep.subr.bf16.mxu0 %v3308_v16  ;;  %v3337_v44 = vld [vmem:[%s4254_s2 + $0x118] sm:$0xff]   ;;  %v2591_v45 = vcombine.high %v147_v43, %v147_v43  ;;  %v2590_v46 = vcombine.low %v147_v43, %v147_v43  ;;  %v148_v48 = vld [vmem:[%s4252_s0 + $0x40] sm:$0xff]  ;;  %v3341_v53 = vld [vmem:[%s4254_s2 + $0x168] sm:$0xff]  }
  0x11   :  { %2824 = vmatpush3.bf16.msra.mxu1 %v3307_v15  ;;  %v2593_v49 = vcombine.high %v148_v48, %v148_v48  ;;  %v2592_v50 = vcombine.low %v148_v48, %v148_v48  ;;  %v3346_v51 = vld [vmem:[%s4254_s2 + $0x180] sm:$0xff]   ;;  %v3343_v54 = vld [vmem:[%s4254_s2 + $0x128] sm:$0xff]   ;;  %v3345_v55 = vld [vmem:[%s4254_s2 + $0x170] sm:$0xff]  }
  0x12   :  { %2825 = vmatprep.subr.bf16.mxu1 %v3310_v18  ;;  %v3339_v52 = vld [vmem:[%s4254_s2 + $0x120] sm:$0xff]   ;;  %v3353_v56 = vld [vmem:[%s4252_s0 + $0x14] ss:$28 sps:$4 sm:$0xff]   ;;  %v3354_v57 = vld [vmem:[%s4254_s2 + $0x188] sm:$0xff]  }
  0x13   :  { %2798 = vmatpush3.bf16.msra.mxu0 %v3309_v17  ;;  %v3355_v58 = vld [vmem:[%s4252_s0 + $0x18] ss:$28 sps:$4 sm:$0xff]   ;;  %v3356_v60 = vld [vmem:[%s4252_s0 + $0x50] ss:$0 sps:$4 sm:$0xff]   ;;  %v149_v63 = vld [vmem:[%s4252_s0 + $0x48] sm:$0xff] }
  0x14   :  { %2799 = vmatprep.subr.bf16.mxu0 %v3312_v20  ;;  %v3348_v59 = vld [vmem:[%s4254_s2 + $0x130] sm:$0xff]   ;;  %v3349_v61 = vld [vmem:[%s4254_s2 + $0x178] sm:$0xff]   ;;  %v2595_v1 = vcombine.high %v149_v63, %v149_v63  ;;  %v2594_v2 = vcombine.low %v149_v63, %v149_v63 }
  0x15   :  { %2826 = vmatpush3.bf16.msra.mxu1 %v3311_v19  ;;  %v3350_v62 = vld [vmem:[%s4254_s2 + $0x138] sm:$0xff]   ;;  %v3351_v0 = vld [vmem:[%s4252_s0 + $0x10] ss:$28 sps:$4 sm:$0xff]  }
  0x16   :  { %2827 = vmatprep.subr.bf16.mxu1 %v3314_v22 }
  0x17   :  { %2800 = vmatpush3.bf16.msra.mxu0 %v3313_v21 }
  0x18   :  { %2801 = vmatprep.subr.bf16.mxu0 %v3316_v24 }
  0x19   :  { %2828 = vmatpush3.bf16.msra.mxu1 %v3315_v23 }
  0x1a   :  { %2829 = vmatprep.subr.bf16.mxu1 %v3318_v26 }
  0x1b   :  { %2802 = vmatpush3.bf16.msra.mxu0 %v3317_v25 }
  0x1c   :  { %2803 = vmatprep.subr.bf16.mxu0 %v3320_v28 }
  0x1d   :  { %2830 = vmatpush3.bf16.msra.mxu1 %v3319_v27 }
  0x1e   :  { %2831 = vmatprep.subr.bf16.mxu1 %v3322_v30 }
  0x1f   :  { %2804 = vmatpush3.bf16.msra.mxu0 %v3321_v29 }
  0x20   :  { %2845 = vmatprep.subr.bf16.mxu0 %v3327_v34 }
  0x21   :  { %2832 = vmatpush3.bf16.msra.mxu1 %v3326_v33 }
  0x22   :  { %557 = vmatmul.mubr.bf16.vlgmr.msra.gmra.mrb[0].mxu0 %v3323_v31  ;;  %2979 = vmatprep.subr.bf16.mxu1 %v3346_v51 }
  0x23   :  { %2846 = vmatpush3.bf16.msra.mxu0 %v3331_v37  ;;  %564 = vmatprep.mubr.bf16.mxu0 %v2591_v45 }
  0x24   :  { %605 = vmatmul.mubr.bf16.vlgmr.msra.gmra.mrb[0].mxu1 %v3328_v35  ;;  %2847 = vmatprep.subr.bf16.mxu0 %v3332_v38 }
  0x25   :  { %612 = vmatprep.mubr.bf16.mxu1 %v2593_v49  ;;  %2980 = vmatpush3.bf16.msra.mxu1 %v3346_v51 }
  0x26   :  { %2981 = vmatprep.subr.bf16.mxu1 %v3354_v57 }
  0x27   :  { %2848 = vmatpush3.bf16.msra.mxu0 %v3333_v39 }
  0x28   :  { %2849 = vmatprep.subr.bf16.mxu0 %v3334_v40 }
  0x29   :  { %2982 = vmatpush3.bf16.msra.mxu1 %v3354_v57 }
  0x2a   :  { %565 = vmatmul.mubr.bf16.gmra.mrb[4].mxu0 %v2590_v46 }
  0x2b   :  { %2850 = vmatpush3.bf16.msra.mxu0 %v3335_v41  ;;  %652 = vmatprep.mubr.bf16.mxu0 %v3353_v56 }
  0x2c   :  { %2851 = vmatprep.subr.bf16.mxu0 %v3336_v42  ;;  %613 = vmatmul.mubr.bf16.gmra.mrb[4].mxu1 %v2592_v50 }
  0x2d   :  { %2983 = vmatprep.mubr.msk.bf16.mxu1 %vm517_vm0, %v3355_v58 }
  0x2f   :  { %2852 = vmatpush3.bf16.msra.mxu0 %v3337_v44 }
  0x30   :  { %2853 = vmatprep.subr.bf16.mxu0 %v3338_v47 }
  0x33   :  { %2854 = vmatpush3.bf16.msra.mxu0 %v3339_v52 }
  0x34   :  { %2855 = vmatprep.subr.bf16.mxu0 %v3341_v53  ;;  %2984 = vmatmul.mubr.msk.bf16.vlgmr.msra.gmra.mrb[8].mxu1 %vm517_vm0, %v3356_v60 }
  0x37   :  { %2856 = vmatpush3.bf16.msra.mxu0 %v3343_v54 }
  0x38   :  { %2857 = vmatprep.subr.bf16.mxu0 %v3345_v55 }
  0x3b   :  { %2858 = vmatpush3.bf16.msra.mxu0 %v3348_v59 }
  0x3c   :  { %2859 = vmatprep.subr.bf16.mxu0 %v3349_v61 }
  0x3f   :  { %2860 = vmatpush3.bf16.msra.mxu0 %v3350_v62 }
  0x42   :  { %653 = vmatmul.mubr.bf16.vlgmr.msra.gmra.mrb[8].mxu0 %v3351_v0 }
  0x43   :  { %660 = vmatprep.mubr.bf16.mxu0 %v2595_v1 }
  0x44   :  { %17 = vsyncpa [#allocation3], 0  ;;  %v3359_v3 = vld [vmem:[%s4256_s4] sm:$0xff]   ;;  %v3469_v5 = vmov 0.0   ;;  %v3361_v6 = vld [vmem:[%s4256_s4 + $0x8] sm:$0xff]   ;;  %vm3470_vm1 = vmmov 0  }
  0x45   :  { %2987 = vmatprep.subr.bf16.mxu1 %v3359_v3  ;;  %v3725_v4 = vld [vmem:[%s4257_s5] sm:$0xff]   ;;  %3011 = vmatprep.subr.bf16.mxu0 %v3469_v5  ;;  %v3736_v7 = vld [vmem:[%s4257_s5 + $0x8] sm:$0xff]   ;;  %v3742_v8 = vld [vmem:[%s4256_s4 + $0x10] sm:$0xff]   ;;  %s3471_s19 = smov [#allocation2]  }
  0x46   :  { %2988 = vmatpush3.bf16.msra.mxu1 %v3359_v3  ;;  %3012 = vmatpush3.bf16.msra.mxu0 %v3725_v4  ;;  %v3747_v9 = vld [vmem:[%s4253_s1] sm:$0xff]  ;;  %v3771_v12 = vld [vmem:[%s4257_s5 + $0x28] sm:$0xff]   ;;  %s2569_s20 = sshll.u32 %s3471_s19, 4  ;;  %s2570_s20 = int_to_ptr.vmem [resolvable:$true] %s2569_s20 }
  0x47   :  { %3013 = vmatprep.subr.bf16.mxu0 %v3469_v5  ;;  %2989 = vmatprep.subr.bf16.mxu1 %v3361_v6  ;;  %v3751_v10 = vpack.c.bf16 %v3747_v9, %v3747_v9  ;;  %v3764_v11 = vld [vmem:[%s4257_s5 + $0x20] sm:$0xff]   ;;  %s3445_s21 = scalar_lea.vmem %s2570_s20, 256  ;;  %p3450_p1 = scmp.lt.s32.totalorder %s2570_s20, %s2570_s20 }
  0x48   :  { %v2582_v14 = vld [vmem:[%s4255_s3] ss:$0 sm:$0xff]  ;;  %p3446_p0 = scmp.ne.s32.totalorder %s2570_s20, %s3445_s21  ;;  %p3451_p2 = scmp.lt.s32.totalorder %s3445_s21, %s3445_s21 }
  0x4a   :  { %661 = vmatmul.mubr.bf16.gmra.mrb[12].mxu0 %v2594_v2  ;;  %2990 = vmatpush3.bf16.msra.mxu1 %v3361_v6  ;;  %v3364_v6 = vld [vmem:[%s4256_s4 + $0x18] sm:$0xff]   ;;  %p3452_p3 = por %p3451_p2, %p3450_p1 }
  0x4b   :  { %3014 = vmatpush3.bf16.msra.mxu0 %v3736_v7  ;;  %2995 = vmatprep.subr.bf16.mxu1 %v3742_v8 }
  0x4c   :  { %3027 = vmatprep.subr.bf16.mxu0 %v3469_v5  ;;  %3015 = vmatprep.mubr.msk.bf16.mxu0 %vm3470_vm1, %v3469_v5  ;;  %p3453_p4 = pnand %p3452_p3, %p3446_p0 }
  0x52   :  { %3016 = vmatmul.mubr.msk.bf16.vlgmr.msra.gmra.mrb[16].mxu0 %vm517_vm0, %v3751_v10 }
  0x53   :  { %3031 = vmatprep.mubr.msk.bf16.mxu0 %vm3470_vm1, %v3469_v5  ;;  %3028 = vmatpush3.bf16.msra.mxu0 %v3764_v11 }
  0x54   :  { %3029 = vmatprep.subr.bf16.mxu0 %v3469_v5 }
  0x57   :  { %3030 = vmatpush3.bf16.msra.mxu0 %v3771_v12 }
  0x58   :  { %3051 = vmatprep.subr.bf16.mxu0 %v3469_v5 }
  0x5a   :  { %3032 = vmatmul.mubr.msk.bf16.vlgmr.msra.gmra.mrb[20].mxu0 %vm517_vm0, %v3751_v10 }
  0x5b   :  { %3055 = vmatprep.mubr.msk.bf16.mxu0 %vm3470_vm1, %v3469_v5 }
  0xf5   :  { %v2805_v13 = vpop.f32.mrb[0].mxu0 }
  0xf6   :  { %v2806_v15 = vpop.f32.mrb[1].mxu0 }
  0xf7   :  { %v2807_v16 = vadd.f32 %v2806_v15, %v2805_v13  ;;  %v2808_v17 = vpop.f32.mrb[2].mxu0  ;;  %v2833_v18 = vpop.f32.mrb[0].mxu1  ;;  %v3365_v13 = vld [vmem:[%s4256_s4 + $0x20] sm:$0xff]   ;;  %v3808_v15 = vld [vmem:[%s4257_s5 + $0x18] sm:$0xff]  }
  0xf8   :  { %v2809_v19 = vpop.f32.mrb[3].mxu0  ;;  %v2834_v22 = vpop.f32.mrb[1].mxu1 }
  0xf9   :  { %v559_v20 = vadd.f32 %v2807_v16, %v2582_v14  ;;  %v2810_v21 = vadd.f32 %v2809_v19, %v2808_v17  ;;  %v2835_v23 = vadd.f32 %v2834_v22, %v2833_v18  ;;  %v2836_v24 = vpop.f32.mrb[2].mxu1 }
  0xfa   :  { %v2837_v26 = vpop.f32.mrb[3].mxu1 }
  0xfb   :  { %v562_v25 = vadd.f32 %v2810_v21, %v2582_v14  ;;  %v607_v27 = vadd.f32 %v2835_v23, %v559_v20  ;;  %v2838_v28 = vadd.f32 %v2837_v26, %v2836_v24  ;;  %v3822_v24 = vld [vmem:[%s4256_s4 + $0x30] sm:$0xff]   ;;  %v3841_v26 = vld [vmem:[%s4256_s4 + $0x48] sm:$0xff]  }
  0xfd   :  { %v610_v29 = vadd.f32 %v2838_v28, %v562_v25  ;;  %v2811_v30 = vpop.f32.mrb[4].mxu0  ;;  %v3836_v25 = vld [vmem:[%s4256_s4 + $0x38] sm:$0xff]   ;;  %v2699_v28 = vld [vmem:[%s4258_s6] ss:$0 sm:$0xff] }
  0xfe   :  { %v2812_v31 = vpop.f32.mrb[5].mxu0 }
  0xff   :  { %v2813_v32 = vadd.f32 %v2812_v31, %v2811_v30  ;;  %v2814_v33 = vpop.f32.mrb[6].mxu0  ;;  %v2839_v36 = vpop.f32.mrb[4].mxu1 }
 0x100   :  { %v2815_v34 = vpop.f32.mrb[7].mxu0  ;;  %v2840_v37 = vpop.f32.mrb[5].mxu1 }
 0x101   :  { %v567_v35 = vadd.f32 %v2813_v32, %v2582_v14  ;;  %v2841_v38 = vadd.f32 %v2840_v37, %v2839_v36  ;;  %v2842_v39 = vpop.f32.mrb[6].mxu1  ;;  %v3366_v14 = vld [vmem:[%s4256_s4 + $0x28] sm:$0xff]  }
 0x102   :  { %v2843_v40 = vpop.f32.mrb[7].mxu1  ;;  %v2704_v39 = vld [vmem:[%s4258_s6 + $0x1] ss:$0 sm:$0xff] }
 0x103   :  { %v615_v41 = vadd.f32 %v2841_v38, %v567_v35 }
 0x107   :  { %v2985_v42 = vpop.f32.mrb[8].mxu1 }
 0x108   :  { %v702_v43 = vpop.f32.mrb[9].mxu1 }
 0x109   :  { %v2986_v44 = vpop.f32.mrb[10].mxu1 }
 0x10a   :  { %v705_v45 = vpop.f32.mrb[11].mxu1 }
 0x115   :  { %v2861_v46 = vpop.f32.mrb[8].mxu0 }
 0x116   :  { %v2862_v47 = vpop.f32.mrb[9].mxu0 }
 0x117   :  { %v2863_v48 = vadd.f32 %v2862_v47, %v2861_v46  ;;  %v2864_v49 = vpop.f32.mrb[10].mxu0  ;;  %v2709_v46 = vld [vmem:[%s4258_s6 + $0x2] ss:$0 sm:$0xff] }
 0x118   :  { %v2865_v50 = vpop.f32.mrb[11].mxu0 }
 0x119   :  { %v2866_v51 = vadd.f32 %v2865_v50, %v2864_v49  ;;  %v655_v52 = vadd.f32 %v2863_v48, %v607_v27  ;;  %v3850_v27 = vld [vmem:[%s4259_s7] ss:$0 sm:$0xff] }
 0x11b   :  { %v703_v53 = vadd.f32 %v702_v43, %v655_v52  ;;  %v658_v54 = vadd.f32 %v2866_v51, %v610_v29 }
 0x11d   :  { %v706_v55 = vadd.f32 %v705_v45, %v658_v54  ;;  %v2867_v56 = vpop.f32.mrb[12].mxu0  ;;  %v716_v58 = vmax.f32 %v703_v53, 0.0 }
 0x11e   :  { %v2868_v57 = vpop.f32.mrb[13].mxu0 }
 0x11f   :  { %v717_v59 = vmax.f32 %v706_v55, 0.0  ;;  %v2869_v60 = vadd.f32 %v2868_v57, %v2867_v56  ;;  %v2870_v61 = vpop.f32.mrb[14].mxu0  ;;  %v3877_v55 = vld [vmem:[%s4259_s7 + $0x1] ss:$0 sm:$0xff] }
 0x120   :  { %v2871_v62 = vpop.f32.mrb[15].mxu0 }
 0x121   :  { %v719_v63 = vpack.c.bf16 %v717_v59, %v716_v58  ;;  %v663_v0 = vadd.f32 %v2869_v60, %v615_v41  ;;  %v3883_v60 = vld [vmem:[%s4259_s7 + $0x2] ss:$0 sm:$0xff] }
 0x123   :  { %v711_v1 = vadd.f32 %v2985_v42, %v663_v0  ;;  %2991 = vmatprep.mubr.msk.bf16.mxu1 %vm517_vm0, %v719_v63 }
 0x125   :  { %v718_v2 = vmax.f32 %v711_v1, 0.0  ;;  %v1069_v16 = vpop.f32.mrb[16].mxu0 }
 0x126   :  { %v3017_v17 = vpop.f32.mrb[17].mxu0  ;;  %v1070_v30 = vadd.f32 %v3850_v27, %v1069_v16 }
 0x127   :  { %v720_v3 = vpack.c.bf16 %v718_v2, %v718_v2  ;;  %v1072_v18 = vpop.f32.mrb[18].mxu0 }
 0x128   :  { %v3018_v19 = vpop.f32.mrb[19].mxu0 }
 0x129   :  { %2992 = vmatmul.mubr.msk.bf16.vlgmr.msra.gmra.mrb[12].mxu1 %vm517_vm0, %v720_v3 }
 0x12a   :  { %2996 = vmatpush3.bf16.msra.mxu1 %v3742_v8  ;;  %2999 = vmatprep.mubr.msk.bf16.mxu1 %vm517_vm0, %v719_v63  ;;  %v3800_v8 = vld [vmem:[%s4257_s5 + $0x10] sm:$0xff]  }
 0x12b   :  { %2997 = vmatprep.subr.bf16.mxu1 %v3364_v6 }
 0x12d   :  { %v1199_v20 = vpop.f32.mrb[20].mxu0 }
 0x12e   :  { %2998 = vmatpush3.bf16.msra.mxu1 %v3364_v6  ;;  %v3033_v21 = vpop.f32.mrb[21].mxu0  ;;  %v1200_v0 = vadd.f32 %v3883_v60, %v1199_v20  ;;  %v3892_v20 = vld [vmem:[%s4257_s5 + $0x30] sm:$0xff]  }
 0x12f   :  { %3003 = vmatprep.subr.bf16.mxu1 %v3365_v13  ;;  %v1202_v22 = vpop.f32.mrb[22].mxu0 }
 0x130   :  { %v3034_v23 = vpop.f32.mrb[23].mxu0 }
 0x131   :  { %3000 = vmatmul.mubr.msk.bf16.vlgmr.msra.gmra.mrb[16].mxu1 %vm517_vm0, %v720_v3 }
 0x132   :  { %3004 = vmatpush3.bf16.msra.mxu1 %v3365_v13  ;;  %3007 = vmatprep.mubr.msk.bf16.mxu1 %vm517_vm0, %v719_v63 }
 0x133   :  { %3005 = vmatprep.subr.bf16.mxu1 %v3366_v14 }
 0x136   :  { %3006 = vmatpush3.bf16.msra.mxu1 %v3366_v14 }
 0x137   :  { %3019 = vmatprep.subr.bf16.mxu1 %v3469_v5 }
 0x139   :  { %3008 = vmatmul.mubr.msk.bf16.vlgmr.msra.gmra.mrb[20].mxu1 %vm517_vm0, %v720_v3 }
 0x13a   :  { %3020 = vmatpush3.bf16.msra.mxu1 %v3800_v8  ;;  %3023 = vmatprep.mubr.msk.bf16.mxu1 %vm3470_vm1, %v3469_v5 }
 0x13b   :  { %3021 = vmatprep.subr.bf16.mxu1 %v3469_v5 }
 0x13e   :  { %3022 = vmatpush3.bf16.msra.mxu1 %v3808_v15 }
 0x13f   :  { %3035 = vmatprep.subr.bf16.mxu1 %v3469_v5 }
 0x141   :  { %3024 = vmatmul.mubr.msk.bf16.vlgmr.msra.gmra.mrb[24].mxu1 %vm517_vm0, %v3751_v10  ;;  %v3827_v10 = vld [vmem:[%s4256_s4 + $0x40] sm:$0xff]  }
 0x142   :  { %3039 = vmatprep.mubr.msk.bf16.mxu1 %vm3470_vm1, %v3469_v5  ;;  %3036 = vmatpush3.bf16.msra.mxu1 %v3822_v24 }
 0x143   :  { %3052 = vmatpush3.bf16.msra.mxu0 %v3827_v10  ;;  %3037 = vmatprep.subr.bf16.mxu1 %v3469_v5 }
 0x144   :  { %3053 = vmatprep.subr.bf16.mxu0 %v3469_v5 }
 0x146   :  { %3038 = vmatpush3.bf16.msra.mxu1 %v3836_v25 }
 0x147   :  { %3054 = vmatpush3.bf16.msra.mxu0 %v3841_v26  ;;  %3043 = vmatprep.subr.bf16.mxu1 %v3469_v5 }
 0x148   :  { %3059 = vmatprep.subr.bf16.mxu0 %v3469_v5 }
 0x1fc   :  { %v2993_v29 = vpop.f32.mrb[12].mxu1 }
 0x1fd   :  { %v3856_v31 = vadd.f32 %v2993_v29, %v2699_v28  ;;  %v864_v32 = vpop.f32.mrb[13].mxu1 }
 0x1fe   :  { %v865_v33 = vadd.f32 %v2699_v28, %v864_v32  ;;  %v2994_v34 = vpop.f32.mrb[14].mxu1  ;;  %v3930_v32 = vld [vmem:[%s4253_s1 + $0x8] sm:$0xff] }
 0x1ff   :  { %v867_v35 = vpop.f32.mrb[15].mxu1  ;;  %v3939_v34 = vld [vmem:[%s4256_s4 + $0x50] sm:$0xff]  }
 0x200   :  { %v1075_v36 = vadd.f32 %v1070_v30, %v865_v33  ;;  %v3858_v37 = vadd.f32 %v2699_v28, %v867_v35  ;;  %v3897_v28 = vld [vmem:[%s4257_s5 + $0x40] sm:$0xff]   ;;  %v3917_v30 = vld [vmem:[%s4257_s5 + $0x48] sm:$0xff]   ;;  %v1213_v33 = vpack.c.bf16 %v3930_v32, %v3930_v32  ;;  %v3944_v35 = vld [vmem:[%s4257_s5 + $0x50] sm:$0xff]  }
 0x202   :  { %v2719_v38 = vmul.f32 -1.442695, %v1075_v36  ;;  %v3953_v36 = vld [vmem:[%s4256_s4 + $0x58] sm:$0xff]  }
 0x204   :  { %3385 = vpow2.f32 %v2719_v38  ;;  %v3001_v40 = vpop.f32.mrb[16].mxu1  ;;  %v3958_v38 = vld [vmem:[%s4257_s5 + $0x58] sm:$0xff]  }
 0x205   :  { %v3863_v41 = vadd.f32 %v3001_v40, %v2704_v39  ;;  %v930_v42 = vpop.f32.mrb[17].mxu1  ;;  %v4007_v40 = vld [vmem:[%s4260_s8 + $0x8] sm:$0xff]  }
 0x206   :  { %v3002_v43 = vpop.f32.mrb[18].mxu1  ;;  %v931_v57 = vadd.f32 %v2704_v39, %v930_v42  ;;  %v2729_v42 = vld [vmem:[%s4258_s6 + $0x3] ss:$0 sm:$0xff] }
 0x207   :  { %v933_v44 = vpop.f32.mrb[19].mxu1  ;;  %v2733_v43 = vld [vmem:[%s4259_s7 + $0x3] ss:$0 sm:$0xff] }
 0x208   :  { %v3865_v45 = vadd.f32 %v2704_v39, %v933_v44  ;;  %v4000_v39 = vld [vmem:[%s4260_s8] sm:$0xff]   ;;  %v4017_v44 = vadd.f32 %v2733_v43, %v2729_v42 }
 0x20c   :  { %v3009_v47 = vpop.f32.mrb[20].mxu1 }
 0x20d   :  { %v3870_v48 = vadd.f32 %v3009_v47, %v2709_v46  ;;  %v996_v49 = vpop.f32.mrb[21].mxu1  ;;  %v2742_v47 = vld [vmem:[%s4259_s7 + $0x4] ss:$0 sm:$0xff] }
 0x20e   :  { %v3386_v50 = vpop.eup %3385  ;;  %v3010_v51 = vpop.f32.mrb[22].mxu1  ;;  %v997_v3 = vadd.f32 %v2709_v46, %v996_v49 }
 0x20f   :  { %v1079_v52 = vadd.f32 1.0, %v3386_v50  ;;  %v999_v53 = vpop.f32.mrb[23].mxu1 }
 0x210   :  { %v3872_v54 = vadd.f32 %v2709_v46, %v999_v53  ;;  %v2738_v46 = vld [vmem:[%s4258_s6 + $0x4] ss:$0 sm:$0xff] }
 0x211   :  { %3387 = vrcp.f32 %v1079_v52  ;;  %v4025_v51 = vadd.f32 %v2742_v47, %v2738_v46 }
 0x214   :  { %v1134_v56 = vpop.f32.mrb[24].mxu1 }
 0x215   :  { %v1135_v58 = vadd.f32 %v3877_v55, %v1134_v56  ;;  %v3025_v59 = vpop.f32.mrb[25].mxu1 }
 0x216   :  { %v1137_v61 = vpop.f32.mrb[26].mxu1 }
 0x217   :  { %v1140_v62 = vadd.f32 %v1135_v58, %v931_v57  ;;  %v3026_v63 = vpop.f32.mrb[27].mxu1 }
 0x219   :  { %v2724_v1 = vmul.f32 -1.442695, %v1140_v62 }
 0x21b   :  { %v3388_v2 = vpop.eup %3387  ;;  %3389 = vpow2.f32 %v2724_v1 }
 0x21c   :  { %v1205_v6 = vmul.f32 %v3388_v2, %v1200_v0 }
 0x21e   :  { %v1206_v13 = vadd.f32 %v1205_v6, %v997_v3 }
 0x225   :  { %v3390_v14 = vpop.eup %3389 }
 0x226   :  { %v1144_v16 = vadd.f32 1.0, %v3390_v14 }
 0x228   :  { %3391 = vrcp.f32 %v1144_v16 }
 0x229   :  { %3393 = vtanh.f32 %v1206_v13 }
 0x232   :  { %v3392_v17 = vpop.eup %3391 }
 0x233   :  { %v1208_v18 = vsub.f32 1.0, %v3392_v17  ;;  %v3394_v19 = vpop.eup %3393  ;;  %v1210_v21 = vmul.f32 %v3392_v17, %v3747_v9  ;;  %v3912_v9 = vld [vmem:[%s4257_s5 + $0x38] sm:$0xff]  }
 0x235   :  { %v1209_v22 = vmul.f32 %v3394_v19, %v1208_v18 }
 0x237   :  { %v3887_v23 = vadd.f32 %v1210_v21, %v1209_v22 }
 0x239   :  { %v3901_v29 = vpack.c.bf16 %v3887_v23, %v3887_v23 }
 0x23b   :  { %3040 = vmatmul.mubr.msk.bf16.vlgmr.msra.gmra.mrb[28].mxu1 %vm517_vm0, %v3901_v29  ;;  %3056 = vmatmul.mubr.msk.bf16.vlgmr.msra.gmra.mrb[24].mxu0 %vm517_vm0, %v3901_v29 }
 0x23c   :  { %3044 = vmatpush3.bf16.msra.mxu1 %v3892_v20  ;;  %3060 = vmatpush3.bf16.msra.mxu0 %v3897_v28 }
 0x23d   :  { %3045 = vmatprep.subr.bf16.mxu1 %v3469_v5  ;;  %3061 = vmatprep.subr.bf16.mxu0 %v3469_v5 }
 0x23e   :  { %3047 = vmatprep.mubr.msk.bf16.mxu1 %vm3470_vm1, %v3469_v5  ;;  %3063 = vmatprep.mubr.msk.bf16.mxu0 %vm3470_vm1, %v3469_v5 }
 0x240   :  { %3046 = vmatpush3.bf16.msra.mxu1 %v3912_v9  ;;  %3062 = vmatpush3.bf16.msra.mxu0 %v3917_v30 }
 0x241   :  { %3067 = vmatprep.subr.bf16.mxu1 %v3469_v5  ;;  %3075 = vmatprep.subr.bf16.mxu0 %v3469_v5 }
 0x247   :  { %3048 = vmatmul.mubr.msk.bf16.vlgmr.msra.gmra.mrb[28].mxu1 %vm517_vm0, %v1213_v33  ;;  %3064 = vmatmul.mubr.msk.bf16.vlgmr.msra.gmra.mrb[24].mxu0 %vm517_vm0, %v1213_v33 }
 0x248   :  { %3068 = vmatpush3.bf16.msra.mxu1 %v3939_v34  ;;  %3076 = vmatpush3.bf16.msra.mxu0 %v3944_v35 }
 0x249   :  { %3069 = vmatprep.subr.bf16.mxu1 %v3469_v5  ;;  %3077 = vmatprep.subr.bf16.mxu0 %v3469_v5 }
 0x24a   :  { %3071 = vmatprep.mubr.msk.bf16.mxu1 %vm3470_vm1, %v3469_v5  ;;  %3079 = vmatprep.mubr.msk.bf16.mxu0 %vm3470_vm1, %v3469_v5 }
 0x24c   :  { %3070 = vmatpush3.bf16.msra.mxu1 %v3953_v36  ;;  %3078 = vmatpush3.bf16.msra.mxu0 %v3958_v38 }
 0x24d   :  { %3091 = vmatprep.subr.bf16.mxu0 %v3469_v5  ;;  %3083 = vmatprep.subr.bf16.mxu1 %v3469_v5 }
 0x24f   :  { %3072 = vmatmul.mubr.msk.bf16.vlgmr.msra.gmra.mrb[32].mxu1 %vm517_vm0, %v3901_v29  ;;  %3080 = vmatmul.mubr.msk.bf16.vlgmr.msra.gmra.mrb[28].mxu0 %vm517_vm0, %v1213_v33 }
 0x250   :  { %3092 = vmatpush3.bf16.msra.mxu0 %v3725_v4  ;;  %3095 = vmatprep.mubr.msk.bf16.mxu0 %vm3470_vm1, %v3469_v5 }
 0x251   :  { %3093 = vmatprep.subr.bf16.mxu0 %v3469_v5  ;;  %3087 = vmatprep.mubr.msk.bf16.mxu1 %vm3470_vm1, %v3469_v5 }
 0x252   :  { %3084 = vmatpush3.bf16.msra.mxu1 %v4000_v39 }
 0x253   :  { %3085 = vmatprep.subr.bf16.mxu1 %v3469_v5 }
 0x254   :  { %3094 = vmatpush3.bf16.msra.mxu0 %v3736_v7 }
 0x255   :  { %3107 = vmatprep.subr.bf16.mxu0 %v3469_v5 }
 0x256   :  { %3086 = vmatpush3.bf16.msra.mxu1 %v4007_v40 }
 0x257   :  { %3096 = vmatmul.mubr.msk.bf16.vlgmr.msra.gmra.mrb[32].mxu0 %vm517_vm0, %v3901_v29  ;;  %3099 = vmatprep.subr.bf16.mxu1 %v3469_v5 }
 0x258   :  { %3108 = vmatpush3.bf16.msra.mxu0 %v3764_v11  ;;  %3111 = vmatprep.mubr.msk.bf16.mxu0 %vm3470_vm1, %v3469_v5 }
 0x259   :  { %3109 = vmatprep.subr.bf16.mxu0 %v3469_v5 }
 0x25c   :  { %3110 = vmatpush3.bf16.msra.mxu0 %v3771_v12 }
 0x25d   :  { %3131 = vmatprep.subr.bf16.mxu0 %v3469_v5 }
 0x25f   :  { %3112 = vmatmul.mubr.msk.bf16.vlgmr.msra.gmra.mrb[36].mxu0 %vm517_vm0, %v3901_v29 }
 0x260   :  { %3132 = vmatpush3.bf16.msra.mxu0 %v3827_v10  ;;  %3135 = vmatprep.mubr.msk.bf16.mxu0 %vm3470_vm1, %v3469_v5 }
 0x261   :  { %3133 = vmatprep.subr.bf16.mxu0 %v3469_v5 }
 0x264   :  { %3134 = vmatpush3.bf16.msra.mxu0 %v3841_v26 }
 0x265   :  { %3139 = vmatprep.subr.bf16.mxu0 %v3469_v5 }
 0x31a   :  { %v1330_v49 = vpop.f32.mrb[28].mxu1  ;;  %v1453_v50 = vpop.f32.mrb[24].mxu0 }
 0x31b   :  { %v3252_v52 = vadd.f32 %v4017_v44, %v1330_v49  ;;  %v3049_v53 = vpop.f32.mrb[29].mxu1  ;;  %v3065_v56 = vpop.f32.mrb[25].mxu0  ;;  %v3254_v63 = vadd.f32 %v4025_v51, %v1453_v50  ;;  %v4034_v50 = vld [vmem:[%s4259_s7 + $0x5] ss:$0 sm:$0xff] }
 0x31c   :  { %v1333_v57 = vpop.f32.mrb[30].mxu1  ;;  %v1456_v58 = vpop.f32.mrb[26].mxu0 }
 0x31d   :  { %v2737_v59 = vmul.f32 -1.442695, %v3252_v52  ;;  %v3050_v61 = vpop.f32.mrb[31].mxu1  ;;  %v3066_v62 = vpop.f32.mrb[27].mxu0  ;;  %v2746_v0 = vmul.f32 -1.442695, %v3254_v63 }
 0x31e   :  { %v4040_v58 = vld [vmem:[%s4258_s6 + $0x5] ss:$0 sm:$0xff] }
 0x31f   :  { %3395 = vpow2.f32 %v2737_v59 }
 0x320   :  { %3397 = vpow2.f32 %v2746_v0 }
 0x322   :  { %v1518_v1 = vpop.f32.mrb[32].mxu1  ;;  %v1576_v2 = vpop.f32.mrb[28].mxu0 }
 0x323   :  { %v3073_v3 = vpop.f32.mrb[33].mxu1  ;;  %v3081_v6 = vpop.f32.mrb[29].mxu0  ;;  %v1577_v56 = vadd.f32 %v4034_v50, %v1576_v2  ;;  %v1519_v62 = vadd.f32 %v4040_v58, %v1518_v1 }
 0x324   :  { %v1521_v13 = vpop.f32.mrb[34].mxu1  ;;  %v1579_v14 = vpop.f32.mrb[30].mxu0 }
 0x325   :  { %v3074_v16 = vpop.f32.mrb[35].mxu1  ;;  %v3082_v17 = vpop.f32.mrb[31].mxu0 }
 0x329   :  { %v3396_v18 = vpop.eup %3395 }
 0x32a   :  { %v1340_v19 = vadd.f32 1.0, %v3396_v18  ;;  %v1687_v21 = vpop.f32.mrb[32].mxu0  ;;  %v3398_v49 = vpop.eup %3397 }
 0x32b   :  { %v1688_v22 = vadd.f32 %v3850_v27, %v1687_v21  ;;  %v3097_v33 = vpop.f32.mrb[33].mxu0  ;;  %v1463_v53 = vadd.f32 1.0, %v3398_v49 }
 0x32c   :  { %3399 = vrcp.f32 %v1340_v19  ;;  %v1690_v42 = vpop.f32.mrb[34].mxu0 }
 0x32d   :  { %v1693_v43 = vadd.f32 %v1688_v22, %v3858_v37  ;;  %v3098_v46 = vpop.f32.mrb[35].mxu0 }
 0x32f   :  { %v2760_v47 = vmul.f32 -1.442695, %v1693_v43 }
 0x331   :  { %3401 = vpow2.f32 %v2760_v47 }
 0x332   :  { %v1781_v52 = vpop.f32.mrb[36].mxu0  ;;  %3403 = vrcp.f32 %v1463_v53 }
 0x333   :  { %v3113_v57 = vpop.f32.mrb[37].mxu0  ;;  %v1782_v18 = vadd.f32 %v3883_v60, %v1781_v52 }
 0x334   :  { %v1784_v37 = vpop.f32.mrb[38].mxu0 }
 0x335   :  { %v3114_v59 = vpop.f32.mrb[39].mxu0 }
 0x336   :  { %v3400_v61 = vpop.eup %3399 }
 0x337   :  { %v1582_v63 = vmul.f32 %v3400_v61, %v1577_v56 }
 0x339   :  { %v1583_v0 = vadd.f32 %v1582_v63, %v1519_v62 }
 0x33b   :  { %v3402_v3 = vpop.eup %3401  ;;  %3405 = vtanh.f32 %v1583_v0 }
 0x33c   :  { %v1697_v6 = vadd.f32 1.0, %v3402_v3  ;;  %v3404_v13 = vpop.eup %3403 }
 0x33d   :  { %v1585_v2 = vsub.f32 1.0, %v3404_v13  ;;  %v1587_v16 = vmul.f32 %v3404_v13, %v3930_v32 }
 0x33e   :  { %3407 = vrcp.f32 %v1697_v6 }
 0x345   :  { %v3406_v14 = vpop.eup %3405 }
 0x346   :  { %v1586_v17 = vmul.f32 %v3406_v14, %v1585_v2 }
 0x348   :  { %v3408_v19 = vpop.eup %3407  ;;  %v4045_v21 = vadd.f32 %v1587_v16, %v1586_v17 }
 0x349   :  { %v1787_v22 = vmul.f32 %v3408_v19, %v1782_v18 }
 0x34a   :  { %v4049_v1 = vpack.c.bf16 %v4045_v21, %v4045_v21 }
 0x34b   :  { %v1788_v33 = vadd.f32 %v1787_v22, %v3872_v54  ;;  %v4071_v54 = vld [vmem:[%s4261_s9] ss:$0 sm:$0xff] }
 0x34c   :  { %3088 = vmatmul.mubr.msk.bf16.vlgmr.msra.gmra.mrb[36].mxu1 %vm517_vm0, %v4049_v1 }
 0x34d   :  { %3100 = vmatpush3.bf16.msra.mxu1 %v3800_v8  ;;  %3103 = vmatprep.mubr.msk.bf16.mxu1 %vm3470_vm1, %v3469_v5 }
 0x34e   :  { %3101 = vmatprep.subr.bf16.mxu1 %v3469_v5 }
 0x351   :  { %3102 = vmatpush3.bf16.msra.mxu1 %v3808_v15 }
 0x352   :  { %3115 = vmatprep.subr.bf16.mxu1 %v3469_v5 }
 0x354   :  { %3104 = vmatmul.mubr.msk.bf16.vlgmr.msra.gmra.mrb[40].mxu1 %vm517_vm0, %v3901_v29 }
 0x355   :  { %3116 = vmatpush3.bf16.msra.mxu1 %v3822_v24  ;;  %3119 = vmatprep.mubr.msk.bf16.mxu1 %vm3470_vm1, %v3469_v5 }
 0x356   :  { %3117 = vmatprep.subr.bf16.mxu1 %v3469_v5 }
 0x359   :  { %3118 = vmatpush3.bf16.msra.mxu1 %v3836_v25 }
 0x35a   :  { %3123 = vmatprep.subr.bf16.mxu1 %v3469_v5 }
 0x41f   :  { %v1645_v32 = vpop.f32.mrb[36].mxu1 }
 0x420   :  { %v1646_v42 = vadd.f32 %v4071_v54, %v1645_v32  ;;  %v3089_v29 = vpop.f32.mrb[37].mxu1 }
 0x421   :  { %v1648_v43 = vpop.f32.mrb[38].mxu1 }
 0x422   :  { %v1651_v46 = vmax.f32 %v1646_v42, 0.0  ;;  %v3090_v47 = vpop.f32.mrb[39].mxu1 }
 0x424   :  { %1652 = vst.msk [vmem:[%s4262_s10] sm:$0xff] %vm517_vm0, %v1651_v46 }
 0x427   :  { %v1734_v49 = vpop.f32.mrb[40].mxu1 }
 0x428   :  { %v1735_v52 = vadd.f32 %v3877_v55, %v1734_v49  ;;  %v3105_v53 = vpop.f32.mrb[41].mxu1 }
 0x429   :  { %v1737_v56 = vpop.f32.mrb[42].mxu1 }
 0x42a   :  { %v1740_v57 = vadd.f32 %v1735_v52, %v3865_v45  ;;  %v3106_v37 = vpop.f32.mrb[43].mxu1 }
 0x42c   :  { %v2762_v59 = vmul.f32 -1.442695, %v1740_v57 }
 0x42e   :  { %3409 = vpow2.f32 %v2762_v59 }
 0x438   :  { %v3410_v61 = vpop.eup %3409 }
 0x439   :  { %v1744_v62 = vadd.f32 1.0, %v3410_v61 }
 0x43b   :  { %3411 = vrcp.f32 %v1744_v62 }
 0x43c   :  { %3413 = vtanh.f32 %v1788_v33 }
 0x445   :  { %v3412_v63 = vpop.eup %3411 }
 0x446   :  { %v1790_v0 = vsub.f32 1.0, %v3412_v63  ;;  %v3414_v3 = vpop.eup %3413  ;;  %v1792_v13 = vmul.f32 %v3412_v63, %v3887_v23 }
 0x448   :  { %v1791_v6 = vmul.f32 %v3414_v3, %v1790_v0 }
 0x44a   :  { %v4081_v2 = vadd.f32 %v1792_v13, %v1791_v6 }
 0x44c   :  { %v4085_v14 = vpack.c.bf16 %v4081_v2, %v4081_v2 }
 0x44e   :  { %3120 = vmatmul.mubr.msk.bf16.vlgmr.msra.gmra.mrb[44].mxu1 %vm517_vm0, %v4085_v14  ;;  %3136 = vmatmul.mubr.msk.bf16.vlgmr.msra.gmra.mrb[40].mxu0 %vm517_vm0, %v4085_v14 }
 0x44f   :  { %3124 = vmatpush3.bf16.msra.mxu1 %v3892_v20  ;;  %3140 = vmatpush3.bf16.msra.mxu0 %v3897_v28 }
 0x450   :  { %3125 = vmatprep.subr.bf16.mxu1 %v3469_v5  ;;  %3141 = vmatprep.subr.bf16.mxu0 %v3469_v5 }
 0x451   :  { %3127 = vmatprep.mubr.msk.bf16.mxu1 %vm3470_vm1, %v3469_v5  ;;  %3143 = vmatprep.mubr.msk.bf16.mxu0 %vm3470_vm1, %v3469_v5 }
 0x453   :  { %3126 = vmatpush3.bf16.msra.mxu1 %v3912_v9  ;;  %3142 = vmatpush3.bf16.msra.mxu0 %v3917_v30 }
 0x454   :  { %3147 = vmatprep.subr.bf16.mxu1 %v3469_v5  ;;  %3155 = vmatprep.subr.bf16.mxu0 %v3469_v5 }
 0x45a   :  { %3128 = vmatmul.mubr.msk.bf16.vlgmr.msra.gmra.mrb[44].mxu1 %vm517_vm0, %v4049_v1  ;;  %3144 = vmatmul.mubr.msk.bf16.vlgmr.msra.gmra.mrb[40].mxu0 %vm517_vm0, %v4049_v1 }
 0x45b   :  { %3148 = vmatpush3.bf16.msra.mxu1 %v3939_v34  ;;  %3156 = vmatpush3.bf16.msra.mxu0 %v3944_v35 }
 0x45c   :  { %3149 = vmatprep.subr.bf16.mxu1 %v3469_v5  ;;  %3157 = vmatprep.subr.bf16.mxu0 %v3469_v5 }
 0x45d   :  { %3151 = vmatprep.mubr.msk.bf16.mxu1 %vm3470_vm1, %v3469_v5  ;;  %3159 = vmatprep.mubr.msk.bf16.mxu0 %vm3470_vm1, %v3469_v5 }
 0x45f   :  { %3150 = vmatpush3.bf16.msra.mxu1 %v3953_v36  ;;  %3158 = vmatpush3.bf16.msra.mxu0 %v3958_v38 }
 0x460   :  { %3171 = vmatprep.subr.bf16.mxu0 %v3469_v5  ;;  %3163 = vmatprep.subr.bf16.mxu1 %v3469_v5 }
 0x462   :  { %3152 = vmatmul.mubr.msk.bf16.vlgmr.msra.gmra.mrb[48].mxu1 %vm517_vm0, %v4085_v14  ;;  %3160 = vmatmul.mubr.msk.bf16.vlgmr.msra.gmra.mrb[44].mxu0 %vm517_vm0, %v4049_v1 }
 0x463   :  { %3172 = vmatpush3.bf16.msra.mxu0 %v3725_v4  ;;  %3175 = vmatprep.mubr.msk.bf16.mxu0 %vm3470_vm1, %v3469_v5 }
 0x464   :  { %3173 = vmatprep.subr.bf16.mxu0 %v3469_v5  ;;  %3164 = vmatpush3.bf16.msra.mxu1 %v4000_v39 }
 0x465   :  { %3165 = vmatprep.subr.bf16.mxu1 %v3469_v5  ;;  %3167 = vmatprep.mubr.msk.bf16.mxu1 %vm3470_vm1, %v3469_v5 }
 0x467   :  { %3174 = vmatpush3.bf16.msra.mxu0 %v3736_v7 }
 0x468   :  { %3187 = vmatprep.subr.bf16.mxu0 %v3469_v5  ;;  %3166 = vmatpush3.bf16.msra.mxu1 %v4007_v40 }
 0x469   :  { %3179 = vmatprep.subr.bf16.mxu1 %v3469_v5 }
 0x46a   :  { %3176 = vmatmul.mubr.msk.bf16.vlgmr.msra.gmra.mrb[48].mxu0 %vm517_vm0, %v4085_v14 }
 0x46b   :  { %3188 = vmatpush3.bf16.msra.mxu0 %v3764_v11  ;;  %3191 = vmatprep.mubr.msk.bf16.mxu0 %vm3470_vm1, %v3469_v5 }
 0x46c   :  { %3189 = vmatprep.subr.bf16.mxu0 %v3469_v5 }
 0x46f   :  { %3190 = vmatpush3.bf16.msra.mxu0 %v3771_v12 }
 0x470   :  { %3211 = vmatprep.subr.bf16.mxu0 %v3469_v5 }
 0x472   :  { %3192 = vmatmul.mubr.msk.bf16.vlgmr.msra.gmra.mrb[52].mxu0 %vm517_vm0, %v4085_v14 }
 0x473   :  { %3212 = vmatpush3.bf16.msra.mxu0 %v3827_v10  ;;  %3215 = vmatprep.mubr.msk.bf16.mxu0 %vm3470_vm1, %v3469_v5 }
 0x474   :  { %3213 = vmatprep.subr.bf16.mxu0 %v3469_v5 }
 0x477   :  { %3214 = vmatpush3.bf16.msra.mxu0 %v3841_v26 }
 0x478   :  { %3219 = vmatprep.subr.bf16.mxu0 %v3469_v5 }
 0x52d   :  { %v1872_v4 = vpop.f32.mrb[44].mxu1  ;;  %v1959_v7 = vpop.f32.mrb[40].mxu0 }
 0x52e   :  { %v3256_v11 = vadd.f32 %v4017_v44, %v1872_v4  ;;  %v3129_v12 = vpop.f32.mrb[45].mxu1  ;;  %v3145_v45 = vpop.f32.mrb[41].mxu0  ;;  %v3258_v19 = vadd.f32 %v4025_v51, %v1959_v7 }
 0x52f   :  { %v1875_v23 = vpop.f32.mrb[46].mxu1  ;;  %v1962_v16 = vpop.f32.mrb[42].mxu0 }
 0x530   :  { %v2766_v17 = vmul.f32 -1.442695, %v3256_v11  ;;  %v3130_v18 = vpop.f32.mrb[47].mxu1  ;;  %v3146_v10 = vpop.f32.mrb[43].mxu0  ;;  %v2769_v22 = vmul.f32 -1.442695, %v3258_v19 }
 0x532   :  { %3415 = vpow2.f32 %v2766_v17 }
 0x533   :  { %3417 = vpow2.f32 %v2769_v22 }
 0x535   :  { %v2006_v1 = vpop.f32.mrb[48].mxu1  ;;  %v2046_v33 = vpop.f32.mrb[44].mxu0 }
 0x536   :  { %v3153_v26 = vpop.f32.mrb[49].mxu1  ;;  %v3161_v32 = vpop.f32.mrb[45].mxu0  ;;  %v2047_v13 = vadd.f32 %v4034_v50, %v2046_v33 }
 0x537   :  { %v2009_v42 = vpop.f32.mrb[50].mxu1  ;;  %v2049_v29 = vpop.f32.mrb[46].mxu0 }
 0x538   :  { %v3154_v43 = vpop.f32.mrb[51].mxu1  ;;  %v3162_v46 = vpop.f32.mrb[47].mxu0 }
 0x53c   :  { %v3416_v47 = vpop.eup %3415 }
 0x53d   :  { %v1882_v49 = vadd.f32 1.0, %v3416_v47  ;;  %v2140_v52 = vpop.f32.mrb[48].mxu0  ;;  %v3418_v62 = vpop.eup %3417 }
 0x53e   :  { %v2141_v53 = vadd.f32 %v3850_v27, %v2140_v52  ;;  %v3177_v56 = vpop.f32.mrb[49].mxu0  ;;  %v1969_v0 = vadd.f32 1.0, %v3418_v62  ;;  %v2007_v27 = vadd.f32 %v4040_v58, %v2006_v1 }
 0x53f   :  { %3419 = vrcp.f32 %v1882_v49  ;;  %v2143_v57 = vpop.f32.mrb[50].mxu0 }
 0x540   :  { %v2146_v37 = vadd.f32 %v2141_v53, %v3856_v31  ;;  %v3178_v59 = vpop.f32.mrb[51].mxu0 }
 0x542   :  { %v2775_v61 = vmul.f32 -1.442695, %v2146_v37 }
 0x544   :  { %3421 = vpow2.f32 %v2775_v61 }
 0x545   :  { %v2234_v63 = vpop.f32.mrb[52].mxu0  ;;  %3423 = vrcp.f32 %v1969_v0 }
 0x546   :  { %v3193_v3 = vpop.f32.mrb[53].mxu0  ;;  %v2235_v19 = vadd.f32 %v3883_v60, %v2234_v63 }
 0x547   :  { %v2237_v6 = vpop.f32.mrb[54].mxu0 }
 0x548   :  { %v3194_v4 = vpop.f32.mrb[55].mxu0 }
 0x549   :  { %v3420_v7 = vpop.eup %3419 }
 0x54a   :  { %v2052_v11 = vmul.f32 %v3420_v7, %v2047_v13 }
 0x54c   :  { %v2053_v12 = vadd.f32 %v2052_v11, %v2007_v27 }
 0x54e   :  { %v3422_v45 = vpop.eup %3421  ;;  %3425 = vtanh.f32 %v2053_v12 }
 0x54f   :  { %v2150_v31 = vadd.f32 1.0, %v3422_v45  ;;  %v3424_v23 = vpop.eup %3423 }
 0x550   :  { %v2055_v16 = vsub.f32 1.0, %v3424_v23  ;;  %v2057_v18 = vmul.f32 %v3424_v23, %v4045_v21 }
 0x551   :  { %3427 = vrcp.f32 %v2150_v31 }
 0x558   :  { %v3426_v17 = vpop.eup %3425 }
 0x559   :  { %v2056_v10 = vmul.f32 %v3426_v17, %v2055_v16 }
 0x55b   :  { %v3428_v22 = vpop.eup %3427  ;;  %v4159_v33 = vadd.f32 %v2057_v18, %v2056_v10 }
 0x55c   :  { %v2240_v26 = vmul.f32 %v3428_v22, %v2235_v19 }
 0x55d   :  { %v4163_v1 = vpack.c.bf16 %v4159_v33, %v4159_v33 }
 0x55e   :  { %v2241_v32 = vadd.f32 %v2240_v26, %v3870_v48 }
 0x55f   :  { %3168 = vmatmul.mubr.msk.bf16.vlgmr.msra.gmra.mrb[52].mxu1 %vm517_vm0, %v4163_v1 }
 0x560   :  { %3180 = vmatpush3.bf16.msra.mxu1 %v3800_v8  ;;  %3183 = vmatprep.mubr.msk.bf16.mxu1 %vm3470_vm1, %v3469_v5 }
 0x561   :  { %3181 = vmatprep.subr.bf16.mxu1 %v3469_v5 }
 0x564   :  { %3182 = vmatpush3.bf16.msra.mxu1 %v3808_v15 }
 0x565   :  { %3195 = vmatprep.subr.bf16.mxu1 %v3469_v5 }
 0x567   :  { %3184 = vmatmul.mubr.msk.bf16.vlgmr.msra.gmra.mrb[56].mxu1 %vm517_vm0, %v4085_v14 }
 0x568   :  { %3196 = vmatpush3.bf16.msra.mxu1 %v3822_v24  ;;  %3199 = vmatprep.mubr.msk.bf16.mxu1 %vm3470_vm1, %v3469_v5 }
 0x569   :  { %3197 = vmatprep.subr.bf16.mxu1 %v3469_v5 }
 0x56c   :  { %3198 = vmatpush3.bf16.msra.mxu1 %v3836_v25 }
 0x56d   :  { %3203 = vmatprep.subr.bf16.mxu1 %v3469_v5 }
 0x632   :  { %v2097_v8 = vpop.f32.mrb[52].mxu1 }
 0x633   :  { %v2098_v48 = vadd.f32 %v4071_v54, %v2097_v8  ;;  %v3169_v15 = vpop.f32.mrb[53].mxu1 }
 0x634   :  { %v2100_v60 = vpop.f32.mrb[54].mxu1 }
 0x635   :  { %v2103_v21 = vmax.f32 %v2098_v48, 0.0  ;;  %v3170_v42 = vpop.f32.mrb[55].mxu1 }
 0x637   :  { %2773 = vst.msk [vmem:[%s4262_s10 + $0x8] sm:$0xff] %vm517_vm0, %v2103_v21 }
 0x63a   :  { %v2187_v24 = vpop.f32.mrb[56].mxu1 }
 0x63b   :  { %v2188_v14 = vadd.f32 %v3877_v55, %v2187_v24  ;;  %v3185_v29 = vpop.f32.mrb[57].mxu1 }
 0x63c   :  { %v2190_v43 = vpop.f32.mrb[58].mxu1 }
 0x63d   :  { %v2193_v25 = vadd.f32 %v2188_v14, %v3863_v41  ;;  %v3186_v46 = vpop.f32.mrb[59].mxu1 }
 0x63f   :  { %v2777_v47 = vmul.f32 -1.442695, %v2193_v25 }
 0x641   :  { %3429 = vpow2.f32 %v2777_v47 }
 0x64b   :  { %v3430_v49 = vpop.eup %3429 }
 0x64c   :  { %v2197_v52 = vadd.f32 1.0, %v3430_v49 }
 0x64e   :  { %3431 = vrcp.f32 %v2197_v52 }
 0x64f   :  { %3433 = vtanh.f32 %v2241_v32 }
 0x658   :  { %v3432_v53 = vpop.eup %3431 }
 0x659   :  { %v2243_v56 = vsub.f32 1.0, %v3432_v53  ;;  %v3434_v57 = vpop.eup %3433  ;;  %v2245_v59 = vmul.f32 %v3432_v53, %v4081_v2 }
 0x65b   :  { %v2244_v37 = vmul.f32 %v3434_v57, %v2243_v56 }
 0x65d   :  { %v2246_v61 = vadd.f32 %v2245_v59, %v2244_v37 }
 0x65f   :  { %v2247_v62 = vpack.c.bf16 %v2246_v61, %v2246_v61  ;;  %2559 = vst.msk [vmem:[#allocation2] sm:$0xff] %vm517_vm0, %v2246_v61 }
 0x661   :  { %3200 = vmatmul.mubr.msk.bf16.vlgmr.msra.gmra.mrb[60].mxu1 %vm517_vm0, %v2247_v62  ;;  %3216 = vmatmul.mubr.msk.bf16.vlgmr.msra.gmra.mrb[56].mxu0 %vm517_vm0, %v2247_v62 }
 0x662   :  { %3204 = vmatpush3.bf16.msra.mxu1 %v3892_v20  ;;  %3220 = vmatpush3.bf16.msra.mxu0 %v3897_v28 }
 0x663   :  { %3205 = vmatprep.subr.bf16.mxu1 %v3469_v5  ;;  %3221 = vmatprep.subr.bf16.mxu0 %v3469_v5 }
 0x664   :  { %3207 = vmatprep.mubr.msk.bf16.mxu1 %vm3470_vm1, %v3469_v5  ;;  %3223 = vmatprep.mubr.msk.bf16.mxu0 %vm3470_vm1, %v3469_v5 }
 0x666   :  { %3206 = vmatpush3.bf16.msra.mxu1 %v3912_v9  ;;  %3222 = vmatpush3.bf16.msra.mxu0 %v3917_v30 }
 0x667   :  { %3227 = vmatprep.subr.bf16.mxu1 %v3469_v5  ;;  %3235 = vmatprep.subr.bf16.mxu0 %v3469_v5 }
 0x66d   :  { %3208 = vmatmul.mubr.msk.bf16.vlgmr.msra.gmra.mrb[60].mxu1 %vm517_vm0, %v4163_v1  ;;  %3224 = vmatmul.mubr.msk.bf16.vlgmr.msra.gmra.mrb[56].mxu0 %vm517_vm0, %v4163_v1 }
 0x66e   :  { %3228 = vmatpush3.bf16.msra.mxu1 %v3939_v34  ;;  %3236 = vmatpush3.bf16.msra.mxu0 %v3944_v35 }
 0x66f   :  { %3229 = vmatprep.subr.bf16.mxu1 %v3469_v5  ;;  %3237 = vmatprep.subr.bf16.mxu0 %v3469_v5 }
 0x670   :  { %3231 = vmatprep.mubr.msk.bf16.mxu1 %vm3470_vm1, %v3469_v5  ;;  %3239 = vmatprep.mubr.msk.bf16.mxu0 %vm3470_vm1, %v3469_v5 }
 0x672   :  { %3230 = vmatpush3.bf16.msra.mxu1 %v3953_v36  ;;  %3238 = vmatpush3.bf16.msra.mxu0 %v3958_v38 }
 0x673   :  { %3243 = vmatprep.subr.bf16.mxu1 %v3469_v5 }
 0x675   :  { %3232 = vmatmul.mubr.msk.bf16.vlgmr.msra.gmra.mrb[64].mxu1 %vm517_vm0, %v2247_v62  ;;  %3240 = vmatmul.mubr.msk.bf16.vlgmr.msra.gmra.mrb[60].mxu0 %vm517_vm0, %v4163_v1 }
 0x676   :  { %3244 = vmatpush3.bf16.msra.mxu1 %v4000_v39  ;;  %3247 = vmatprep.mubr.msk.bf16.mxu1 %vm3470_vm1, %v3469_v5 }
 0x677   :  { %3245 = vmatprep.subr.bf16.mxu1 %v3469_v5 }
 0x67a   :  { %3246 = vmatpush3.bf16.msra.mxu1 %v4007_v40 }
 0x740   :  { %v2325_v41 = vpop.f32.mrb[60].mxu1  ;;  %v2412_v55 = vpop.f32.mrb[56].mxu0 }
 0x741   :  { %v3260_v20 = vadd.f32 %v4017_v44, %v2325_v41  ;;  %v3209_v28 = vpop.f32.mrb[61].mxu1  ;;  %v3225_v9 = vpop.f32.mrb[57].mxu0  ;;  %v3262_v39 = vadd.f32 %v4025_v51, %v2412_v55 }
 0x742   :  { %v2328_v30 = vpop.f32.mrb[62].mxu1  ;;  %v2415_v34 = vpop.f32.mrb[58].mxu0 }
 0x743   :  { %v2781_v35 = vmul.f32 -1.442695, %v3260_v20  ;;  %v3210_v36 = vpop.f32.mrb[63].mxu1  ;;  %v3226_v38 = vpop.f32.mrb[59].mxu0  ;;  %v2784_v2 = vmul.f32 -1.442695, %v3262_v39 }
 0x745   :  { %3435 = vpow2.f32 %v2781_v35 }
 0x746   :  { %3437 = vpow2.f32 %v2784_v2 }
 0x748   :  { %v2459_v63 = vpop.f32.mrb[64].mxu1  ;;  %v2499_v0 = vpop.f32.mrb[60].mxu0 }
 0x749   :  { %v3233_v5 = vpop.f32.mrb[65].mxu1  ;;  %v3241_v3 = vpop.f32.mrb[61].mxu0  ;;  %v2500_v12 = vadd.f32 %v4034_v50, %v2499_v0  ;;  %v2460_v51 = vadd.f32 %v4040_v58, %v2459_v63 }
 0x74a   :  { %v2462_v40 = vpop.f32.mrb[66].mxu1  ;;  %v2502_v6 = vpop.f32.mrb[62].mxu0 }
 0x74b   :  { %v3234_v13 = vpop.f32.mrb[67].mxu1  ;;  %v3242_v4 = vpop.f32.mrb[63].mxu0 }
 0x74f   :  { %v3436_v44 = vpop.eup %3435 }
 0x750   :  { %v2335_v7 = vadd.f32 1.0, %v3436_v44  ;;  %v3438_v27 = vpop.eup %3437 }
 0x751   :  { %v2422_v11 = vadd.f32 1.0, %v3438_v27 }
 0x752   :  { %3439 = vrcp.f32 %v2335_v7 }
 0x753   :  { %3441 = vrcp.f32 %v2422_v11 }
 0x75c   :  { %v3440_v45 = vpop.eup %3439 }
 0x75d   :  { %v2505_v31 = vmul.f32 %v3440_v45, %v2500_v12  ;;  %v3442_v16 = vpop.eup %3441 }
 0x75e   :  { %v2508_v17 = vsub.f32 1.0, %v3442_v16  ;;  %v2510_v10 = vmul.f32 %v3442_v16, %v4159_v33 }
 0x75f   :  { %v2506_v23 = vadd.f32 %v2505_v31, %v2460_v51 }
 0x761   :  { %3443 = vtanh.f32 %v2506_v23 }
 0x76b   :  { %v3444_v18 = vpop.eup %3443 }
 0x76c   :  { %v2509_v19 = vmul.f32 %v3444_v18, %v2508_v17 }
 0x76e   :  { %v2511_v22 = vadd.f32 %v2510_v10, %v2509_v19 }
 0x770   :  { %v2512_v26 = vpack.c.bf16 %v2511_v22, %v2511_v22  ;;  %2561 = vst.msk [vmem:[#allocation2 + $0x8] sm:$0xff] %vm517_vm0, %v2511_v22 }
 0x772   :  { %3248 = vmatmul.mubr.msk.bf16.vlgmr.msra.gmra.mrb[68].mxu1 %vm517_vm0, %v2512_v26 }
 0x773   :  { %3456 = shalt.err (!%p3453_p4)
}
 0x774   :  { %s3457_s22 = scalar_lea.hbm %s4263_s11, 256 }
 0x775   :  { %p3458_p5 = scmp.ne.s32.totalorder %s4263_s11, %s3457_s22  ;;  %p3461_p6 = scmp.lt.u32.totalorder %s3457_s22, %s4263_s11 }
 0x777   :  { %p3463_p7 = pnand %p3461_p6, %p3458_p5 }
 0x779   :  { %3466 = shalt.err (!%p3463_p7)
}
 0x77a   :  { %s3472_s2 = smov 128   ;;  %s3473_s25 = smov 8  }
 0x77b   :  { %2575 = dma.vmem_to_hbm [thread:$0]  %s2570_s20, 256, %s4263_s11, [#allocation3], %s3472_s2, %s3472_s2, %s3473_s25  }
 0x845   :  { %v2550_v50 = vpop.f32.mrb[68].mxu1 }
 0x846   :  { %v2551_v58 = vadd.f32 %v4071_v54, %v2550_v50  ;;  %v3249_v33 = vpop.f32.mrb[69].mxu1 }
 0x847   :  { %v2553_v1 = vpop.f32.mrb[70].mxu1 }
 0x848   :  { %v2556_v32 = vmax.f32 %v2551_v58, 0.0  ;;  %v3250_v8 = vpop.f32.mrb[71].mxu1 }
 0x84a   :  { %2788 = vst.msk [vmem:[%s4262_s10 + $0x10] sm:$0xff] %vm517_vm0, %v2556_v32 }
 0x84b   :  { %3467 = dma.done.wait [#allocation3], 256  }
 0x84c   :  { %3468 = vsyncadd [#allocation3], 4294967040 }
 0x84d   :  { %2581 = vsyncpa [#allocation3], 1 }

// kernel: prob_encoder_forward.2
= control target key start
LH: loop header
LB: loop body
LE: loop exit
PB: predicated region body
PF: predicated region fallthrough
CT: control target
= control target key end

     0   :  { %13 = vsyncpa [#allocation3], 0  ;;  %s11684_s0 = inlined_call_operand.vmem [shape: bf16[6,28,28], index: 0, kind: input, shape index: {}]   ;;  %s11685_s1 = inlined_call_operand.vmem [shape: bf16[6,64,16], index: 1, kind: input, shape index: {}]   ;;  %s11686_s2 = inlined_call_operand.hbm [shape: bf16[5,28,512], index: 2, kind: input, shape index: {}]   ;;  %s11687_s3 = inlined_call_operand.hbm [shape: f32[1,240], index: 3, kind: input, shape index: {}]   ;;  %s11688_s4 = inlined_call_operand.hbm [shape: bf16[5,240,512], index: 4, kind: input, shape index: {}]   ;;  %s11689_s5 = inlined_call_operand.hbm [shape: f32[1,200], index: 5, kind: input, shape index: {}]   ;;  %s11690_s6 = inlined_call_operand.hbm [shape: f32[6,16,50], index: 6, kind: output, shape index: {0}]   ;;  %s11691_s7 = inlined_call_operand.vmem [shape: bf16[6,64,50], index: 7, kind: output, shape index: {1}]  }
   0x1   :  { %14 = vsyncpa [#allocation6], 0 }
   0x2   :  { %15 = vsyncpa [#allocation9], 0 }
   0x3   :  { %16 = vsyncpa [#allocation4], 0  ;;  %s9495_s24 = smov [#allocation5]   ;;  %s9496_s26 = smov [#allocation2]  }
   0x4   :  { %s39_s25 = sshll.u32 %s9495_s24, 4  ;;  %s26_s27 = sshll.u32 %s9496_s26, 4  ;;  %s40_s25 = int_to_ptr.vmem [resolvable:$true] %s39_s25  ;;  %s9548_s27 = int_to_ptr.vmem [resolvable:$true] %s26_s27 }
   0x5   :  { %s9377_s30 = scalar_lea.hbm %s11687_s3, 32 }
   0x6   :  { %p9378_p0 = scmp.ne.s32.totalorder %s11687_s3, %s9377_s30  ;;  %p9381_p1 = scmp.lt.u32.totalorder %s9377_s30, %s11687_s3 }
   0x8   :  { %p9383_p2 = pnand %p9381_p1, %p9378_p0 }
   0xa   :  { %9386 = shalt.err (!%p9383_p2)
}
   0xb   :  { %s9387_s12 = scalar_lea.vmem %s40_s25, 32  ;;  %p9392_p4 = scmp.lt.s32.totalorder %s40_s25, %s40_s25 }
   0xc   :  { %p9388_p3 = scmp.ne.s32.totalorder %s40_s25, %s9387_s12  ;;  %p9393_p5 = scmp.lt.s32.totalorder %s9387_s12, %s9387_s12 }
   0xe   :  { %p9394_p6 = por %p9393_p5, %p9392_p4 }
  0x10   :  { %p9395_p7 = pnand %p9394_p6, %p9388_p3 }
  0x12   :  { %9398 = shalt.err (!%p9395_p7)
}
  0x13   :  { %42 = dma.hbm_to_vmem [thread:$0]  %s11687_s3, 32, %s40_s25, [#allocation6]  }
  0x14   :  { %s9399_s17 = scalar_lea.hbm %s11686_s2, 5120 }
  0x15   :  { %p9400_p8 = scmp.ne.s32.totalorder %s11686_s2, %s9399_s17  ;;  %p9403_p9 = scmp.lt.u32.totalorder %s9399_s17, %s11686_s2 }
  0x17   :  { %p9405_p10 = pnand %p9403_p9, %p9400_p8 }
  0x19   :  { %9408 = shalt.err (!%p9405_p10)
}
  0x1a   :  { %s9409_s22 = scalar_lea.vmem %s9548_s27, 5120  ;;  %p9414_p12 = scmp.lt.s32.totalorder %s9548_s27, %s9548_s27 }
  0x1b   :  { %p9410_p11 = scmp.ne.s32.totalorder %s9548_s27, %s9409_s22  ;;  %p9415_p13 = scmp.lt.s32.totalorder %s9409_s22, %s9409_s22 }
  0x1d   :  { %p9416_p0 = por %p9415_p13, %p9414_p12 }
  0x1f   :  { %p9417_p1 = pnand %p9416_p0, %p9410_p11 }
  0x21   :  { %9420 = shalt.err (!%p9417_p1)
}
  0x22   :  { %s9497_s3 = smov 256   ;;  %s9498_s23 = smov 16  }
  0x23   :  { %32 = dma.hbm_to_vmem [thread:$0]  %s11686_s2, 5120, %s9548_s27, [#allocation3], %s9497_s3, %s9497_s3, %s9498_s23  }
  0x24   :  { %s9499_s26 = smov [#allocation7]   ;;  %s9500_s29 = smov [#allocation8]  }
  0x25   :  { %s48_s28 = sshll.u32 %s9499_s26, 4  ;;  %s61_s30 = sshll.u32 %s9500_s29, 4  ;;  %s49_s28 = int_to_ptr.vmem [resolvable:$true] %s48_s28  ;;  %s62_s30 = int_to_ptr.vmem [resolvable:$true] %s61_s30 }
  0x26   :  { %s9421_s10 = scalar_lea.hbm %s11688_s4, 38400 }
  0x27   :  { %p9422_p2 = scmp.ne.s32.totalorder %s11688_s4, %s9421_s10  ;;  %p9425_p3 = scmp.lt.u32.totalorder %s9421_s10, %s11688_s4 }
  0x29   :  { %p9427_p4 = pnand %p9425_p3, %p9422_p2 }
  0x2b   :  { %9430 = shalt.err (!%p9427_p4)
}
  0x2c   :  { %s9431_s2 = scalar_lea.vmem %s49_s28, 38400  ;;  %p9436_p6 = scmp.lt.s32.totalorder %s49_s28, %s49_s28 }
  0x2d   :  { %p9432_p5 = scmp.ne.s32.totalorder %s49_s28, %s9431_s2  ;;  %p9437_p7 = scmp.lt.s32.totalorder %s9431_s2, %s9431_s2 }
  0x2f   :  { %p9438_p8 = por %p9437_p7, %p9436_p6 }
  0x31   :  { %p9439_p9 = pnand %p9438_p8, %p9432_p5 }
  0x33   :  { %9442 = shalt.err (!%p9439_p9)
}
  0x34   :  { %54 = dma.hbm_to_vmem [thread:$0]  %s11688_s4, 38400, %s49_s28, [#allocation6], %s9497_s3, %s9497_s3, %s9498_s23  }
  0x35   :  { %s9443_s18 = scalar_lea.hbm %s11689_s5, 32 }
  0x36   :  { %p9444_p10 = scmp.ne.s32.totalorder %s11689_s5, %s9443_s18  ;;  %p9447_p11 = scmp.lt.u32.totalorder %s9443_s18, %s11689_s5 }
  0x38   :  { %p9449_p12 = pnand %p9447_p11, %p9444_p10 }
  0x3a   :  { %9452 = shalt.err (!%p9449_p12)
}
  0x3b   :  { %s9453_s24 = scalar_lea.vmem %s62_s30, 32  ;;  %p9458_p0 = scmp.lt.s32.totalorder %s62_s30, %s62_s30 }
  0x3c   :  { %p9454_p13 = scmp.ne.s32.totalorder %s62_s30, %s9453_s24  ;;  %p9459_p1 = scmp.lt.s32.totalorder %s9453_s24, %s9453_s24 }
  0x3e   :  { %p9460_p2 = por %p9459_p1, %p9458_p0 }
  0x40   :  { %p9461_p3 = pnand %p9460_p2, %p9454_p13 }
  0x42   :  { %9464 = shalt.err (!%p9461_p3)
}
  0x43   :  { %64 = dma.hbm_to_vmem [thread:$0]  %s11689_s5, 32, %s62_s30, [#allocation9]  }
  0x44   :  { %9487 = dma.done.wait [#allocation3], 5120  }
  0x45   :  { %9488 = vsyncadd [#allocation3], 4294962176 }
  0x46   :  { %9489 = dma.done.wait [#allocation6], 38432  }
  0x47   :  { %9490 = vsyncadd [#allocation6], 4294928864 }
  0x48   :  { %9491 = dma.done.wait [#allocation9], 32  }
  0x49   :  { %9492 = vsyncadd [#allocation9], 4294967264  ;;  %v11729_v0 = vmov 0   ;;  %v8810_v1 = vld [vmem:[#allocation2 + $0x44] ss:$16 sps:$4 sm:$0xff]   ;;  %vm417_vm2 = vcmask 1045504  }
  0x4a   :  { %462 = vmatprep.mubr.bf16.mxu0 %v11729_v0  ;;  %585 = vmatprep.mubr.bf16.mxu1 %v11729_v0  ;;  %v8812_v2 = vld [vmem:[#allocation2 + $0x4c] ss:$16 sps:$4 sm:$0xff]   ;;  %vm110_vm0 = vsmask.f32 3328  ;;  %vm111_vm1 = vsmask.f32 7440 }
  0x4b   :  { %430 = vmatprep.subr.bf16.mxu0 %v8810_v1  ;;  %v8814_v3 = vld [vmem:[#allocation2 + $0x40] ss:$16 sps:$4 sm:$0xff]   ;;  %v8815_v4 = vld [vmem:[#allocation2 + $0x48] ss:$16 sps:$4 sm:$0xff]   ;;  %553 = vmatprep.subr.bf16.mxu1 %v8812_v2  ;;  %v9615_v10 = vld [vmem:[%s11684_s0 + $0x4] sm:$0xf] }
  0x4c   :  { %v8816_v5 = vld [vmem:[#allocation2 + $0x64] ss:$16 sps:$4 sm:$0x3f]   ;;  %431 = vmatpush1.bf16.msra.mxu0 %v8814_v3  ;;  %554 = vmatpush1.bf16.msra.mxu1 %v8815_v4  ;;  %v8818_v6 = vld [vmem:[#allocation2 + $0x6c] ss:$16 sps:$4 sm:$0x3f]   ;;  %vm9653_vm3 = vmor %vm110_vm0, %vm111_vm1 }
  0x4d   :  { %7597 = vmatprep.subr.msk.bf16.mxu0 %vm417_vm2, %v8816_v5  ;;  %v8820_v7 = vld [vmem:[#allocation2 + $0x60] ss:$16 sps:$4 sm:$0x3f]   ;;  %v8821_v8 = vld [vmem:[#allocation2 + $0x68] ss:$16 sps:$4 sm:$0x3f]   ;;  %7607 = vmatprep.subr.msk.bf16.mxu1 %vm417_vm2, %v8818_v6 }
  0x4e   :  { %v9610_v9 = vld [vmem:[%s11684_s0] sm:$0xf]  ;;  %v9620_v11 = vld [vmem:[%s11684_s0 + $0x8] sm:$0xf]  ;;  %v419_v12 = vsel %vm417_vm2, %v8820_v7, 0  ;;  %v425_v13 = vsel %vm417_vm2, %v8821_v8, 0 }
  0x4f   :  { %v114_v14 = vshrl.u32 %v9610_v9, 16  ;;  %v117_v15 = vshll.u32 %v9610_v9, 16  ;;  %v123_v16 = vshll.u32 %v9615_v10, 16  ;;  %v127_v17 = vshrl.u32 %v9615_v10, 16  ;;  %v9632_v19 = vld [vmem:[%s11684_s0 + $0xc] sm:$0x3] }
  0x50   :  { %433 = vmatpush1.bf16.msra.mxu0 %v419_v12  ;;  %556 = vmatpush1.bf16.msra.mxu1 %v425_v13  ;;  %v133_v18 = vshll.u32 %v9620_v11, 16  ;;  %v137_v20 = vshrl.u32 %v9620_v11, 16  ;;  %v9642_v25 = vld [vmem:[%s11684_s0 + $0x10] sm:$0xf]  ;;  %v9649_v33 = vld [vmem:[%s11684_s0 + $0x14] sm:$0xf] }
  0x51   :  { %v116_v21 = vrot.slane %v114_v14, 4  ;;  %v119_v22 = vrot.slane %v117_v15, 5  ;;  %v9635_v23 = vrot.slane %v114_v14, 5  ;;  %v9637_v24 = vrot.slane %v117_v15, 6  ;;  %v9662_v39 = vld [vmem:[%s11684_s0 + $0x18] sm:$0xf] }
  0x52   :  { %v125_v26 = vrot.slane %v123_v16, 5  ;;  %v129_v27 = vrot.slane %v127_v17, 4  ;;  %v1547_v28 = vrot.slane %v127_v17, 5  ;;  %v135_v30 = vrot.slane %v133_v18, 5  ;;  %v8824_v44 = vld [vmem:[#allocation2 + $0x4] ss:$16 sps:$4 sm:$0xff]  }
  0x53   :  { %v120_v29 = vor.u32 %v119_v22, %v116_v21  ;;  %v1545_v31 = vor.u32 %v9637_v24, %v9635_v23  ;;  %v1548_v32 = vrot.slane %v123_v16, 6  ;;  %v11749_v34 = vmov 0  ;;  %v9674_v49 = vld [vmem:[%s11684_s0 + $0x1c] sm:$0x3]  ;;  %v8822_v53 = vld [vmem:[#allocation2] ss:$16 sps:$4 sm:$0xff]   ;;  %796 = vmatprep.subr.bf16.mxu0 %v8824_v44 }
  0x54   :  { %v11750_v34 = vsel %vm9653_vm3, 4294967295, %v11749_v34  ;;  %v130_v35 = vor.u32 %v129_v27, %v125_v26  ;;  %v139_v36 = vrot.slane %v137_v20, 4  ;;  %v11725_v37 = vshll.u32 %v9632_v19, 16  ;;  %v8827_v54 = vld [vmem:[#allocation2 + $0xc] ss:$16 sps:$4 sm:$0xff]   ;;  %s9503_s27 = smov 78  }
  0x55   :  { %11751 = vst [vmem:[#allocation15_spill] sm:$0xff] %v11750_v34  ;;  %v148_v38 = vshrl.u32 %v9642_v25, 16  ;;  %v121_v40 = vrot.slane %v120_v29, 4  ;;  %v9664_v41 = vor.u32 %v1548_v32, %v1547_v28  ;;  %v1553_v42 = vrot.slane %v133_v18, 6  ;;  %v9687_v59 = vld [vmem:[%s11684_s0 + $0x20] sm:$0xf]  ;;  %919 = vmatprep.subr.bf16.mxu1 %v8827_v54 }
  0x56   :  { %v151_v43 = vshll.u32 %v9642_v25, 16  ;;  %v131_v45 = vrot.slane %v130_v35, 4  ;;  %v140_v46 = vor.u32 %v139_v36, %v135_v30  ;;  %v145_v47 = vrot.slane %v11725_v37, 5  ;;  %v8825_v1 = vld [vmem:[#allocation2 + $0x8] ss:$16 sps:$4 sm:$0xff]   ;;  %s9504_s15 = smov 106  }
  0x57   :  { %v150_v48 = vrot.slane %v148_v38, 4  ;;  %v126_v50 = vsel %vm9653_vm3, %v121_v40, %v125_v26  ;;  %vm389_vm4 = vcmask 228352   ;;  %v11723_v52 = vshll.u32 %v9649_v33, 16  ;;  %v9695_v2 = vld [vmem:[%s11684_s0 + $0x24] sm:$0xf]  ;;  %s9505_s11 = smov [#allocation10]  }
  0x58   :  { %v153_v51 = vrot.slane %v151_v43, 5  ;;  %v136_v55 = vsel %vm9653_vm3, %v131_v45, %v135_v30  ;;  %v141_v56 = vrot.slane %v140_v46, 4  ;;  %v1552_v57 = vrot.slane %v137_v20, 5  ;;  %v9728_v32 = vld [vmem:[%s11684_s0 + $0x28] sm:$0xf]  ;;  %s7562_s12 = sshll.u32 %s9505_s11, 4  ;;  %s7563_s12 = int_to_ptr.vmem [resolvable:$true] %s7562_s12 }
  0x59   :  { %v11724_v58 = vshrl.u32 %v9649_v33, 16  ;;  %v7580_v60 = vcombine.low %v126_v50, %v136_v55  ;;  %v159_v62 = vrot.slane %v11723_v52, 5  ;;  %v11721_v63 = vshll.u32 %v9662_v39, 16  ;;  %v9737_v40 = vld [vmem:[%s11684_s0 + $0x30] sm:$0xf]  ;;  %s9465_s13 = scalar_lea.vmem %s7563_s12, 1536  ;;  %p9470_p5 = scmp.lt.s32.totalorder %s7563_s12, %s7563_s12 }
  0x5a   :  { %v154_v61 = vor.u32 %v153_v51, %v150_v48  ;;  %v146_v3 = vsel %vm9653_vm3, %v141_v56, %v145_v47  ;;  %v9699_v4 = vor.u32 %v1553_v42, %v1552_v57  ;;  %v11722_v6 = vshrl.u32 %v9662_v39, 16  ;;  %v8828_v47 = vld [vmem:[#allocation2 + $0x24] ss:$16 sps:$4 sm:$0x3f]   ;;  %v9755_v55 = vld [vmem:[%s11684_s0 + $0x2c] sm:$0x3]  ;;  %p9466_p4 = scmp.ne.s32.totalorder %s7563_s12, %s9465_s13  ;;  %p9471_p6 = scmp.lt.s32.totalorder %s9465_s13, %s9465_s13 }
  0x5b   :  { %v163_v5 = vrot.slane %v11724_v58, 4  ;;  %7598 = vmatmul.mubr.msk.bf16.vlgmr.msra.gmra.mrb[0].mxu0 %vm389_vm4, %v7580_v60  ;;  %7608 = vmatmul.mubr.msk.bf16.vlgmr.msra.gmra.mrb[0].mxu1 %vm389_vm4, %v7580_v60  ;;  %v169_v8 = vrot.slane %v11721_v63, 5  ;;  %v11720_v12 = vshll.u32 %v9674_v49, 16  ;;  %v11719_v13 = vshrl.u32 %v9687_v59, 16  ;;  %v10219_v58 = vld [vmem:[%s11684_s0 + $0x5c] sm:$0x3] }
  0x5c   :  { %v155_v7 = vrot.slane %v154_v61, 4  ;;  %472 = vmatprep.mubr.bf16.mxu0 %v11729_v0  ;;  %595 = vmatprep.mubr.bf16.mxu1 %v11729_v0  ;;  %v173_v15 = vrot.slane %v11722_v6, 4  ;;  %v11718_v16 = vshll.u32 %v9687_v59, 16  ;;  %v11716_v17 = vshll.u32 %v9695_v2, 16  ;;  %v9764_v61 = vld [vmem:[%s11684_s0 + $0x34] sm:$0xf]  ;;  %p9472_p7 = por %p9471_p6, %p9470_p5 }
  0x5d   :  { %v164_v14 = vor.u32 %v163_v5, %v159_v62  ;;  %797 = vmatpush1.bf16.msra.mxu0 %v8822_v53  ;;  %920 = vmatpush1.bf16.msra.mxu1 %v8825_v1  ;;  %v11717_v20 = vshrl.u32 %v9695_v2, 16  ;;  %v184_v27 = vrot.slane %v11719_v13, 4  ;;  %v179_v30 = vrot.slane %v11720_v12, 5  ;;  %v8830_v54 = vld [vmem:[#allocation2 + $0x2c] ss:$16 sps:$4 sm:$0x3f]  }
  0x5e   :  { %v160_v18 = vsel %vm9653_vm3, %v155_v7, %v159_v62  ;;  %v174_v21 = vor.u32 %v173_v15, %v169_v8  ;;  %v187_v28 = vrot.slane %v11718_v16, 5  ;;  %v193_v35 = vrot.slane %v11716_v17, 5  ;;  %7634 = vmatprep.subr.msk.bf16.mxu0 %vm417_vm2, %v8828_v47  ;;  %v9769_v62 = vld [vmem:[%s11684_s0 + $0x38] sm:$0xf]  ;;  %7644 = vmatprep.subr.msk.bf16.mxu1 %vm417_vm2, %v8830_v54  ;;  %v8872_v17 = vld [vmem:[#allocation2 + $0x10c] ss:$16 sps:$4 sm:$0xff]   ;;  %p9473_p8 = pnand %p9472_p7, %p9466_p4 }
  0x5f   :  { %v7581_v22 = vcombine.low %v146_v3, %v160_v18  ;;  %v165_v26 = vrot.slane %v164_v14, 4  ;;  %v197_v36 = vrot.slane %v11717_v20, 4  ;;  %v11715_v42 = vshrl.u32 %v9728_v32, 16  ;;  %v10187_v13 = vld [vmem:[%s11684_s0 + $0x4c] sm:$0x3] }
  0x60   :  { %v175_v29 = vrot.slane %v174_v21, 4  ;;  %v188_v45 = vor.u32 %v187_v28, %v184_v27  ;;  %v11714_v46 = vshll.u32 %v9728_v32, 16  ;;  %v11713_v51 = vshrl.u32 %v9737_v40, 16 }
  0x61   :  { %v170_v44 = vsel %vm9653_vm3, %v165_v26, %v169_v8  ;;  %v198_v50 = vor.u32 %v197_v36, %v193_v35  ;;  %v11712_v53 = vshll.u32 %v9737_v40, 16  ;;  %v207_v56 = vrot.slane %v11715_v42, 4  ;;  %v9792_v36 = vld [vmem:[%s11684_s0 + $0x3c] sm:$0x3] }
  0x62   :  { %v180_v48 = vsel %vm9653_vm3, %v175_v29, %v179_v30  ;;  %v203_v60 = vrot.slane %v11714_v46, 5  ;;  %v189_v1 = vrot.slane %v188_v45, 4  ;;  %v218_v5 = vrot.slane %v11713_v51, 4  ;;  %v8832_v29 = vld [vmem:[#allocation2 + $0x20] ss:$16 sps:$4 sm:$0x3f]  }
  0x63   :  { %7599 = vmatmul.mubr.msk.bf16.gmra.mrb[4].mxu0 %vm389_vm4, %v7581_v22  ;;  %7609 = vmatmul.mubr.msk.bf16.gmra.mrb[4].mxu1 %vm389_vm4, %v7581_v22  ;;  %v7582_v57 = vcombine.low %v170_v44, %v180_v48  ;;  %v199_v3 = vrot.slane %v198_v50, 4  ;;  %v221_v7 = vrot.slane %v11712_v53, 5  ;;  %v11705_v14 = vshll.u32 %v9755_v55, 16  ;;  %v8833_v30 = vld [vmem:[#allocation2 + $0x28] ss:$16 sps:$4 sm:$0x3f]  }
  0x64   :  { %482 = vmatprep.mubr.bf16.mxu0 %v11729_v0  ;;  %605 = vmatprep.mubr.bf16.mxu1 %v11729_v0  ;;  %v208_v8 = vor.u32 %v207_v56, %v203_v60  ;;  %v11699_v15 = vshll.u32 %v9764_v61, 16  ;;  %v11704_v18 = vshrl.u32 %v9764_v61, 16  ;;  %v11692_v21 = vshll.u32 %v9769_v62, 16  ;;  %v9799_v45 = vld [vmem:[%s11684_s0 + $0x40] sm:$0xf] }
  0x65   :  { %v11698_v22 = vshrl.u32 %v9769_v62, 16  ;;  %v194_v26 = vsel %vm9653_vm3, %v189_v1, %v193_v35  ;;  %v204_v27 = vsel %vm9653_vm3, %v199_v3, %v203_v60  ;;  %v222_v28 = vor.u32 %v221_v7, %v218_v5  ;;  %v8839_v35 = vld [vmem:[#allocation2 + $0x84] ss:$16 sps:$4 sm:$0xff]   ;;  %v8842_v7 = vld [vmem:[#allocation2 + $0x8c] ss:$16 sps:$4 sm:$0xff]  }
  0x66   :  { %v213_v44 = vrot.slane %v11705_v14, 5  ;;  %v7583_v47 = vcombine.low %v194_v26, %v204_v27  ;;  %v209_v48 = vrot.slane %v208_v8, 4  ;;  %v227_v50 = vrot.slane %v11699_v15, 5  ;;  %v9813_v3 = vld [vmem:[%s11684_s0 + $0x44] sm:$0xf] }
  0x67   :  { %v231_v54 = vrot.slane %v11704_v18, 4  ;;  %v223_v56 = vrot.slane %v222_v28, 4  ;;  %v241_v60 = vrot.slane %v11698_v22, 4  ;;  %v785_v1 = vsel %vm417_vm2, %v8832_v29, 0  ;;  %v9904_v14 = vld [vmem:[%s11684_s0 + $0x5c] sm:$0x3] }
  0x68   :  { %799 = vmatpush1.bf16.msra.mxu0 %v785_v1  ;;  %v791_v5 = vsel %vm417_vm2, %v8833_v30, 0  ;;  %v11693_v8 = vshll.u32 %v9792_v36, 16  ;;  %v214_v26 = vsel %vm9653_vm3, %v209_v48, %v213_v44  ;;  %v11697_v28 = vshrl.u32 %v9799_v45, 16  ;;  %v9834_v48 = vld [vmem:[%s11684_s0 + $0x48] sm:$0xf] }
  0x69   :  { %922 = vmatpush1.bf16.msra.mxu1 %v791_v5  ;;  %1222 = vmatprep.subr.bf16.mxu0 %v8839_v35  ;;  %v232_v27 = vor.u32 %v231_v54, %v227_v50  ;;  %v11694_v29 = vshll.u32 %v9799_v45, 16  ;;  %v228_v30 = vsel %vm9653_vm3, %v223_v56, %v227_v50  ;;  %v11695_v1 = vshll.u32 %v9813_v3, 16  ;;  %v9843_v56 = vld [vmem:[%s11684_s0 + $0x50] sm:$0xf]  ;;  %v10071_v51 = vld [vmem:[%s11684_s0 + $0x1c] sm:$0x3] }
  0x6a   :  { %1345 = vmatprep.subr.bf16.mxu1 %v8842_v7  ;;  %v247_v44 = vrot.slane %v11693_v8, 5  ;;  %v7584_v54 = vcombine.low %v214_v26, %v228_v30  ;;  %v11700_v30 = vshll.u32 %v9834_v48, 16  ;;  %vm1540_vm5 = vsmask.f32 2304 }
  0x6b   :  { %7600 = vmatmul.mubr.msk.bf16.gmra.mrb[8].mxu0 %vm389_vm4, %v7582_v57  ;;  %7610 = vmatmul.mubr.msk.bf16.gmra.mrb[8].mxu1 %vm389_vm4, %v7582_v57  ;;  %v237_v57 = vrot.slane %v11692_v21, 5  ;;  %v233_v5 = vrot.slane %v232_v27, 4  ;;  %v252_v21 = vrot.slane %v11697_v28, 4  ;;  %v255_v50 = vrot.slane %v11694_v29, 5 }
  0x6c   :  { %492 = vmatprep.mubr.bf16.mxu0 %v11729_v0  ;;  %615 = vmatprep.mubr.bf16.mxu1 %v11729_v0  ;;  %v261_v7 = vrot.slane %v11695_v1, 5  ;;  %v11703_v29 = vshrl.u32 %v9834_v48, 16  ;;  %vm1541_vm6 = vsmask.f32 6416  ;;  %vm1048_vm8 = vcmask 1042432  }
  0x6d   :  { %v242_v35 = vor.u32 %v241_v60, %v237_v57  ;;  %v238_v26 = vsel %vm9653_vm3, %v233_v5, %v237_v57  ;;  %v256_v27 = vor.u32 %v255_v50, %v252_v21  ;;  %v9864_v21 = vld [vmem:[%s11684_s0 + $0x4c] sm:$0x3]  ;;  %v9869_v57 = vld [vmem:[%s11684_s0 + $0x54] sm:$0xf]  ;;  %vm9955_vm7 = vmor %vm1540_vm5, %vm1541_vm6  ;;  %vm1049_vm9 = vcmask 1046532  }
  0x6e   :  { %vm10000_vm10 = vmor %vm1048_vm8, %vm1049_vm9  ;;  %v8863_v53 = vld [vmem:[#allocation2 + $0xec] ss:$16 sps:$4 sm:$0x3f]   ;;  %v1069_v46 = vrot.slane %v10071_v51, 5  ;;  %v1099_v12 = vrot.slane %v10187_v13, 5  ;;  %v11761_v34 = vshll.u32 %v9632_v19, 16 }
  0x6f   :  { %v243_v60 = vrot.slane %v242_v35, 4  ;;  %v257_v50 = vrot.slane %v256_v27, 4  ;;  %v1556_v19 = vrot.slane %v9699_v4, 4  ;;  %vm2092_vm11 = vcmask 1041408  }
  0x70   :  { %vm2093_vm12 = vcmask 1045508   ;;  %vm3268_vm14 = vcmask 1040384   ;;  %vm3307_vm15 = vcmask 1043456   ;;  %vm3320_vm0 = vcmask 1044480  }
  0x71   :  { %v248_v35 = vsel %vm9653_vm3, %v243_v60, %v247_v44  ;;  %v271_v44 = vrot.slane %v11700_v30, 5  ;;  %v9878_v60 = vld [vmem:[%s11684_s0 + $0x58] sm:$0xf]  ;;  %v262_v27 = vsel %vm9653_vm3, %v257_v50, %v261_v7  ;;  %v11707_v30 = vshll.u32 %v9869_v57, 16  ;;  %vm10387_vm13 = vmor %vm2092_vm11, %vm2093_vm12 }
  0x72   :  { %v7585_v5 = vcombine.low %v238_v26, %v248_v35  ;;  %v11711_v26 = vshll.u32 %v9864_v21, 16  ;;  %vm3345_vm1 = vcmask 1046528   ;;  %vm3980_vm5 = vcmask 916480  }
  0x73   :  { %7601 = vmatmul.mubr.msk.bf16.gmra.mrb[12].mxu0 %vm389_vm4, %v7583_v47  ;;  %7611 = vmatmul.mubr.msk.bf16.gmra.mrb[12].mxu1 %vm389_vm4, %v7583_v47  ;;  %v11696_v47 = vshrl.u32 %v9813_v3, 16  ;;  %v295_v18 = vrot.slane %v11707_v30, 5  ;;  %vm6569_vm6 = vcmask 405508  }
  0x74   :  { %502 = vmatprep.mubr.bf16.mxu0 %v11729_v0  ;;  %625 = vmatprep.mubr.bf16.mxu1 %v11729_v0 }
  0x75   :  { %v265_v8 = vrot.slane %v11696_v47, 4  ;;  %v11702_v47 = vshrl.u32 %v9843_v56, 16 }
  0x77   :  { %v266_v1 = vor.u32 %v265_v8, %v261_v7  ;;  %v275_v8 = vrot.slane %v11703_v29, 4  ;;  %v286_v22 = vrot.slane %v11702_v47, 4  ;;  %v11706_v29 = vshll.u32 %v9878_v60, 16 }
  0x78   :  { %v281_v7 = vrot.slane %v11711_v26, 5  ;;  %v8861_v26 = vld [vmem:[#allocation2 + $0xe4] ss:$16 sps:$4 sm:$0x3f]  }
  0x79   :  { %v267_v28 = vrot.slane %v266_v1, 4  ;;  %v276_v35 = vor.u32 %v275_v8, %v271_v44  ;;  %v11709_v1 = vshrl.u32 %v9869_v57, 16 }
  0x7b   :  { %7602 = vmatmul.mubr.msk.bf16.gmra.mrb[16].mxu0 %vm389_vm4, %v7584_v54  ;;  %7612 = vmatmul.mubr.msk.bf16.gmra.mrb[16].mxu1 %vm389_vm4, %v7584_v54  ;;  %v11701_v54 = vshll.u32 %v9843_v56, 16  ;;  %v277_v8 = vrot.slane %v276_v35, 4 }
  0x7c   :  { %512 = vmatprep.mubr.bf16.mxu0 %v11729_v0  ;;  %635 = vmatprep.mubr.bf16.mxu1 %v11729_v0 }
  0x7d   :  { %v289_v15 = vrot.slane %v11701_v54, 5  ;;  %v272_v54 = vsel %vm9653_vm3, %v267_v28, %v271_v44  ;;  %v305_v28 = vrot.slane %v11706_v29, 5  ;;  %v11710_v29 = vshll.u32 %v9904_v14, 16 }
  0x7e   :  { %v7586_v50 = vcombine.low %v262_v27, %v272_v54  ;;  %v282_v54 = vsel %vm9653_vm3, %v277_v8, %v281_v7 }
  0x7f   :  { %v290_v47 = vor.u32 %v289_v15, %v286_v22  ;;  %v299_v15 = vrot.slane %v11709_v1, 4 }
  0x81   :  { %v291_v22 = vrot.slane %v290_v47, 4  ;;  %v300_v27 = vor.u32 %v299_v15, %v295_v18  ;;  %v8837_v15 = vld [vmem:[#allocation2 + $0x80] ss:$16 sps:$4 sm:$0xff]  }
  0x83   :  { %7603 = vmatmul.mubr.msk.bf16.gmra.mrb[20].mxu0 %vm389_vm4, %v7585_v5  ;;  %7613 = vmatmul.mubr.msk.bf16.gmra.mrb[20].mxu1 %vm389_vm4, %v7585_v5  ;;  %v11708_v5 = vshrl.u32 %v9878_v60, 16  ;;  %v296_v47 = vsel %vm9653_vm3, %v291_v22, %v295_v18  ;;  %v8840_v22 = vld [vmem:[#allocation2 + $0x88] ss:$16 sps:$4 sm:$0xff]  }
  0x84   :  { %522 = vmatprep.mubr.bf16.mxu0 %v11729_v0  ;;  %645 = vmatprep.mubr.bf16.mxu1 %v11729_v0  ;;  %v7587_v30 = vcombine.low %v282_v54, %v296_v47  ;;  %v8850_v54 = vld [vmem:[#allocation2 + $0xac] ss:$16 sps:$4 sm:$0x3f]  }
  0x85   :  { %v309_v44 = vrot.slane %v11708_v5, 4  ;;  %v301_v5 = vrot.slane %v300_v27, 4  ;;  %v8860_v47 = vld [vmem:[#allocation2 + $0xcc] ss:$16 sps:$4 sm:$0xff]   ;;  %v7618_v27 = vcombine.low %v9620_v11, %v9642_v25  ;;  %v11752_v11 = vmov 0 }
  0x86   :  { %v11753_v11 = vsel %vm9955_vm7, 4294967295, %v11752_v11  ;;  %v1577_v25 = vshrl.u32 %v10071_v51, 16 }
  0x87   :  { %v310_v35 = vor.u32 %v309_v44, %v305_v28  ;;  %v306_v18 = vsel %vm9653_vm3, %v301_v5, %v305_v28  ;;  %v8848_v44 = vld [vmem:[#allocation2 + $0xa4] ss:$16 sps:$4 sm:$0x3f]   ;;  %v8852_v5 = vld [vmem:[#allocation2 + $0xa0] ss:$16 sps:$4 sm:$0x3f]  }
  0x88   :  { %v8853_v28 = vld [vmem:[#allocation2 + $0xa8] ss:$16 sps:$4 sm:$0x3f]   ;;  %11754 = vst [vmem:[#allocation16_spill] sm:$0xff] %v11753_v11 }
  0x89   :  { %v311_v1 = vrot.slane %v310_v35, 4  ;;  %v1546_v35 = vrot.slane %v1545_v31, 4  ;;  %v7619_v31 = vcombine.low %v9649_v33, %v9662_v39 }
  0x8b   :  { %7604 = vmatmul.mubr.msk.bf16.gmra.mrb[24].mxu0 %vm389_vm4, %v7586_v50  ;;  %7614 = vmatmul.mubr.msk.bf16.gmra.mrb[24].mxu1 %vm389_vm4, %v7586_v50  ;;  %v315_v50 = vrot.slane %v11710_v29, 5  ;;  %v1550_v23 = vsel %vm9955_vm7, %v1546_v35, %v9664_v41  ;;  %v8866_v29 = vld [vmem:[#allocation2 + $0xe8] ss:$16 sps:$4 sm:$0x3f]  }
  0x8c   :  { %532 = vmatprep.mubr.bf16.mxu0 %v11729_v0  ;;  %655 = vmatprep.mubr.bf16.mxu1 %v11729_v0 }
  0x8d   :  { %v316_v7 = vsel %vm9653_vm3, %v311_v1, %v315_v50  ;;  %v8857_v1 = vld [vmem:[#allocation2 + $0xc4] ss:$16 sps:$4 sm:$0xff]   ;;  %v1551_v50 = vrot.slane %v9664_v41, 4  ;;  %v7620_v41 = vcombine.low %v9687_v59, %v9695_v2 }
  0x8e   :  { %v7588_v8 = vcombine.low %v306_v18, %v316_v7  ;;  %v7621_v7 = vcombine.low %v9728_v32, %v9737_v40 }
  0x8f   :  { %v1555_v24 = vsel %vm9955_vm7, %v1551_v50, %v9699_v4  ;;  %v10039_v50 = vld [vmem:[%s11684_s0 + $0xc] sm:$0x3] }
  0x90   :  { %v9967_v18 = vcombine.low %v1550_v23, %v1555_v24  ;;  %v1059_v23 = vrot.slane %v10039_v50, 5  ;;  %v10045_v24 = vld [vmem:[%s11684_s0 + $0x10] sm:$0xf] }
  0x93   :  { %7605 = vmatmul.mubr.msk.bf16.gmra.mrb[28].mxu0 %vm389_vm4, %v7587_v30  ;;  %7615 = vmatmul.mubr.msk.bf16.gmra.mrb[28].mxu1 %vm389_vm4, %v7587_v30  ;;  %v7617_v30 = vcombine.low %v9610_v9, %v9615_v10  ;;  %v1211_v9 = vsel %vm417_vm2, %v8852_v5, 0  ;;  %v1217_v10 = vsel %vm417_vm2, %v8853_v28, 0  ;;  %v7625_v5 = vcombine.low %v9869_v57, %v9878_v60  ;;  %v10019_v28 = vld [vmem:[%s11684_s0] sm:$0xf] }
  0x94   :  { %542 = vmatprep.mubr.bf16.mxu0 %v11729_v0  ;;  %665 = vmatprep.mubr.bf16.mxu1 %v11729_v0 }
  0x9b   :  { %7606 = vmatmul.mubr.msk.bf16.gmra.mrb[32].mxu0 %vm389_vm4, %v7588_v8  ;;  %7616 = vmatmul.mubr.msk.bf16.gmra.mrb[32].mxu1 %vm389_vm4, %v7588_v8  ;;  %v7622_v8 = vcombine.low %v9764_v61, %v9769_v62 }
  0x9c   :  { %828 = vmatprep.mubr.bf16.mxu0 %v11729_v0  ;;  %951 = vmatprep.mubr.bf16.mxu1 %v11729_v0 }
  0xa3   :  { %7635 = vmatmul.mubr.msk.bf16.vlgmr.msra.gmra.mrb[0].mxu0 %vm389_vm4, %v7617_v30  ;;  %7645 = vmatmul.mubr.msk.bf16.vlgmr.msra.gmra.mrb[0].mxu1 %vm389_vm4, %v7617_v30  ;;  %v7623_v30 = vcombine.low %v9799_v45, %v9813_v3 }
  0xa4   :  { %838 = vmatprep.mubr.bf16.mxu0 %v11729_v0  ;;  %961 = vmatprep.mubr.bf16.mxu1 %v11729_v0 }
  0xa5   :  { %1223 = vmatpush1.bf16.msra.mxu0 %v8837_v15  ;;  %1346 = vmatpush1.bf16.msra.mxu1 %v8840_v22  ;;  %v7624_v15 = vcombine.low %v9834_v48, %v9843_v56  ;;  %v11755_v22 = vmov 0 }
  0xa6   :  { %7677 = vmatprep.subr.msk.bf16.mxu0 %vm417_vm2, %v8848_v44  ;;  %7687 = vmatprep.subr.msk.bf16.mxu1 %vm417_vm2, %v8850_v54  ;;  %v11756_v22 = vsel %vm10000_vm10, 4294967295, %v11755_v22  ;;  %v10011_v44 = vld [vmem:[%s11684_s0 + $0x4] sm:$0xf] }
  0xa7   :  { %11757 = vst [vmem:[#allocation17_spill] sm:$0xff] %v11756_v22  ;;  %v1053_v54 = vrot.slane %v10011_v44, 5  ;;  %v8873_v22 = vld [vmem:[#allocation2 + $0x124] ss:$16 sps:$4 sm:$0x3f]  }
  0xa9   :  { %1225 = vmatpush1.bf16.msra.mxu0 %v1211_v9  ;;  %1348 = vmatpush1.bf16.msra.mxu1 %v1217_v10  ;;  %v10025_v9 = vld [vmem:[%s11684_s0 + $0x8] sm:$0xf] }
  0xaa   :  { %1774 = vmatprep.subr.bf16.mxu0 %v8857_v1  ;;  %1897 = vmatprep.subr.bf16.mxu1 %v8860_v47  ;;  %v7654_v1 = vrot.slane %v10019_v28, 9  ;;  %v1055_v47 = vrot.slane %v1053_v54, 4  ;;  %v1056_v10 = vrot.slane %v10025_v9, 5 }
  0xab   :  { %7636 = vmatmul.mubr.msk.bf16.gmra.mrb[4].mxu0 %vm389_vm4, %v7618_v27  ;;  %7646 = vmatmul.mubr.msk.bf16.gmra.mrb[4].mxu1 %vm389_vm4, %v7618_v27 }
  0xac   :  { %848 = vmatprep.mubr.bf16.mxu0 %v11729_v0  ;;  %971 = vmatprep.mubr.bf16.mxu1 %v11729_v0  ;;  %v1054_v27 = vsel %vm10000_vm10, %v7654_v1, %v1053_v54  ;;  %v1057_v35 = vsel %vm10000_vm10, %v1055_v47, %v1056_v10  ;;  %v8858_v1 = vld [vmem:[#allocation2 + $0xc8] ss:$16 sps:$4 sm:$0xff]   ;;  %v8865_v47 = vld [vmem:[#allocation2 + $0xe0] ss:$16 sps:$4 sm:$0x3f]  }
  0xad   :  { %v7660_v54 = vcombine.low %v1054_v27, %v1057_v35 }
  0xb3   :  { %7637 = vmatmul.mubr.msk.bf16.gmra.mrb[8].mxu0 %vm389_vm4, %v7619_v31  ;;  %7647 = vmatmul.mubr.msk.bf16.gmra.mrb[8].mxu1 %vm389_vm4, %v7619_v31  ;;  %v7655_v31 = vrot.slane %v10045_v24, 9 }
  0xb4   :  { %858 = vmatprep.mubr.bf16.mxu0 %v11729_v0  ;;  %981 = vmatprep.mubr.bf16.mxu1 %v11729_v0 }
  0xbb   :  { %7638 = vmatmul.mubr.msk.bf16.gmra.mrb[12].mxu0 %vm389_vm4, %v7620_v41  ;;  %7648 = vmatmul.mubr.msk.bf16.gmra.mrb[12].mxu1 %vm389_vm4, %v7620_v41  ;;  %v10051_v41 = vld [vmem:[%s11684_s0 + $0x14] sm:$0xf] }
  0xbc   :  { %868 = vmatprep.mubr.bf16.mxu0 %v11729_v0  ;;  %991 = vmatprep.mubr.bf16.mxu1 %v11729_v0 }
  0xc3   :  { %7639 = vmatmul.mubr.msk.bf16.gmra.mrb[16].mxu0 %vm389_vm4, %v7621_v7  ;;  %7649 = vmatmul.mubr.msk.bf16.gmra.mrb[16].mxu1 %vm389_vm4, %v7621_v7  ;;  %v1063_v7 = vrot.slane %v10051_v41, 5 }
  0xc4   :  { %878 = vmatprep.mubr.bf16.mxu0 %v11729_v0  ;;  %1001 = vmatprep.mubr.bf16.mxu1 %v11729_v0 }
  0xc5   :  { %v1064_v27 = vsel %vm10000_vm10, %v7655_v31, %v1063_v7  ;;  %v1065_v35 = vrot.slane %v1063_v7, 4  ;;  %v1763_v31 = vsel %vm417_vm2, %v8865_v47, 0  ;;  %v1769_v7 = vsel %vm417_vm2, %v8866_v29, 0 }
  0xcb   :  { %7640 = vmatmul.mubr.msk.bf16.gmra.mrb[20].mxu0 %vm389_vm4, %v7622_v8  ;;  %7650 = vmatmul.mubr.msk.bf16.gmra.mrb[20].mxu1 %vm389_vm4, %v7622_v8  ;;  %v1058_v8 = vrot.slane %v1056_v10, 4 }
  0xcc   :  { %888 = vmatprep.mubr.bf16.mxu0 %v11729_v0  ;;  %1011 = vmatprep.mubr.bf16.mxu1 %v11729_v0 }
  0xcd   :  { %v1060_v10 = vsel %vm10000_vm10, %v1058_v8, %v1059_v23  ;;  %v8869_v8 = vld [vmem:[#allocation2 + $0x104] ss:$16 sps:$4 sm:$0xff]  }
  0xce   :  { %v7661_v20 = vcombine.low %v1060_v10, %v1064_v27  ;;  %v10115_v27 = vld [vmem:[%s11684_s0 + $0x2c] sm:$0x3] }
  0xd3   :  { %7641 = vmatmul.mubr.msk.bf16.gmra.mrb[24].mxu0 %vm389_vm4, %v7623_v30  ;;  %7651 = vmatmul.mubr.msk.bf16.gmra.mrb[24].mxu1 %vm389_vm4, %v7623_v30  ;;  %v10057_v30 = vld [vmem:[%s11684_s0 + $0x18] sm:$0xf] }
  0xd4   :  { %898 = vmatprep.mubr.bf16.mxu0 %v11729_v0  ;;  %1021 = vmatprep.mubr.bf16.mxu1 %v11729_v0 }
  0xdb   :  { %7642 = vmatmul.mubr.msk.bf16.gmra.mrb[28].mxu0 %vm389_vm4, %v7624_v15  ;;  %7652 = vmatmul.mubr.msk.bf16.gmra.mrb[28].mxu1 %vm389_vm4, %v7624_v15  ;;  %v1066_v15 = vrot.slane %v10057_v30, 5 }
  0xdc   :  { %908 = vmatprep.mubr.bf16.mxu0 %v11729_v0  ;;  %1031 = vmatprep.mubr.bf16.mxu1 %v11729_v0 }
  0xdd   :  { %v1068_v42 = vrot.slane %v1066_v15, 4  ;;  %v1067_v29 = vsel %vm10000_vm10, %v1065_v35, %v1066_v15  ;;  %v1079_v35 = vrot.slane %v10115_v27, 5 }
  0xe3   :  { %7643 = vmatmul.mubr.msk.bf16.gmra.mrb[32].mxu0 %vm389_vm4, %v7625_v5  ;;  %7653 = vmatmul.mubr.msk.bf16.gmra.mrb[32].mxu1 %vm389_vm4, %v7625_v5  ;;  %v8855_v5 = vld [vmem:[#allocation2 + $0xc0] ss:$16 sps:$4 sm:$0xff]  }
  0xe4   :  { %1254 = vmatprep.mubr.bf16.mxu0 %v11729_v0  ;;  %1377 = vmatprep.mubr.bf16.mxu1 %v11729_v0 }
  0xeb   :  { %7678 = vmatmul.mubr.msk.bf16.vlgmr.msra.gmra.mrb[0].mxu0 %vm389_vm4, %v7660_v54  ;;  %7688 = vmatmul.mubr.msk.bf16.vlgmr.msra.gmra.mrb[0].mxu1 %vm389_vm4, %v7660_v54  ;;  %v10077_v54 = vld [vmem:[%s11684_s0 + $0x24] sm:$0xf] }
  0xec   :  { %1264 = vmatprep.mubr.bf16.mxu0 %v11729_v0  ;;  %1387 = vmatprep.mubr.bf16.mxu1 %v11729_v0  ;;  %v1073_v23 = vrot.slane %v10077_v54, 5 }
  0xed   :  { %1775 = vmatpush1.bf16.msra.mxu0 %v8855_v5  ;;  %1898 = vmatpush1.bf16.msra.mxu1 %v8858_v1 }
  0xee   :  { %7714 = vmatprep.subr.msk.bf16.mxu0 %vm417_vm2, %v8861_v26  ;;  %7724 = vmatprep.subr.msk.bf16.mxu1 %vm417_vm2, %v8863_v53  ;;  %v1070_v53 = vsel %vm10000_vm10, %v1068_v42, %v1069_v46  ;;  %v10095_v26 = vld [vmem:[%s11684_s0 + $0x20] sm:$0xf]  ;;  %v1075_v5 = vrot.slane %v1073_v23, 4 }
  0xef   :  { %v7662_v47 = vcombine.low %v1067_v29, %v1070_v53 }
  0xf1   :  { %1777 = vmatpush1.bf16.msra.mxu0 %v1763_v31  ;;  %1900 = vmatpush1.bf16.msra.mxu1 %v1769_v7  ;;  %v10121_v31 = vld [vmem:[%s11684_s0 + $0x30] sm:$0xf] }
  0xf2   :  { %2266 = vmatprep.subr.bf16.mxu0 %v8869_v8  ;;  %2389 = vmatprep.subr.bf16.mxu1 %v8872_v17  ;;  %v7656_v17 = vrot.slane %v10095_v26, 9  ;;  %v7657_v7 = vrot.slane %v10121_v31, 9 }
  0xf3   :  { %7679 = vmatmul.mubr.msk.bf16.gmra.mrb[4].mxu0 %vm389_vm4, %v7661_v20  ;;  %7689 = vmatmul.mubr.msk.bf16.gmra.mrb[4].mxu1 %vm389_vm4, %v7661_v20  ;;  %v10101_v20 = vld [vmem:[%s11684_s0 + $0x28] sm:$0xf] }
  0xf4   :  { %1274 = vmatprep.mubr.bf16.mxu0 %v11729_v0  ;;  %1397 = vmatprep.mubr.bf16.mxu1 %v11729_v0  ;;  %v1076_v1 = vrot.slane %v10101_v20, 5  ;;  %v1074_v42 = vsel %vm10000_vm10, %v7656_v17, %v1073_v23  ;;  %v10127_v23 = vld [vmem:[%s11684_s0 + $0x34] sm:$0xf]  ;;  %v10141_v17 = vld [vmem:[%s11684_s0 + $0x38] sm:$0xf] }
  0xf5   :  { %v1083_v8 = vrot.slane %v10127_v23, 5 }
  0xf6   :  { %v1077_v46 = vsel %vm10000_vm10, %v1075_v5, %v1076_v1  ;;  %v1078_v10 = vrot.slane %v1076_v1, 4  ;;  %v1086_v5 = vrot.slane %v10141_v17, 5 }
  0xf7   :  { %v7663_v15 = vcombine.low %v1074_v42, %v1077_v46  ;;  %v1084_v53 = vsel %vm10000_vm10, %v7657_v7, %v1083_v8  ;;  %v10147_v46 = vld [vmem:[%s11684_s0 + $0x3c] sm:$0x3]  ;;  %v10161_v7 = vld [vmem:[%s11684_s0 + $0x44] sm:$0xf] }
  0xf8   :  { %v1080_v29 = vsel %vm10000_vm10, %v1078_v10, %v1079_v35  ;;  %v1088_v42 = vrot.slane %v1086_v5, 4 }
  0xf9   :  { %v7664_v1 = vcombine.low %v1080_v29, %v1084_v53  ;;  %v10167_v53 = vld [vmem:[%s11684_s0 + $0x40] sm:$0xf] }
  0xfb   :  { %7680 = vmatmul.mubr.msk.bf16.gmra.mrb[8].mxu0 %vm389_vm4, %v7662_v47  ;;  %7690 = vmatmul.mubr.msk.bf16.gmra.mrb[8].mxu1 %vm389_vm4, %v7662_v47  ;;  %v1085_v47 = vrot.slane %v1083_v8, 4  ;;  %v1093_v8 = vrot.slane %v10161_v7, 5 }
  0xfc   :  { %1284 = vmatprep.mubr.bf16.mxu0 %v11729_v0  ;;  %1407 = vmatprep.mubr.bf16.mxu1 %v11729_v0 }
  0xfd   :  { %v1087_v10 = vsel %vm10000_vm10, %v1085_v47, %v1086_v5  ;;  %v1095_v16 = vrot.slane %v1093_v8, 4  ;;  %v10173_v5 = vld [vmem:[%s11684_s0 + $0x48] sm:$0xf] }
  0xfe   :  { %v1096_v47 = vrot.slane %v10173_v5, 5 }
 0x103   :  { %7681 = vmatmul.mubr.msk.bf16.gmra.mrb[12].mxu0 %vm389_vm4, %v7663_v15  ;;  %7691 = vmatmul.mubr.msk.bf16.gmra.mrb[12].mxu1 %vm389_vm4, %v7663_v15  ;;  %v1089_v15 = vrot.slane %v10147_v46, 5 }
 0x104   :  { %1294 = vmatprep.mubr.bf16.mxu0 %v11729_v0  ;;  %1417 = vmatprep.mubr.bf16.mxu1 %v11729_v0 }
 0x105   :  { %v1090_v35 = vsel %vm10000_vm10, %v1088_v42, %v1089_v15  ;;  %v1097_v15 = vsel %vm10000_vm10, %v1095_v16, %v1096_v47  ;;  %v10199_v16 = vld [vmem:[%s11684_s0 + $0x54] sm:$0xf] }
 0x106   :  { %v7665_v29 = vcombine.low %v1087_v10, %v1090_v35  ;;  %v1098_v35 = vrot.slane %v1096_v47, 4  ;;  %11759 = vst [vmem:[#allocation19_spill] sm:$0xff] %v10199_v16 }
 0x10b   :  { %7682 = vmatmul.mubr.msk.bf16.gmra.mrb[16].mxu0 %vm389_vm4, %v7664_v1  ;;  %7692 = vmatmul.mubr.msk.bf16.gmra.mrb[16].mxu1 %vm389_vm4, %v7664_v1  ;;  %v7658_v1 = vrot.slane %v10167_v53, 9 }
 0x10c   :  { %1304 = vmatprep.mubr.bf16.mxu0 %v11729_v0  ;;  %1427 = vmatprep.mubr.bf16.mxu1 %v11729_v0 }
 0x10d   :  { %v1094_v42 = vsel %vm10000_vm10, %v7658_v1, %v1093_v8  ;;  %v1103_v8 = vrot.slane %v10199_v16, 5  ;;  %v1100_v1 = vsel %vm10000_vm10, %v1098_v35, %v1099_v12  ;;  %v1109_v12 = vrot.slane %v10219_v58, 5 }
 0x10e   :  { %v7666_v10 = vcombine.low %v1094_v42, %v1097_v15  ;;  %v10213_v42 = vld [vmem:[%s11684_s0 + $0x58] sm:$0xf]  ;;  %v11762_v16 = vshrl.u32 %v9649_v33, 16 }
 0x10f   :  { %11760 = vst [vmem:[#allocation20_spill] sm:$0xff] %v10213_v42  ;;  %v1106_v15 = vrot.slane %v10213_v42, 5  ;;  %v1105_v52 = vrot.slane %v1103_v8, 4  ;;  %v1560_v42 = vrot.slane %v11761_v34, 6 }
 0x113   :  { %7683 = vmatmul.mubr.msk.bf16.gmra.mrb[20].mxu0 %vm389_vm4, %v7665_v29  ;;  %7693 = vmatmul.mubr.msk.bf16.gmra.mrb[20].mxu1 %vm389_vm4, %v7665_v29  ;;  %v10193_v29 = vld [vmem:[%s11684_s0 + $0x50] sm:$0xf]  ;;  %s9502_s0 = smov 28  }
 0x114   :  { %1314 = vmatprep.mubr.bf16.mxu0 %v11729_v0  ;;  %1437 = vmatprep.mubr.bf16.mxu1 %v11729_v0  ;;  %11758 = vst [vmem:[#allocation18_spill] sm:$0xff] %v10193_v29  ;;  %v7659_v63 = vrot.slane %v10193_v29, 9  ;;  %v8875_v29 = vld [vmem:[#allocation2 + $0x12c] ss:$16 sps:$4 sm:$0x3f]  }
 0x116   :  { %v1104_v47 = vsel %vm10000_vm10, %v7659_v63, %v1103_v8  ;;  %v1107_v63 = vsel %vm10000_vm10, %v1105_v52, %v1106_v15  ;;  %v1557_v8 = vshrl.u32 %v10039_v50, 16  ;;  %v1567_v52 = vrot.slane %v11762_v16, 5 }
 0x117   :  { %v7667_v6 = vcombine.low %v1100_v1, %v1104_v47  ;;  %v1563_v1 = vrot.slane %v148_v38, 5  ;;  %v1564_v47 = vrot.slane %v151_v43, 6  ;;  %v11764_v38 = vmov 0  }
 0x118   :  { %v11765_v16 = vshrl.u32 %v9662_v39, 16 }
 0x11b   :  { %7684 = vmatmul.mubr.msk.bf16.gmra.mrb[24].mxu0 %vm389_vm4, %v7666_v10  ;;  %7694 = vmatmul.mubr.msk.bf16.gmra.mrb[24].mxu1 %vm389_vm4, %v7666_v10  ;;  %v1108_v10 = vrot.slane %v1106_v15, 4  ;;  %v11763_v15 = vshll.u32 %v9649_v33, 16  ;;  %v11766_v33 = vshll.u32 %v9662_v39, 16 }
 0x11c   :  { %1324 = vmatprep.mubr.bf16.mxu0 %v11729_v0  ;;  %1447 = vmatprep.mubr.bf16.mxu1 %v11729_v0 }
 0x11d   :  { %v1110_v35 = vsel %vm10000_vm10, %v1108_v10, %v1109_v12  ;;  %v1568_v10 = vrot.slane %v11763_v15, 6  ;;  %v8870_v15 = vld [vmem:[#allocation2 + $0x108] ss:$16 sps:$4 sm:$0xff]  }
 0x11e   :  { %v7668_v37 = vcombine.low %v1107_v63, %v1110_v35  ;;  %v1572_v63 = vrot.slane %v11765_v16, 5  ;;  %v1573_v35 = vrot.slane %v11766_v33, 6  ;;  %v11769_v16 = vshll.u32 %v9687_v59, 16 }
 0x11f   :  { %v1569_v12 = vor.u32 %v1568_v10, %v1567_v52  ;;  %v8878_v52 = vld [vmem:[#allocation2 + $0x128] ss:$16 sps:$4 sm:$0x3f]  }
 0x123   :  { %7685 = vmatmul.mubr.msk.bf16.gmra.mrb[28].mxu0 %vm389_vm4, %v7667_v6  ;;  %7695 = vmatmul.mubr.msk.bf16.gmra.mrb[28].mxu1 %vm389_vm4, %v7667_v6  ;;  %v1559_v6 = vrot.slane %v1557_v8, 5  ;;  %v1579_v8 = vrot.slane %v1577_v25, 5 }
 0x124   :  { %1334 = vmatprep.mubr.bf16.mxu0 %v11729_v0  ;;  %1457 = vmatprep.mubr.bf16.mxu1 %v11729_v0  ;;  %v1565_v0 = vor.u32 %v1564_v47, %v1563_v1  ;;  %v8867_v47 = vld [vmem:[#allocation2 + $0x100] ss:$16 sps:$4 sm:$0xff]  }
 0x125   :  { %v1561_v34 = vor.u32 %v1560_v42, %v1559_v6  ;;  %v1574_v42 = vor.u32 %v1573_v35, %v1572_v63  ;;  %v8877_v6 = vld [vmem:[#allocation2 + $0x120] ss:$16 sps:$4 sm:$0x3f]   ;;  %v1584_v63 = vrot.slane %v11769_v16, 6  ;;  %v11771_v35 = vshll.u32 %v9695_v2, 16 }
 0x126   :  { %v1566_v43 = vrot.slane %v1565_v0, 4  ;;  %v11776_v16 = vshll.u32 %v9755_v55, 16 }
 0x127   :  { %v1562_v4 = vsel %vm9955_vm7, %v1556_v19, %v1561_v34  ;;  %v1576_v10 = vrot.slane %v1574_v42, 4  ;;  %v2255_v19 = vsel %vm417_vm2, %v8877_v6, 0  ;;  %v2261_v34 = vsel %vm417_vm2, %v8878_v52, 0 }
 0x128   :  { %v1570_v0 = vsel %vm9955_vm7, %v1566_v43, %v1569_v12 }
 0x129   :  { %v7698_v39 = vcombine.low %v1562_v4, %v1570_v0  ;;  %v8881_v4 = vld [vmem:[#allocation7 + $0x1e4] ss:$16 sps:$4 sm:$0xff]   ;;  %v8884_v0 = vld [vmem:[#allocation7 + $0x1ec] ss:$16 sps:$4 sm:$0xff]  }
 0x12b   :  { %7686 = vmatmul.mubr.msk.bf16.gmra.mrb[32].mxu0 %vm389_vm4, %v7668_v37  ;;  %7696 = vmatmul.mubr.msk.bf16.gmra.mrb[32].mxu1 %vm389_vm4, %v7668_v37  ;;  %v11767_v37 = vshll.u32 %v9674_v49, 16  ;;  %v1571_v49 = vrot.slane %v1569_v12, 4  ;;  %v11770_v12 = vshrl.u32 %v9695_v2, 16  ;;  %v11773_v2 = vshll.u32 %v9728_v32, 16 }
 0x12c   :  { %1806 = vmatprep.mubr.bf16.mxu0 %v11764_v38  ;;  %1929 = vmatprep.mubr.bf16.mxu1 %v11764_v38 }
 0x12d   :  { %v1580_v1 = vrot.slane %v11767_v37, 6  ;;  %v1587_v33 = vrot.slane %v11770_v12, 5  ;;  %v11777_v12 = vshrl.u32 %v9764_v61, 16 }
 0x12f   :  { %v1581_v25 = vor.u32 %v1580_v1, %v1579_v8  ;;  %v1588_v8 = vrot.slane %v11771_v35, 6  ;;  %v11772_v1 = vshrl.u32 %v9728_v32, 16  ;;  %v11775_v32 = vshll.u32 %v9737_v40, 16 }
 0x130   :  { %v11778_v35 = vshll.u32 %v9764_v61, 16 }
 0x131   :  { %v1589_v37 = vor.u32 %v1588_v8, %v1587_v33  ;;  %v1607_v33 = vrot.slane %v11777_v12, 5 }
 0x132   :  { %v1608_v8 = vrot.slane %v11778_v35, 6  ;;  %v11786_v35 = vshrl.u32 %v9834_v48, 16 }
 0x133   :  { %7715 = vmatmul.mubr.msk.bf16.vlgmr.msra.gmra.mrb[0].mxu0 %vm389_vm4, %v9967_v18  ;;  %7725 = vmatmul.mubr.msk.bf16.vlgmr.msra.gmra.mrb[0].mxu1 %vm389_vm4, %v9967_v18  ;;  %v11768_v18 = vshrl.u32 %v9687_v59, 16  ;;  %v1591_v52 = vrot.slane %v1589_v37, 4 }
 0x134   :  { %1816 = vmatprep.mubr.bf16.mxu0 %v11764_v38  ;;  %1939 = vmatprep.mubr.bf16.mxu1 %v11764_v38 }
 0x135   :  { %2267 = vmatpush1.bf16.msra.mxu0 %v8867_v47  ;;  %2390 = vmatpush1.bf16.msra.mxu1 %v8870_v15  ;;  %v1583_v43 = vrot.slane %v11768_v18, 5  ;;  %v1592_v47 = vrot.slane %v11772_v1, 5  ;;  %v1593_v15 = vrot.slane %v11773_v2, 6 }
 0x136   :  { %7757 = vmatprep.subr.msk.bf16.mxu0 %vm417_vm2, %v8873_v22  ;;  %7767 = vmatprep.subr.msk.bf16.mxu1 %vm417_vm2, %v8875_v29  ;;  %v1575_v22 = vsel %vm9955_vm7, %v1571_v49, %v1574_v42  ;;  %v1582_v29 = vsel %vm9955_vm7, %v1576_v10, %v1581_v25  ;;  %v1597_v49 = vshrl.u32 %v10115_v27, 16  ;;  %v11774_v10 = vshrl.u32 %v9737_v40, 16 }
 0x137   :  { %v1585_v59 = vor.u32 %v1584_v63, %v1583_v43  ;;  %v7699_v42 = vcombine.low %v1575_v22, %v1582_v29  ;;  %v1600_v63 = vrot.slane %v11776_v16, 6  ;;  %v11779_v29 = vshrl.u32 %v9769_v62, 16 }
 0x138   :  { %v1603_v25 = vrot.slane %v11774_v10, 5  ;;  %v1599_v43 = vrot.slane %v1597_v49, 5  ;;  %v11785_v16 = vshll.u32 %v9813_v3, 16 }
 0x139   :  { %2269 = vmatpush1.bf16.msra.mxu0 %v2255_v19  ;;  %2392 = vmatpush1.bf16.msra.mxu1 %v2261_v34  ;;  %v1586_v6 = vrot.slane %v1585_v59, 4  ;;  %v1604_v19 = vrot.slane %v11775_v32, 6  ;;  %v1612_v59 = vrot.slane %v11779_v29, 5  ;;  %v11782_v32 = vshrl.u32 %v9799_v45, 16 }
 0x13a   :  { %3990 = vmatprep.subr.bf16.mxu0 %v8881_v4  ;;  %4053 = vmatprep.subr.bf16.mxu1 %v8884_v0  ;;  %v1609_v4 = vor.u32 %v1608_v8, %v1607_v33  ;;  %v11787_v8 = vshll.u32 %v9834_v48, 16  ;;  %v11790_v48 = vshll.u32 %v9864_v21, 16 }
 0x13b   :  { %7716 = vmatmul.mubr.msk.bf16.gmra.mrb[4].mxu0 %vm389_vm4, %v7698_v39  ;;  %7726 = vmatmul.mubr.msk.bf16.gmra.mrb[4].mxu1 %vm389_vm4, %v7698_v39  ;;  %v1594_v39 = vor.u32 %v1593_v15, %v1592_v47  ;;  %v1590_v34 = vsel %vm9955_vm7, %v1586_v6, %v1589_v37  ;;  %v1605_v40 = vor.u32 %v1604_v19, %v1603_v25  ;;  %v11780_v37 = vshll.u32 %v9769_v62, 16 }
 0x13c   :  { %1826 = vmatprep.mubr.bf16.mxu0 %v11764_v38  ;;  %1949 = vmatprep.mubr.bf16.mxu1 %v11764_v38  ;;  %v1617_v47 = vshrl.u32 %v10147_v46, 16  ;;  %v1601_v15 = vor.u32 %v1600_v63, %v1599_v43  ;;  %v1611_v49 = vrot.slane %v1609_v4, 4  ;;  %v1623_v19 = vrot.slane %v11782_v32, 5 }
 0x13d   :  { %v1595_v18 = vsel %vm9955_vm7, %v1591_v52, %v1594_v39  ;;  %v1613_v1 = vrot.slane %v11780_v37, 6  ;;  %v1596_v2 = vrot.slane %v1594_v39, 4  ;;  %v1606_v55 = vrot.slane %v1605_v40, 4 }
 0x13e   :  { %v7700_v22 = vcombine.low %v1590_v34, %v1595_v18  ;;  %v1619_v61 = vrot.slane %v1617_v47, 5  ;;  %v11784_v18 = vshrl.u32 %v9813_v3, 16  ;;  %v1628_v63 = vrot.slane %v11785_v16, 6 }
 0x13f   :  { %v1614_v0 = vor.u32 %v1613_v1, %v1612_v59  ;;  %v1602_v62 = vsel %vm9955_vm7, %v1596_v2, %v1601_v15  ;;  %v1610_v52 = vsel %vm9955_vm7, %v1606_v55, %v1609_v4  ;;  %v1632_v3 = vrot.slane %v11786_v35, 5 }
 0x140   :  { %v7701_v39 = vcombine.low %v1602_v62, %v1610_v52  ;;  %v1627_v43 = vrot.slane %v11784_v18, 5  ;;  %v1637_v59 = vshrl.u32 %v10187_v13, 16  ;;  %v11788_v37 = vshrl.u32 %v9843_v56, 16 }
 0x141   :  { %v1616_v10 = vrot.slane %v1614_v0, 4  ;;  %v1615_v40 = vsel %vm9955_vm7, %v1611_v49, %v1614_v0  ;;  %v11789_v47 = vshll.u32 %v9843_v56, 16  ;;  %v11791_v62 = vshrl.u32 %v9869_v57, 16 }
 0x142   :  { %v1629_v33 = vor.u32 %v1628_v63, %v1627_v43  ;;  %v1643_v1 = vrot.slane %v11788_v37, 5  ;;  %v1639_v0 = vrot.slane %v1637_v59, 5  ;;  %v11794_v18 = vshll.u32 %v9878_v60, 16 }
 0x143   :  { %7717 = vmatmul.mubr.msk.bf16.gmra.mrb[8].mxu0 %vm389_vm4, %v7699_v42  ;;  %7727 = vmatmul.mubr.msk.bf16.gmra.mrb[8].mxu1 %vm389_vm4, %v7699_v42  ;;  %v11781_v42 = vshll.u32 %v9792_v36, 16  ;;  %v11783_v36 = vshll.u32 %v9799_v45, 16  ;;  %v1644_v2 = vrot.slane %v11789_v47, 6  ;;  %v1647_v52 = vrot.slane %v11791_v62, 5  ;;  %v8888_v62 = vld [vmem:[#allocation7 + $0x208] ss:$16 sps:$4 sm:$0xff]  }
 0x144   :  { %1836 = vmatprep.mubr.bf16.mxu0 %v11764_v38  ;;  %1959 = vmatprep.mubr.bf16.mxu1 %v11764_v38  ;;  %v1631_v55 = vrot.slane %v1629_v33, 4  ;;  %v1653_v43 = vrot.slane %v11794_v18, 6  ;;  %v1657_v16 = vshrl.u32 %v10219_v58, 16  ;;  %v7734_v37 = vrot.slane %v10019_v28, 10 }
 0x145   :  { %v1620_v6 = vrot.slane %v11781_v42, 6  ;;  %v1624_v34 = vrot.slane %v11783_v36, 6  ;;  %v1645_v42 = vor.u32 %v1644_v2, %v1643_v1  ;;  %v11793_v36 = vshrl.u32 %v9878_v60, 16 }
 0x146   :  { %v11795_v60 = vshll.u32 %v9904_v14, 16  ;;  %v2097_v14 = vrot.slane %v10011_v44, 6  ;;  %v2100_v47 = vrot.slane %v10025_v9, 6  ;;  %v11796_v2 = vmov 0 }
 0x147   :  { %v1621_v25 = vor.u32 %v1620_v6, %v1619_v61  ;;  %v1625_v45 = vor.u32 %v1624_v34, %v1623_v19  ;;  %v1640_v61 = vrot.slane %v11790_v48, 6  ;;  %v1646_v32 = vrot.slane %v1645_v42, 4  ;;  %v8879_v48 = vld [vmem:[#allocation7 + $0x1e0] ss:$16 sps:$4 sm:$0xff]   ;;  %v8887_v42 = vld [vmem:[#allocation7 + $0x204] ss:$16 sps:$4 sm:$0xff]  }
 0x148   :  { %v1652_v34 = vrot.slane %v11793_v36, 5  ;;  %v2099_v1 = vrot.slane %v2097_v14, 4  ;;  %v11797_v2 = vsel %vm10387_vm13, 4294967295, %v11796_v2  ;;  %v2098_v44 = vsel %vm10387_vm13, %v7734_v37, %v2097_v14  ;;  %v8902_v36 = vld [vmem:[#allocation7 + $0x24c] ss:$16 sps:$4 sm:$0xff]  }
 0x149   :  { %v1622_v12 = vsel %vm9955_vm7, %v1616_v10, %v1621_v25  ;;  %v1626_v15 = vrot.slane %v1625_v45, 4  ;;  %v1641_v25 = vor.u32 %v1640_v61, %v1639_v0  ;;  %v1660_v45 = vrot.slane %v11795_v60, 6  ;;  %11798 = vst [vmem:[#allocation21_spill] sm:$0xff] %v11797_v2  ;;  %v8882_v61 = vld [vmem:[#allocation7 + $0x1e8] ss:$16 sps:$4 sm:$0xff]  }
 0x14a   :  { %v7702_v29 = vcombine.low %v1615_v40, %v1622_v12  ;;  %v1654_v40 = vor.u32 %v1653_v43, %v1652_v34  ;;  %v1659_v12 = vrot.slane %v1657_v16, 5  ;;  %v2101_v28 = vsel %vm10387_vm13, %v2099_v1, %v2100_v47  ;;  %v8897_v43 = vld [vmem:[#allocation7 + $0x240] ss:$16 sps:$4 sm:$0xff]   ;;  %v8900_v16 = vld [vmem:[#allocation7 + $0x248] ss:$16 sps:$4 sm:$0xff]  }
 0x14b   :  { %7718 = vmatmul.mubr.msk.bf16.gmra.mrb[12].mxu0 %vm389_vm4, %v7700_v22  ;;  %7728 = vmatmul.mubr.msk.bf16.gmra.mrb[12].mxu1 %vm389_vm4, %v7700_v22  ;;  %v1633_v22 = vrot.slane %v11787_v8, 6  ;;  %v1630_v56 = vsel %vm9955_vm7, %v1626_v15, %v1629_v33  ;;  %v7740_v9 = vcombine.low %v2098_v44, %v2101_v28  ;;  %v2102_v15 = vrot.slane %v2100_v47, 4 }
 0x14c   :  { %1846 = vmatprep.mubr.bf16.mxu0 %v11764_v38  ;;  %1969 = vmatprep.mubr.bf16.mxu1 %v11764_v38  ;;  %v1661_v8 = vor.u32 %v1660_v45, %v1659_v12  ;;  %v2107_v0 = vrot.slane %v10051_v41, 6  ;;  %v8885_v41 = vld [vmem:[#allocation7 + $0x200] ss:$16 sps:$4 sm:$0xff]   ;;  %v2117_v18 = vrot.slane %v10077_v54, 6  ;;  %v2120_v12 = vrot.slane %v10101_v20, 6 }
 0x14d   :  { %v1634_v4 = vor.u32 %v1633_v22, %v1632_v3  ;;  %v1656_v3 = vrot.slane %v1654_v40, 4  ;;  %v2123_v20 = vrot.slane %v10115_v27, 6  ;;  %v2130_v27 = vrot.slane %v10141_v17, 6 }
 0x14e   :  { %v2122_v45 = vrot.slane %v2120_v12, 4  ;;  %v2137_v17 = vrot.slane %v10161_v7, 6  ;;  %v7738_v1 = vrot.slane %v10167_v53, 10  ;;  %v2140_v47 = vrot.slane %v10173_v5, 6 }
 0x14f   :  { %v1635_v6 = vsel %vm9955_vm7, %v1631_v55, %v1634_v4  ;;  %v1636_v21 = vrot.slane %v1634_v4, 4  ;;  %v2103_v55 = vrot.slane %v10039_v50, 6  ;;  %v7735_v4 = vrot.slane %v10045_v24, 10 }
 0x150   :  { %v7703_v10 = vcombine.low %v1630_v56, %v1635_v6  ;;  %v8890_v56 = vld [vmem:[#allocation7 + $0x20c] ss:$16 sps:$4 sm:$0xff]   ;;  %v2110_v24 = vrot.slane %v10057_v30, 6  ;;  %v8899_v30 = vld [vmem:[#allocation7 + $0x244] ss:$16 sps:$4 sm:$0xff]   ;;  %v2138_v44 = vsel %vm10387_vm13, %v7738_v1, %v2137_v17  ;;  %v2143_v53 = vrot.slane %v10187_v13, 6 }
 0x151   :  { %v2104_v6 = vsel %vm10387_vm13, %v2102_v15, %v2103_v55  ;;  %v2108_v50 = vsel %vm10387_vm13, %v7735_v4, %v2107_v0  ;;  %v11799_v15 = vld [vmem:[#allocation18_spill] sm:$0xff]  ;;  %v11800_v55 = vld [vmem:[#allocation19_spill] sm:$0xff] }
 0x152   :  { %v7739_v5 = vrot.slane %v11799_v15, 10  ;;  %v2147_v4 = vrot.slane %v11800_v55, 6  ;;  %v8960_v1 = vld [vmem:[#allocation7 + $0x388] ss:$16 sps:$4 sm:$0xff]  }
 0x153   :  { %7719 = vmatmul.mubr.msk.bf16.gmra.mrb[16].mxu0 %vm389_vm4, %v7701_v39  ;;  %7729 = vmatmul.mubr.msk.bf16.gmra.mrb[16].mxu1 %vm389_vm4, %v7701_v39  ;;  %v11792_v39 = vshll.u32 %v9869_v57, 16  ;;  %v1642_v57 = vsel %vm9955_vm7, %v1636_v21, %v1641_v25  ;;  %v2112_v21 = vrot.slane %v2110_v24, 4  ;;  %v2113_v25 = vrot.slane %v10071_v51, 6 }
 0x154   :  { %1856 = vmatprep.mubr.bf16.mxu0 %v11764_v38  ;;  %1979 = vmatprep.mubr.bf16.mxu1 %v11764_v38 }
 0x155   :  { %v1648_v49 = vrot.slane %v11792_v39, 6  ;;  %v8896_v39 = vld [vmem:[#allocation7 + $0x22c] ss:$16 sps:$4 sm:$0xff]   ;;  %v2114_v51 = vsel %vm10387_vm13, %v2112_v21, %v2113_v25  ;;  %v8909_v21 = vld [vmem:[#allocation7 + $0x280] ss:$16 sps:$4 sm:$0xff]  }
 0x156   :  { %v8912_v25 = vld [vmem:[#allocation7 + $0x288] ss:$16 sps:$4 sm:$0xff]  }
 0x157   :  { %v1649_v19 = vor.u32 %v1648_v49, %v1647_v52  ;;  %v8893_v52 = vld [vmem:[#allocation7 + $0x224] ss:$16 sps:$4 sm:$0xff]   ;;  %v7741_v49 = vcombine.low %v2104_v6, %v2108_v50  ;;  %v2153_v50 = vrot.slane %v10219_v58, 6 }
 0x158   :  { %v8905_v58 = vld [vmem:[#allocation7 + $0x264] ss:$16 sps:$4 sm:$0xff]  }
 0x159   :  { %v1650_v63 = vsel %vm9955_vm7, %v1646_v32, %v1649_v19  ;;  %v1651_v35 = vrot.slane %v1649_v19, 4  ;;  %v8891_v32 = vld [vmem:[#allocation7 + $0x220] ss:$16 sps:$4 sm:$0xff]   ;;  %v8894_v19 = vld [vmem:[#allocation7 + $0x228] ss:$16 sps:$4 sm:$0xff]  }
 0x15a   :  { %v7704_v33 = vcombine.low %v1642_v57, %v1650_v63  ;;  %v7736_v63 = vrot.slane %v10095_v26, 10 }
 0x15b   :  { %7720 = vmatmul.mubr.msk.bf16.gmra.mrb[20].mxu0 %vm389_vm4, %v7702_v29  ;;  %7730 = vmatmul.mubr.msk.bf16.gmra.mrb[20].mxu1 %vm389_vm4, %v7702_v29  ;;  %v1655_v22 = vsel %vm9955_vm7, %v1651_v35, %v1654_v40  ;;  %v1662_v29 = vsel %vm9955_vm7, %v1656_v3, %v1661_v8  ;;  %v2119_v40 = vrot.slane %v2117_v18, 4  ;;  %v2127_v35 = vrot.slane %v10127_v23, 6 }
 0x15c   :  { %1866 = vmatprep.mubr.bf16.mxu0 %v11764_v38  ;;  %1989 = vmatprep.mubr.bf16.mxu1 %v11764_v38  ;;  %v7705_v59 = vcombine.low %v1655_v22, %v1662_v29  ;;  %v2118_v54 = vsel %vm10387_vm13, %v7736_v63, %v2117_v18  ;;  %v2124_v3 = vsel %vm10387_vm13, %v2122_v45, %v2123_v20  ;;  %v2132_v29 = vrot.slane %v2130_v27, 4  ;;  %v8921_v18 = vld [vmem:[#allocation7 + $0x2c0] ss:$16 sps:$4 sm:$0xff]   ;;  %v8941_v45 = vld [vmem:[#allocation7 + $0x324] ss:$16 sps:$4 sm:$0xff]  }
 0x15d   :  { %v2121_v60 = vsel %vm10387_vm13, %v2119_v40, %v2120_v12  ;;  %v2133_v23 = vrot.slane %v10147_v46, 6  ;;  %v2139_v46 = vrot.slane %v2137_v17, 4  ;;  %v8927_v63 = vld [vmem:[#allocation7 + $0x2e0] ss:$16 sps:$4 sm:$0xff]   ;;  %v8930_v40 = vld [vmem:[#allocation7 + $0x2e8] ss:$16 sps:$4 sm:$0xff]  }
 0x15e   :  { %v7743_v26 = vcombine.low %v2118_v54, %v2121_v60  ;;  %v8935_v12 = vld [vmem:[#allocation7 + $0x304] ss:$16 sps:$4 sm:$0xff]   ;;  %v8938_v54 = vld [vmem:[#allocation7 + $0x30c] ss:$16 sps:$4 sm:$0xff]   ;;  %v8933_v60 = vld [vmem:[#allocation7 + $0x300] ss:$16 sps:$4 sm:$0xff]  }
 0x15f   :  { %v2141_v7 = vsel %vm10387_vm13, %v2139_v46, %v2140_v47  ;;  %v8944_v20 = vld [vmem:[#allocation7 + $0x32c] ss:$16 sps:$4 sm:$0xff]   ;;  %v8965_v46 = vld [vmem:[#allocation7 + $0x3a4] ss:$16 sps:$4 sm:$0xff]  }
 0x160   :  { %v7746_v28 = vcombine.low %v2138_v44, %v2141_v7  ;;  %v8962_v17 = vld [vmem:[#allocation7 + $0x38c] ss:$16 sps:$4 sm:$0xff]   ;;  %v8963_v44 = vld [vmem:[#allocation7 + $0x3a0] ss:$16 sps:$4 sm:$0xff]   ;;  %v8966_v7 = vld [vmem:[#allocation7 + $0x3a8] ss:$16 sps:$4 sm:$0xff]  }
 0x163   :  { %7721 = vmatmul.mubr.msk.bf16.gmra.mrb[24].mxu0 %vm389_vm4, %v7703_v10  ;;  %7731 = vmatmul.mubr.msk.bf16.gmra.mrb[24].mxu1 %vm389_vm4, %v7703_v10  ;;  %v2109_v10 = vrot.slane %v2107_v0, 4 }
 0x164   :  { %1876 = vmatprep.mubr.bf16.mxu0 %v11764_v38  ;;  %1999 = vmatprep.mubr.bf16.mxu1 %v11764_v38 }
 0x165   :  { %v2111_v34 = vsel %vm10387_vm13, %v2109_v10, %v2110_v24  ;;  %v8911_v10 = vld [vmem:[#allocation7 + $0x284] ss:$16 sps:$4 sm:$0xff]  }
 0x166   :  { %v7742_v57 = vcombine.low %v2111_v34, %v2114_v51  ;;  %v8923_v34 = vld [vmem:[#allocation7 + $0x2c4] ss:$16 sps:$4 sm:$0xff]   ;;  %v8926_v51 = vld [vmem:[#allocation7 + $0x2cc] ss:$16 sps:$4 sm:$0xff]  }
 0x16b   :  { %7722 = vmatmul.mubr.msk.bf16.gmra.mrb[28].mxu0 %vm389_vm4, %v7704_v33  ;;  %7732 = vmatmul.mubr.msk.bf16.gmra.mrb[28].mxu1 %vm389_vm4, %v7704_v33  ;;  %v7737_v33 = vrot.slane %v10121_v31, 10  ;;  %v2129_v31 = vrot.slane %v2127_v35, 4 }
 0x16c   :  { %1886 = vmatprep.mubr.bf16.mxu0 %v11764_v38  ;;  %2009 = vmatprep.mubr.bf16.mxu1 %v11764_v38 }
 0x16d   :  { %v2128_v8 = vsel %vm10387_vm13, %v7737_v33, %v2127_v35  ;;  %v2131_v14 = vsel %vm10387_vm13, %v2129_v31, %v2130_v27  ;;  %v8939_v33 = vld [vmem:[#allocation7 + $0x320] ss:$16 sps:$4 sm:$0xff]   ;;  %v8942_v35 = vld [vmem:[#allocation7 + $0x328] ss:$16 sps:$4 sm:$0xff]   ;;  %v8953_v31 = vld [vmem:[#allocation7 + $0x364] ss:$16 sps:$4 sm:$0xff]  }
 0x16e   :  { %v7744_v22 = vcombine.low %v2124_v3, %v2128_v8  ;;  %v8947_v3 = vld [vmem:[#allocation7 + $0x344] ss:$16 sps:$4 sm:$0xff]   ;;  %v8950_v8 = vld [vmem:[#allocation7 + $0x34c] ss:$16 sps:$4 sm:$0xff]   ;;  %v8945_v27 = vld [vmem:[#allocation7 + $0x340] ss:$16 sps:$4 sm:$0xff]  }
 0x173   :  { %7723 = vmatmul.mubr.msk.bf16.gmra.mrb[32].mxu0 %vm389_vm4, %v7705_v59  ;;  %7733 = vmatmul.mubr.msk.bf16.gmra.mrb[32].mxu1 %vm389_vm4, %v7705_v59  ;;  %v2134_v59 = vsel %vm10387_vm13, %v2132_v29, %v2133_v23  ;;  %v8956_v29 = vld [vmem:[#allocation7 + $0x36c] ss:$16 sps:$4 sm:$0xff]   ;;  %v8951_v23 = vld [vmem:[#allocation7 + $0x360] ss:$16 sps:$4 sm:$0xff]  }
 0x174   :  { %2298 = vmatprep.mubr.bf16.mxu0 %v11764_v38  ;;  %2421 = vmatprep.mubr.bf16.mxu1 %v11764_v38  ;;  %v7745_v37 = vcombine.low %v2131_v14, %v2134_v59  ;;  %v8954_v14 = vld [vmem:[#allocation7 + $0x368] ss:$16 sps:$4 sm:$0xff]   ;;  %v8959_v59 = vld [vmem:[#allocation7 + $0x384] ss:$16 sps:$4 sm:$0xff]  }
 0x17b   :  { %7758 = vmatmul.mubr.msk.bf16.vlgmr.msra.gmra.mrb[0].mxu0 %vm389_vm4, %v7740_v9  ;;  %7768 = vmatmul.mubr.msk.bf16.vlgmr.msra.gmra.mrb[0].mxu1 %vm389_vm4, %v7740_v9  ;;  %v2142_v9 = vrot.slane %v2140_v47, 4  ;;  %v8968_v47 = vld [vmem:[#allocation7 + $0x3ac] ss:$16 sps:$4 sm:$0xff]  }
 0x17c   :  { %2308 = vmatprep.mubr.bf16.mxu0 %v11764_v38  ;;  %2431 = vmatprep.mubr.bf16.mxu1 %v11764_v38 }
 0x17d   :  { %3991 = vmatpush1.bf16.msra.mxu0 %v8879_v48  ;;  %4054 = vmatpush1.bf16.msra.mxu1 %v8882_v61  ;;  %v2144_v0 = vsel %vm10387_vm13, %v2142_v9, %v2143_v53  ;;  %v2148_v48 = vsel %vm10387_vm13, %v7739_v5, %v2147_v4  ;;  %v11801_v61 = vld [vmem:[#allocation20_spill] sm:$0xff]  ;;  %v2694_v53 = vlaneseq }
 0x17e   :  { %3992 = vmatprep.subr.bf16.mxu0 %v8887_v42  ;;  %4055 = vmatprep.subr.bf16.mxu1 %v8890_v56  ;;  %v2150_v13 = vrot.slane %v11801_v61, 6  ;;  %v7747_v42 = vcombine.low %v2144_v0, %v2148_v48  ;;  %v2149_v56 = vrot.slane %v2147_v4, 4  ;;  %v8974_v9 = vld [vmem:[#allocation7 + $0xc] ss:$16 sps:$4 sm:$0xff]  }
 0x17f   :  { %v10486_v15 = vshrl.u32 %v2694_v53, 7  ;;  %v2584_v4 = vld [vmem:[#allocation5] sm:$0x3] }
 0x180   :  { %v2152_v6 = vrot.slane %v2150_v13, 4  ;;  %v2151_v24 = vsel %vm10387_vm13, %v2149_v56, %v2150_v13 }
 0x181   :  { %3993 = vmatpush1.bf16.msra.mxu0 %v8885_v41  ;;  %4056 = vmatpush1.bf16.msra.mxu1 %v8888_v62  ;;  %11802 = vst [vmem:[#allocation18_spill] sm:$0xff] %v10486_v15  ;;  %v11736_v5 = vsub.s32 0, %v10486_v15  ;;  %v11735_v55 = vsub.s32 1, %v10486_v15 }
 0x182   :  { %3994 = vmatprep.subr.bf16.mxu0 %v8893_v52  ;;  %4057 = vmatprep.subr.bf16.mxu1 %v8896_v39  ;;  %v2154_v41 = vsel %vm10387_vm13, %v2152_v6, %v2153_v50  ;;  %v8903_v52 = vld [vmem:[#allocation7 + $0x260] ss:$16 sps:$4 sm:$0xff]   ;;  %v8906_v39 = vld [vmem:[#allocation7 + $0x268] ss:$16 sps:$4 sm:$0xff]  }
 0x183   :  { %7759 = vmatmul.mubr.msk.bf16.gmra.mrb[4].mxu0 %vm389_vm4, %v7741_v49  ;;  %7769 = vmatmul.mubr.msk.bf16.gmra.mrb[4].mxu1 %vm389_vm4, %v7741_v49  ;;  %v7748_v62 = vcombine.low %v2151_v24, %v2154_v41  ;;  %v8908_v49 = vld [vmem:[#allocation7 + $0x26c] ss:$16 sps:$4 sm:$0xff]   ;;  %v10492_v6 = vrot.slane %v2584_v4, %v11736_v5  ;;  %v10496_v41 = vrot.slane %v2584_v4, %v11735_v55 }
 0x184   :  { %2318 = vmatprep.mubr.bf16.mxu0 %v11764_v38  ;;  %2441 = vmatprep.mubr.bf16.mxu1 %v11764_v38 }
 0x185   :  { %3995 = vmatpush1.bf16.msra.mxu0 %v8891_v32  ;;  %4058 = vmatpush1.bf16.msra.mxu1 %v8894_v19  ;;  %v8917_v32 = vld [vmem:[#allocation7 + $0x2a4] ss:$16 sps:$4 sm:$0xff]   ;;  %v8920_v19 = vld [vmem:[#allocation7 + $0x2ac] ss:$16 sps:$4 sm:$0xff]  }
 0x186   :  { %3996 = vmatprep.subr.bf16.mxu0 %v8899_v30  ;;  %4059 = vmatprep.subr.bf16.mxu1 %v8902_v36  ;;  %v8915_v30 = vld [vmem:[#allocation7 + $0x2a0] ss:$16 sps:$4 sm:$0xff]   ;;  %v8918_v36 = vld [vmem:[#allocation7 + $0x2a8] ss:$16 sps:$4 sm:$0xff]  }
 0x189   :  { %3997 = vmatpush1.bf16.msra.mxu0 %v8897_v43  ;;  %4060 = vmatpush1.bf16.msra.mxu1 %v8900_v16  ;;  %v8924_v43 = vld [vmem:[#allocation7 + $0x2c8] ss:$16 sps:$4 sm:$0xff]   ;;  %v8929_v16 = vld [vmem:[#allocation7 + $0x2e4] ss:$16 sps:$4 sm:$0xff]  }
 0x18a   :  { %3998 = vmatprep.subr.bf16.mxu0 %v8905_v58  ;;  %4061 = vmatprep.subr.bf16.mxu1 %v8908_v49 }
 0x18b   :  { %7760 = vmatmul.mubr.msk.bf16.gmra.mrb[8].mxu0 %vm389_vm4, %v7742_v57  ;;  %7770 = vmatmul.mubr.msk.bf16.gmra.mrb[8].mxu1 %vm389_vm4, %v7742_v57  ;;  %v8932_v57 = vld [vmem:[#allocation7 + $0x2ec] ss:$16 sps:$4 sm:$0xff]  }
 0x18c   :  { %2328 = vmatprep.mubr.bf16.mxu0 %v11764_v38  ;;  %2451 = vmatprep.mubr.bf16.mxu1 %v11764_v38 }
 0x18d   :  { %3999 = vmatpush1.bf16.msra.mxu0 %v8903_v52  ;;  %4062 = vmatpush1.bf16.msra.mxu1 %v8906_v39 }
 0x18e   :  { %4000 = vmatprep.subr.bf16.mxu0 %v8911_v10 }
 0x191   :  { %4001 = vmatpush1.bf16.msra.mxu0 %v8909_v21 }
 0x192   :  { %4002 = vmatprep.subr.bf16.mxu0 %v8917_v32 }
 0x193   :  { %7761 = vmatmul.mubr.msk.bf16.gmra.mrb[12].mxu0 %vm389_vm4, %v7743_v26  ;;  %7771 = vmatmul.mubr.msk.bf16.gmra.mrb[12].mxu1 %vm389_vm4, %v7743_v26  ;;  %v8936_v26 = vld [vmem:[#allocation7 + $0x308] ss:$16 sps:$4 sm:$0xff]  }
 0x194   :  { %2338 = vmatprep.mubr.bf16.mxu0 %v11764_v38  ;;  %2461 = vmatprep.mubr.bf16.mxu1 %v11764_v38 }
 0x195   :  { %4003 = vmatpush1.bf16.msra.mxu0 %v8915_v30 }
 0x196   :  { %4004 = vmatprep.subr.bf16.mxu0 %v8923_v34 }
 0x199   :  { %4005 = vmatpush1.bf16.msra.mxu0 %v8921_v18 }
 0x19a   :  { %4006 = vmatprep.subr.bf16.mxu0 %v8929_v16 }
 0x19b   :  { %7762 = vmatmul.mubr.msk.bf16.gmra.mrb[16].mxu0 %vm389_vm4, %v7744_v22  ;;  %7772 = vmatmul.mubr.msk.bf16.gmra.mrb[16].mxu1 %vm389_vm4, %v7744_v22  ;;  %v8948_v22 = vld [vmem:[#allocation7 + $0x348] ss:$16 sps:$4 sm:$0xff]  }
 0x19c   :  { %2348 = vmatprep.mubr.bf16.mxu0 %v11764_v38  ;;  %2471 = vmatprep.mubr.bf16.mxu1 %v11764_v38 }
 0x19d   :  { %4007 = vmatpush1.bf16.msra.mxu0 %v8927_v63 }
 0x19e   :  { %4008 = vmatprep.subr.bf16.mxu0 %v8935_v12 }
 0x1a1   :  { %4009 = vmatpush1.bf16.msra.mxu0 %v8933_v60 }
 0x1a2   :  { %4010 = vmatprep.subr.bf16.mxu0 %v8941_v45 }
 0x1a3   :  { %7763 = vmatmul.mubr.msk.bf16.gmra.mrb[20].mxu0 %vm389_vm4, %v7745_v37  ;;  %7773 = vmatmul.mubr.msk.bf16.gmra.mrb[20].mxu1 %vm389_vm4, %v7745_v37  ;;  %v8957_v37 = vld [vmem:[#allocation7 + $0x380] ss:$16 sps:$4 sm:$0xff]  }
 0x1a4   :  { %2358 = vmatprep.mubr.bf16.mxu0 %v11764_v38  ;;  %2481 = vmatprep.mubr.bf16.mxu1 %v11764_v38 }
 0x1a5   :  { %4011 = vmatpush1.bf16.msra.mxu0 %v8939_v33 }
 0x1a6   :  { %4012 = vmatprep.subr.bf16.mxu0 %v8947_v3 }
 0x1a9   :  { %4013 = vmatpush1.bf16.msra.mxu0 %v8945_v27 }
 0x1aa   :  { %4014 = vmatprep.subr.bf16.mxu0 %v8953_v31 }
 0x1ab   :  { %7764 = vmatmul.mubr.msk.bf16.gmra.mrb[24].mxu0 %vm389_vm4, %v7746_v28  ;;  %7774 = vmatmul.mubr.msk.bf16.gmra.mrb[24].mxu1 %vm389_vm4, %v7746_v28  ;;  %v8971_v28 = vld [vmem:[#allocation7 + $0x4] ss:$16 sps:$4 sm:$0xff]  }
 0x1ac   :  { %2368 = vmatprep.mubr.bf16.mxu0 %v11764_v38  ;;  %2491 = vmatprep.mubr.bf16.mxu1 %v11764_v38 }
 0x1ad   :  { %4015 = vmatpush1.bf16.msra.mxu0 %v8951_v23 }
 0x1ae   :  { %4016 = vmatprep.subr.bf16.mxu0 %v8959_v59 }
 0x1b1   :  { %4017 = vmatpush1.bf16.msra.mxu0 %v8957_v37 }
 0x1b2   :  { %4018 = vmatprep.subr.bf16.mxu0 %v8965_v46 }
 0x1b3   :  { %7765 = vmatmul.mubr.msk.bf16.gmra.mrb[28].mxu0 %vm389_vm4, %v7747_v42  ;;  %7775 = vmatmul.mubr.msk.bf16.gmra.mrb[28].mxu1 %vm389_vm4, %v7747_v42 }
 0x1b4   :  { %2378 = vmatprep.mubr.bf16.mxu0 %v11764_v38  ;;  %2501 = vmatprep.mubr.bf16.mxu1 %v11764_v38  ;;  %v8914_v38 = vld [vmem:[#allocation7 + $0x28c] ss:$16 sps:$4 sm:$0xff]  }
 0x1b5   :  { %4063 = vmatprep.subr.bf16.mxu1 %v8914_v38  ;;  %4019 = vmatpush1.bf16.msra.mxu0 %v8963_v44 }
 0x1b6   :  { %4064 = vmatpush1.bf16.msra.mxu1 %v8912_v25  ;;  %4434 = vmatprep.subr.bf16.mxu0 %v8971_v28 }
 0x1b7   :  { %4065 = vmatprep.subr.bf16.mxu1 %v8920_v19 }
 0x1ba   :  { %4066 = vmatpush1.bf16.msra.mxu1 %v8918_v36 }
 0x1bb   :  { %7766 = vmatmul.mubr.msk.bf16.gmra.mrb[32].mxu0 %vm389_vm4, %v7748_v62  ;;  %7776 = vmatmul.mubr.msk.bf16.gmra.mrb[32].mxu1 %vm389_vm4, %v7748_v62 }
 0x1bc   :  { %4067 = vmatprep.subr.bf16.mxu1 %v8926_v51 }
 0x1be   :  { %4068 = vmatpush1.bf16.msra.mxu1 %v8924_v43 }
 0x1bf   :  { %4069 = vmatprep.subr.bf16.mxu1 %v8932_v57 }
 0x1c2   :  { %4070 = vmatpush1.bf16.msra.mxu1 %v8930_v40 }
 0x1c3   :  { %4071 = vmatprep.subr.bf16.mxu1 %v8938_v54 }
 0x1c6   :  { %4072 = vmatpush1.bf16.msra.mxu1 %v8936_v26 }
 0x1c7   :  { %4073 = vmatprep.subr.bf16.mxu1 %v8944_v20 }
 0x1ca   :  { %4074 = vmatpush1.bf16.msra.mxu1 %v8942_v35 }
 0x1cb   :  { %4075 = vmatprep.subr.bf16.mxu1 %v8950_v8 }
 0x1ce   :  { %4076 = vmatpush1.bf16.msra.mxu1 %v8948_v22 }
 0x1cf   :  { %4077 = vmatprep.subr.bf16.mxu1 %v8956_v29 }
 0x1d2   :  { %4078 = vmatpush1.bf16.msra.mxu1 %v8954_v14 }
 0x1d3   :  { %4079 = vmatprep.subr.bf16.mxu1 %v8962_v17 }
 0x1d6   :  { %4080 = vmatpush1.bf16.msra.mxu1 %v8960_v1 }
 0x1d7   :  { %4081 = vmatprep.subr.bf16.mxu1 %v8968_v47 }
 0x1da   :  { %4082 = vmatpush1.bf16.msra.mxu1 %v8966_v7 }
 0x1db   :  { %4497 = vmatprep.subr.bf16.mxu1 %v8974_v9 }
 0x24e   :  { %v2300_v0 = vpop.f32.mrb[0].mxu0  ;;  %v2423_v48 = vpop.f32.mrb[0].mxu1 }
 0x24f   :  { %v2609_v61 = vrot.slane %v2300_v0, 1  ;;  %v2611_v13 = vrot.slane %v2423_v48, 1  ;;  %v2302_v42 = vpop.f32.mrb[1].mxu0  ;;  %v2425_v56 = vpop.f32.mrb[1].mxu1 }
 0x250   :  { %v2610_v50 = vrot.slane %v2302_v42, 1  ;;  %v2612_v24 = vrot.slane %v2425_v56, 1  ;;  %v2304_v62 = vpop.f32.mrb[2].mxu0  ;;  %v2427_v58 = vpop.f32.mrb[2].mxu1 }
 0x251   :  { %v2657_v52 = vmax.f32 %v2300_v0, %v2609_v61  ;;  %v2659_v39 = vmax.f32 %v2423_v48, %v2611_v13  ;;  %v2752_v49 = vrot.slane %v2304_v62, 1  ;;  %v2754_v10 = vrot.slane %v2427_v58, 1  ;;  %v2306_v38 = vpop.f32.mrb[3].mxu0  ;;  %v2429_v21 = vpop.f32.mrb[3].mxu1 }
 0x252   :  { %v2658_v25 = vmax.f32 %v2302_v42, %v2610_v50  ;;  %v2660_v32 = vmax.f32 %v2425_v56, %v2612_v24  ;;  %v2753_v19 = vrot.slane %v2306_v38, 1  ;;  %v2755_v30 = vrot.slane %v2429_v21, 1 }
 0x253   :  { %v2681_v36 = vmax.f32 %v2657_v52, %v2659_v39  ;;  %v2800_v34 = vmax.f32 %v2304_v62, %v2752_v49  ;;  %v2802_v51 = vmax.f32 %v2427_v58, %v2754_v10 }
 0x254   :  { %v2682_v18 = vmax.f32 %v2658_v25, %v2660_v32  ;;  %v2801_v43 = vmax.f32 %v2306_v38, %v2753_v19  ;;  %v2803_v16 = vmax.f32 %v2429_v21, %v2755_v30 }
 0x255   :  { %v2704_v57 = vadd.f32 %v10492_v6, %v2681_v36  ;;  %v2824_v63 = vmax.f32 %v2800_v34, %v2802_v51 }
 0x256   :  { %v2705_v40 = vadd.f32 %v10496_v41, %v2682_v18  ;;  %v2825_v12 = vmax.f32 %v2801_v43, %v2803_v16  ;;  %v2310_v54 = vpop.f32.mrb[4].mxu0  ;;  %v2433_v60 = vpop.f32.mrb[4].mxu1 }
 0x257   :  { %v2716_v26 = vmax.f32 %v2704_v57, 0.0  ;;  %v2836_v45 = vadd.f32 %v2824_v63, %v10492_v6  ;;  %v2884_v20 = vrot.slane %v2310_v54, 1  ;;  %v2886_v33 = vrot.slane %v2433_v60, 1  ;;  %v2312_v35 = vpop.f32.mrb[5].mxu0  ;;  %v2435_v3 = vpop.f32.mrb[5].mxu1 }
 0x258   :  { %v2717_v8 = vmax.f32 %v2705_v40, 0.0  ;;  %v2837_v27 = vadd.f32 %v2825_v12, %v10496_v41  ;;  %v2885_v22 = vrot.slane %v2312_v35, 1  ;;  %v2887_v31 = vrot.slane %v2435_v3, 1  ;;  %v2314_v29 = vpop.f32.mrb[6].mxu0  ;;  %v2437_v23 = vpop.f32.mrb[6].mxu1 }
 0x259   :  { %v3004_v14 = vrot.slane %v2716_v26, 1  ;;  %v3028_v59 = vrot.slane %v2716_v26, 2  ;;  %v3052_v17 = vrot.slane %v2716_v26, 3  ;;  %v2848_v37 = vmax.f32 %v2836_v45, 0.0  ;;  %v2316_v1 = vpop.f32.mrb[7].mxu0  ;;  %v2439_v46 = vpop.f32.mrb[7].mxu1 }
 0x25a   :  { %v3005_v47 = vrot.slane %v2717_v8, 1  ;;  %v3029_v44 = vrot.slane %v2717_v8, 2  ;;  %v3053_v7 = vrot.slane %v2717_v8, 3  ;;  %v2849_v28 = vmax.f32 %v2837_v27, 0.0 }
 0x25b   :  { %v3269_v9 = vsel %vm3268_vm14, %v2716_v26, %v3004_v14  ;;  %v3088_v53 = vrot.slane %v2848_v37, 4  ;;  %v3112_v4 = vrot.slane %v2848_v37, 5  ;;  %v3136_v0 = vrot.slane %v2848_v37, 6 }
 0x25c   :  { %v3282_v48 = vsel %vm2092_vm11, %v3269_v9, %v3028_v59  ;;  %v3270_v61 = vsel %vm3268_vm14, %v2717_v8, %v3005_v47  ;;  %v3160_v13 = vrot.slane %v2848_v37, 7  ;;  %v3089_v42 = vrot.slane %v2849_v28, 4 }
 0x25d   :  { %v3295_v56 = vsel %vm1048_vm8, %v3282_v48, %v3052_v17  ;;  %v3283_v50 = vsel %vm2092_vm11, %v3270_v61, %v3029_v44  ;;  %v3113_v24 = vrot.slane %v2849_v28, 5  ;;  %v3137_v62 = vrot.slane %v2849_v28, 6 }
 0x25e   :  { %v3296_v58 = vsel %vm1048_vm8, %v3283_v50, %v3053_v7  ;;  %v3308_v52 = vsel %vm3307_vm15, %v3295_v56, %v3088_v53  ;;  %v3161_v39 = vrot.slane %v2849_v28, 7  ;;  %v2932_v49 = vmax.f32 %v2310_v54, %v2884_v20  ;;  %v2320_v10 = vpop.f32.mrb[8].mxu0  ;;  %v2443_v38 = vpop.f32.mrb[8].mxu1 }
 0x25f   :  { %v3321_v21 = vsel %vm3320_vm0, %v3308_v52, %v3112_v4  ;;  %v3309_v25 = vsel %vm3307_vm15, %v3296_v58, %v3089_v42  ;;  %v2934_v32 = vmax.f32 %v2433_v60, %v2886_v33  ;;  %v2933_v19 = vmax.f32 %v2312_v35, %v2885_v22  ;;  %v2322_v30 = vpop.f32.mrb[9].mxu0  ;;  %v2445_v36 = vpop.f32.mrb[9].mxu1 }
 0x260   :  { %v3333_v34 = vsel %vm417_vm2, %v3321_v21, %v3136_v0  ;;  %v3322_v51 = vsel %vm3320_vm0, %v3309_v25, %v3113_v24  ;;  %v2935_v18 = vmax.f32 %v2435_v3, %v2887_v31  ;;  %v2613_v43 = vrot.slane %v2314_v29, 1  ;;  %v10513_v16 = vpop.f32.mrb[10].mxu0  ;;  %v10515_v57 = vpop.f32.mrb[10].mxu1 }
 0x261   :  { %v10518_v63 = vsel %vm3345_vm1, %v3333_v34, %v3160_v13  ;;  %v3334_v40 = vsel %vm417_vm2, %v3322_v51, %v3137_v62  ;;  %v2956_v12 = vmax.f32 %v2932_v49, %v2934_v32  ;;  %v2615_v54 = vrot.slane %v2437_v23, 1  ;;  %v10521_v60 = vpop.f32.mrb[11].mxu0  ;;  %v10523_v26 = vpop.f32.mrb[11].mxu1 }
 0x262   :  { %11803 = vst [vmem:[#allocation19_spill] sm:$0xff] %v10518_v63  ;;  %v10526_v45 = vsel %vm3345_vm1, %v3334_v40, %v3161_v39  ;;  %v2957_v20 = vmax.f32 %v2933_v19, %v2935_v18  ;;  %v2661_v33 = vmax.f32 %v2314_v29, %v2613_v43  ;;  %v2614_v35 = vrot.slane %v2316_v1, 1 }
 0x263   :  { %11804 = vst [vmem:[#allocation20_spill] sm:$0xff] %v10526_v45  ;;  %v10530_v3 = vpack.c.bf16 %v10526_v45, %v10518_v63  ;;  %v2968_v8 = vadd.f32 %v2956_v12, %v10492_v6  ;;  %v2663_v27 = vmax.f32 %v2437_v23, %v2615_v54  ;;  %v2616_v22 = vrot.slane %v2439_v46, 1 }
 0x264   :  { %v2969_v31 = vadd.f32 %v2957_v20, %v10496_v41  ;;  %v2662_v14 = vmax.f32 %v2316_v1, %v2614_v35  ;;  %v2756_v59 = vrot.slane %v2320_v10, 1  ;;  %v2758_v17 = vrot.slane %v2443_v38, 1 }
 0x265   :  { %v2980_v37 = vmax.f32 %v2968_v8, 0.0  ;;  %v2683_v47 = vmax.f32 %v2661_v33, %v2663_v27  ;;  %v2664_v44 = vmax.f32 %v2439_v46, %v2616_v22  ;;  %v2757_v7 = vrot.slane %v2322_v30, 1 }
 0x266   :  { %v2981_v28 = vmax.f32 %v2969_v31, 0.0  ;;  %v2804_v29 = vmax.f32 %v2320_v10, %v2756_v59  ;;  %v2806_v9 = vmax.f32 %v2443_v38, %v2758_v17  ;;  %v2759_v53 = vrot.slane %v2445_v36, 1  ;;  %v10534_v4 = vpop.f32.mrb[12].mxu0  ;;  %v10536_v0 = vpop.f32.mrb[12].mxu1 }
 0x267   :  { %v3196_v48 = vrot.slane %v2980_v37, 1  ;;  %v3220_v23 = vrot.slane %v2980_v37, 2  ;;  %v3244_v61 = vrot.slane %v2980_v37, 3  ;;  %v2706_v13 = vadd.f32 %v10492_v6, %v2683_v47  ;;  %v10539_v1 = vpop.f32.mrb[13].mxu0  ;;  %v10541_v42 = vpop.f32.mrb[13].mxu1 }
 0x268   :  { %v3197_v56 = vrot.slane %v2981_v28, 1  ;;  %v3221_v46 = vrot.slane %v2981_v28, 2  ;;  %v3245_v50 = vrot.slane %v2981_v28, 3  ;;  %v2684_v24 = vmax.f32 %v2662_v14, %v2664_v44  ;;  %v10543_v62 = vpop.f32.mrb[14].mxu0  ;;  %v10545_v58 = vpop.f32.mrb[14].mxu1 }
 0x269   :  { %v3358_v52 = vsel %vm3268_vm14, %v2980_v37, %v3196_v48  ;;  %v2718_v39 = vmax.f32 %v2706_v13, 0.0  ;;  %v2826_v49 = vmax.f32 %v2804_v29, %v2806_v9  ;;  %v2805_v10 = vmax.f32 %v2322_v30, %v2757_v7  ;;  %v10548_v38 = vpop.f32.mrb[15].mxu0  ;;  %v10550_v21 = vpop.f32.mrb[15].mxu1 }
 0x26a   :  { %v3370_v25 = vsel %vm2092_vm11, %v3358_v52, %v3220_v23  ;;  %v3359_v32 = vsel %vm3268_vm14, %v2981_v28, %v3197_v56  ;;  %v2707_v19 = vadd.f32 %v10496_v41, %v2684_v24  ;;  %v2807_v34 = vmax.f32 %v2445_v36, %v2759_v53 }
 0x26b   :  { %v3382_v51 = vsel %vm1048_vm8, %v3370_v25, %v3244_v61  ;;  %v3371_v18 = vsel %vm2092_vm11, %v3359_v32, %v3221_v46  ;;  %v3006_v43 = vrot.slane %v2718_v39, 1  ;;  %v3030_v40 = vrot.slane %v2718_v39, 2 }
 0x26c   :  { %v3383_v12 = vsel %vm1048_vm8, %v3371_v18, %v3245_v50  ;;  %v3054_v30 = vrot.slane %v2718_v39, 3  ;;  %v2719_v54 = vmax.f32 %v2707_v19, 0.0  ;;  %v2838_v20 = vadd.f32 %v2826_v49, %v10492_v6 }
 0x26d   :  { %v10559_v33 = vpack.c.bf16 %v3383_v12, %v3382_v51  ;;  %v3271_v35 = vsel %vm3268_vm14, %v2718_v39, %v3006_v43  ;;  %v2827_v8 = vmax.f32 %v2805_v10, %v2807_v34  ;;  %v2888_v27 = vrot.slane %v10513_v16, 1 }
 0x26e   :  { %v3284_v36 = vsel %vm2092_vm11, %v3271_v35, %v3030_v40  ;;  %v3007_v22 = vrot.slane %v2719_v54, 1  ;;  %v3031_v31 = vrot.slane %v2719_v54, 2  ;;  %v3055_v14 = vrot.slane %v2719_v54, 3  ;;  %v10564_v59 = vpop.f32.mrb[16].mxu0  ;;  %v10566_v17 = vpop.f32.mrb[16].mxu1 }
 0x26f   :  { %v3297_v37 = vsel %vm1048_vm8, %v3284_v36, %v3054_v30  ;;  %v2850_v47 = vmax.f32 %v2838_v20, 0.0  ;;  %v2839_v44 = vadd.f32 %v2827_v8, %v10496_v41  ;;  %v2936_v7 = vmax.f32 %v10513_v16, %v2888_v27  ;;  %v10571_v28 = vpop.f32.mrb[17].mxu0  ;;  %v10573_v29 = vpop.f32.mrb[17].mxu1 }
 0x270   :  { %v3272_v9 = vsel %vm3268_vm14, %v2719_v54, %v3007_v22  ;;  %v2890_v53 = vrot.slane %v10515_v57, 1  ;;  %v2889_v48 = vrot.slane %v10521_v60, 1  ;;  %v2891_v23 = vrot.slane %v10523_v26, 1  ;;  %v10579_v61 = vpop.f32.mrb[18].mxu0  ;;  %v10581_v13 = vpop.f32.mrb[18].mxu1 }
 0x271   :  { %v3285_v56 = vsel %vm2092_vm11, %v3272_v9, %v3031_v31  ;;  %v3090_v46 = vrot.slane %v2850_v47, 4  ;;  %v3114_v16 = vrot.slane %v2850_v47, 5  ;;  %v3138_v50 = vrot.slane %v2850_v47, 6  ;;  %v10584_v24 = vpop.f32.mrb[19].mxu0  ;;  %v10586_v52 = vpop.f32.mrb[19].mxu1 }
 0x272   :  { %v3298_v39 = vsel %vm1048_vm8, %v3285_v56, %v3055_v14  ;;  %v3162_v49 = vrot.slane %v2850_v47, 7  ;;  %v2851_v10 = vmax.f32 %v2839_v44, 0.0  ;;  %v2938_v25 = vmax.f32 %v10515_v57, %v2890_v53 }
 0x273   :  { %v3310_v32 = vsel %vm3307_vm15, %v3297_v37, %v3090_v46  ;;  %v2937_v19 = vmax.f32 %v10521_v60, %v2889_v48  ;;  %v2939_v34 = vmax.f32 %v10523_v26, %v2891_v23  ;;  %v2617_v51 = vrot.slane %v10534_v4, 1 }
 0x274   :  { %v3323_v18 = vsel %vm3320_vm0, %v3310_v32, %v3114_v16  ;;  %v3091_v43 = vrot.slane %v2851_v10, 4  ;;  %v3115_v40 = vrot.slane %v2851_v10, 5  ;;  %v3139_v12 = vrot.slane %v2851_v10, 6 }
 0x275   :  { %v3335_v30 = vsel %vm417_vm2, %v3323_v18, %v3138_v50  ;;  %v3163_v54 = vrot.slane %v2851_v10, 7  ;;  %v2958_v20 = vmax.f32 %v2936_v7, %v2938_v25  ;;  %v2959_v35 = vmax.f32 %v2937_v19, %v2939_v34 }
 0x276   :  { %v10597_v57 = vsel %vm3345_vm1, %v3335_v30, %v3162_v49  ;;  %v3311_v8 = vsel %vm3307_vm15, %v3298_v39, %v3091_v43  ;;  %v2665_v60 = vmax.f32 %v10534_v4, %v2617_v51  ;;  %v2619_v26 = vrot.slane %v10536_v0, 1  ;;  %v10602_v27 = vpop.f32.mrb[20].mxu0  ;;  %v10604_v36 = vpop.f32.mrb[20].mxu1 }
 0x277   :  { %11805 = vst [vmem:[#allocation22_spill] sm:$0xff] %v10597_v57  ;;  %v3324_v22 = vsel %vm3320_vm0, %v3311_v8, %v3115_v40  ;;  %v2970_v31 = vadd.f32 %v2958_v20, %v10492_v6  ;;  %v2971_v14 = vadd.f32 %v2959_v35, %v10496_v41  ;;  %v2618_v37 = vrot.slane %v10539_v1, 1  ;;  %v10610_v47 = vpop.f32.mrb[21].mxu0  ;;  %v10612_v44 = vpop.f32.mrb[21].mxu1 }
 0x278   :  { %v3336_v4 = vsel %vm417_vm2, %v3324_v22, %v3139_v12  ;;  %v2667_v7 = vmax.f32 %v10536_v0, %v2619_v26  ;;  %v2620_v9 = vrot.slane %v10541_v42, 1  ;;  %v2760_v53 = vrot.slane %v10543_v62, 1  ;;  %v10618_v48 = vpop.f32.mrb[22].mxu0  ;;  %v10620_v23 = vpop.f32.mrb[22].mxu1 }
 0x279   :  { %v10623_v56 = vsel %vm3345_vm1, %v3336_v4, %v3163_v54  ;;  %v2982_v46 = vmax.f32 %v2970_v31, 0.0  ;;  %v2983_v16 = vmax.f32 %v2971_v14, 0.0  ;;  %v2666_v50 = vmax.f32 %v10539_v1, %v2618_v37  ;;  %v10626_v39 = vpop.f32.mrb[23].mxu0  ;;  %v10628_v49 = vpop.f32.mrb[23].mxu1 }
 0x27a   :  { %11806 = vst [vmem:[#allocation23_spill] sm:$0xff] %v10623_v56  ;;  %v10632_v0 = vpack.c.bf16 %v10623_v56, %v10597_v57  ;;  %v2685_v10 = vmax.f32 %v2665_v60, %v2667_v7  ;;  %v2668_v25 = vmax.f32 %v10541_v42, %v2620_v9  ;;  %v2808_v32 = vmax.f32 %v10543_v62, %v2760_v53 }
 0x27b   :  { %v3198_v19 = vrot.slane %v2982_v46, 1  ;;  %v3222_v34 = vrot.slane %v2982_v46, 2  ;;  %v3246_v51 = vrot.slane %v2982_v46, 3  ;;  %v3199_v18 = vrot.slane %v2983_v16, 1 }
 0x27c   :  { %v3223_v43 = vrot.slane %v2983_v16, 2  ;;  %v3247_v40 = vrot.slane %v2983_v16, 3  ;;  %v2708_v1 = vadd.f32 %v10492_v6, %v2685_v10  ;;  %v2686_v12 = vmax.f32 %v2666_v50, %v2668_v25 }
 0x27d   :  { %v3360_v30 = vsel %vm3268_vm14, %v2982_v46, %v3198_v19  ;;  %v3361_v54 = vsel %vm3268_vm14, %v2983_v16, %v3199_v18  ;;  %v2762_v20 = vrot.slane %v10545_v58, 1  ;;  %v2761_v35 = vrot.slane %v10548_v38, 1 }
 0x27e   :  { %v3372_v42 = vsel %vm2092_vm11, %v3360_v30, %v3222_v34  ;;  %v3373_v62 = vsel %vm2092_vm11, %v3361_v54, %v3223_v43  ;;  %v2720_v8 = vmax.f32 %v2708_v1, 0.0  ;;  %v2709_v60 = vadd.f32 %v10496_v41, %v2686_v12  ;;  %v10644_v26 = vpop.f32.mrb[24].mxu0  ;;  %v10646_v22 = vpop.f32.mrb[24].mxu1 }
 0x27f   :  { %v3384_v31 = vsel %vm1048_vm8, %v3372_v42, %v3246_v51  ;;  %v3385_v14 = vsel %vm1048_vm8, %v3373_v62, %v3247_v40  ;;  %v2810_v37 = vmax.f32 %v10545_v58, %v2762_v20  ;;  %v2809_v4 = vmax.f32 %v10548_v38, %v2761_v35  ;;  %v10652_v7 = vpop.f32.mrb[25].mxu0  ;;  %v10654_v9 = vpop.f32.mrb[25].mxu1 }
 0x280   :  { %v10656_v53 = vpack.c.bf16 %v3385_v14, %v3384_v31  ;;  %v3008_v46 = vrot.slane %v2720_v8, 1  ;;  %v3032_v16 = vrot.slane %v2720_v8, 2  ;;  %v3056_v50 = vrot.slane %v2720_v8, 3  ;;  %v10658_v10 = vpop.f32.mrb[26].mxu0  ;;  %v10660_v25 = vpop.f32.mrb[26].mxu1 }
 0x281   :  { %v2721_v19 = vmax.f32 %v2709_v60, 0.0  ;;  %v2828_v34 = vmax.f32 %v2808_v32, %v2810_v37  ;;  %v2763_v51 = vrot.slane %v10550_v21, 1  ;;  %v2892_v58 = vrot.slane %v10564_v59, 1  ;;  %v10664_v38 = vpop.f32.mrb[27].mxu0  ;;  %v10666_v18 = vpop.f32.mrb[27].mxu1 }
 0x282   :  { %v3273_v43 = vsel %vm3268_vm14, %v2720_v8, %v3008_v46  ;;  %v2894_v40 = vrot.slane %v10566_v17, 1  ;;  %v2893_v1 = vrot.slane %v10571_v28, 1  ;;  %v2895_v12 = vrot.slane %v10573_v29, 1 }
 0x283   :  { %v3286_v30 = vsel %vm2092_vm11, %v3273_v43, %v3032_v16  ;;  %v3009_v54 = vrot.slane %v2721_v19, 1  ;;  %v3033_v32 = vrot.slane %v2721_v19, 2  ;;  %v3057_v20 = vrot.slane %v2721_v19, 3 }
 0x284   :  { %v3299_v35 = vsel %vm1048_vm8, %v3286_v30, %v3056_v50  ;;  %v2840_v42 = vadd.f32 %v2828_v34, %v10492_v6  ;;  %v2811_v62 = vmax.f32 %v10550_v21, %v2763_v51  ;;  %v2940_v60 = vmax.f32 %v10564_v59, %v2892_v58 }
 0x285   :  { %v3274_v8 = vsel %vm3268_vm14, %v2721_v19, %v3009_v54  ;;  %v2942_v31 = vmax.f32 %v10566_v17, %v2894_v40  ;;  %v2941_v14 = vmax.f32 %v10571_v28, %v2893_v1  ;;  %v2943_v37 = vmax.f32 %v10573_v29, %v2895_v12 }
 0x286   :  { %v3287_v46 = vsel %vm2092_vm11, %v3274_v8, %v3033_v32  ;;  %v2852_v16 = vmax.f32 %v2840_v42, 0.0  ;;  %v2829_v43 = vmax.f32 %v2809_v4, %v2811_v62  ;;  %v2621_v50 = vrot.slane %v10579_v61, 1  ;;  %v10683_v30 = vpop.f32.mrb[28].mxu0  ;;  %v10685_v34 = vpop.f32.mrb[28].mxu1 }
 0x287   :  { %v3300_v21 = vsel %vm1048_vm8, %v3287_v46, %v3057_v20  ;;  %v2960_v59 = vmax.f32 %v2940_v60, %v2942_v31  ;;  %v2961_v19 = vmax.f32 %v2941_v14, %v2943_v37  ;;  %v2623_v17 = vrot.slane %v10581_v13, 1  ;;  %v10689_v51 = vpop.f32.mrb[29].mxu0  ;;  %v10691_v28 = vpop.f32.mrb[29].mxu1 }
 0x288   :  { %v3092_v29 = vrot.slane %v2852_v16, 4  ;;  %v3116_v58 = vrot.slane %v2852_v16, 5  ;;  %v3140_v40 = vrot.slane %v2852_v16, 6  ;;  %v3164_v4 = vrot.slane %v2852_v16, 7  ;;  %v10693_v1 = vpop.f32.mrb[30].mxu0  ;;  %v10695_v12 = vpop.f32.mrb[30].mxu1 }
 0x289   :  { %v2841_v54 = vadd.f32 %v2829_v43, %v10496_v41  ;;  %v2972_v32 = vadd.f32 %v2960_v59, %v10492_v6  ;;  %v2973_v20 = vadd.f32 %v2961_v19, %v10496_v41  ;;  %v2669_v42 = vmax.f32 %v10579_v61, %v2621_v50  ;;  %v10701_v62 = vpop.f32.mrb[31].mxu0  ;;  %v10703_v60 = vpop.f32.mrb[31].mxu1 }
 0x28a   :  { %v3312_v8 = vsel %vm3307_vm15, %v3299_v35, %v3092_v29  ;;  %v2671_v31 = vmax.f32 %v10581_v13, %v2623_v17  ;;  %v2622_v14 = vrot.slane %v10584_v24, 1  ;;  %v2624_v37 = vrot.slane %v10586_v52, 1 }
 0x28b   :  { %v3325_v46 = vsel %vm3320_vm0, %v3312_v8, %v3116_v58  ;;  %v2853_v16 = vmax.f32 %v2841_v54, 0.0  ;;  %v2984_v43 = vmax.f32 %v2972_v32, 0.0  ;;  %v2985_v59 = vmax.f32 %v2973_v20, 0.0 }
 0x28c   :  { %v3337_v19 = vsel %vm417_vm2, %v3325_v46, %v3140_v40  ;;  %v2687_v61 = vmax.f32 %v2669_v42, %v2671_v31  ;;  %v2670_v50 = vmax.f32 %v10584_v24, %v2622_v14  ;;  %v2672_v55 = vmax.f32 %v10586_v52, %v2624_v37 }
 0x28d   :  { %v10714_v35 = vsel %vm3345_vm1, %v3337_v19, %v3164_v4  ;;  %v3093_v13 = vrot.slane %v2853_v16, 4  ;;  %v3117_v17 = vrot.slane %v2853_v16, 5  ;;  %v3141_v29 = vrot.slane %v2853_v16, 6 }
 0x28e   :  { %11807 = vst [vmem:[#allocation24_spill] sm:$0xff] %v10714_v35  ;;  %v3165_v5 = vrot.slane %v2853_v16, 7  ;;  %v3200_v15 = vrot.slane %v2984_v43, 1  ;;  %v3224_v2 = vrot.slane %v2984_v43, 2  ;;  %v3248_v58 = vrot.slane %v2984_v43, 3  ;;  %v10716_v54 = vpop.f32.mrb[32].mxu0 }
 0x28f   :  { %v10718_v32 = vpop.f32.mrb[32].mxu1  ;;  %v3313_v40 = vsel %vm3307_vm15, %v3300_v21, %v3093_v13  ;;  %v3201_v20 = vrot.slane %v2985_v59, 1  ;;  %v3225_v24 = vrot.slane %v2985_v59, 2  ;;  %v3249_v42 = vrot.slane %v2985_v59, 3  ;;  %v10721_v52 = vpop.f32.mrb[33].mxu0 }
 0x290   :  { %v10723_v4 = vpop.f32.mrb[33].mxu1  ;;  %v3326_v8 = vsel %vm3320_vm0, %v3313_v40, %v3117_v17  ;;  %v3362_v31 = vsel %vm3268_vm14, %v2984_v43, %v3200_v15  ;;  %v2710_v14 = vadd.f32 %v10492_v6, %v2687_v61  ;;  %v2688_v37 = vmax.f32 %v2670_v50, %v2672_v55  ;;  %v10728_v46 = vpop.f32.mrb[34].mxu0 }
 0x291   :  { %v10730_v16 = vpop.f32.mrb[34].mxu1  ;;  %v3338_v21 = vsel %vm417_vm2, %v3326_v8, %v3141_v29  ;;  %v3374_v19 = vsel %vm2092_vm11, %v3362_v31, %v3224_v2  ;;  %v3363_v13 = vsel %vm3268_vm14, %v2985_v59, %v3201_v20  ;;  %v2764_v11 = vrot.slane %v10602_v27, 1  ;;  %v10736_v57 = vpop.f32.mrb[35].mxu0 }
 0x292   :  { %v10738_v17 = vpop.f32.mrb[35].mxu1  ;;  %v10741_v15 = vsel %vm3345_vm1, %v3338_v21, %v3165_v5  ;;  %v3386_v55 = vsel %vm1048_vm8, %v3374_v19, %v3248_v58  ;;  %v3375_v43 = vsel %vm2092_vm11, %v3363_v13, %v3225_v24  ;;  %v2722_v61 = vmax.f32 %v2710_v14, 0.0 }
 0x293   :  { %v10747_v50 = vpack.c.bf16 %v10741_v15, %v10714_v35  ;;  %v3387_v2 = vsel %vm1048_vm8, %v3375_v43, %v3249_v42  ;;  %v2711_v59 = vadd.f32 %v10496_v41, %v2688_v37  ;;  %v2812_v29 = vmax.f32 %v10602_v27, %v2764_v11 }
 0x294   :  { %v10752_v40 = vpack.c.bf16 %v3387_v2, %v3386_v55  ;;  %v3010_v20 = vrot.slane %v2722_v61, 1  ;;  %v3034_v5 = vrot.slane %v2722_v61, 2  ;;  %v3058_v8 = vrot.slane %v2722_v61, 3 }
 0x295   :  { %v2723_v31 = vmax.f32 %v2711_v59, 0.0  ;;  %v2766_v58 = vrot.slane %v10604_v36, 1  ;;  %v2765_v24 = vrot.slane %v10610_v47, 1  ;;  %v2767_v14 = vrot.slane %v10612_v44, 1 }
 0x296   :  { %v3275_v21 = vsel %vm3268_vm14, %v2722_v61, %v3010_v20  ;;  %v2896_v42 = vrot.slane %v10618_v48, 1  ;;  %v2898_v37 = vrot.slane %v10620_v23, 1  ;;  %v2897_v11 = vrot.slane %v10626_v39, 1 }
 0x297   :  { %v3288_v27 = vsel %vm2092_vm11, %v3275_v21, %v3034_v5  ;;  %v3011_v19 = vrot.slane %v2723_v31, 1  ;;  %v3035_v13 = vrot.slane %v2723_v31, 2  ;;  %v3059_v55 = vrot.slane %v2723_v31, 3 }
 0x298   :  { %v3301_v43 = vsel %vm1048_vm8, %v3288_v27, %v3058_v8  ;;  %v2814_v2 = vmax.f32 %v10604_v36, %v2766_v58  ;;  %v2813_v59 = vmax.f32 %v10610_v47, %v2765_v24  ;;  %v2815_v63 = vmax.f32 %v10612_v44, %v2767_v14 }
 0x299   :  { %v3276_v61 = vsel %vm3268_vm14, %v2723_v31, %v3011_v19  ;;  %v2944_v20 = vmax.f32 %v10618_v48, %v2896_v42  ;;  %v2946_v56 = vmax.f32 %v10620_v23, %v2898_v37  ;;  %v2945_v45 = vmax.f32 %v10626_v39, %v2897_v11 }
 0x29a   :  { %v3289_v5 = vsel %vm2092_vm11, %v3276_v61, %v3035_v13  ;;  %v2830_v21 = vmax.f32 %v2812_v29, %v2814_v2  ;;  %v2831_v35 = vmax.f32 %v2813_v59, %v2815_v63  ;;  %v2899_v8 = vrot.slane %v10628_v49, 1 }
 0x29b   :  { %v3302_v36 = vsel %vm1048_vm8, %v3289_v5, %v3059_v55  ;;  %v2962_v58 = vmax.f32 %v2944_v20, %v2946_v56  ;;  %v3515_v47 = vshrl.u32 %v10530_v3, 16  ;;  %v3518_v44 = vshll.u32 %v10530_v3, 16 }
 0x29c   :  { %v2842_v31 = vadd.f32 %v2830_v21, %v10492_v6  ;;  %v2843_v48 = vadd.f32 %v2831_v35, %v10496_v41  ;;  %v2947_v23 = vmax.f32 %v10628_v49, %v2899_v8  ;;  %v11748_v39 = vshll.u32 %v10559_v33, 16 }
 0x29d   :  { %v2974_v29 = vadd.f32 %v2962_v58, %v10492_v6  ;;  %v3517_v63 = vrot.slane %v3515_v47, 4  ;;  %v3520_v56 = vrot.slane %v3518_v44, 5  ;;  %v3529_v24 = vshrl.u32 %v10632_v0, 16 }
 0x29e   :  { %v2854_v14 = vmax.f32 %v2842_v31, 0.0  ;;  %v2855_v42 = vmax.f32 %v2843_v48, 0.0  ;;  %v2963_v37 = vmax.f32 %v2945_v45, %v2947_v23  ;;  %v3526_v35 = vrot.slane %v11748_v39, 5 }
 0x29f   :  { %v2986_v11 = vmax.f32 %v2974_v29, 0.0  ;;  %v3521_v49 = vor.u32 %v3520_v56, %v3517_v63  ;;  %v3531_v27 = vrot.slane %v3529_v24, 4  ;;  %v3532_v19 = vshll.u32 %v10632_v0, 16 }
 0x2a0   :  { %v3094_v13 = vrot.slane %v2854_v14, 4  ;;  %v3118_v55 = vrot.slane %v2854_v14, 5  ;;  %v3142_v2 = vrot.slane %v2854_v14, 6  ;;  %v3166_v59 = vrot.slane %v2854_v14, 7 }
 0x2a1   :  { %v3095_v61 = vrot.slane %v2855_v42, 4  ;;  %v3119_v20 = vrot.slane %v2855_v42, 5  ;;  %v3143_v5 = vrot.slane %v2855_v42, 6  ;;  %v3167_v21 = vrot.slane %v2855_v42, 7 }
 0x2a2   :  { %v3314_v45 = vsel %vm3307_vm15, %v3301_v43, %v3094_v13  ;;  %v3202_v8 = vrot.slane %v2986_v11, 1  ;;  %v3226_v58 = vrot.slane %v2986_v11, 2  ;;  %v3250_v31 = vrot.slane %v2986_v11, 3 }
 0x2a3   :  { %v3327_v48 = vsel %vm3320_vm0, %v3314_v45, %v3118_v55  ;;  %v3315_v23 = vsel %vm3307_vm15, %v3302_v36, %v3095_v61  ;;  %v2975_v29 = vadd.f32 %v2963_v37, %v10496_v41  ;;  %v3522_v63 = vrot.slane %v3521_v49, 4 }
 0x2a4   :  { %v3339_v56 = vsel %vm417_vm2, %v3327_v48, %v3142_v2  ;;  %v3328_v14 = vsel %vm3320_vm0, %v3315_v23, %v3119_v20  ;;  %v3364_v39 = vsel %vm3268_vm14, %v2986_v11, %v3202_v8  ;;  %v3534_v42 = vrot.slane %v3532_v19, 5  ;;  %v9089_v2 = vld [vmem:[#allocation7 + $0x460] ss:$16 sps:$4 sm:$0xff]  }
 0x2a5   :  { %v10800_v43 = vsel %vm3345_vm1, %v3339_v56, %v3166_v59  ;;  %v3340_v13 = vsel %vm417_vm2, %v3328_v14, %v3143_v5  ;;  %v3376_v36 = vsel %vm2092_vm11, %v3364_v39, %v3226_v58  ;;  %v2987_v55 = vmax.f32 %v2975_v29, 0.0 }
 0x2a6   :  { %v10805_v37 = vsel %vm3345_vm1, %v3340_v13, %v3167_v21  ;;  %v3388_v49 = vsel %vm1048_vm8, %v3376_v36, %v3250_v31  ;;  %v3527_v11 = vsel %vm9653_vm3, %v3522_v63, %v3526_v35  ;;  %v3535_v61 = vor.u32 %v3534_v42, %v3531_v27 }
 0x2a7   :  { %v10812_v20 = vpack.c.bf16 %v10805_v37, %v10800_v43  ;;  %v3203_v59 = vrot.slane %v2987_v55, 1  ;;  %v3227_v45 = vrot.slane %v2987_v55, 2  ;;  %v3251_v8 = vrot.slane %v2987_v55, 3 }
 0x2a8   :  { %v3536_v5 = vrot.slane %v3535_v61, 4  ;;  %v3538_v39 = vshll.u32 %v10656_v53, 16  ;;  %v2625_v58 = vrot.slane %v10644_v26, 1  ;;  %v2627_v21 = vrot.slane %v10646_v22, 1 }
 0x2a9   :  { %v3365_v31 = vsel %vm3268_vm14, %v2987_v55, %v3203_v59  ;;  %v2626_v48 = vrot.slane %v10652_v7, 1  ;;  %v2628_v35 = vrot.slane %v10654_v9, 1  ;;  %v2768_v27 = vrot.slane %v10658_v10, 1 }
 0x2aa   :  { %v3377_v23 = vsel %vm2092_vm11, %v3365_v31, %v3227_v45  ;;  %v3540_v29 = vrot.slane %v3538_v39, 5  ;;  %v2673_v63 = vmax.f32 %v10644_v26, %v2625_v58  ;;  %v2675_v56 = vmax.f32 %v10646_v22, %v2627_v21  ;;  %v8969_v58 = vld [vmem:[#allocation7] ss:$16 sps:$4 sm:$0xff]   ;;  %v8972_v22 = vld [vmem:[#allocation7 + $0x8] ss:$16 sps:$4 sm:$0xff]  }
 0x2ab   :  { %v3389_v14 = vsel %vm1048_vm8, %v3377_v23, %v3251_v8  ;;  %v2674_v42 = vmax.f32 %v10652_v7, %v2626_v48  ;;  %v2676_v13 = vmax.f32 %v10654_v9, %v2628_v35  ;;  %v2816_v36 = vmax.f32 %v10658_v10, %v2768_v27  ;;  %v8980_v48 = vld [vmem:[#allocation7 + $0x2c] ss:$16 sps:$4 sm:$0xff]  }
 0x2ac   :  { %v10830_v55 = vpack.c.bf16 %v3389_v14, %v3388_v49  ;;  %v3541_v61 = vsel %vm9653_vm3, %v3536_v5, %v3540_v29  ;;  %v2689_v59 = vmax.f32 %v2673_v63, %v2675_v56  ;;  %v2770_v45 = vrot.slane %v10660_v25, 1  ;;  %v8977_v49 = vld [vmem:[#allocation7 + $0x24] ss:$16 sps:$4 sm:$0xff]   ;;  %v8975_v56 = vld [vmem:[#allocation7 + $0x20] ss:$16 sps:$4 sm:$0xff]  }
 0x2ad   :  { %v7789_v31 = vcombine.low %v3527_v11, %v3541_v61  ;;  %v7790_v26 = vcombine.high %v3527_v11, %v3541_v61  ;;  %v2690_v21 = vmax.f32 %v2674_v42, %v2676_v13  ;;  %v2769_v8 = vrot.slane %v10664_v38, 1  ;;  %v8978_v13 = vld [vmem:[#allocation7 + $0x28] ss:$16 sps:$4 sm:$0xff]   ;;  %v8983_v61 = vld [vmem:[#allocation7 + $0x44] ss:$16 sps:$4 sm:$0xff]  }
 0x2ae   :  { %v2712_v7 = vadd.f32 %v10492_v6, %v2689_v59  ;;  %v2818_v9 = vmax.f32 %v10660_v25, %v2770_v45  ;;  %v2771_v10 = vrot.slane %v10666_v18, 1  ;;  %v2900_v5 = vrot.slane %v10683_v30, 1 }
 0x2af   :  { %7855 = vmatprep.mubr.msk.bf16.mxu0 %vm3980_vm5, %v7790_v26  ;;  %7858 = vmatprep.mubr.msk.bf16.mxu1 %vm3980_vm5, %v7790_v26  ;;  %v2713_v11 = vadd.f32 %v10496_v41, %v2690_v21  ;;  %v2817_v35 = vmax.f32 %v10664_v38, %v2769_v8  ;;  %v2902_v27 = vrot.slane %v10685_v34, 1  ;;  %v2901_v23 = vrot.slane %v10689_v51, 1 }
 0x2b0   :  { %v2724_v29 = vmax.f32 %v2712_v7, 0.0  ;;  %4023 = vmatmul.mubr.bf16.vlgmr.msra.gmra.mrb[36].mxu0 %v7789_v31  ;;  %4086 = vmatmul.mubr.bf16.vlgmr.msra.gmra.mrb[36].mxu1 %v7789_v31  ;;  %v2832_v25 = vmax.f32 %v2816_v36, %v2818_v9  ;;  %v2819_v63 = vmax.f32 %v10666_v18, %v2771_v10  ;;  %v2948_v14 = vmax.f32 %v10683_v30, %v2900_v5  ;;  %v8986_v18 = vld [vmem:[#allocation7 + $0x4c] ss:$16 sps:$4 sm:$0xff]  }
 0x2b1   :  { %4435 = vmatpush1.bf16.msra.mxu0 %v8969_v58  ;;  %4498 = vmatpush1.bf16.msra.mxu1 %v8972_v22  ;;  %v2725_v42 = vmax.f32 %v2713_v11, 0.0  ;;  %v2950_v38 = vmax.f32 %v10685_v34, %v2902_v27  ;;  %v2949_v59 = vmax.f32 %v10689_v51, %v2901_v23  ;;  %v2903_v45 = vrot.slane %v10691_v28, 1 }
 0x2b2   :  { %v3012_v26 = vrot.slane %v2724_v29, 1  ;;  %v3036_v21 = vrot.slane %v2724_v29, 2  ;;  %v3060_v31 = vrot.slane %v2724_v29, 3  ;;  %v2844_v36 = vadd.f32 %v2832_v25, %v10492_v6  ;;  %4436 = vmatprep.subr.bf16.mxu0 %v8977_v49  ;;  %4499 = vmatprep.subr.bf16.mxu1 %v8980_v48  ;;  %v8981_v49 = vld [vmem:[#allocation7 + $0x40] ss:$16 sps:$4 sm:$0xff]  }
 0x2b3   :  { %v3013_v30 = vrot.slane %v2725_v42, 1  ;;  %v3037_v58 = vrot.slane %v2725_v42, 2  ;;  %v3061_v22 = vrot.slane %v2725_v42, 3  ;;  %v2833_v8 = vmax.f32 %v2817_v35, %v2819_v63  ;;  %v8984_v48 = vld [vmem:[#allocation7 + $0x48] ss:$16 sps:$4 sm:$0xff]  }
 0x2b4   :  { %v3277_v7 = vsel %vm3268_vm14, %v2724_v29, %v3012_v26  ;;  %v2856_v9 = vmax.f32 %v2844_v36, 0.0  ;;  %v2964_v34 = vmax.f32 %v2948_v14, %v2950_v38  ;;  %v2951_v51 = vmax.f32 %v10691_v28, %v2903_v45  ;;  %v8989_v28 = vld [vmem:[#allocation7 + $0x64] ss:$16 sps:$4 sm:$0xff]   ;;  %v8992_v63 = vld [vmem:[#allocation7 + $0x6c] ss:$16 sps:$4 sm:$0xff]  }
 0x2b5   :  { %v3290_v10 = vsel %vm2092_vm11, %v3277_v7, %v3036_v21  ;;  %v3278_v5 = vsel %vm3268_vm14, %v2725_v42, %v3013_v30  ;;  %v2845_v11 = vadd.f32 %v2833_v8, %v10496_v41  ;;  %4437 = vmatpush1.bf16.msra.mxu0 %v8975_v56  ;;  %4500 = vmatpush1.bf16.msra.mxu1 %v8978_v13  ;;  %v2629_v27 = vrot.slane %v10693_v1, 1 }
 0x2b6   :  { %v3303_v35 = vsel %vm1048_vm8, %v3290_v10, %v3060_v31  ;;  %v3291_v23 = vsel %vm2092_vm11, %v3278_v5, %v3037_v58  ;;  %v3096_v29 = vrot.slane %v2856_v9, 4  ;;  %v3120_v25 = vrot.slane %v2856_v9, 5  ;;  %4438 = vmatprep.subr.bf16.mxu0 %v8983_v61  ;;  %4501 = vmatprep.subr.bf16.mxu1 %v8986_v18  ;;  %v8987_v31 = vld [vmem:[#allocation7 + $0x60] ss:$16 sps:$4 sm:$0xff]   ;;  %v8990_v58 = vld [vmem:[#allocation7 + $0x68] ss:$16 sps:$4 sm:$0xff]  }
 0x2b7   :  { %v3304_v14 = vsel %vm1048_vm8, %v3291_v23, %v3061_v22  ;;  %v3144_v42 = vrot.slane %v2856_v9, 6  ;;  %v3168_v38 = vrot.slane %v2856_v9, 7  ;;  %v2857_v56 = vmax.f32 %v2845_v11, 0.0 }
 0x2b8   :  { %v3316_v13 = vsel %vm3307_vm15, %v3303_v35, %v3096_v29  ;;  %v2976_v45 = vadd.f32 %v2964_v34, %v10492_v6  ;;  %v2965_v26 = vmax.f32 %v2949_v59, %v2951_v51  ;;  %v2677_v21 = vmax.f32 %v10693_v1, %v2629_v27  ;;  %v8995_v59 = vld [vmem:[#allocation7 + $0x84] ss:$16 sps:$4 sm:$0xff]   ;;  %v8998_v34 = vld [vmem:[#allocation7 + $0x8c] ss:$16 sps:$4 sm:$0xff]  }
 0x2b9   :  { %v3329_v36 = vsel %vm3320_vm0, %v3316_v13, %v3120_v25  ;;  %v3097_v30 = vrot.slane %v2857_v56, 4  ;;  %v3121_v61 = vrot.slane %v2857_v56, 5  ;;  %v3145_v18 = vrot.slane %v2857_v56, 6  ;;  %4439 = vmatpush1.bf16.msra.mxu0 %v8981_v49  ;;  %4502 = vmatpush1.bf16.msra.mxu1 %v8984_v48  ;;  %v9001_v13 = vld [vmem:[#allocation7 + $0xa4] ss:$16 sps:$4 sm:$0xff]  }
 0x2ba   :  { %v3341_v22 = vsel %vm417_vm2, %v3329_v36, %v3144_v42  ;;  %v3169_v8 = vrot.slane %v2857_v56, 7  ;;  %v2988_v7 = vmax.f32 %v2976_v45, 0.0  ;;  %v2977_v9 = vadd.f32 %v2965_v26, %v10496_v41  ;;  %4440 = vmatprep.subr.bf16.mxu0 %v8989_v28  ;;  %4503 = vmatprep.subr.bf16.mxu1 %v8992_v63  ;;  %v8993_v28 = vld [vmem:[#allocation7 + $0x80] ss:$16 sps:$4 sm:$0xff]   ;;  %v8996_v63 = vld [vmem:[#allocation7 + $0x88] ss:$16 sps:$4 sm:$0xff]  }
 0x2bb   :  { %v10868_v1 = vsel %vm3345_vm1, %v3341_v22, %v3168_v38  ;;  %v3317_v51 = vsel %vm3307_vm15, %v3304_v14, %v3097_v30  ;;  %v2631_v10 = vrot.slane %v10695_v12, 1  ;;  %v2630_v5 = vrot.slane %v10701_v62, 1  ;;  %v9004_v45 = vld [vmem:[#allocation7 + $0xac] ss:$16 sps:$4 sm:$0xff]  }
 0x2bc   :  { %v3330_v11 = vsel %vm3320_vm0, %v3317_v51, %v3121_v61  ;;  %v3204_v49 = vrot.slane %v2988_v7, 1  ;;  %v3228_v48 = vrot.slane %v2988_v7, 2  ;;  %v3252_v27 = vrot.slane %v2988_v7, 3 }
 0x2bd   :  { %v3342_v35 = vsel %vm417_vm2, %v3330_v11, %v3145_v18  ;;  %v2989_v23 = vmax.f32 %v2977_v9, 0.0  ;;  %v2679_v29 = vmax.f32 %v10695_v12, %v2631_v10  ;;  %v2678_v25 = vmax.f32 %v10701_v62, %v2630_v5  ;;  %4441 = vmatpush1.bf16.msra.mxu0 %v8987_v31  ;;  %4504 = vmatpush1.bf16.msra.mxu1 %v8990_v58  ;;  %v8999_v9 = vld [vmem:[#allocation7 + $0xa0] ss:$16 sps:$4 sm:$0xff]   ;;  %v9010_v5 = vld [vmem:[#allocation7 + $0xcc] ss:$16 sps:$4 sm:$0xff]  }
 0x2be   :  { %v10878_v14 = vsel %vm3345_vm1, %v3342_v35, %v3169_v8  ;;  %v3366_v42 = vsel %vm3268_vm14, %v2988_v7, %v3204_v49  ;;  %v2632_v38 = vrot.slane %v10703_v60, 1  ;;  %4442 = vmatprep.subr.bf16.mxu0 %v8995_v59  ;;  %4505 = vmatprep.subr.bf16.mxu1 %v8998_v34  ;;  %v2772_v56 = vrot.slane %v10716_v54, 1  ;;  %v9002_v59 = vld [vmem:[#allocation7 + $0xa8] ss:$16 sps:$4 sm:$0xff]  }
 0x2bf   :  { %v10885_v12 = vpack.c.bf16 %v10878_v14, %v10868_v1  ;;  %v3378_v62 = vsel %vm2092_vm11, %v3366_v42, %v3228_v48  ;;  %v3205_v26 = vrot.slane %v2989_v23, 1  ;;  %v3229_v31 = vrot.slane %v2989_v23, 2 }
 0x2c0   :  { %v3390_v36 = vsel %vm1048_vm8, %v3378_v62, %v3252_v27  ;;  %v3253_v30 = vrot.slane %v2989_v23, 3  ;;  %v2691_v61 = vmax.f32 %v2677_v21, %v2679_v29  ;;  %v2680_v18 = vmax.f32 %v10703_v60, %v2632_v38  ;;  %v9007_v60 = vld [vmem:[#allocation7 + $0xc4] ss:$16 sps:$4 sm:$0xff]  }
 0x2c1   :  { %v3367_v58 = vsel %vm3268_vm14, %v2989_v23, %v3205_v26  ;;  %v2820_v22 = vmax.f32 %v10716_v54, %v2772_v56  ;;  %v2774_v8 = vrot.slane %v10718_v32, 1  ;;  %4443 = vmatpush1.bf16.msra.mxu0 %v8993_v28  ;;  %4506 = vmatpush1.bf16.msra.mxu1 %v8996_v63  ;;  %v2773_v7 = vrot.slane %v10721_v52, 1  ;;  %v9016_v26 = vld [vmem:[#allocation7 + $0xec] ss:$16 sps:$4 sm:$0xff]  }
 0x2c2   :  { %v3379_v34 = vsel %vm2092_vm11, %v3367_v58, %v3229_v31  ;;  %v2714_v51 = vadd.f32 %v10492_v6, %v2691_v61  ;;  %v2692_v10 = vmax.f32 %v2678_v25, %v2680_v18  ;;  %v2775_v21 = vrot.slane %v10723_v4, 1  ;;  %4444 = vmatprep.subr.bf16.mxu0 %v9001_v13  ;;  %4507 = vmatprep.subr.bf16.mxu1 %v9004_v45  ;;  %v9005_v25 = vld [vmem:[#allocation7 + $0xc0] ss:$16 sps:$4 sm:$0xff]  }
 0x2c3   :  { %v3391_v54 = vsel %vm1048_vm8, %v3379_v34, %v3253_v30  ;;  %v2822_v11 = vmax.f32 %v10718_v32, %v2774_v8  ;;  %v2821_v49 = vmax.f32 %v10721_v52, %v2773_v7  ;;  %v2904_v48 = vrot.slane %v10728_v46, 1  ;;  %v9008_v32 = vld [vmem:[#allocation7 + $0xc8] ss:$16 sps:$4 sm:$0xff]   ;;  %v9013_v52 = vld [vmem:[#allocation7 + $0xe4] ss:$16 sps:$4 sm:$0xff]  }
 0x2c4   :  { %v10901_v27 = vpack.c.bf16 %v3391_v54, %v3390_v36  ;;  %v2726_v35 = vmax.f32 %v2714_v51, 0.0  ;;  %v2715_v23 = vadd.f32 %v10496_v41, %v2692_v10  ;;  %v2823_v29 = vmax.f32 %v10723_v4, %v2775_v21  ;;  %v9014_v34 = vld [vmem:[#allocation7 + $0xe8] ss:$16 sps:$4 sm:$0xff]   ;;  %v9019_v21 = vld [vmem:[#allocation7 + $0x104] ss:$16 sps:$4 sm:$0xff]  }
 0x2c5   :  { %v2834_v28 = vmax.f32 %v2820_v22, %v2822_v11  ;;  %v2952_v63 = vmax.f32 %v10728_v46, %v2904_v48  ;;  %v2906_v42 = vrot.slane %v10730_v16, 1  ;;  %v2905_v38 = vrot.slane %v10736_v57, 1  ;;  %4445 = vmatpush1.bf16.msra.mxu0 %v8999_v9  ;;  %4508 = vmatpush1.bf16.msra.mxu1 %v9002_v59  ;;  %v9011_v59 = vld [vmem:[#allocation7 + $0xe0] ss:$16 sps:$4 sm:$0xff]  }
 0x2c6   :  { %v3014_v56 = vrot.slane %v2726_v35, 1  ;;  %v3038_v13 = vrot.slane %v2726_v35, 2  ;;  %v3062_v45 = vrot.slane %v2726_v35, 3  ;;  %v2727_v62 = vmax.f32 %v2715_v23, 0.0  ;;  %4446 = vmatprep.subr.bf16.mxu0 %v9007_v60  ;;  %4509 = vmatprep.subr.bf16.mxu1 %v9010_v5  ;;  %v9022_v60 = vld [vmem:[#allocation7 + $0x10c] ss:$16 sps:$4 sm:$0xff]  }
 0x2c7   :  { %v2846_v4 = vadd.f32 %v2834_v28, %v10492_v6  ;;  %v2835_v31 = vmax.f32 %v2821_v49, %v2823_v29  ;;  %v2954_v46 = vmax.f32 %v10730_v16, %v2906_v42  ;;  %v10911_v36 = vmax.f32 %v10736_v57, %v2905_v38 }
 0x2c8   :  { %v3279_v30 = vsel %vm3268_vm14, %v2726_v35, %v3014_v56  ;;  %v3015_v61 = vrot.slane %v2727_v62, 1  ;;  %v3039_v18 = vrot.slane %v2727_v62, 2  ;;  %v3063_v58 = vrot.slane %v2727_v62, 3 }
 0x2c9   :  { %v3292_v22 = vsel %vm2092_vm11, %v3279_v30, %v3038_v13  ;;  %v2858_v8 = vmax.f32 %v2846_v4, 0.0  ;;  %v2847_v7 = vadd.f32 %v2835_v31, %v10496_v41  ;;  %v2966_v9 = vmax.f32 %v2952_v63, %v2954_v46  ;;  %4447 = vmatpush1.bf16.msra.mxu0 %v9005_v25  ;;  %4510 = vmatpush1.bf16.msra.mxu1 %v9008_v32  ;;  %v9017_v25 = vld [vmem:[#allocation7 + $0x100] ss:$16 sps:$4 sm:$0xff]   ;;  %v9020_v32 = vld [vmem:[#allocation7 + $0x108] ss:$16 sps:$4 sm:$0xff]  }
 0x2ca   :  { %v3305_v16 = vsel %vm1048_vm8, %v3292_v22, %v3062_v45  ;;  %v3280_v57 = vsel %vm3268_vm14, %v2727_v62, %v3015_v61  ;;  %v2907_v51 = vrot.slane %v10738_v17, 1  ;;  %v3543_v10 = vshrl.u32 %v10747_v50, 16  ;;  %4448 = vmatprep.subr.bf16.mxu0 %v9013_v52  ;;  %4511 = vmatprep.subr.bf16.mxu1 %v9016_v26  ;;  %v9025_v52 = vld [vmem:[#allocation7 + $0x124] ss:$16 sps:$4 sm:$0xff]  }
 0x2cb   :  { %v3293_v5 = vsel %vm2092_vm11, %v3280_v57, %v3039_v18  ;;  %v3098_v54 = vrot.slane %v2858_v8, 4  ;;  %v3122_v11 = vrot.slane %v2858_v8, 5  ;;  %v3146_v49 = vrot.slane %v2858_v8, 6 }
 0x2cc   :  { %v3306_v48 = vsel %vm1048_vm8, %v3293_v5, %v3063_v58  ;;  %v3170_v35 = vrot.slane %v2858_v8, 7  ;;  %v2859_v23 = vmax.f32 %v2847_v7, 0.0  ;;  %v2978_v29 = vadd.f32 %v2966_v9, %v10492_v6  ;;  %v9028_v6 = vld [vmem:[#allocation7 + $0x12c] ss:$16 sps:$4 sm:$0xff]   ;;  %v9023_v58 = vld [vmem:[#allocation7 + $0x120] ss:$16 sps:$4 sm:$0xff]  }
 0x2cd   :  { %v3318_v28 = vsel %vm3307_vm15, %v3305_v16, %v3098_v54  ;;  %v2955_v63 = vmax.f32 %v10738_v17, %v2907_v51  ;;  %v3545_v42 = vrot.slane %v3543_v10, 4  ;;  %v3546_v38 = vshll.u32 %v10747_v50, 16  ;;  %4449 = vmatpush1.bf16.msra.mxu0 %v9011_v59  ;;  %4512 = vmatpush1.bf16.msra.mxu1 %v9014_v34  ;;  %v9026_v59 = vld [vmem:[#allocation7 + $0x128] ss:$16 sps:$4 sm:$0xff]   ;;  %v9031_v51 = vld [vmem:[#allocation7 + $0x144] ss:$16 sps:$4 sm:$0xff]  }
 0x2ce   :  { %v3331_v56 = vsel %vm3320_vm0, %v3318_v28, %v3122_v11  ;;  %v3099_v13 = vrot.slane %v2859_v23, 4  ;;  %v3123_v45 = vrot.slane %v2859_v23, 5  ;;  %v3147_v62 = vrot.slane %v2859_v23, 6  ;;  %4450 = vmatprep.subr.bf16.mxu0 %v9019_v21  ;;  %4513 = vmatprep.subr.bf16.mxu1 %v9022_v60  ;;  %v9034_v21 = vld [vmem:[#allocation7 + $0x14c] ss:$16 sps:$4 sm:$0xff]  }
 0x2cf   :  { %v3343_v26 = vsel %vm417_vm2, %v3331_v56, %v3146_v49  ;;  %v3171_v17 = vrot.slane %v2859_v23, 7  ;;  %v2990_v4 = vmax.f32 %v2978_v29, 0.0  ;;  %v2967_v31 = vmax.f32 %v10911_v36, %v2955_v63  ;;  %v9029_v23 = vld [vmem:[#allocation7 + $0x140] ss:$16 sps:$4 sm:$0xff]   ;;  %v9032_v29 = vld [vmem:[#allocation7 + $0x148] ss:$16 sps:$4 sm:$0xff]  }
 0x2d0   :  { %v10932_v46 = vsel %vm3345_vm1, %v3343_v26, %v3170_v35  ;;  %v3319_v30 = vsel %vm3307_vm15, %v3306_v48, %v3099_v13  ;;  %v3548_v61 = vrot.slane %v3546_v38, 5  ;;  %v3552_v18 = vshll.u32 %v10752_v40, 16 }
 0x2d1   :  { %v3332_v22 = vsel %vm3320_vm0, %v3319_v30, %v3123_v45  ;;  %v3206_v8 = vrot.slane %v2990_v4, 1  ;;  %v3230_v7 = vrot.slane %v2990_v4, 2  ;;  %v3254_v9 = vrot.slane %v2990_v4, 3  ;;  %4451 = vmatpush1.bf16.msra.mxu0 %v9017_v25  ;;  %4514 = vmatpush1.bf16.msra.mxu1 %v9020_v32  ;;  %v9037_v32 = vld [vmem:[#allocation7 + $0x164] ss:$16 sps:$4 sm:$0xff]  }
 0x2d2   :  { %v3344_v36 = vsel %vm417_vm2, %v3332_v22, %v3147_v62  ;;  %v2979_v34 = vadd.f32 %v2967_v31, %v10496_v41  ;;  %v3549_v16 = vor.u32 %v3548_v61, %v3545_v42  ;;  %v3554_v57 = vrot.slane %v3552_v18, 5  ;;  %4452 = vmatprep.subr.bf16.mxu0 %v9025_v52  ;;  %4515 = vmatprep.subr.bf16.mxu1 %v9028_v6  ;;  %v9040_v62 = vld [vmem:[#allocation7 + $0x16c] ss:$16 sps:$4 sm:$0xff]   ;;  %v9035_v30 = vld [vmem:[#allocation7 + $0x160] ss:$16 sps:$4 sm:$0xff]  }
 0x2d3   :  { %v10944_v60 = vsel %vm3345_vm1, %v3344_v36, %v3171_v17  ;;  %v3368_v5 = vsel %vm3268_vm14, %v2990_v4, %v3206_v8  ;;  %v3557_v54 = vshrl.u32 %v10812_v20, 16  ;;  %v3560_v11 = vshll.u32 %v10812_v20, 16 }
 0x2d4   :  { %v10951_v41 = vpack.c.bf16 %v10944_v60, %v10932_v46  ;;  %v3380_v49 = vsel %vm2092_vm11, %v3368_v5, %v3230_v7  ;;  %v2991_v48 = vmax.f32 %v2979_v34, 0.0  ;;  %v3550_v35 = vrot.slane %v3549_v16, 4 }
 0x2d5   :  { %v3392_v25 = vsel %vm1048_vm8, %v3380_v49, %v3254_v9  ;;  %v3559_v28 = vrot.slane %v3557_v54, 4  ;;  %v3562_v63 = vrot.slane %v3560_v11, 5  ;;  %v3566_v42 = vshll.u32 %v10830_v55, 16  ;;  %4453 = vmatpush1.bf16.msra.mxu0 %v9023_v58  ;;  %4516 = vmatpush1.bf16.msra.mxu1 %v9026_v59  ;;  %v9038_v9 = vld [vmem:[#allocation7 + $0x168] ss:$16 sps:$4 sm:$0xff]  }
 0x2d6   :  { %v3207_v52 = vrot.slane %v2991_v48, 1  ;;  %v3231_v56 = vrot.slane %v2991_v48, 2  ;;  %v3255_v13 = vrot.slane %v2991_v48, 3  ;;  %v3555_v45 = vsel %vm9653_vm3, %v3550_v35, %v3554_v57  ;;  %4454 = vmatprep.subr.bf16.mxu0 %v9031_v51  ;;  %4517 = vmatprep.subr.bf16.mxu1 %v9034_v21 }
 0x2d7   :  { %v3563_v6 = vor.u32 %v3562_v63, %v3559_v28  ;;  %v3568_v26 = vrot.slane %v3566_v42, 5  ;;  %v3571_v17 = vshrl.u32 %v10885_v12, 16  ;;  %v3574_v4 = vshll.u32 %v10885_v12, 16  ;;  %v9046_v28 = vld [vmem:[#allocation7 + $0x18c] ss:$16 sps:$4 sm:$0xff]  }
 0x2d8   :  { %v3369_v31 = vsel %vm3268_vm14, %v2991_v48, %v3207_v52  ;;  %v3580_v61 = vshll.u32 %v10901_v27, 16  ;;  %v3585_v58 = vshrl.u32 %v10951_v41, 16  ;;  %v3588_v22 = vshll.u32 %v10951_v41, 16  ;;  %v9041_v52 = vld [vmem:[#allocation7 + $0x180] ss:$16 sps:$4 sm:$0xff]  }
 0x2d9   :  { %v3381_v8 = vsel %vm2092_vm11, %v3369_v31, %v3231_v56  ;;  %v3564_v7 = vrot.slane %v3563_v6, 4  ;;  %4455 = vmatpush1.bf16.msra.mxu0 %v9029_v23  ;;  %4518 = vmatpush1.bf16.msra.mxu1 %v9032_v29  ;;  %v3573_v59 = vrot.slane %v3571_v17, 4  ;;  %v3576_v36 = vrot.slane %v3574_v4, 5  ;;  %v9043_v29 = vld [vmem:[#allocation7 + $0x184] ss:$16 sps:$4 sm:$0xff]  }
 0x2da   :  { %v3393_v34 = vsel %vm1048_vm8, %v3381_v8, %v3255_v13  ;;  %4456 = vmatprep.subr.bf16.mxu0 %v9037_v32  ;;  %4519 = vmatprep.subr.bf16.mxu1 %v9040_v62  ;;  %v3587_v16 = vrot.slane %v3585_v58, 4  ;;  %v3590_v57 = vrot.slane %v3588_v22, 5  ;;  %v3582_v49 = vrot.slane %v3580_v61, 5  ;;  %v11809_v13 = vld [vmem:[#allocation24_spill] sm:$0xff]  ;;  %v9049_v6 = vld [vmem:[#allocation7 + $0x1a4] ss:$16 sps:$4 sm:$0xff]  }
 0x2db   :  { %v10980_v51 = vpack.c.bf16 %v3393_v34, %v3392_v25  ;;  %v3569_v21 = vsel %vm9653_vm3, %v3564_v7, %v3568_v26  ;;  %v3577_v5 = vor.u32 %v3576_v36, %v3573_v59  ;;  %v9044_v25 = vld [vmem:[#allocation7 + $0x188] ss:$16 sps:$4 sm:$0xff]   ;;  %v10989_v56 = vpack.c.bf16 %v10805_v37, %v10741_v15  ;;  %v9052_v26 = vld [vmem:[#allocation7 + $0x1ac] ss:$16 sps:$4 sm:$0xff]   ;;  %v9055_v36 = vld [vmem:[#allocation7 + $0x1c4] ss:$16 sps:$4 sm:$0xff]  }
 0x2dc   :  { %v7792_v48 = vcombine.high %v3555_v45, %v3569_v21  ;;  %v7791_v35 = vcombine.low %v3555_v45, %v3569_v21  ;;  %v3591_v23 = vor.u32 %v3590_v57, %v3587_v16  ;;  %v10993_v62 = vpack.c.bf16 %v10800_v43, %v11809_v13  ;;  %v9058_v34 = vld [vmem:[#allocation7 + $0x1cc] ss:$16 sps:$4 sm:$0xff]  }
 0x2dd   :  { %4457 = vmatpush1.bf16.msra.mxu0 %v9035_v30  ;;  %4520 = vmatpush1.bf16.msra.mxu1 %v9038_v9  ;;  %v3578_v63 = vrot.slane %v3577_v5, 4  ;;  %v3594_v32 = vshll.u32 %v10980_v51, 16  ;;  %v10999_v31 = vpack.c.bf16 %v10944_v60, %v10878_v14  ;;  %v11003_v30 = vpack.c.bf16 %v10932_v46, %v10868_v1  ;;  %v9047_v1 = vld [vmem:[#allocation7 + $0x1a0] ss:$16 sps:$4 sm:$0xff]   ;;  %v9050_v46 = vld [vmem:[#allocation7 + $0x1a8] ss:$16 sps:$4 sm:$0xff]  }
 0x2de   :  { %7856 = vmatprep.mubr.msk.bf16.mxu0 %vm3980_vm5, %v7792_v48  ;;  %7859 = vmatprep.mubr.msk.bf16.mxu1 %vm3980_vm5, %v7792_v48  ;;  %v3592_v45 = vrot.slane %v3591_v23, 4  ;;  %v4570_v37 = vrot.slane %v10752_v40, 5  ;;  %v7936_v8 = vrot.slane %v10812_v20, 9  ;;  %v7935_v60 = vrot.slane %v10747_v50, 9 }
 0x2df   :  { %4033 = vmatmul.mubr.bf16.gmra.mrb[40].mxu0 %v7791_v35  ;;  %4096 = vmatmul.mubr.bf16.gmra.mrb[40].mxu1 %v7791_v35  ;;  %v3583_v15 = vsel %vm9653_vm3, %v3578_v63, %v3582_v49  ;;  %v3596_v43 = vrot.slane %v3594_v32, 5  ;;  %v4574_v7 = vrot.slane %v10830_v55, 5  ;;  %v7937_v16 = vrot.slane %v10885_v12, 9 }
 0x2e0   :  { %4458 = vmatprep.subr.bf16.mxu0 %v9043_v29  ;;  %4521 = vmatprep.subr.bf16.mxu1 %v9046_v28  ;;  %v4578_v57 = vrot.slane %v10901_v27, 5  ;;  %v4571_v21 = vsel %vm10000_vm10, %v7935_v60, %v4570_v37  ;;  %v7938_v23 = vrot.slane %v10951_v41, 9  ;;  %v9053_v29 = vld [vmem:[#allocation7 + $0x1c0] ss:$16 sps:$4 sm:$0xff]   ;;  %v9056_v28 = vld [vmem:[#allocation7 + $0x1c8] ss:$16 sps:$4 sm:$0xff]  }
 0x2e1   :  { %v3597_v14 = vsel %vm9653_vm3, %v3592_v45, %v3596_v43  ;;  %4459 = vmatpush1.bf16.msra.mxu0 %v9041_v52  ;;  %4522 = vmatpush1.bf16.msra.mxu1 %v9044_v25  ;;  %v4575_v5 = vsel %vm10000_vm10, %v7936_v8, %v4574_v7  ;;  %v4582_v63 = vrot.slane %v10980_v51, 5  ;;  %v11811_v52 = vld [vmem:[#allocation20_spill] sm:$0xff]  ;;  %v11812_v25 = vld [vmem:[#allocation23_spill] sm:$0xff]  ;;  %v5145_v37 = vrot.slane %v3543_v10, 5 }
 0x2e2   :  { %v7794_v9 = vcombine.high %v3583_v15, %v3597_v14  ;;  %v7793_v59 = vcombine.low %v3583_v15, %v3597_v14  ;;  %4460 = vmatprep.subr.bf16.mxu0 %v9049_v6  ;;  %4523 = vmatprep.subr.bf16.mxu1 %v9052_v26  ;;  %v11023_v49 = vcombine.high %v4571_v21, %v4575_v5  ;;  %v9061_v45 = vld [vmem:[#allocation7 + $0x3c4] ss:$16 sps:$4 sm:$0xff]   ;;  %v9064_v6 = vld [vmem:[#allocation7 + $0x3cc] ss:$16 sps:$4 sm:$0xff]   ;;  %v5146_v8 = vrot.slane %v3546_v38, 6 }
 0x2e3   :  { %v11025_v48 = vcombine.low %v4571_v21, %v4575_v5  ;;  %v4579_v35 = vsel %vm10000_vm10, %v7937_v16, %v4578_v57  ;;  %v8270_v13 = vpack.c.bf16 %v11812_v25, %v11811_v52  ;;  %v4583_v26 = vsel %vm10000_vm10, %v7938_v23, %v4582_v63  ;;  %v9059_v60 = vld [vmem:[#allocation7 + $0x3c0] ss:$16 sps:$4 sm:$0xff]   ;;  %v9062_v16 = vld [vmem:[#allocation7 + $0x3c8] ss:$16 sps:$4 sm:$0xff]   ;;  %v9067_v38 = vld [vmem:[#allocation7 + $0x3e4] ss:$16 sps:$4 sm:$0xff]  }
 0x2e4   :  { %7857 = vmatprep.mubr.msk.bf16.mxu0 %vm3980_vm5, %v7794_v9  ;;  %7860 = vmatprep.mubr.msk.bf16.mxu1 %vm3980_vm5, %v7794_v9  ;;  %v11037_v15 = vcombine.high %v4579_v35, %v4583_v26  ;;  %v11039_v43 = vcombine.low %v4579_v35, %v4583_v26  ;;  %v5149_v14 = vshrl.u32 %v10752_v40, 16  ;;  %v5147_v7 = vor.u32 %v5146_v8, %v5145_v37  ;;  %v9073_v26 = vld [vmem:[#allocation7 + $0x404] ss:$16 sps:$4 sm:$0xff]  }
 0x2e5   :  { %4461 = vmatpush1.bf16.msra.mxu0 %v9047_v1  ;;  %4524 = vmatpush1.bf16.msra.mxu1 %v9050_v46  ;;  %v5152_v1 = vrot.slane %v3552_v18, 6  ;;  %v5155_v46 = vrot.slane %v3557_v54, 5  ;;  %v5156_v9 = vrot.slane %v3560_v11, 6  ;;  %v5159_v10 = vshrl.u32 %v10830_v55, 16  ;;  %v9070_v18 = vld [vmem:[#allocation7 + $0x3ec] ss:$16 sps:$4 sm:$0xff]  }
 0x2e6   :  { %4462 = vmatprep.subr.bf16.mxu0 %v9055_v36  ;;  %4525 = vmatprep.subr.bf16.mxu1 %v9058_v34  ;;  %v11814_v36 = vld [vmem:[#allocation22_spill] sm:$0xff]  ;;  %v5151_v57 = vrot.slane %v5149_v14, 5  ;;  %v5162_v21 = vrot.slane %v3566_v42, 6  ;;  %v5148_v5 = vrot.slane %v5147_v7, 4  ;;  %v5165_v23 = vrot.slane %v3571_v17, 5 }
 0x2e7   :  { %4043 = vmatmul.mubr.bf16.gmra.mrb[44].mxu0 %v7793_v59  ;;  %4106 = vmatmul.mubr.bf16.gmra.mrb[44].mxu1 %v7793_v59  ;;  %v11813_v59 = vld [vmem:[#allocation19_spill] sm:$0xff]  ;;  %v5157_v35 = vor.u32 %v5156_v9, %v5155_v46  ;;  %v5161_v54 = vrot.slane %v5159_v10, 5  ;;  %v5172_v63 = vrot.slane %v3580_v61, 6  ;;  %v5175_v17 = vrot.slane %v3585_v58, 5 }
 0x2e8   :  { %7927 = vmatprep.mubr.msk.bf16.mxu0 %vm3980_vm5, %v8270_v13  ;;  %7930 = vmatprep.mubr.msk.bf16.mxu1 %vm3980_vm5, %v8270_v13  ;;  %v8269_v34 = vpack.c.bf16 %v11814_v36, %v11813_v59  ;;  %v5153_v11 = vor.u32 %v5152_v1, %v5151_v57  ;;  %v5176_v25 = vrot.slane %v3588_v22, 6  ;;  %v9068_v13 = vld [vmem:[#allocation7 + $0x3e8] ss:$16 sps:$4 sm:$0xff]   ;;  %v5179_v14 = vshrl.u32 %v10980_v51, 16  ;;  %v9071_v59 = vld [vmem:[#allocation7 + $0x400] ss:$16 sps:$4 sm:$0xff]  }
 0x2e9   :  { %4463 = vmatpush1.bf16.msra.mxu0 %v9053_v29  ;;  %4526 = vmatpush1.bf16.msra.mxu1 %v9056_v28  ;;  %v5166_v29 = vrot.slane %v3574_v4, 6  ;;  %v5169_v28 = vshrl.u32 %v10901_v27, 16  ;;  %v5158_v42 = vrot.slane %v5157_v35, 4  ;;  %v5163_v52 = vor.u32 %v5162_v21, %v5161_v54  ;;  %v9065_v4 = vld [vmem:[#allocation7 + $0x3e0] ss:$16 sps:$4 sm:$0xff]  }
 0x2ea   :  { %4975 = vmatprep.subr.bf16.mxu0 %v9061_v45  ;;  %5038 = vmatprep.subr.bf16.mxu1 %v9064_v6  ;;  %v5154_v61 = vsel %vm9955_vm7, %v5148_v5, %v5153_v11  ;;  %v5177_v58 = vor.u32 %v5176_v25, %v5175_v17  ;;  %v5182_v46 = vrot.slane %v3594_v32, 6  ;;  %v5181_v10 = vrot.slane %v5179_v14, 5  ;;  %v9074_v36 = vld [vmem:[#allocation7 + $0x408] ss:$16 sps:$4 sm:$0xff]   ;;  %v9094_v14 = vld [vmem:[#allocation7 + $0x46c] ss:$16 sps:$4 sm:$0xff]  }
 0x2eb   :  { %v5167_v6 = vor.u32 %v5166_v29, %v5165_v23  ;;  %v5164_v37 = vsel %vm9955_vm7, %v5158_v42, %v5163_v52  ;;  %v5171_v8 = vrot.slane %v5169_v28, 5  ;;  %v5736_v32 = vrot.slane %v10752_v40, 6  ;;  %v9077_v23 = vld [vmem:[#allocation7 + $0x420] ss:$16 sps:$4 sm:$0xff]   ;;  %v9080_v11 = vld [vmem:[#allocation7 + $0x428] ss:$16 sps:$4 sm:$0xff]  }
 0x2ec   :  { %v11077_v22 = vcombine.high %v5154_v61, %v5164_v37  ;;  %v11079_v1 = vcombine.low %v5154_v61, %v5164_v37  ;;  %v5178_v9 = vrot.slane %v5177_v58, 4  ;;  %v5183_v21 = vor.u32 %v5182_v46, %v5181_v10  ;;  %v9091_v58 = vld [vmem:[#allocation7 + $0x464] ss:$16 sps:$4 sm:$0xff]   ;;  %v9092_v46 = vld [vmem:[#allocation7 + $0x468] ss:$16 sps:$4 sm:$0xff]  }
 0x2ed   :  { %v5173_v7 = vor.u32 %v5172_v63, %v5171_v8  ;;  %v8085_v5 = vrot.slane %v10747_v50, 10  ;;  %v8086_v35 = vrot.slane %v10812_v20, 10  ;;  %v5740_v54 = vrot.slane %v10830_v55, 6  ;;  %v9085_v50 = vld [vmem:[#allocation7 + $0x444] ss:$16 sps:$4 sm:$0xff]  }
 0x2ee   :  { %v4562_v40 = vrot.slane %v10559_v33, 5  ;;  %v8087_v63 = vrot.slane %v10885_v12, 10  ;;  %v5744_v52 = vrot.slane %v10901_v27, 6  ;;  %v8088_v17 = vrot.slane %v10951_v41, 10  ;;  %v9083_v41 = vld [vmem:[#allocation7 + $0x440] ss:$16 sps:$4 sm:$0xff]  }
 0x2ef   :  { %4467 = vmatmul.mubr.bf16.vlgmr.msra.gmra.mrb[36].mxu0 %v8269_v34  ;;  %4530 = vmatmul.mubr.bf16.vlgmr.msra.gmra.mrb[36].mxu1 %v8269_v34  ;;  %v9079_v34 = vld [vmem:[#allocation7 + $0x424] ss:$16 sps:$4 sm:$0xff]   ;;  %v5737_v28 = vsel %vm10387_vm13, %v8085_v5, %v5736_v32  ;;  %v5741_v42 = vsel %vm10387_vm13, %v8086_v35, %v5740_v54  ;;  %v5748_v25 = vrot.slane %v10980_v51, 6  ;;  %v9086_v51 = vld [vmem:[#allocation7 + $0x448] ss:$16 sps:$4 sm:$0xff]   ;;  %vm6435_vm2 = vcmask 401408  }
 0x2f0   :  { %7928 = vmatprep.mubr.msk.bf16.mxu0 %vm3980_vm5, %v10989_v56  ;;  %7931 = vmatprep.mubr.msk.bf16.mxu1 %vm3980_vm5, %v10989_v56  ;;  %v9076_v56 = vld [vmem:[#allocation7 + $0x40c] ss:$16 sps:$4 sm:$0xff]   ;;  %v11117_v61 = vcombine.high %v5737_v28, %v5741_v42  ;;  %v11119_v12 = vcombine.low %v5737_v28, %v5741_v42  ;;  %v9098_v10 = vld [vmem:[#allocation7 + $0x488] ss:$16 sps:$4 sm:$0xff]   ;;  %v9115_v32 = vld [vmem:[#allocation7 + $0x4e4] ss:$16 sps:$4 sm:$0xff]  }
 0x2f1   :  { %4976 = vmatpush1.bf16.msra.mxu0 %v9059_v60  ;;  %5039 = vmatpush1.bf16.msra.mxu1 %v9062_v16  ;;  %v5168_v60 = vrot.slane %v5167_v6, 4  ;;  %v9082_v16 = vld [vmem:[#allocation7 + $0x42c] ss:$16 sps:$4 sm:$0xff]   ;;  %v5745_v6 = vsel %vm10387_vm13, %v8087_v63, %v5744_v52  ;;  %v5749_v27 = vsel %vm10387_vm13, %v8088_v17, %v5748_v25  ;;  %v9113_v5 = vld [vmem:[#allocation7 + $0x4e0] ss:$16 sps:$4 sm:$0xff]   ;;  %vm6544_vm3 = vcmask 403458  }
 0x2f2   :  { %4977 = vmatprep.subr.bf16.mxu0 %v9067_v38  ;;  %5040 = vmatprep.subr.bf16.mxu1 %v9070_v18  ;;  %v7934_v38 = vrot.slane %v10632_v0, 9  ;;  %v4566_v18 = vrot.slane %v10656_v53, 5  ;;  %v11131_v37 = vcombine.low %v5745_v6, %v5749_v27  ;;  %v9116_v35 = vld [vmem:[#allocation7 + $0x4e8] ss:$16 sps:$4 sm:$0xff]   ;;  %v9121_v54 = vld [vmem:[#allocation7 + $0x504] ss:$16 sps:$4 sm:$0xff]  }
 0x2f3   :  { %v5174_v57 = vsel %vm9955_vm7, %v5168_v60, %v5173_v7  ;;  %v9097_v60 = vld [vmem:[#allocation7 + $0x484] ss:$16 sps:$4 sm:$0xff]   ;;  %v9100_v7 = vld [vmem:[#allocation7 + $0x48c] ss:$16 sps:$4 sm:$0xff]   ;;  %v9125_v28 = vld [vmem:[#allocation7 + $0x520] ss:$16 sps:$4 sm:$0xff]  }
 0x2f4   :  { %v9128_v63 = vld [vmem:[#allocation7 + $0x528] ss:$16 sps:$4 sm:$0xff]   ;;  %v9136_v42 = vld [vmem:[#allocation7 + $0x54c] ss:$16 sps:$4 sm:$0xff]   ;;  %v9131_v52 = vld [vmem:[#allocation7 + $0x540] ss:$16 sps:$4 sm:$0xff]  }
 0x2f5   :  { %4978 = vmatpush1.bf16.msra.mxu0 %v9065_v4  ;;  %5041 = vmatpush1.bf16.msra.mxu1 %v9068_v13  ;;  %v7933_v4 = vrot.slane %v10530_v3, 9  ;;  %v11115_v13 = vsel %vm10000_vm10, %v7934_v38, %v4566_v18  ;;  %v9112_v38 = vld [vmem:[#allocation7 + $0x4cc] ss:$16 sps:$4 sm:$0xff]   ;;  %v9134_v17 = vld [vmem:[#allocation7 + $0x548] ss:$16 sps:$4 sm:$0xff]   ;;  %vm6705_vm8 = vcmask 130048  }
 0x2f6   :  { %4979 = vmatprep.subr.bf16.mxu0 %v9073_v26  ;;  %5042 = vmatprep.subr.bf16.mxu1 %v9076_v56  ;;  %v11129_v56 = vcombine.high %v5745_v6, %v5749_v27  ;;  %v9118_v18 = vld [vmem:[#allocation7 + $0x4ec] ss:$16 sps:$4 sm:$0xff]   ;;  %v9139_v25 = vld [vmem:[#allocation7 + $0x564] ss:$16 sps:$4 sm:$0xff]   ;;  %v9137_v6 = vld [vmem:[#allocation7 + $0x560] ss:$16 sps:$4 sm:$0xff]  }
 0x2f7   :  { %4477 = vmatmul.mubr.bf16.gmra.mrb[40].mxu0 %v10993_v62  ;;  %4540 = vmatmul.mubr.bf16.gmra.mrb[40].mxu1 %v10993_v62  ;;  %v5184_v62 = vsel %vm9955_vm7, %v5178_v9, %v5183_v21  ;;  %v11127_v26 = vsel %vm10000_vm10, %v7933_v4, %v4562_v40  ;;  %v9095_v9 = vld [vmem:[#allocation7 + $0x480] ss:$16 sps:$4 sm:$0xff]   ;;  %v9110_v21 = vld [vmem:[#allocation7 + $0x4c8] ss:$16 sps:$4 sm:$0xff]   ;;  %v9142_v4 = vld [vmem:[#allocation7 + $0x56c] ss:$16 sps:$4 sm:$0xff]  }
 0x2f8   :  { %7929 = vmatprep.mubr.msk.bf16.mxu0 %vm3980_vm5, %v10999_v31  ;;  %7932 = vmatprep.mubr.msk.bf16.mxu1 %vm3980_vm5, %v10999_v31  ;;  %v11100_v29 = vcombine.high %v5174_v57, %v5184_v62  ;;  %v11102_v20 = vcombine.low %v5174_v57, %v5184_v62  ;;  %v9088_v31 = vld [vmem:[#allocation7 + $0x44c] ss:$16 sps:$4 sm:$0xff]   ;;  %v7940_v8 = vcombine.high %v11127_v26, %v11115_v13  ;;  %v9107_v57 = vld [vmem:[#allocation7 + $0x4c0] ss:$16 sps:$4 sm:$0xff]   ;;  %v9122_v62 = vld [vmem:[#allocation7 + $0x508] ss:$16 sps:$4 sm:$0xff]  }
 0x2f9   :  { %4980 = vmatpush1.bf16.msra.mxu0 %v9071_v59  ;;  %5043 = vmatpush1.bf16.msra.mxu1 %v9074_v36  ;;  %v9103_v59 = vld [vmem:[#allocation7 + $0x4a4] ss:$16 sps:$4 sm:$0xff]   ;;  %v9101_v36 = vld [vmem:[#allocation7 + $0x4a0] ss:$16 sps:$4 sm:$0xff]   ;;  %v9140_v27 = vld [vmem:[#allocation7 + $0x568] ss:$16 sps:$4 sm:$0xff]  }
 0x2fa   :  { %4981 = vmatprep.subr.bf16.mxu0 %v9079_v34  ;;  %5044 = vmatprep.subr.bf16.mxu1 %v9082_v16  ;;  %v9104_v34 = vld [vmem:[#allocation7 + $0x4a8] ss:$16 sps:$4 sm:$0xff]   ;;  %v9109_v16 = vld [vmem:[#allocation7 + $0x4c4] ss:$16 sps:$4 sm:$0xff]   ;;  %v9119_v40 = vld [vmem:[#allocation7 + $0x500] ss:$16 sps:$4 sm:$0xff]  }
 0x2fb   :  { %v9179_v45 = vld [vmem:[#allocation7 + $0x640] ss:$16 sps:$4 sm:$0xff]   ;;  %v9272_v55 = vld [vmem:[#allocation7 + $0x828] ss:$16 sps:$4 sm:$0xff]  }
 0x2fd   :  { %4982 = vmatpush1.bf16.msra.mxu0 %v9077_v23  ;;  %5045 = vmatpush1.bf16.msra.mxu1 %v9080_v11  ;;  %v9124_v23 = vld [vmem:[#allocation7 + $0x50c] ss:$16 sps:$4 sm:$0xff]   ;;  %v9127_v11 = vld [vmem:[#allocation7 + $0x524] ss:$16 sps:$4 sm:$0xff]  }
 0x2fe   :  { %4983 = vmatprep.subr.bf16.mxu0 %v9085_v50  ;;  %5046 = vmatprep.subr.bf16.mxu1 %v9088_v31  ;;  %v9130_v50 = vld [vmem:[#allocation7 + $0x52c] ss:$16 sps:$4 sm:$0xff]   ;;  %v9133_v31 = vld [vmem:[#allocation7 + $0x544] ss:$16 sps:$4 sm:$0xff]  }
 0x2ff   :  { %4487 = vmatmul.mubr.bf16.gmra.mrb[44].mxu0 %v11003_v30  ;;  %4550 = vmatmul.mubr.bf16.gmra.mrb[44].mxu1 %v11003_v30  ;;  %v9106_v30 = vld [vmem:[#allocation7 + $0x4ac] ss:$16 sps:$4 sm:$0xff]  }
 0x300   :  { %8005 = vmatprep.mubr.msk.bf16.mxu0 %vm3980_vm5, %v7940_v8  ;;  %8008 = vmatprep.mubr.msk.bf16.mxu1 %vm3980_vm5, %v7940_v8  ;;  %v9143_v8 = vld [vmem:[#allocation7 + $0x580] ss:$16 sps:$4 sm:$0xff]  }
 0x301   :  { %4984 = vmatpush1.bf16.msra.mxu0 %v9083_v41  ;;  %5047 = vmatpush1.bf16.msra.mxu1 %v9086_v51  ;;  %v9145_v41 = vld [vmem:[#allocation7 + $0x584] ss:$16 sps:$4 sm:$0xff]   ;;  %v9148_v51 = vld [vmem:[#allocation7 + $0x58c] ss:$16 sps:$4 sm:$0xff]  }
 0x302   :  { %4985 = vmatprep.subr.bf16.mxu0 %v9091_v58  ;;  %5048 = vmatprep.subr.bf16.mxu1 %v9094_v14  ;;  %v9146_v58 = vld [vmem:[#allocation7 + $0x588] ss:$16 sps:$4 sm:$0xff]   ;;  %v9151_v14 = vld [vmem:[#allocation7 + $0x5a4] ss:$16 sps:$4 sm:$0xff]  }
 0x305   :  { %4986 = vmatpush1.bf16.msra.mxu0 %v9089_v2  ;;  %5049 = vmatpush1.bf16.msra.mxu1 %v9092_v46  ;;  %v9154_v2 = vld [vmem:[#allocation7 + $0x5ac] ss:$16 sps:$4 sm:$0xff]   ;;  %v7939_v46 = vcombine.low %v11127_v26, %v11115_v13  ;;  %v9155_v13 = vld [vmem:[#allocation7 + $0x5c0] ss:$16 sps:$4 sm:$0xff]   ;;  %v9158_v26 = vld [vmem:[#allocation7 + $0x5c8] ss:$16 sps:$4 sm:$0xff]  }
 0x306   :  { %4987 = vmatprep.subr.bf16.mxu0 %v9097_v60  ;;  %5050 = vmatprep.subr.bf16.mxu1 %v9100_v7  ;;  %v9149_v60 = vld [vmem:[#allocation7 + $0x5a0] ss:$16 sps:$4 sm:$0xff]   ;;  %v9152_v7 = vld [vmem:[#allocation7 + $0x5a8] ss:$16 sps:$4 sm:$0xff]  }
 0x309   :  { %4988 = vmatpush1.bf16.msra.mxu0 %v9095_v9  ;;  %5051 = vmatpush1.bf16.msra.mxu1 %v9098_v10  ;;  %v9157_v9 = vld [vmem:[#allocation7 + $0x5c4] ss:$16 sps:$4 sm:$0xff]   ;;  %v9160_v10 = vld [vmem:[#allocation7 + $0x5cc] ss:$16 sps:$4 sm:$0xff]  }
 0x30a   :  { %4989 = vmatprep.subr.bf16.mxu0 %v9103_v59  ;;  %5052 = vmatprep.subr.bf16.mxu1 %v9106_v30  ;;  %v5135_v59 = vrot.slane %v3529_v24, 5  ;;  %v5136_v30 = vrot.slane %v3532_v19, 6  ;;  %v9163_v24 = vld [vmem:[#allocation7 + $0x5e4] ss:$16 sps:$4 sm:$0xff]   ;;  %v5125_v19 = vrot.slane %v3515_v47, 5 }
 0x30b   :  { %v9172_v47 = vld [vmem:[#allocation7 + $0x60c] ss:$16 sps:$4 sm:$0xff]  }
 0x30d   :  { %4990 = vmatpush1.bf16.msra.mxu0 %v9101_v36  ;;  %5053 = vmatpush1.bf16.msra.mxu1 %v9104_v34  ;;  %v5139_v36 = vshrl.u32 %v10656_v53, 16  ;;  %v5129_v34 = vshrl.u32 %v10559_v33, 16 }
 0x30e   :  { %4991 = vmatprep.subr.bf16.mxu0 %v9109_v16  ;;  %5054 = vmatprep.subr.bf16.mxu1 %v9112_v38  ;;  %v9166_v16 = vld [vmem:[#allocation7 + $0x5ec] ss:$16 sps:$4 sm:$0xff]   ;;  %v5126_v38 = vrot.slane %v3518_v44, 6 }
 0x310   :  { %v5127_v44 = vor.u32 %v5126_v38, %v5125_v19  ;;  %v9220_v19 = vld [vmem:[#allocation7 + $0x70c] ss:$16 sps:$4 sm:$0xff]   ;;  %v9215_v38 = vld [vmem:[#allocation7 + $0x700] ss:$16 sps:$4 sm:$0xff]  }
 0x311   :  { %4992 = vmatpush1.bf16.msra.mxu0 %v9107_v57  ;;  %5055 = vmatpush1.bf16.msra.mxu1 %v9110_v21  ;;  %v5137_v57 = vor.u32 %v5136_v30, %v5135_v59  ;;  %v5141_v21 = vrot.slane %v5139_v36, 5  ;;  %v9208_v59 = vld [vmem:[#allocation7 + $0x6cc] ss:$16 sps:$4 sm:$0xff]   ;;  %v9203_v30 = vld [vmem:[#allocation7 + $0x6c0] ss:$16 sps:$4 sm:$0xff]  }
 0x312   :  { %4993 = vmatprep.subr.bf16.mxu0 %v9115_v32  ;;  %5056 = vmatprep.subr.bf16.mxu1 %v9118_v18  ;;  %v9161_v32 = vld [vmem:[#allocation7 + $0x5e0] ss:$16 sps:$4 sm:$0xff]   ;;  %v9164_v18 = vld [vmem:[#allocation7 + $0x5e8] ss:$16 sps:$4 sm:$0xff]  }
 0x313   :  { %v9206_v36 = vld [vmem:[#allocation7 + $0x6c8] ss:$16 sps:$4 sm:$0xff]  }
 0x315   :  { %4994 = vmatpush1.bf16.msra.mxu0 %v9113_v5  ;;  %5057 = vmatpush1.bf16.msra.mxu1 %v9116_v35  ;;  %v5131_v5 = vrot.slane %v5129_v34, 5  ;;  %v11817_v35 = vshll.u32 %v10559_v33, 16  ;;  %v9209_v34 = vld [vmem:[#allocation7 + $0x6e0] ss:$16 sps:$4 sm:$0xff]  }
 0x316   :  { %4995 = vmatprep.subr.bf16.mxu0 %v9121_v54  ;;  %5058 = vmatprep.subr.bf16.mxu1 %v9124_v23  ;;  %v9169_v23 = vld [vmem:[#allocation7 + $0x604] ss:$16 sps:$4 sm:$0xff]  }
 0x317   :  { %v5132_v54 = vrot.slane %v11817_v35, 6  ;;  %v9232_v35 = vld [vmem:[#allocation7 + $0x74c] ss:$16 sps:$4 sm:$0xff]  }
 0x319   :  { %4996 = vmatpush1.bf16.msra.mxu0 %v9119_v40  ;;  %5059 = vmatpush1.bf16.msra.mxu1 %v9122_v62  ;;  %v5138_v40 = vrot.slane %v5137_v57, 4  ;;  %v9218_v57 = vld [vmem:[#allocation7 + $0x708] ss:$16 sps:$4 sm:$0xff]  }
 0x31a   :  { %4997 = vmatprep.subr.bf16.mxu0 %v9127_v11  ;;  %5060 = vmatprep.subr.bf16.mxu1 %v9130_v50  ;;  %v9170_v11 = vld [vmem:[#allocation7 + $0x608] ss:$16 sps:$4 sm:$0xff]   ;;  %v5133_v50 = vor.u32 %v5132_v54, %v5131_v5  ;;  %v9229_v5 = vld [vmem:[#allocation7 + $0x744] ss:$16 sps:$4 sm:$0xff]   ;;  %v9227_v54 = vld [vmem:[#allocation7 + $0x740] ss:$16 sps:$4 sm:$0xff]  }
 0x31d   :  { %4998 = vmatpush1.bf16.msra.mxu0 %v9125_v28  ;;  %5061 = vmatpush1.bf16.msra.mxu1 %v9128_v63  ;;  %v9175_v28 = vld [vmem:[#allocation7 + $0x624] ss:$16 sps:$4 sm:$0xff]   ;;  %v9178_v63 = vld [vmem:[#allocation7 + $0x62c] ss:$16 sps:$4 sm:$0xff]  }
 0x31e   :  { %4999 = vmatprep.subr.bf16.mxu0 %v9133_v31  ;;  %5062 = vmatprep.subr.bf16.mxu1 %v9136_v42  ;;  %v5128_v31 = vrot.slane %v5127_v44, 4  ;;  %v9173_v42 = vld [vmem:[#allocation7 + $0x620] ss:$16 sps:$4 sm:$0xff]   ;;  %v9238_v44 = vld [vmem:[#allocation7 + $0x76c] ss:$16 sps:$4 sm:$0xff]  }
 0x321   :  { %5000 = vmatpush1.bf16.msra.mxu0 %v9131_v52  ;;  %5063 = vmatpush1.bf16.msra.mxu1 %v9134_v17  ;;  %v9176_v52 = vld [vmem:[#allocation7 + $0x628] ss:$16 sps:$4 sm:$0xff]  }
 0x322   :  { %5001 = vmatprep.subr.bf16.mxu0 %v9139_v25  ;;  %5064 = vmatprep.subr.bf16.mxu1 %v9142_v4  ;;  %v9181_v25 = vld [vmem:[#allocation7 + $0x644] ss:$16 sps:$4 sm:$0xff]   ;;  %v9184_v4 = vld [vmem:[#allocation7 + $0x64c] ss:$16 sps:$4 sm:$0xff]  }
 0x325   :  { %5002 = vmatpush1.bf16.msra.mxu0 %v9137_v6  ;;  %5065 = vmatpush1.bf16.msra.mxu1 %v9140_v27  ;;  %v9182_v6 = vld [vmem:[#allocation7 + $0x648] ss:$16 sps:$4 sm:$0xff]   ;;  %v9187_v27 = vld [vmem:[#allocation7 + $0x664] ss:$16 sps:$4 sm:$0xff]  }
 0x326   :  { %5003 = vmatprep.subr.bf16.mxu0 %v9145_v41  ;;  %5066 = vmatprep.subr.bf16.mxu1 %v9148_v51  ;;  %v9190_v41 = vld [vmem:[#allocation7 + $0x66c] ss:$16 sps:$4 sm:$0xff]   ;;  %v9185_v51 = vld [vmem:[#allocation7 + $0x660] ss:$16 sps:$4 sm:$0xff]  }
 0x329   :  { %5004 = vmatpush1.bf16.msra.mxu0 %v9143_v8  ;;  %5067 = vmatpush1.bf16.msra.mxu1 %v9146_v58  ;;  %v9188_v8 = vld [vmem:[#allocation7 + $0x668] ss:$16 sps:$4 sm:$0xff]   ;;  %v9193_v58 = vld [vmem:[#allocation7 + $0x684] ss:$16 sps:$4 sm:$0xff]  }
 0x32a   :  { %5576 = vmatprep.subr.bf16.mxu0 %v9151_v14  ;;  %5639 = vmatprep.subr.bf16.mxu1 %v9154_v2  ;;  %v9191_v14 = vld [vmem:[#allocation7 + $0x680] ss:$16 sps:$4 sm:$0xff]   ;;  %v9194_v2 = vld [vmem:[#allocation7 + $0x688] ss:$16 sps:$4 sm:$0xff]  }
 0x32c   :  { %5008 = vmatmul.mubr.bf16.vlgmr.msra.gmra.mrb[36].mxu0 %v7939_v46  ;;  %5071 = vmatmul.mubr.bf16.vlgmr.msra.gmra.mrb[36].mxu1 %v7939_v46  ;;  %v9199_v46 = vld [vmem:[#allocation7 + $0x6a4] ss:$16 sps:$4 sm:$0xff]  }
 0x32d   :  { %8006 = vmatprep.mubr.msk.bf16.mxu0 %vm3980_vm5, %v11023_v49  ;;  %8009 = vmatprep.mubr.msk.bf16.mxu1 %vm3980_vm5, %v11023_v49  ;;  %v5142_v49 = vrot.slane %v3538_v39, 6  ;;  %v9167_v39 = vld [vmem:[#allocation7 + $0x600] ss:$16 sps:$4 sm:$0xff]  }
 0x32e   :  { %5577 = vmatpush1.bf16.msra.mxu0 %v9149_v60  ;;  %5640 = vmatpush1.bf16.msra.mxu1 %v9152_v7  ;;  %v9202_v60 = vld [vmem:[#allocation7 + $0x6ac] ss:$16 sps:$4 sm:$0xff]   ;;  %v9197_v7 = vld [vmem:[#allocation7 + $0x6a0] ss:$16 sps:$4 sm:$0xff]  }
 0x32f   :  { %5578 = vmatprep.subr.bf16.mxu0 %v9157_v9  ;;  %5641 = vmatprep.subr.bf16.mxu1 %v9160_v10  ;;  %v5143_v62 = vor.u32 %v5142_v49, %v5141_v21  ;;  %v9200_v9 = vld [vmem:[#allocation7 + $0x6a8] ss:$16 sps:$4 sm:$0xff]   ;;  %v9205_v10 = vld [vmem:[#allocation7 + $0x6c4] ss:$16 sps:$4 sm:$0xff]   ;;  %v9226_v49 = vld [vmem:[#allocation7 + $0x72c] ss:$16 sps:$4 sm:$0xff]  }
 0x330   :  { %v9223_v21 = vld [vmem:[#allocation7 + $0x724] ss:$16 sps:$4 sm:$0xff]  }
 0x332   :  { %5579 = vmatpush1.bf16.msra.mxu0 %v9155_v13  ;;  %5642 = vmatpush1.bf16.msra.mxu1 %v9158_v26  ;;  %v9211_v13 = vld [vmem:[#allocation7 + $0x6e4] ss:$16 sps:$4 sm:$0xff]   ;;  %v9214_v26 = vld [vmem:[#allocation7 + $0x6ec] ss:$16 sps:$4 sm:$0xff]  }
 0x333   :  { %5580 = vmatprep.subr.bf16.mxu0 %v9163_v24  ;;  %5643 = vmatprep.subr.bf16.mxu1 %v9166_v16  ;;  %v9212_v24 = vld [vmem:[#allocation7 + $0x6e8] ss:$16 sps:$4 sm:$0xff]   ;;  %v9217_v16 = vld [vmem:[#allocation7 + $0x704] ss:$16 sps:$4 sm:$0xff]  }
 0x334   :  { %5018 = vmatmul.mubr.bf16.gmra.mrb[40].mxu0 %v11025_v48  ;;  %5081 = vmatmul.mubr.bf16.gmra.mrb[40].mxu1 %v11025_v48  ;;  %v11167_v48 = vsel %vm9955_vm7, %v5138_v40, %v5143_v62  ;;  %v9233_v40 = vld [vmem:[#allocation7 + $0x760] ss:$16 sps:$4 sm:$0xff]   ;;  %v9236_v62 = vld [vmem:[#allocation7 + $0x768] ss:$16 sps:$4 sm:$0xff]  }
 0x335   :  { %8007 = vmatprep.mubr.msk.bf16.mxu0 %vm3980_vm5, %v11037_v15  ;;  %8010 = vmatprep.mubr.msk.bf16.mxu1 %vm3980_vm5, %v11037_v15  ;;  %v11171_v15 = vsel %vm9955_vm7, %v5128_v31, %v5133_v50  ;;  %v9247_v31 = vld [vmem:[#allocation7 + $0x7a4] ss:$16 sps:$4 sm:$0xff]   ;;  %vm6594_vm7 = vcmask 407558  }
 0x336   :  { %5581 = vmatpush1.bf16.msra.mxu0 %v9161_v32  ;;  %5644 = vmatpush1.bf16.msra.mxu1 %v9164_v18  ;;  %v8012_v17 = vcombine.high %v11171_v15, %v11167_v48  ;;  %v9221_v32 = vld [vmem:[#allocation7 + $0x720] ss:$16 sps:$4 sm:$0xff]   ;;  %v9224_v18 = vld [vmem:[#allocation7 + $0x728] ss:$16 sps:$4 sm:$0xff]   ;;  %v8011_v50 = vcombine.low %v11171_v15, %v11167_v48  ;;  %v9253_v48 = vld [vmem:[#allocation7 + $0x7c4] ss:$16 sps:$4 sm:$0xff]  }
 0x337   :  { %5582 = vmatprep.subr.bf16.mxu0 %v9169_v23  ;;  %5645 = vmatprep.subr.bf16.mxu1 %v9172_v47  ;;  %v9230_v23 = vld [vmem:[#allocation7 + $0x748] ss:$16 sps:$4 sm:$0xff]   ;;  %v9235_v47 = vld [vmem:[#allocation7 + $0x764] ss:$16 sps:$4 sm:$0xff]   ;;  %v9256_v15 = vld [vmem:[#allocation7 + $0x7cc] ss:$16 sps:$4 sm:$0xff]  }
 0x33a   :  { %5583 = vmatpush1.bf16.msra.mxu0 %v9167_v39  ;;  %5646 = vmatpush1.bf16.msra.mxu1 %v9170_v11  ;;  %v9241_v39 = vld [vmem:[#allocation7 + $0x784] ss:$16 sps:$4 sm:$0xff]   ;;  %v9244_v11 = vld [vmem:[#allocation7 + $0x78c] ss:$16 sps:$4 sm:$0xff]  }
 0x33b   :  { %5584 = vmatprep.subr.bf16.mxu0 %v9175_v28  ;;  %5647 = vmatprep.subr.bf16.mxu1 %v9178_v63  ;;  %v9239_v28 = vld [vmem:[#allocation7 + $0x780] ss:$16 sps:$4 sm:$0xff]   ;;  %v9242_v63 = vld [vmem:[#allocation7 + $0x788] ss:$16 sps:$4 sm:$0xff]  }
 0x33c   :  { %5028 = vmatmul.mubr.bf16.gmra.mrb[44].mxu0 %v11039_v43  ;;  %5091 = vmatmul.mubr.bf16.gmra.mrb[44].mxu1 %v11039_v43  ;;  %v9196_v43 = vld [vmem:[#allocation7 + $0x68c] ss:$16 sps:$4 sm:$0xff]  }
 0x33d   :  { %8077 = vmatprep.mubr.msk.bf16.mxu0 %vm3980_vm5, %v8012_v17  ;;  %8080 = vmatprep.mubr.msk.bf16.mxu1 %vm3980_vm5, %v8012_v17  ;;  %v9248_v17 = vld [vmem:[#allocation7 + $0x7a8] ss:$16 sps:$4 sm:$0xff]  }
 0x33e   :  { %5585 = vmatpush1.bf16.msra.mxu0 %v9173_v42  ;;  %5648 = vmatpush1.bf16.msra.mxu1 %v9176_v52  ;;  %v9250_v42 = vld [vmem:[#allocation7 + $0x7ac] ss:$16 sps:$4 sm:$0xff]   ;;  %v9245_v52 = vld [vmem:[#allocation7 + $0x7a0] ss:$16 sps:$4 sm:$0xff]  }
 0x33f   :  { %5586 = vmatprep.subr.bf16.mxu0 %v9181_v25  ;;  %5649 = vmatprep.subr.bf16.mxu1 %v9184_v4  ;;  %v9251_v25 = vld [vmem:[#allocation7 + $0x7c0] ss:$16 sps:$4 sm:$0xff]   ;;  %v9254_v4 = vld [vmem:[#allocation7 + $0x7c8] ss:$16 sps:$4 sm:$0xff]  }
 0x342   :  { %5587 = vmatpush1.bf16.msra.mxu0 %v9179_v45  ;;  %5650 = vmatpush1.bf16.msra.mxu1 %v9182_v6  ;;  %v9259_v45 = vld [vmem:[#allocation7 + $0x7e4] ss:$16 sps:$4 sm:$0xff]   ;;  %v9262_v6 = vld [vmem:[#allocation7 + $0x7ec] ss:$16 sps:$4 sm:$0xff]  }
 0x343   :  { %5588 = vmatprep.subr.bf16.mxu0 %v9187_v27  ;;  %5651 = vmatprep.subr.bf16.mxu1 %v9190_v41  ;;  %v5732_v27 = vrot.slane %v10656_v53, 6  ;;  %v9257_v41 = vld [vmem:[#allocation7 + $0x7e0] ss:$16 sps:$4 sm:$0xff]  }
 0x346   :  { %5589 = vmatpush1.bf16.msra.mxu0 %v9185_v51  ;;  %5652 = vmatpush1.bf16.msra.mxu1 %v9188_v8  ;;  %v9260_v51 = vld [vmem:[#allocation7 + $0x7e8] ss:$16 sps:$4 sm:$0xff]   ;;  %v5728_v8 = vrot.slane %v10559_v33, 6 }
 0x347   :  { %5590 = vmatprep.subr.bf16.mxu0 %v9193_v58  ;;  %5653 = vmatprep.subr.bf16.mxu1 %v9196_v43  ;;  %v9265_v58 = vld [vmem:[#allocation7 + $0x804] ss:$16 sps:$4 sm:$0xff]   ;;  %v9263_v43 = vld [vmem:[#allocation7 + $0x800] ss:$16 sps:$4 sm:$0xff]  }
 0x34a   :  { %5591 = vmatpush1.bf16.msra.mxu0 %v9191_v14  ;;  %5654 = vmatpush1.bf16.msra.mxu1 %v9194_v2  ;;  %v9271_v2 = vld [vmem:[#allocation7 + $0x824] ss:$16 sps:$4 sm:$0xff]  }
 0x34b   :  { %5592 = vmatprep.subr.bf16.mxu0 %v9199_v46  ;;  %5655 = vmatprep.subr.bf16.mxu1 %v9202_v60  ;;  %v9274_v46 = vld [vmem:[#allocation7 + $0x82c] ss:$16 sps:$4 sm:$0xff]   ;;  %v9277_v60 = vld [vmem:[#allocation7 + $0x844] ss:$16 sps:$4 sm:$0xff]  }
 0x34e   :  { %5593 = vmatpush1.bf16.msra.mxu0 %v9197_v7  ;;  %5656 = vmatpush1.bf16.msra.mxu1 %v9200_v9  ;;  %v9280_v7 = vld [vmem:[#allocation7 + $0x84c] ss:$16 sps:$4 sm:$0xff]   ;;  %v9275_v9 = vld [vmem:[#allocation7 + $0x840] ss:$16 sps:$4 sm:$0xff]  }
 0x34f   :  { %5594 = vmatprep.subr.bf16.mxu0 %v9205_v10  ;;  %5657 = vmatprep.subr.bf16.mxu1 %v9208_v59  ;;  %v9278_v10 = vld [vmem:[#allocation7 + $0x848] ss:$16 sps:$4 sm:$0xff]   ;;  %v9283_v59 = vld [vmem:[#allocation7 + $0x864] ss:$16 sps:$4 sm:$0xff]  }
 0x352   :  { %5595 = vmatpush1.bf16.msra.mxu0 %v9203_v30  ;;  %5658 = vmatpush1.bf16.msra.mxu1 %v9206_v36  ;;  %v9281_v30 = vld [vmem:[#allocation7 + $0x860] ss:$16 sps:$4 sm:$0xff]   ;;  %v9284_v36 = vld [vmem:[#allocation7 + $0x868] ss:$16 sps:$4 sm:$0xff]  }
 0x353   :  { %5596 = vmatprep.subr.bf16.mxu0 %v9211_v13  ;;  %5659 = vmatprep.subr.bf16.mxu1 %v9214_v26  ;;  %v9289_v13 = vld [vmem:[#allocation7 + $0x884] ss:$16 sps:$4 sm:$0xff]   ;;  %v9292_v26 = vld [vmem:[#allocation7 + $0x88c] ss:$16 sps:$4 sm:$0xff]  }
 0x356   :  { %5597 = vmatpush1.bf16.msra.mxu0 %v9209_v34  ;;  %5660 = vmatpush1.bf16.msra.mxu1 %v9212_v24  ;;  %v9287_v34 = vld [vmem:[#allocation7 + $0x880] ss:$16 sps:$4 sm:$0xff]   ;;  %v9290_v24 = vld [vmem:[#allocation7 + $0x888] ss:$16 sps:$4 sm:$0xff]  }
 0x357   :  { %5598 = vmatprep.subr.bf16.mxu0 %v9217_v16  ;;  %5661 = vmatprep.subr.bf16.mxu1 %v9220_v19  ;;  %v9295_v16 = vld [vmem:[#allocation7 + $0x8a4] ss:$16 sps:$4 sm:$0xff]   ;;  %v9298_v19 = vld [vmem:[#allocation7 + $0x8ac] ss:$16 sps:$4 sm:$0xff]  }
 0x35a   :  { %5599 = vmatpush1.bf16.msra.mxu0 %v9215_v38  ;;  %5662 = vmatpush1.bf16.msra.mxu1 %v9218_v57  ;;  %v9293_v38 = vld [vmem:[#allocation7 + $0x8a0] ss:$16 sps:$4 sm:$0xff]   ;;  %v9296_v57 = vld [vmem:[#allocation7 + $0x8a8] ss:$16 sps:$4 sm:$0xff]  }
 0x35b   :  { %5600 = vmatprep.subr.bf16.mxu0 %v9223_v21  ;;  %5663 = vmatprep.subr.bf16.mxu1 %v9226_v49  ;;  %v9301_v21 = vld [vmem:[#allocation7 + $0x8c4] ss:$16 sps:$4 sm:$0xff]   ;;  %v9304_v49 = vld [vmem:[#allocation7 + $0x8cc] ss:$16 sps:$4 sm:$0xff]  }
 0x35e   :  { %5601 = vmatpush1.bf16.msra.mxu0 %v9221_v32  ;;  %5664 = vmatpush1.bf16.msra.mxu1 %v9224_v18  ;;  %v9299_v32 = vld [vmem:[#allocation7 + $0x8c0] ss:$16 sps:$4 sm:$0xff]   ;;  %v9302_v18 = vld [vmem:[#allocation7 + $0x8c8] ss:$16 sps:$4 sm:$0xff]  }
 0x35f   :  { %5602 = vmatprep.subr.bf16.mxu0 %v9229_v5  ;;  %5665 = vmatprep.subr.bf16.mxu1 %v9232_v35  ;;  %v9307_v5 = vld [vmem:[#allocation7 + $0x8e4] ss:$16 sps:$4 sm:$0xff]   ;;  %v9310_v35 = vld [vmem:[#allocation7 + $0x8ec] ss:$16 sps:$4 sm:$0xff]  }
 0x362   :  { %5603 = vmatpush1.bf16.msra.mxu0 %v9227_v54  ;;  %5666 = vmatpush1.bf16.msra.mxu1 %v9230_v23  ;;  %v9305_v54 = vld [vmem:[#allocation7 + $0x8e0] ss:$16 sps:$4 sm:$0xff]   ;;  %v9308_v23 = vld [vmem:[#allocation7 + $0x8e8] ss:$16 sps:$4 sm:$0xff]  }
 0x363   :  { %5604 = vmatprep.subr.bf16.mxu0 %v9235_v47  ;;  %5667 = vmatprep.subr.bf16.mxu1 %v9238_v44  ;;  %v9313_v47 = vld [vmem:[#allocation7 + $0x904] ss:$16 sps:$4 sm:$0xff]   ;;  %v9316_v44 = vld [vmem:[#allocation7 + $0x90c] ss:$16 sps:$4 sm:$0xff]  }
 0x366   :  { %5605 = vmatpush1.bf16.msra.mxu0 %v9233_v40  ;;  %5668 = vmatpush1.bf16.msra.mxu1 %v9236_v62  ;;  %v9311_v40 = vld [vmem:[#allocation7 + $0x900] ss:$16 sps:$4 sm:$0xff]   ;;  %v9314_v62 = vld [vmem:[#allocation7 + $0x908] ss:$16 sps:$4 sm:$0xff]  }
 0x367   :  { %6141 = vmatprep.subr.bf16.mxu0 %v9241_v39  ;;  %6204 = vmatprep.subr.bf16.mxu1 %v9244_v11  ;;  %v9319_v39 = vld [vmem:[#allocation7 + $0x924] ss:$16 sps:$4 sm:$0xff]   ;;  %v9322_v11 = vld [vmem:[#allocation7 + $0x92c] ss:$16 sps:$4 sm:$0xff]  }
 0x369   :  { %5609 = vmatmul.mubr.bf16.vlgmr.msra.gmra.mrb[36].mxu0 %v8011_v50  ;;  %5672 = vmatmul.mubr.bf16.vlgmr.msra.gmra.mrb[36].mxu1 %v8011_v50  ;;  %v9317_v50 = vld [vmem:[#allocation7 + $0x920] ss:$16 sps:$4 sm:$0xff]  }
 0x36a   :  { %8078 = vmatprep.mubr.msk.bf16.mxu0 %vm3980_vm5, %v11077_v22  ;;  %8081 = vmatprep.mubr.msk.bf16.mxu1 %vm3980_vm5, %v11077_v22  ;;  %v8084_v22 = vrot.slane %v10632_v0, 10  ;;  %v8083_v0 = vrot.slane %v10530_v3, 10  ;;  %v9269_v3 = vld [vmem:[#allocation7 + $0x820] ss:$16 sps:$4 sm:$0xff]  }
 0x36b   :  { %6142 = vmatpush1.bf16.msra.mxu0 %v9239_v28  ;;  %6205 = vmatpush1.bf16.msra.mxu1 %v9242_v63  ;;  %v9320_v28 = vld [vmem:[#allocation7 + $0x928] ss:$16 sps:$4 sm:$0xff]   ;;  %v9325_v63 = vld [vmem:[#allocation7 + $0x944] ss:$16 sps:$4 sm:$0xff]  }
 0x36c   :  { %6143 = vmatprep.subr.bf16.mxu0 %v9247_v31  ;;  %6206 = vmatprep.subr.bf16.mxu1 %v9250_v42  ;;  %v11197_v53 = vsel %vm10387_vm13, %v8084_v22, %v5732_v27  ;;  %v11201_v14 = vsel %vm10387_vm13, %v8083_v0, %v5728_v8  ;;  %v9328_v31 = vld [vmem:[#allocation7 + $0x94c] ss:$16 sps:$4 sm:$0xff]   ;;  %v9323_v42 = vld [vmem:[#allocation7 + $0x940] ss:$16 sps:$4 sm:$0xff]  }
 0x36d   :  { %v8090_v33 = vcombine.high %v11201_v14, %v11197_v53  ;;  %v11818_v22 = vld [vmem:[#allocation18_spill] sm:$0xff] }
 0x36e   :  { %v11819_v27 = vsub.s32 0, %v11818_v22 }
 0x36f   :  { %6144 = vmatpush1.bf16.msra.mxu0 %v9245_v52  ;;  %6207 = vmatpush1.bf16.msra.mxu1 %v9248_v17  ;;  %v9326_v52 = vld [vmem:[#allocation7 + $0x948] ss:$16 sps:$4 sm:$0xff]   ;;  %v8089_v17 = vcombine.low %v11201_v14, %v11197_v53 }
 0x370   :  { %6145 = vmatprep.subr.bf16.mxu0 %v9253_v48  ;;  %6208 = vmatprep.subr.bf16.mxu1 %v9256_v15  ;;  %v6291_v48 = vld [vmem:[#allocation8] sm:$0x3] }
 0x371   :  { %5619 = vmatmul.mubr.bf16.gmra.mrb[40].mxu0 %v11079_v1  ;;  %5682 = vmatmul.mubr.bf16.gmra.mrb[40].mxu1 %v11079_v1  ;;  %v9268_v1 = vld [vmem:[#allocation7 + $0x80c] ss:$16 sps:$4 sm:$0xff]  }
 0x372   :  { %8079 = vmatprep.mubr.msk.bf16.mxu0 %vm3980_vm5, %v11100_v29  ;;  %8082 = vmatprep.mubr.msk.bf16.mxu1 %vm3980_vm5, %v11100_v29  ;;  %v9266_v29 = vld [vmem:[#allocation7 + $0x808] ss:$16 sps:$4 sm:$0xff]  }
 0x373   :  { %6146 = vmatpush1.bf16.msra.mxu0 %v9251_v25  ;;  %6209 = vmatpush1.bf16.msra.mxu1 %v9254_v4 }
 0x374   :  { %6147 = vmatprep.subr.bf16.mxu0 %v9259_v45  ;;  %6210 = vmatprep.subr.bf16.mxu1 %v9262_v6 }
 0x377   :  { %6148 = vmatpush1.bf16.msra.mxu0 %v9257_v41  ;;  %6211 = vmatpush1.bf16.msra.mxu1 %v9260_v51 }
 0x378   :  { %6149 = vmatprep.subr.bf16.mxu0 %v9265_v58  ;;  %6212 = vmatprep.subr.bf16.mxu1 %v9268_v1 }
 0x379   :  { %5629 = vmatmul.mubr.bf16.gmra.mrb[44].mxu0 %v11102_v20  ;;  %5692 = vmatmul.mubr.bf16.gmra.mrb[44].mxu1 %v11102_v20  ;;  %v9286_v20 = vld [vmem:[#allocation7 + $0x86c] ss:$16 sps:$4 sm:$0xff]  }
 0x37a   :  { %8155 = vmatprep.mubr.msk.bf16.mxu0 %vm3980_vm5, %v8090_v33  ;;  %8158 = vmatprep.mubr.msk.bf16.mxu1 %vm3980_vm5, %v8090_v33 }
 0x37b   :  { %6150 = vmatpush1.bf16.msra.mxu0 %v9263_v43  ;;  %6213 = vmatpush1.bf16.msra.mxu1 %v9266_v29 }
 0x37c   :  { %6151 = vmatprep.subr.bf16.mxu0 %v9271_v2  ;;  %6214 = vmatprep.subr.bf16.mxu1 %v9274_v46 }
 0x37f   :  { %6152 = vmatpush1.bf16.msra.mxu0 %v9269_v3  ;;  %6215 = vmatpush1.bf16.msra.mxu1 %v9272_v55 }
 0x380   :  { %6153 = vmatprep.subr.bf16.mxu0 %v9277_v60  ;;  %6216 = vmatprep.subr.bf16.mxu1 %v9280_v7 }
 0x383   :  { %6154 = vmatpush1.bf16.msra.mxu0 %v9275_v9  ;;  %6217 = vmatpush1.bf16.msra.mxu1 %v9278_v10  ;;  %v11820_v10 = vsub.s32 1, %v11818_v22 }
 0x384   :  { %6155 = vmatprep.subr.bf16.mxu0 %v9283_v59  ;;  %6218 = vmatprep.subr.bf16.mxu1 %v9286_v20 }
 0x385   :  { %v11229_v59 = vrot.slane %v6291_v48, %v11820_v10 }
 0x387   :  { %6156 = vmatpush1.bf16.msra.mxu0 %v9281_v30  ;;  %6219 = vmatpush1.bf16.msra.mxu1 %v9284_v36 }
 0x388   :  { %6157 = vmatprep.subr.bf16.mxu0 %v9289_v13  ;;  %6220 = vmatprep.subr.bf16.mxu1 %v9292_v26 }
 0x38b   :  { %6158 = vmatpush1.bf16.msra.mxu0 %v9287_v34  ;;  %6221 = vmatpush1.bf16.msra.mxu1 %v9290_v24 }
 0x38c   :  { %6159 = vmatprep.subr.bf16.mxu0 %v9295_v16  ;;  %6222 = vmatprep.subr.bf16.mxu1 %v9298_v19 }
 0x38f   :  { %6160 = vmatpush1.bf16.msra.mxu0 %v9293_v38  ;;  %6223 = vmatpush1.bf16.msra.mxu1 %v9296_v57 }
 0x390   :  { %6161 = vmatprep.subr.bf16.mxu0 %v9301_v21  ;;  %6224 = vmatprep.subr.bf16.mxu1 %v9304_v49 }
 0x393   :  { %6162 = vmatpush1.bf16.msra.mxu0 %v9299_v32  ;;  %6225 = vmatpush1.bf16.msra.mxu1 %v9302_v18 }
 0x394   :  { %6163 = vmatprep.subr.bf16.mxu0 %v9307_v5  ;;  %6226 = vmatprep.subr.bf16.mxu1 %v9310_v35 }
 0x397   :  { %6164 = vmatpush1.bf16.msra.mxu0 %v9305_v54  ;;  %6227 = vmatpush1.bf16.msra.mxu1 %v9308_v23 }
 0x398   :  { %6165 = vmatprep.subr.bf16.mxu0 %v9313_v47  ;;  %6228 = vmatprep.subr.bf16.mxu1 %v9316_v44 }
 0x39b   :  { %6166 = vmatpush1.bf16.msra.mxu0 %v9311_v40  ;;  %6229 = vmatpush1.bf16.msra.mxu1 %v9314_v62 }
 0x39c   :  { %6167 = vmatprep.subr.bf16.mxu0 %v9319_v39  ;;  %6230 = vmatprep.subr.bf16.mxu1 %v9322_v11 }
 0x39f   :  { %6168 = vmatpush1.bf16.msra.mxu0 %v9317_v50  ;;  %6231 = vmatpush1.bf16.msra.mxu1 %v9320_v28 }
 0x3a0   :  { %6169 = vmatprep.subr.bf16.mxu0 %v9325_v63  ;;  %6232 = vmatprep.subr.bf16.mxu1 %v9328_v31 }
 0x3a3   :  { %6170 = vmatpush1.bf16.msra.mxu0 %v9323_v42  ;;  %6233 = vmatpush1.bf16.msra.mxu1 %v9326_v52 }
 0x3a6   :  { %6174 = vmatmul.mubr.bf16.vlgmr.msra.gmra.mrb[36].mxu0 %v8089_v17  ;;  %6237 = vmatmul.mubr.bf16.vlgmr.msra.gmra.mrb[36].mxu1 %v8089_v17 }
 0x3a7   :  { %8156 = vmatprep.mubr.msk.bf16.mxu0 %vm3980_vm5, %v11117_v61  ;;  %8159 = vmatprep.mubr.msk.bf16.mxu1 %vm3980_vm5, %v11117_v61 }
 0x3ae   :  { %6184 = vmatmul.mubr.bf16.gmra.mrb[40].mxu0 %v11119_v12  ;;  %6247 = vmatmul.mubr.bf16.gmra.mrb[40].mxu1 %v11119_v12  ;;  %v11225_v12 = vrot.slane %v6291_v48, %v11819_v27 }
 0x3af   :  { %8157 = vmatprep.mubr.msk.bf16.mxu0 %vm3980_vm5, %v11129_v56  ;;  %8160 = vmatprep.mubr.msk.bf16.mxu1 %vm3980_vm5, %v11129_v56 }
 0x3b6   :  { %6194 = vmatmul.mubr.bf16.gmra.mrb[44].mxu0 %v11131_v37  ;;  %6257 = vmatmul.mubr.bf16.gmra.mrb[44].mxu1 %v11131_v37 }
 0x479   :  { %v6175_v15 = vpop.f32.mrb[36].mxu0  ;;  %v6238_v25 = vpop.f32.mrb[36].mxu1 }
 0x47a   :  { %v6316_v4 = vrot.slane %v6175_v15, 1  ;;  %v6318_v45 = vrot.slane %v6238_v25, 1  ;;  %v6177_v61 = vpop.f32.mrb[37].mxu0  ;;  %v6240_v6 = vpop.f32.mrb[37].mxu1 }
 0x47b   :  { %v6317_v41 = vrot.slane %v6177_v61, 1  ;;  %v6319_v51 = vrot.slane %v6240_v6, 1  ;;  %v6179_v8 = vpop.f32.mrb[38].mxu0  ;;  %v6242_v58 = vpop.f32.mrb[38].mxu1 }
 0x47c   :  { %v6364_v56 = vmax.f32 %v6175_v15, %v6316_v4  ;;  %v6366_v1 = vmax.f32 %v6238_v25, %v6318_v45  ;;  %v6320_v0 = vrot.slane %v6179_v8, 1  ;;  %v6322_v53 = vrot.slane %v6242_v58, 1  ;;  %v6181_v37 = vpop.f32.mrb[39].mxu0  ;;  %v6244_v43 = vpop.f32.mrb[39].mxu1 }
 0x47d   :  { %v6365_v29 = vmax.f32 %v6177_v61, %v6317_v41  ;;  %v6367_v14 = vmax.f32 %v6240_v6, %v6319_v51  ;;  %v6321_v33 = vrot.slane %v6181_v37, 1  ;;  %v6323_v2 = vrot.slane %v6244_v43, 1 }
 0x47e   :  { %v6388_v46 = vmax.f32 %v6364_v56, %v6366_v1  ;;  %v6368_v3 = vmax.f32 %v6179_v8, %v6320_v0  ;;  %v6370_v55 = vmax.f32 %v6242_v58, %v6322_v53 }
 0x47f   :  { %v6389_v60 = vmax.f32 %v6365_v29, %v6367_v14  ;;  %v6369_v7 = vmax.f32 %v6181_v37, %v6321_v33  ;;  %v6371_v9 = vmax.f32 %v6244_v43, %v6323_v2 }
 0x480   :  { %v6411_v20 = vadd.f32 %v11225_v12, %v6388_v46  ;;  %v6390_v30 = vmax.f32 %v6368_v3, %v6370_v55 }
 0x481   :  { %v6391_v36 = vmax.f32 %v6369_v7, %v6371_v9  ;;  %v6185_v13 = vpop.f32.mrb[40].mxu0  ;;  %v6248_v26 = vpop.f32.mrb[40].mxu1  ;;  %v11234_v5 = vadd.f32 %v11229_v59, %v6389_v60 }
 0x482   :  { %v6423_v34 = vmax.f32 %v6411_v20, 0.0  ;;  %v6413_v24 = vadd.f32 %v11225_v12, %v6390_v30  ;;  %v6324_v16 = vrot.slane %v6185_v13, 1  ;;  %v6326_v19 = vrot.slane %v6248_v26, 1  ;;  %v6187_v38 = vpop.f32.mrb[41].mxu0  ;;  %v6250_v57 = vpop.f32.mrb[41].mxu1 }
 0x483   :  { %v6325_v21 = vrot.slane %v6187_v38, 1  ;;  %v6327_v49 = vrot.slane %v6250_v57, 1  ;;  %v6189_v32 = vpop.f32.mrb[42].mxu0  ;;  %v6252_v18 = vpop.f32.mrb[42].mxu1  ;;  %v6414_v48 = vadd.f32 %v11229_v59, %v6391_v36  ;;  %v6424_v6 = vmax.f32 %v11234_v5, 0.0  ;;  %v9329_v5 = vld [vmem:[%s11685_s1] sm:$0xff]  }
 0x484   :  { %6436 = vst.msk [vmem:[#allocation10] sm:$0x1] %vm6435_vm2, %v6423_v34  ;;  %v6425_v35 = vmax.f32 %v6413_v24, 0.0  ;;  %v6372_v54 = vmax.f32 %v6185_v13, %v6324_v16  ;;  %v6374_v23 = vmax.f32 %v6248_v26, %v6326_v19  ;;  %v6328_v47 = vrot.slane %v6189_v32, 1  ;;  %v6254_v44 = vpop.f32.mrb[43].mxu1  ;;  %6478 = vrot.lane.b32.xlu0 %v6423_v34, %s9502_s0  ;;  %v6191_v40 = vpop.f32.mrb[43].mxu0  ;;  %8355 = vmatprep.mubr.msk.bf16.mxu0 %vm6705_vm8, %v9329_v5 }
 0x485   :  { %6545 = vst.msk [vmem:[#allocation10 + $0x2] sm:$0x4] %vm6544_vm3, %v6423_v34  ;;  %v11241_v62 = vmax.f32 %v6187_v38, %v6325_v21  ;;  %v11243_v39 = vmax.f32 %v6250_v57, %v6327_v49  ;;  %v6330_v11 = vrot.slane %v6252_v18, 1  ;;  %v6331_v50 = vrot.slane %v6254_v44, 1 }
 0x486   :  { %6570 = vst.msk [vmem:[#allocation10 + $0x4] sm:$0x10] %vm6569_vm6, %v6423_v34  ;;  %6571 = vst.msk [vmem:[#allocation10 + $0x14] sm:$0x10] %vm6569_vm6, %v6425_v35  ;;  %v6392_v28 = vmax.f32 %v6372_v54, %v6374_v23  ;;  %v6376_v63 = vmax.f32 %v6189_v32, %v6328_v47  ;;  %v6329_v31 = vrot.slane %v6191_v40, 1  ;;  %6482 = vrot.lane.b32.xlu1 %v6425_v35, %s9502_s0  ;;  %v6426_v43 = vmax.f32 %v6414_v48, 0.0 }
 0x487   :  { %6595 = vst.msk [vmem:[#allocation10 + $0x6] sm:$0x40] %vm6594_vm7, %v6423_v34  ;;  %6596 = vst.msk [vmem:[#allocation10 + $0x16] sm:$0x40] %vm6594_vm7, %v6425_v35  ;;  %v6393_v42 = vmax.f32 %v11241_v62, %v11243_v39  ;;  %v6378_v52 = vmax.f32 %v6252_v18, %v6330_v11  ;;  %v11252_v17 = vmax.f32 %v6254_v44, %v6331_v50 }
 0x488   :  { %6437 = vst.msk [vmem:[#allocation10 + $0x10] sm:$0x1] %vm6435_vm2, %v6425_v35  ;;  %v6415_v15 = vadd.f32 %v11225_v12, %v6392_v28  ;;  %v11256_v25 = vmax.f32 %v6191_v40, %v6329_v31  ;;  %6448 = vrot.lane.b32.xlu0 %v6423_v34, %s9503_s27 }
 0x489   :  { %6546 = vst.msk [vmem:[#allocation10 + $0x12] sm:$0x4] %vm6544_vm3, %v6425_v35  ;;  %v6394_v4 = vmax.f32 %v6376_v63, %v6378_v52  ;;  %v6195_v45 = vpop.f32.mrb[44].mxu0  ;;  %v6258_v61 = vpop.f32.mrb[44].mxu1  ;;  %v6416_v19 = vadd.f32 %v11229_v59, %v6393_v42 }
 0x48a   :  { %v6427_v22 = vmax.f32 %v6415_v15, 0.0  ;;  %v6395_v27 = vmax.f32 %v11256_v25, %v11252_v17  ;;  %v6332_v41 = vrot.slane %v6195_v45, 1  ;;  %v6334_v51 = vrot.slane %v6258_v61, 1  ;;  %v6260_v8 = vpop.f32.mrb[45].mxu1  ;;  %6450 = vrot.lane.b32.xlu1 %v6425_v35, %s9503_s27  ;;  %v6197_v58 = vpop.f32.mrb[45].mxu0  ;;  %v9331_v35 = vld [vmem:[%s11685_s1 + $0x20] sm:$0xff]  }
 0x48b   :  { %v6417_v56 = vadd.f32 %v11225_v12, %v6394_v4  ;;  %v6335_v1 = vrot.slane %v6260_v8, 1  ;;  %v6333_v0 = vrot.slane %v6197_v58, 1  ;;  %v6199_v53 = vpop.f32.mrb[46].mxu0  ;;  %v6262_v37 = vpop.f32.mrb[46].mxu1  ;;  %v6428_v32 = vmax.f32 %v6416_v19, 0.0  ;;  %8365 = vmatprep.mubr.msk.bf16.mxu1 %vm6705_vm8, %v9331_v35  ;;  %v9342_v19 = vld [vmem:[%s11685_s1 + $0x70] sm:$0xff]  }
 0x48c   :  { %6438 = vst.msk [vmem:[#allocation10 + $0x20] sm:$0x1] %vm6435_vm2, %v6427_v22  ;;  %v6380_v29 = vmax.f32 %v6195_v45, %v6332_v41  ;;  %v6382_v14 = vmax.f32 %v6258_v61, %v6334_v51  ;;  %v6336_v33 = vrot.slane %v6199_v53, 1  ;;  %v6338_v2 = vrot.slane %v6262_v37, 1  ;;  %v6264_v46 = vpop.f32.mrb[47].mxu1  ;;  %6480 = vrot.lane.b32.xlu0 %v6424_v6, %s9502_s0  ;;  %v6201_v3 = vpop.f32.mrb[47].mxu0 }
 0x48d   :  { %6547 = vst.msk [vmem:[#allocation10 + $0x22] sm:$0x4] %vm6544_vm3, %v6427_v22  ;;  %v6429_v55 = vmax.f32 %v6417_v56, 0.0  ;;  %v6383_v60 = vmax.f32 %v6260_v8, %v6335_v1  ;;  %v6381_v7 = vmax.f32 %v6197_v58, %v6333_v0  ;;  %v6339_v9 = vrot.slane %v6264_v46, 1  ;;  %v9330_v41 = vld [vmem:[%s11685_s1 + $0x8] sm:$0xff]   ;;  %v9333_v8 = vld [vmem:[%s11685_s1 + $0x10] sm:$0xff]  }
 0x48e   :  { %6572 = vst.msk [vmem:[#allocation10 + $0x24] sm:$0x10] %vm6569_vm6, %v6427_v22  ;;  %v6396_v10 = vmax.f32 %v6380_v29, %v6382_v14  ;;  %v6384_v20 = vmax.f32 %v6199_v53, %v6336_v33  ;;  %v6386_v30 = vmax.f32 %v6262_v37, %v6338_v2  ;;  %v6337_v36 = vrot.slane %v6201_v3, 1  ;;  %6484 = vrot.lane.b32.xlu1 %v6426_v43, %s9502_s0  ;;  %v9332_v58 = vld [vmem:[%s11685_s1 + $0x28] sm:$0xff]   ;;  %v9335_v1 = vld [vmem:[%s11685_s1 + $0x30] sm:$0xff]   ;;  %v9337_v14 = vld [vmem:[%s11685_s1 + $0x40] sm:$0xff]  }
 0x48f   :  { %6597 = vst.msk [vmem:[#allocation10 + $0x26] sm:$0x40] %vm6594_vm7, %v6427_v22  ;;  %6598 = vst.msk [vmem:[#allocation10 + $0x36] sm:$0x40] %vm6594_vm7, %v6429_v55  ;;  %v6397_v13 = vmax.f32 %v6381_v7, %v6383_v60  ;;  %v6387_v26 = vmax.f32 %v6264_v46, %v6339_v9  ;;  %v9336_v33 = vld [vmem:[%s11685_s1 + $0x38] sm:$0xff]   ;;  %v9339_v46 = vld [vmem:[%s11685_s1 + $0x60] sm:$0xff]  }
 0x490   :  { %6439 = vst.msk [vmem:[#allocation10 + $0x30] sm:$0x1] %vm6435_vm2, %v6429_v55  ;;  %v6419_v34 = vadd.f32 %v11225_v12, %v6396_v10  ;;  %v6398_v24 = vmax.f32 %v6384_v20, %v6386_v30  ;;  %v6385_v16 = vmax.f32 %v6201_v3, %v6337_v36  ;;  %6520 = vrot.lane.b32.xlu0 %v6424_v6, %s9504_s15 }
 0x491   :  { %6548 = vst.msk [vmem:[#allocation10 + $0x32] sm:$0x4] %vm6544_vm3, %v6429_v55  ;;  %v6420_v54 = vadd.f32 %v11229_v59, %v6397_v13  ;;  %v9338_v13 = vld [vmem:[%s11685_s1 + $0x48] sm:$0xff]  }
 0x492   :  { %6573 = vst.msk [vmem:[#allocation10 + $0x34] sm:$0x10] %vm6569_vm6, %v6429_v55  ;;  %v6431_v38 = vmax.f32 %v6419_v34, 0.0  ;;  %v6421_v57 = vadd.f32 %v11225_v12, %v6398_v24  ;;  %v6399_v21 = vmax.f32 %v6385_v16, %v6387_v26  ;;  %6522 = vrot.lane.b32.xlu1 %v6426_v43, %s9504_s15  ;;  %v6418_v12 = vadd.f32 %v11229_v59, %v6395_v27  ;;  %v9334_v43 = vld [vmem:[%s11685_s1 + $0x18] sm:$0xff]   ;;  %v9341_v34 = vld [vmem:[%s11685_s1 + $0x50] sm:$0xff]   ;;  %v9340_v24 = vld [vmem:[%s11685_s1 + $0x68] sm:$0xff]  }
 0x493   :  { %v6432_v23 = vmax.f32 %v6420_v54, 0.0 }
 0x494   :  { %6440 = vst.msk [vmem:[#allocation10 + $0x40] sm:$0x1] %vm6435_vm2, %v6431_v38  ;;  %v6433_v49 = vmax.f32 %v6421_v57, 0.0  ;;  %6486 = vrot.lane.b32.xlu0 %v6427_v22, %s9502_s0  ;;  %v6430_v18 = vmax.f32 %v6418_v12, 0.0  ;;  %v6422_v47 = vadd.f32 %v11229_v59, %v6399_v21  ;;  %v9344_v12 = vld [vmem:[%s11685_s1 + $0x78] sm:$0xff]  }
 0x495   :  { %6549 = vst.msk [vmem:[#allocation10 + $0x42] sm:$0x4] %vm6544_vm3, %v6431_v38 }
 0x496   :  { %6574 = vst.msk [vmem:[#allocation10 + $0x44] sm:$0x10] %vm6569_vm6, %v6431_v38  ;;  %6575 = vst.msk [vmem:[#allocation10 + $0x54] sm:$0x10] %vm6569_vm6, %v6433_v49  ;;  %6488 = vrot.lane.b32.xlu1 %v6428_v32, %s9502_s0  ;;  %v6434_v44 = vmax.f32 %v6422_v47, 0.0 }
 0x497   :  { %6599 = vst.msk [vmem:[#allocation10 + $0x46] sm:$0x40] %vm6594_vm7, %v6431_v38  ;;  %6600 = vst.msk [vmem:[#allocation10 + $0x56] sm:$0x40] %vm6594_vm7, %v6433_v49 }
 0x498   :  { %6441 = vst.msk [vmem:[#allocation10 + $0x50] sm:$0x1] %vm6435_vm2, %v6433_v49  ;;  %6452 = vrot.lane.b32.xlu0 %v6427_v22, %s9503_s27 }
 0x499   :  { %6550 = vst.msk [vmem:[#allocation10 + $0x52] sm:$0x4] %vm6544_vm3, %v6433_v49 }
 0x49a   :  { %6454 = vrot.lane.b32.xlu1 %v6429_v55, %s9503_s27 }
 0x49c   :  { %6490 = vrot.lane.b32.xlu0 %v6429_v55, %s9502_s0 }
 0x49e   :  { %6492 = vrot.lane.b32.xlu1 %v6430_v18, %s9502_s0 }
 0x4a0   :  { %6524 = vrot.lane.b32.xlu0 %v6428_v32, %s9504_s15  ;;  %v9345_v32 = vld [vmem:[%s11685_s1 + $0x80] sm:$0xff]  }
 0x4a2   :  { %6526 = vrot.lane.b32.xlu1 %v6430_v18, %s9504_s15  ;;  %v9346_v18 = vld [vmem:[%s11685_s1 + $0xa0] sm:$0xff]  }
 0x4a4   :  { %6494 = vrot.lane.b32.xlu0 %v6431_v38, %s9502_s0 }
 0x4a6   :  { %6496 = vrot.lane.b32.xlu1 %v6432_v23, %s9502_s0 }
 0x4a8   :  { %6456 = vrot.lane.b32.xlu0 %v6431_v38, %s9503_s27 }
 0x4aa   :  { %6458 = vrot.lane.b32.xlu1 %v6433_v49, %s9503_s27 }
 0x4ac   :  { %6498 = vrot.lane.b32.xlu0 %v6433_v49, %s9502_s0  ;;  %v9343_v49 = vld [vmem:[%s11685_s1 + $0x58] sm:$0xff]  }
 0x4ae   :  { %6500 = vrot.lane.b32.xlu1 %v6434_v44, %s9502_s0 }
 0x4b0   :  { %6528 = vrot.lane.b32.xlu0 %v6432_v23, %s9504_s15 }
 0x4b2   :  { %6530 = vrot.lane.b32.xlu1 %v6434_v44, %s9504_s15 }
 0x4f6   :  { %v6479_v40 = vpop.permute.xlu0 %6478 }
 0x4f8   :  { %v6483_v62 = vpop.permute.xlu1 %6482 }
 0x4fa   :  { %v6449_v39 = vpop.permute.xlu0 %6448 }
 0x4fb   :  { %6466 = vst.msk [vmem:[#allocation10 + $0x1] sm:$0x1] %vm6435_vm2, %v6449_v39 }
 0x4fc   :  { %6551 = vst.msk [vmem:[#allocation10 + $0x3] sm:$0x4] %vm6544_vm3, %v6449_v39  ;;  %v6451_v59 = vpop.permute.xlu1 %6450 }
 0x4fd   :  { %6576 = vst.msk [vmem:[#allocation10 + $0x5] sm:$0x10] %vm6569_vm6, %v6449_v39  ;;  %6577 = vst.msk [vmem:[#allocation10 + $0x15] sm:$0x10] %vm6569_vm6, %v6451_v59 }
 0x4fe   :  { %6601 = vst.msk [vmem:[#allocation10 + $0x7] sm:$0x40] %vm6594_vm7, %v6449_v39  ;;  %6602 = vst.msk [vmem:[#allocation10 + $0x17] sm:$0x40] %vm6594_vm7, %v6451_v59  ;;  %v6481_v11 = vpop.permute.xlu0 %6480  ;;  %v9348_v39 = vld [vmem:[%s11685_s1 + $0xa8] sm:$0xff]  }
 0x4ff   :  { %6467 = vst.msk [vmem:[#allocation10 + $0x11] sm:$0x1] %vm6435_vm2, %v6451_v59  ;;  %v6502_v50 = vsel %vm389_vm4, %v6479_v40, %v6481_v11  ;;  %v9347_v40 = vld [vmem:[%s11685_s1 + $0x88] sm:$0xff]   ;;  %v9351_v11 = vld [vmem:[%s11685_s1 + $0x98] sm:$0xff]  }
 0x500   :  { %6552 = vst.msk [vmem:[#allocation10 + $0x13] sm:$0x4] %vm6544_vm3, %v6451_v59  ;;  %6557 = vst.msk [vmem:[#allocation10 + $0x4] sm:$0x4] %vm6544_vm3, %v6502_v50  ;;  %v6485_v28 = vpop.permute.xlu1 %6484  ;;  %v9350_v59 = vld [vmem:[%s11685_s1 + $0xb0] sm:$0xff]  }
 0x501   :  { %6514 = vst.msk [vmem:[#allocation10 + $0x2] sm:$0x1] %vm6435_vm2, %v6502_v50  ;;  %v6503_v63 = vsel %vm389_vm4, %v6483_v62, %v6485_v28  ;;  %v9349_v62 = vld [vmem:[%s11685_s1 + $0x90] sm:$0xff]  }
 0x502   :  { %6582 = vst.msk [vmem:[#allocation10 + $0x6] sm:$0x10] %vm6569_vm6, %v6502_v50  ;;  %6583 = vst.msk [vmem:[#allocation10 + $0x16] sm:$0x10] %vm6569_vm6, %v6503_v63  ;;  %v6521_v31 = vpop.permute.xlu0 %6520 }
 0x503   :  { %6607 = vst.msk [vmem:[#allocation10 + $0x8] sm:$0x40] %vm6594_vm7, %v6502_v50  ;;  %6608 = vst.msk [vmem:[#allocation10 + $0x18] sm:$0x40] %vm6594_vm7, %v6503_v63  ;;  %v9352_v50 = vld [vmem:[%s11685_s1 + $0xb8] sm:$0xff]  }
 0x504   :  { %6515 = vst.msk [vmem:[#allocation10 + $0x12] sm:$0x1] %vm6435_vm2, %v6503_v63  ;;  %6538 = vst.msk [vmem:[#allocation10 + $0x3] sm:$0x1] %vm6435_vm2, %v6521_v31  ;;  %v6523_v42 = vpop.permute.xlu1 %6522 }
 0x505   :  { %6558 = vst.msk [vmem:[#allocation10 + $0x14] sm:$0x4] %vm6544_vm3, %v6503_v63  ;;  %6563 = vst.msk [vmem:[#allocation10 + $0x5] sm:$0x4] %vm6544_vm3, %v6521_v31 }
 0x506   :  { %6588 = vst.msk [vmem:[#allocation10 + $0x7] sm:$0x10] %vm6569_vm6, %v6521_v31  ;;  %6589 = vst.msk [vmem:[#allocation10 + $0x17] sm:$0x10] %vm6569_vm6, %v6523_v42  ;;  %v6487_v52 = vpop.permute.xlu0 %6486 }
 0x507   :  { %6613 = vst.msk [vmem:[#allocation10 + $0x9] sm:$0x40] %vm6594_vm7, %v6521_v31  ;;  %6614 = vst.msk [vmem:[#allocation10 + $0x19] sm:$0x40] %vm6594_vm7, %v6523_v42 }
 0x508   :  { %6539 = vst.msk [vmem:[#allocation10 + $0x13] sm:$0x1] %vm6435_vm2, %v6523_v42  ;;  %v6489_v17 = vpop.permute.xlu1 %6488 }
 0x509   :  { %6564 = vst.msk [vmem:[#allocation10 + $0x15] sm:$0x4] %vm6544_vm3, %v6523_v42  ;;  %v6504_v48 = vsel %vm389_vm4, %v6487_v52, %v6489_v17 }
 0x50a   :  { %6516 = vst.msk [vmem:[#allocation10 + $0x22] sm:$0x1] %vm6435_vm2, %v6504_v48  ;;  %v6453_v15 = vpop.permute.xlu0 %6452 }
 0x50b   :  { %6559 = vst.msk [vmem:[#allocation10 + $0x24] sm:$0x4] %vm6544_vm3, %v6504_v48  ;;  %6553 = vst.msk [vmem:[#allocation10 + $0x23] sm:$0x4] %vm6544_vm3, %v6453_v15 }
 0x50c   :  { %6584 = vst.msk [vmem:[#allocation10 + $0x26] sm:$0x10] %vm6569_vm6, %v6504_v48  ;;  %v6619_v25 = vld [vmem:[#allocation10] sm:$0xff]  ;;  %6578 = vst.msk [vmem:[#allocation10 + $0x25] sm:$0x10] %vm6569_vm6, %v6453_v15  ;;  %v6455_v61 = vpop.permute.xlu1 %6454 }
 0x50d   :  { %6609 = vst.msk [vmem:[#allocation10 + $0x28] sm:$0x40] %vm6594_vm7, %v6504_v48  ;;  %6603 = vst.msk [vmem:[#allocation10 + $0x27] sm:$0x40] %vm6594_vm7, %v6453_v15 }
 0x50e   :  { %v6620_v4 = vld [vmem:[#allocation10 + $0x8] sm:$0xff]  ;;  %6468 = vst.msk [vmem:[#allocation10 + $0x21] sm:$0x1] %vm6435_vm2, %v6453_v15  ;;  %v6622_v22 = vld [vmem:[#allocation10 + $0x18] sm:$0xff]  ;;  %6469 = vst.msk [vmem:[#allocation10 + $0x31] sm:$0x1] %vm6435_vm2, %v6455_v61  ;;  %v6491_v51 = vpop.permute.xlu0 %6490 }
 0x50f   :  { %v6631_v45 = vpack.c.bf16 %v6620_v4, %v6619_v25  ;;  %6554 = vst.msk [vmem:[#allocation10 + $0x33] sm:$0x4] %vm6544_vm3, %v6455_v61 }
 0x510   :  { %v6621_v6 = vld [vmem:[#allocation10 + $0x10] sm:$0xff]  ;;  %6579 = vst.msk [vmem:[#allocation10 + $0x35] sm:$0x10] %vm6569_vm6, %v6455_v61  ;;  %v6493_v56 = vpop.permute.xlu1 %6492 }
 0x511   :  { %6604 = vst.msk [vmem:[#allocation10 + $0x37] sm:$0x40] %vm6594_vm7, %v6455_v61  ;;  %8353 = vmatprep.subr.bf16.mxu0 %v6631_v45  ;;  %v6632_v27 = vpack.c.bf16 %v6622_v22, %v6621_v6  ;;  %v6505_v0 = vsel %vm389_vm4, %v6491_v51, %v6493_v56 }
 0x512   :  { %8354 = vmatpush3.bf16.msra.mxu0 %v6631_v45  ;;  %6517 = vst.msk [vmem:[#allocation10 + $0x32] sm:$0x1] %vm6435_vm2, %v6505_v0  ;;  %v6525_v53 = vpop.permute.xlu0 %6524 }
 0x513   :  { %8363 = vmatprep.subr.bf16.mxu1 %v6632_v27  ;;  %6560 = vst.msk [vmem:[#allocation10 + $0x34] sm:$0x4] %vm6544_vm3, %v6505_v0  ;;  %6565 = vst.msk [vmem:[#allocation10 + $0x25] sm:$0x4] %vm6544_vm3, %v6525_v53 }
 0x514   :  { %8364 = vmatpush3.bf16.msra.mxu1 %v6632_v27  ;;  %6585 = vst.msk [vmem:[#allocation10 + $0x36] sm:$0x10] %vm6569_vm6, %v6505_v0  ;;  %6590 = vst.msk [vmem:[#allocation10 + $0x27] sm:$0x10] %vm6569_vm6, %v6525_v53  ;;  %v6527_v37 = vpop.permute.xlu1 %6526 }
 0x515   :  { %8356 = vmatmul.mubr.msk.bf16.vlgmr.msra.gmra.mrb[48].mxu0 %vm6705_vm8, %v9330_v41  ;;  %6610 = vst.msk [vmem:[#allocation10 + $0x38] sm:$0x40] %vm6594_vm7, %v6505_v0  ;;  %6615 = vst.msk [vmem:[#allocation10 + $0x29] sm:$0x40] %vm6594_vm7, %v6525_v53 }
 0x516   :  { %8359 = vmatprep.mubr.msk.bf16.mxu0 %vm6705_vm8, %v9333_v8  ;;  %6540 = vst.msk [vmem:[#allocation10 + $0x23] sm:$0x1] %vm6435_vm2, %v6525_v53  ;;  %6541 = vst.msk [vmem:[#allocation10 + $0x33] sm:$0x1] %vm6435_vm2, %v6527_v37  ;;  %v6495_v29 = vpop.permute.xlu0 %6494 }
 0x517   :  { %8366 = vmatmul.mubr.msk.bf16.vlgmr.msra.gmra.mrb[48].mxu1 %vm6705_vm8, %v9332_v58  ;;  %6566 = vst.msk [vmem:[#allocation10 + $0x35] sm:$0x4] %vm6544_vm3, %v6527_v37 }
 0x518   :  { %8369 = vmatprep.mubr.msk.bf16.mxu1 %vm6705_vm8, %v9335_v1  ;;  %6591 = vst.msk [vmem:[#allocation10 + $0x37] sm:$0x10] %vm6569_vm6, %v6527_v37  ;;  %v6497_v2 = vpop.permute.xlu1 %6496 }
 0x519   :  { %6616 = vst.msk [vmem:[#allocation10 + $0x39] sm:$0x40] %vm6594_vm7, %v6527_v37  ;;  %v6506_v3 = vsel %vm389_vm4, %v6495_v29, %v6497_v2 }
 0x51a   :  { %6518 = vst.msk [vmem:[#allocation10 + $0x42] sm:$0x1] %vm6435_vm2, %v6506_v3  ;;  %v6457_v55 = vpop.permute.xlu0 %6456 }
 0x51b   :  { %6561 = vst.msk [vmem:[#allocation10 + $0x44] sm:$0x4] %vm6544_vm3, %v6506_v3  ;;  %6555 = vst.msk [vmem:[#allocation10 + $0x43] sm:$0x4] %vm6544_vm3, %v6457_v55 }
 0x51c   :  { %6586 = vst.msk [vmem:[#allocation10 + $0x46] sm:$0x10] %vm6569_vm6, %v6506_v3  ;;  %v6624_v7 = vld [vmem:[#allocation10 + $0x28] sm:$0xff]  ;;  %6580 = vst.msk [vmem:[#allocation10 + $0x45] sm:$0x10] %vm6569_vm6, %v6457_v55  ;;  %v6459_v10 = vpop.permute.xlu1 %6458 }
 0x51d   :  { %8360 = vmatmul.mubr.msk.bf16.gmra.mrb[52].mxu0 %vm6705_vm8, %v9334_v43  ;;  %6611 = vst.msk [vmem:[#allocation10 + $0x48] sm:$0x40] %vm6594_vm7, %v6506_v3  ;;  %v6623_v60 = vld [vmem:[#allocation10 + $0x20] sm:$0xff]  ;;  %6605 = vst.msk [vmem:[#allocation10 + $0x47] sm:$0x40] %vm6594_vm7, %v6457_v55 }
 0x51e   :  { %8375 = vmatprep.mubr.msk.bf16.mxu0 %vm6705_vm8, %v9337_v14  ;;  %6470 = vst.msk [vmem:[#allocation10 + $0x41] sm:$0x1] %vm6435_vm2, %v6457_v55  ;;  %v6633_v9 = vpack.c.bf16 %v6624_v7, %v6623_v60  ;;  %v6625_v20 = vld [vmem:[#allocation10 + $0x30] sm:$0xff]  ;;  %6471 = vst.msk [vmem:[#allocation10 + $0x51] sm:$0x1] %vm6435_vm2, %v6459_v10  ;;  %v6499_v26 = vpop.permute.xlu0 %6498 }
 0x51f   :  { %8370 = vmatmul.mubr.msk.bf16.gmra.mrb[52].mxu1 %vm6705_vm8, %v9336_v33  ;;  %6556 = vst.msk [vmem:[#allocation10 + $0x53] sm:$0x4] %vm6544_vm3, %v6459_v10 }
 0x520   :  { %v6626_v30 = vld [vmem:[#allocation10 + $0x38] sm:$0xff]  ;;  %8385 = vmatprep.mubr.msk.bf16.mxu1 %vm6705_vm8, %v9339_v46  ;;  %6581 = vst.msk [vmem:[#allocation10 + $0x55] sm:$0x10] %vm6569_vm6, %v6459_v10  ;;  %8373 = vmatprep.subr.bf16.mxu0 %v6633_v9  ;;  %v6501_v16 = vpop.permute.xlu1 %6500 }
 0x521   :  { %6606 = vst.msk [vmem:[#allocation10 + $0x57] sm:$0x40] %vm6594_vm7, %v6459_v10  ;;  %v6634_v36 = vpack.c.bf16 %v6626_v30, %v6625_v20  ;;  %8374 = vmatpush3.bf16.msra.mxu0 %v6633_v9  ;;  %v6507_v38 = vsel %vm389_vm4, %v6499_v26, %v6501_v16 }
 0x522   :  { %6519 = vst.msk [vmem:[#allocation10 + $0x52] sm:$0x1] %vm6435_vm2, %v6507_v38  ;;  %v6529_v57 = vpop.permute.xlu0 %6528 }
 0x523   :  { %8383 = vmatprep.subr.bf16.mxu1 %v6634_v36  ;;  %6562 = vst.msk [vmem:[#allocation10 + $0x54] sm:$0x4] %vm6544_vm3, %v6507_v38  ;;  %6567 = vst.msk [vmem:[#allocation10 + $0x45] sm:$0x4] %vm6544_vm3, %v6529_v57 }
 0x524   :  { %8384 = vmatpush3.bf16.msra.mxu1 %v6634_v36  ;;  %6587 = vst.msk [vmem:[#allocation10 + $0x56] sm:$0x10] %vm6569_vm6, %v6507_v38  ;;  %6592 = vst.msk [vmem:[#allocation10 + $0x47] sm:$0x10] %vm6569_vm6, %v6529_v57  ;;  %v6531_v21 = vpop.permute.xlu1 %6530 }
 0x525   :  { %8376 = vmatmul.mubr.msk.bf16.vlgmr.msra.gmra.mrb[56].mxu0 %vm6705_vm8, %v9338_v13  ;;  %6612 = vst.msk [vmem:[#allocation10 + $0x58] sm:$0x40] %vm6594_vm7, %v6507_v38  ;;  %6617 = vst.msk [vmem:[#allocation10 + $0x49] sm:$0x40] %vm6594_vm7, %v6529_v57 }
 0x526   :  { %8379 = vmatprep.mubr.msk.bf16.mxu0 %vm6705_vm8, %v9341_v34  ;;  %6542 = vst.msk [vmem:[#allocation10 + $0x43] sm:$0x1] %vm6435_vm2, %v6529_v57  ;;  %6543 = vst.msk [vmem:[#allocation10 + $0x53] sm:$0x1] %vm6435_vm2, %v6531_v21 }
 0x527   :  { %8386 = vmatmul.mubr.msk.bf16.vlgmr.msra.gmra.mrb[56].mxu1 %vm6705_vm8, %v9340_v24  ;;  %6568 = vst.msk [vmem:[#allocation10 + $0x55] sm:$0x4] %vm6544_vm3, %v6531_v21 }
 0x528   :  { %8389 = vmatprep.mubr.msk.bf16.mxu1 %vm6705_vm8, %v9342_v19  ;;  %6593 = vst.msk [vmem:[#allocation10 + $0x57] sm:$0x10] %vm6569_vm6, %v6531_v21 }
 0x529   :  { %6618 = vst.msk [vmem:[#allocation10 + $0x59] sm:$0x40] %vm6594_vm7, %v6531_v21 }
 0x52c   :  { %v6628_v35 = vld [vmem:[#allocation10 + $0x48] sm:$0xff] }
 0x52d   :  { %8380 = vmatmul.mubr.msk.bf16.gmra.mrb[60].mxu0 %vm6705_vm8, %v9343_v49  ;;  %v6627_v5 = vld [vmem:[#allocation10 + $0x40] sm:$0xff] }
 0x52e   :  { %8395 = vmatprep.mubr.msk.bf16.mxu0 %vm6705_vm8, %v9345_v32  ;;  %v6635_v54 = vpack.c.bf16 %v6628_v35, %v6627_v5  ;;  %v6629_v23 = vld [vmem:[#allocation10 + $0x50] sm:$0xff] }
 0x52f   :  { %8390 = vmatmul.mubr.msk.bf16.gmra.mrb[60].mxu1 %vm6705_vm8, %v9344_v12 }
 0x530   :  { %v6630_v47 = vld [vmem:[#allocation10 + $0x58] sm:$0xff]  ;;  %8405 = vmatprep.mubr.msk.bf16.mxu1 %vm6705_vm8, %v9346_v18  ;;  %8393 = vmatprep.subr.bf16.mxu0 %v6635_v54 }
 0x531   :  { %v6636_v44 = vpack.c.bf16 %v6630_v47, %v6629_v23  ;;  %8394 = vmatpush3.bf16.msra.mxu0 %v6635_v54 }
 0x533   :  { %8403 = vmatprep.subr.bf16.mxu1 %v6636_v44 }
 0x534   :  { %8404 = vmatpush3.bf16.msra.mxu1 %v6636_v44 }
 0x535   :  { %8396 = vmatmul.mubr.msk.bf16.vlgmr.msra.gmra.mrb[64].mxu0 %vm6705_vm8, %v9347_v40 }
 0x536   :  { %8399 = vmatprep.mubr.msk.bf16.mxu0 %vm6705_vm8, %v9349_v62 }
 0x537   :  { %8406 = vmatmul.mubr.msk.bf16.vlgmr.msra.gmra.mrb[64].mxu1 %vm6705_vm8, %v9348_v39 }
 0x538   :  { %8409 = vmatprep.mubr.msk.bf16.mxu1 %vm6705_vm8, %v9350_v59 }
 0x53d   :  { %8400 = vmatmul.mubr.msk.bf16.gmra.mrb[68].mxu0 %vm6705_vm8, %v9351_v11 }
 0x53f   :  { %8410 = vmatmul.mubr.msk.bf16.gmra.mrb[68].mxu1 %vm6705_vm8, %v9352_v50 }
 0x540   :  { %9476 = shalt.err (!%p9473_p8)
}
 0x541   :  { %s9477_s0 = scalar_lea.hbm %s11690_s6, 1536 }
 0x542   :  { %p9478_p9 = scmp.ne.s32.totalorder %s11690_s6, %s9477_s0  ;;  %p9481_p10 = scmp.lt.u32.totalorder %s9477_s0, %s11690_s6 }
 0x544   :  { %p9483_p11 = pnand %p9481_p10, %p9478_p9 }
 0x546   :  { %9486 = shalt.err (!%p9483_p11)
}
 0x547   :  { %s9506_s17 = smov 128   ;;  %s9507_s18 = smov 8   ;;  %vm7508_vm4 = vcmask 404480  }
 0x548   :  { %7568 = dma.vmem_to_hbm [thread:$0]  %s7563_s12, 1536, %s11690_s6, [#allocation4], %s9506_s17, %s9506_s17, %s9507_s18  }
 0x5e8   :  { %v8357_v28 = vpop.f32.mrb[48].mxu0 }
 0x5e9   :  { %v7270_v63 = vmax.f32 %v8357_v28, 0.0  ;;  %v6752_v31 = vpop.f32.mrb[49].mxu0 }
 0x5ea   :  { %v8367_v42 = vpop.f32.mrb[48].mxu1  ;;  %v7268_v52 = vmax.f32 %v6752_v31, 0.0  ;;  %v8358_v17 = vpop.f32.mrb[50].mxu0 }
 0x5eb   :  { %v8277_v48 = vpack.c.bf16 %v7270_v63, %v7270_v63  ;;  %v7278_v15 = vmax.f32 %v8367_v42, 0.0  ;;  %v6849_v25 = vpop.f32.mrb[49].mxu1  ;;  %v7271_v4 = vmax.f32 %v8358_v17, 0.0  ;;  %v6755_v45 = vpop.f32.mrb[51].mxu0 }
 0x5ec   :  { %v8275_v61 = vpack.c.bf16 %v7268_v52, %v7268_v52  ;;  %v7276_v6 = vmax.f32 %v6849_v25, 0.0  ;;  %v8368_v22 = vpop.f32.mrb[50].mxu1  ;;  %v7269_v27 = vmax.f32 %v6755_v45, 0.0 }
 0x5ed   :  { %7511 = vst.msk [vmem:[%s11691_s7 + $0x8] sm:$0xf] %vm7508_vm4, %v8277_v48  ;;  %v8285_v41 = vpack.c.bf16 %v7278_v15, %v7278_v15  ;;  %v8278_v51 = vpack.c.bf16 %v7271_v4, %v7271_v4  ;;  %v7279_v8 = vmax.f32 %v8368_v22, 0.0  ;;  %v6852_v58 = vpop.f32.mrb[51].mxu1 }
 0x5ee   :  { %7509 = vst.msk [vmem:[%s11691_s7] sm:$0xf] %vm7508_vm4, %v8275_v61  ;;  %v8283_v56 = vpack.c.bf16 %v7276_v6, %v7276_v6  ;;  %v8276_v1 = vpack.c.bf16 %v7269_v27, %v7269_v27  ;;  %v7277_v0 = vmax.f32 %v6852_v58, 0.0 }
 0x5ef   :  { %7519 = vst.msk [vmem:[%s11691_s7 + $0x28] sm:$0xf] %vm7508_vm4, %v8285_v41  ;;  %7512 = vst.msk [vmem:[%s11691_s7 + $0xc] sm:$0xf] %vm7508_vm4, %v8278_v51  ;;  %v8286_v53 = vpack.c.bf16 %v7279_v8, %v7279_v8 }
 0x5f0   :  { %7517 = vst.msk [vmem:[%s11691_s7 + $0x20] sm:$0xf] %vm7508_vm4, %v8283_v56  ;;  %7510 = vst.msk [vmem:[%s11691_s7 + $0x4] sm:$0xf] %vm7508_vm4, %v8276_v1  ;;  %v8284_v37 = vpack.c.bf16 %v7277_v0, %v7277_v0  ;;  %v8361_v43 = vpop.f32.mrb[52].mxu0 }
 0x5f1   :  { %7520 = vst.msk [vmem:[%s11691_s7 + $0x2c] sm:$0xf] %vm7508_vm4, %v8286_v53  ;;  %v7274_v29 = vmax.f32 %v8361_v43, 0.0  ;;  %v6768_v14 = vpop.f32.mrb[53].mxu0 }
 0x5f2   :  { %7518 = vst.msk [vmem:[%s11691_s7 + $0x24] sm:$0xf] %vm7508_vm4, %v8284_v37  ;;  %v8371_v33 = vpop.f32.mrb[52].mxu1  ;;  %v7272_v2 = vmax.f32 %v6768_v14, 0.0  ;;  %v8362_v46 = vpop.f32.mrb[54].mxu0 }
 0x5f3   :  { %v8281_v3 = vpack.c.bf16 %v7274_v29, %v7274_v29  ;;  %v7282_v55 = vmax.f32 %v8371_v33, 0.0  ;;  %v6865_v60 = vpop.f32.mrb[53].mxu1  ;;  %v7275_v7 = vmax.f32 %v8362_v46, 0.0  ;;  %v6771_v9 = vpop.f32.mrb[55].mxu0 }
 0x5f4   :  { %v8279_v10 = vpack.c.bf16 %v7272_v2, %v7272_v2  ;;  %v7280_v20 = vmax.f32 %v6865_v60, 0.0  ;;  %v8372_v30 = vpop.f32.mrb[54].mxu1  ;;  %v7273_v36 = vmax.f32 %v6771_v9, 0.0 }
 0x5f5   :  { %7515 = vst.msk [vmem:[%s11691_s7 + $0x18] sm:$0xf] %vm7508_vm4, %v8281_v3  ;;  %v8289_v13 = vpack.c.bf16 %v7282_v55, %v7282_v55  ;;  %v8282_v26 = vpack.c.bf16 %v7275_v7, %v7275_v7  ;;  %v7283_v34 = vmax.f32 %v8372_v30, 0.0  ;;  %v6868_v24 = vpop.f32.mrb[55].mxu1 }
 0x5f6   :  { %7513 = vst.msk [vmem:[%s11691_s7 + $0x10] sm:$0xf] %vm7508_vm4, %v8279_v10  ;;  %v8287_v16 = vpack.c.bf16 %v7280_v20, %v7280_v20  ;;  %v8280_v19 = vpack.c.bf16 %v7273_v36, %v7273_v36  ;;  %v7281_v38 = vmax.f32 %v6868_v24, 0.0 }
 0x5f7   :  { %7523 = vst.msk [vmem:[%s11691_s7 + $0x38] sm:$0xf] %vm7508_vm4, %v8289_v13  ;;  %7516 = vst.msk [vmem:[%s11691_s7 + $0x1c] sm:$0xf] %vm7508_vm4, %v8282_v26  ;;  %v8290_v57 = vpack.c.bf16 %v7283_v34, %v7283_v34 }
 0x5f8   :  { %7521 = vst.msk [vmem:[%s11691_s7 + $0x30] sm:$0xf] %vm7508_vm4, %v8287_v16  ;;  %7514 = vst.msk [vmem:[%s11691_s7 + $0x14] sm:$0xf] %vm7508_vm4, %v8280_v19  ;;  %v8288_v21 = vpack.c.bf16 %v7281_v38, %v7281_v38  ;;  %v8377_v49 = vpop.f32.mrb[56].mxu0 }
 0x5f9   :  { %7524 = vst.msk [vmem:[%s11691_s7 + $0x3c] sm:$0xf] %vm7508_vm4, %v8290_v57  ;;  %v7286_v32 = vmax.f32 %v8377_v49, 0.0  ;;  %v6946_v12 = vpop.f32.mrb[57].mxu0 }
 0x5fa   :  { %7522 = vst.msk [vmem:[%s11691_s7 + $0x34] sm:$0xf] %vm7508_vm4, %v8288_v21  ;;  %v8387_v18 = vpop.f32.mrb[56].mxu1  ;;  %v7284_v5 = vmax.f32 %v6946_v12, 0.0  ;;  %v8378_v35 = vpop.f32.mrb[58].mxu0 }
 0x5fb   :  { %v8293_v54 = vpack.c.bf16 %v7286_v32, %v7286_v32  ;;  %v7294_v23 = vmax.f32 %v8387_v18, 0.0  ;;  %v7043_v47 = vpop.f32.mrb[57].mxu1  ;;  %v7287_v44 = vmax.f32 %v8378_v35, 0.0  ;;  %v6949_v40 = vpop.f32.mrb[59].mxu0 }
 0x5fc   :  { %v8291_v62 = vpack.c.bf16 %v7284_v5, %v7284_v5  ;;  %v7292_v39 = vmax.f32 %v7043_v47, 0.0  ;;  %v8388_v59 = vpop.f32.mrb[58].mxu1  ;;  %v7285_v11 = vmax.f32 %v6949_v40, 0.0 }
 0x5fd   :  { %7527 = vst.msk [vmem:[%s11691_s7 + $0x48] sm:$0xf] %vm7508_vm4, %v8293_v54  ;;  %v8301_v50 = vpack.c.bf16 %v7294_v23, %v7294_v23  ;;  %v8294_v28 = vpack.c.bf16 %v7287_v44, %v7287_v44  ;;  %v7295_v63 = vmax.f32 %v8388_v59, 0.0  ;;  %v7046_v31 = vpop.f32.mrb[59].mxu1 }
 0x5fe   :  { %7525 = vst.msk [vmem:[%s11691_s7 + $0x40] sm:$0xf] %vm7508_vm4, %v8291_v62  ;;  %v8299_v42 = vpack.c.bf16 %v7292_v39, %v7292_v39  ;;  %v8292_v52 = vpack.c.bf16 %v7285_v11, %v7285_v11  ;;  %v7293_v17 = vmax.f32 %v7046_v31, 0.0 }
 0x5ff   :  { %7535 = vst.msk [vmem:[%s11691_s7 + $0x68] sm:$0xf] %vm7508_vm4, %v8301_v50  ;;  %7528 = vst.msk [vmem:[%s11691_s7 + $0x4c] sm:$0xf] %vm7508_vm4, %v8294_v28  ;;  %v8302_v48 = vpack.c.bf16 %v7295_v63, %v7295_v63 }
 0x600   :  { %7533 = vst.msk [vmem:[%s11691_s7 + $0x60] sm:$0xf] %vm7508_vm4, %v8299_v42  ;;  %7526 = vst.msk [vmem:[%s11691_s7 + $0x44] sm:$0xf] %vm7508_vm4, %v8292_v52  ;;  %v8300_v15 = vpack.c.bf16 %v7293_v17, %v7293_v17  ;;  %v8381_v25 = vpop.f32.mrb[60].mxu0 }
 0x601   :  { %7536 = vst.msk [vmem:[%s11691_s7 + $0x6c] sm:$0xf] %vm7508_vm4, %v8302_v48  ;;  %v7290_v4 = vmax.f32 %v8381_v25, 0.0  ;;  %v6962_v45 = vpop.f32.mrb[61].mxu0 }
 0x602   :  { %7534 = vst.msk [vmem:[%s11691_s7 + $0x64] sm:$0xf] %vm7508_vm4, %v8300_v15  ;;  %v8391_v61 = vpop.f32.mrb[60].mxu1  ;;  %v7288_v6 = vmax.f32 %v6962_v45, 0.0  ;;  %v8382_v22 = vpop.f32.mrb[62].mxu0 }
 0x603   :  { %v8297_v27 = vpack.c.bf16 %v7290_v4, %v7290_v4  ;;  %v7298_v41 = vmax.f32 %v8391_v61, 0.0  ;;  %v7059_v51 = vpop.f32.mrb[61].mxu1  ;;  %v7291_v8 = vmax.f32 %v8382_v22, 0.0  ;;  %v6965_v58 = vpop.f32.mrb[63].mxu0 }
 0x604   :  { %v8295_v56 = vpack.c.bf16 %v7288_v6, %v7288_v6  ;;  %v7296_v1 = vmax.f32 %v7059_v51, 0.0  ;;  %v8392_v0 = vpop.f32.mrb[62].mxu1  ;;  %v7289_v53 = vmax.f32 %v6965_v58, 0.0 }
 0x605   :  { %7531 = vst.msk [vmem:[%s11691_s7 + $0x58] sm:$0xf] %vm7508_vm4, %v8297_v27  ;;  %v8305_v37 = vpack.c.bf16 %v7298_v41, %v7298_v41  ;;  %v8298_v43 = vpack.c.bf16 %v7291_v8, %v7291_v8  ;;  %v7299_v29 = vmax.f32 %v8392_v0, 0.0  ;;  %v7062_v14 = vpop.f32.mrb[63].mxu1 }
 0x606   :  { %7529 = vst.msk [vmem:[%s11691_s7 + $0x50] sm:$0xf] %vm7508_vm4, %v8295_v56  ;;  %v8303_v33 = vpack.c.bf16 %v7296_v1, %v7296_v1  ;;  %v8296_v2 = vpack.c.bf16 %v7289_v53, %v7289_v53  ;;  %v7297_v46 = vmax.f32 %v7062_v14, 0.0 }
 0x607   :  { %7539 = vst.msk [vmem:[%s11691_s7 + $0x78] sm:$0xf] %vm7508_vm4, %v8305_v37  ;;  %7532 = vst.msk [vmem:[%s11691_s7 + $0x5c] sm:$0xf] %vm7508_vm4, %v8298_v43  ;;  %v8306_v3 = vpack.c.bf16 %v7299_v29, %v7299_v29 }
 0x608   :  { %7537 = vst.msk [vmem:[%s11691_s7 + $0x70] sm:$0xf] %vm7508_vm4, %v8303_v33  ;;  %7530 = vst.msk [vmem:[%s11691_s7 + $0x54] sm:$0xf] %vm7508_vm4, %v8296_v2  ;;  %v8304_v55 = vpack.c.bf16 %v7297_v46, %v7297_v46  ;;  %v8397_v60 = vpop.f32.mrb[64].mxu0 }
 0x609   :  { %7540 = vst.msk [vmem:[%s11691_s7 + $0x7c] sm:$0xf] %vm7508_vm4, %v8306_v3  ;;  %v7302_v7 = vmax.f32 %v8397_v60, 0.0  ;;  %v7140_v9 = vpop.f32.mrb[65].mxu0 }
 0x60a   :  { %7538 = vst.msk [vmem:[%s11691_s7 + $0x74] sm:$0xf] %vm7508_vm4, %v8304_v55  ;;  %v8407_v10 = vpop.f32.mrb[64].mxu1  ;;  %v7300_v20 = vmax.f32 %v7140_v9, 0.0  ;;  %v8398_v30 = vpop.f32.mrb[66].mxu0 }
 0x60b   :  { %v8309_v36 = vpack.c.bf16 %v7302_v7, %v7302_v7  ;;  %v7310_v13 = vmax.f32 %v8407_v10, 0.0  ;;  %v7237_v26 = vpop.f32.mrb[65].mxu1  ;;  %v7303_v34 = vmax.f32 %v8398_v30, 0.0  ;;  %v7143_v24 = vpop.f32.mrb[67].mxu0 }
 0x60c   :  { %v8307_v16 = vpack.c.bf16 %v7300_v20, %v7300_v20  ;;  %v7308_v19 = vmax.f32 %v7237_v26, 0.0  ;;  %v8408_v38 = vpop.f32.mrb[66].mxu1  ;;  %v7301_v57 = vmax.f32 %v7143_v24, 0.0 }
 0x60d   :  { %7543 = vst.msk [vmem:[%s11691_s7 + $0x88] sm:$0xf] %vm7508_vm4, %v8309_v36  ;;  %v8317_v21 = vpack.c.bf16 %v7310_v13, %v7310_v13  ;;  %v8310_v49 = vpack.c.bf16 %v7303_v34, %v7303_v34  ;;  %v7311_v32 = vmax.f32 %v8408_v38, 0.0  ;;  %v7240_v12 = vpop.f32.mrb[67].mxu1 }
 0x60e   :  { %7541 = vst.msk [vmem:[%s11691_s7 + $0x80] sm:$0xf] %vm7508_vm4, %v8307_v16  ;;  %v8315_v18 = vpack.c.bf16 %v7308_v19, %v7308_v19  ;;  %v8308_v5 = vpack.c.bf16 %v7301_v57, %v7301_v57  ;;  %v7309_v35 = vmax.f32 %v7240_v12, 0.0 }
 0x60f   :  { %7551 = vst.msk [vmem:[%s11691_s7 + $0xa8] sm:$0xf] %vm7508_vm4, %v8317_v21  ;;  %7544 = vst.msk [vmem:[%s11691_s7 + $0x8c] sm:$0xf] %vm7508_vm4, %v8310_v49  ;;  %v8318_v54 = vpack.c.bf16 %v7311_v32, %v7311_v32 }
 0x610   :  { %7549 = vst.msk [vmem:[%s11691_s7 + $0xa0] sm:$0xf] %vm7508_vm4, %v8315_v18  ;;  %7542 = vst.msk [vmem:[%s11691_s7 + $0x84] sm:$0xf] %vm7508_vm4, %v8308_v5  ;;  %v8316_v23 = vpack.c.bf16 %v7309_v35, %v7309_v35  ;;  %v8401_v47 = vpop.f32.mrb[68].mxu0 }
 0x611   :  { %7552 = vst.msk [vmem:[%s11691_s7 + $0xac] sm:$0xf] %vm7508_vm4, %v8318_v54  ;;  %v7306_v44 = vmax.f32 %v8401_v47, 0.0  ;;  %v7156_v40 = vpop.f32.mrb[69].mxu0 }
 0x612   :  { %7550 = vst.msk [vmem:[%s11691_s7 + $0xa4] sm:$0xf] %vm7508_vm4, %v8316_v23  ;;  %v8411_v62 = vpop.f32.mrb[68].mxu1  ;;  %v7304_v39 = vmax.f32 %v7156_v40, 0.0  ;;  %v8402_v59 = vpop.f32.mrb[70].mxu0 }
 0x613   :  { %v8313_v11 = vpack.c.bf16 %v7306_v44, %v7306_v44  ;;  %v7314_v50 = vmax.f32 %v8411_v62, 0.0  ;;  %v7253_v28 = vpop.f32.mrb[69].mxu1  ;;  %v7307_v63 = vmax.f32 %v8402_v59, 0.0  ;;  %v7159_v31 = vpop.f32.mrb[71].mxu0 }
 0x614   :  { %v8311_v42 = vpack.c.bf16 %v7304_v39, %v7304_v39  ;;  %v7312_v52 = vmax.f32 %v7253_v28, 0.0  ;;  %v8412_v17 = vpop.f32.mrb[70].mxu1  ;;  %v7305_v48 = vmax.f32 %v7159_v31, 0.0 }
 0x615   :  { %7547 = vst.msk [vmem:[%s11691_s7 + $0x98] sm:$0xf] %vm7508_vm4, %v8313_v11  ;;  %v8321_v15 = vpack.c.bf16 %v7314_v50, %v7314_v50  ;;  %v8314_v25 = vpack.c.bf16 %v7307_v63, %v7307_v63  ;;  %v7315_v4 = vmax.f32 %v8412_v17, 0.0  ;;  %v7256_v45 = vpop.f32.mrb[71].mxu1 }
 0x616   :  { %7545 = vst.msk [vmem:[%s11691_s7 + $0x90] sm:$0xf] %vm7508_vm4, %v8311_v42  ;;  %v8319_v61 = vpack.c.bf16 %v7312_v52, %v7312_v52  ;;  %v8312_v6 = vpack.c.bf16 %v7305_v48, %v7305_v48  ;;  %v7313_v22 = vmax.f32 %v7256_v45, 0.0 }
 0x617   :  { %7555 = vst.msk [vmem:[%s11691_s7 + $0xb8] sm:$0xf] %vm7508_vm4, %v8321_v15  ;;  %7548 = vst.msk [vmem:[%s11691_s7 + $0x9c] sm:$0xf] %vm7508_vm4, %v8314_v25  ;;  %v8322_v27 = vpack.c.bf16 %v7315_v4, %v7315_v4 }
 0x618   :  { %7553 = vst.msk [vmem:[%s11691_s7 + $0xb0] sm:$0xf] %vm7508_vm4, %v8319_v61  ;;  %7546 = vst.msk [vmem:[%s11691_s7 + $0x94] sm:$0xf] %vm7508_vm4, %v8312_v6  ;;  %v8320_v41 = vpack.c.bf16 %v7313_v22, %v7313_v22 }
 0x619   :  { %7556 = vst.msk [vmem:[%s11691_s7 + $0xbc] sm:$0xf] %vm7508_vm4, %v8322_v27 }
 0x61a   :  { %7554 = vst.msk [vmem:[%s11691_s7 + $0xb4] sm:$0xf] %vm7508_vm4, %v8320_v41 }
 0x61b   :  { %9493 = dma.done.wait [#allocation4], 1536  }
 0x61c   :  { %9494 = vsyncadd [#allocation4], 4294965760 }
 0x61d   :  { %7576 = vsyncpa [#allocation3], 1 }
 0x61e   :  { %7577 = vsyncpa [#allocation6], 1 }
 0x61f   :  { %7578 = vsyncpa [#allocation9], 1 }
 0x620   :  { %7579 = vsyncpa [#allocation4], 1 }

</bundles_post_ra>
